<compile_context>
chip_gen: v5e
topology: v5e:2x2
jax: 0.10.0
libtpu: 0.0.40
codegen_flags: <defaults>
</compile_context>

<pallas_src>
import jax
import jax.numpy as jnp
from jax.experimental import pallas as pl
from jax.experimental.pallas import tpu as pltpu


# ----------------------------------------------------------------------------
# Fused whole-network kernel (one grid step == one image)
# ----------------------------------------------------------------------------
def _make_fused_kernel(in_h, in_w, n_blocks, num_fc):
    n_conv = 2 * n_blocks

    def kernel(*args):
        x_ref = args[0]                                          # (H, W, 1)
        conv_refs = args[1:1 + 3 * n_conv]                       # (w, scale, bias) per conv
        fc_refs = args[1 + 3 * n_conv:1 + 3 * n_conv + 2 * num_fc]
        o_ref = args[1 + 3 * n_conv + 2 * num_fc]                # (1, num_classes)
        pad_refs = args[2 + 3 * n_conv + 2 * num_fc:]            # one padded VMEM buf per conv

        f32 = jnp.float32

        def fill_padded(pad_ref, val, h, w):
            # Zero-pad (pad=1) into a VMEM scratch buffer.
            c = pad_ref.shape[-1]
            pad_ref[...] = jnp.zeros(pad_ref.shape, f32)
            pad_ref[1:h + 1, 1:w + 1, :] = val.reshape(h, w, c)

        def conv_bn_relu(pad_ref, w_ref, s_ref, b_ref, h, w):
            # Single im2col matmul per conv: (h*w, 9*Cin) x (9*Cin, Cout).
            c = pad_ref.shape[-1]
            cols = [pad_ref[dy:dy + h, dx:dx + w, :].reshape(h * w, c)
                    for dy in range(3) for dx in range(3)]
            patches = jnp.concatenate(cols, axis=1)              # (h*w, 9*Cin)
            y = jnp.dot(patches, w_ref[...], preferred_element_type=f32)
            # Folded eval-mode BatchNorm (+ conv bias) and ReLU.
            return jnp.maximum(y * s_ref[...] + b_ref[...], 0.0)  # (h*w, Cout)

        def maxpool2x2(y, h, w):
            c = y.shape[-1]
            r = y.reshape(h // 2, 2, w // 2, 2, c)
            return jnp.maximum(
                jnp.maximum(r[:, 0, :, 0, :], r[:, 0, :, 1, :]),
                jnp.maximum(r[:, 1, :, 0, :], r[:, 1, :, 1, :]),
            )                                                     # (h//2, w//2, c)

        h, w = in_h, in_w
        cur = x_ref[...]                                          # (H, W, 1)
        for li in range(n_conv):
            w_ref, s_ref, b_ref = conv_refs[3 * li:3 * li + 3]
            fill_padded(pad_refs[li], cur, h, w)
            cur = conv_bn_relu(pad_refs[li], w_ref, s_ref, b_ref, h, w)
            if li % 2 == 1:                                       # end of block
                cur = maxpool2x2(cur, h, w)
                h, w = h // 2, w // 2
            # Dropout2d(dropout_rate): identity at inference.

        # Flatten to (1, h*w*C) in NHWC order via lane-aligned concatenation
        # (C == 128 for the last block, so each piece lands on a 128-lane slot).
        c_last = cur.shape[-1]
        cur = cur.reshape(h, w, c_last)
        pieces = [cur[a:a + 1, b:b + 1, :].reshape(1, c_last)
                  for a in range(h) for b in range(w)]
        feat = pieces[0] if len(pieces) == 1 else jnp.concatenate(pieces, axis=1)

        # FC head, fully VMEM-resident (FC1 rows were pre-permuted at init so
        # this NHWC-order flatten matches PyTorch's NCHW x.view(-1, C*H*W)).
        for fi in range(num_fc):
            w_ref, b_ref = fc_refs[2 * fi], fc_refs[2 * fi + 1]
            feat = jnp.dot(feat, w_ref[...], preferred_element_type=f32) + b_ref[...]
            if fi < num_fc - 1:
                feat = jnp.maximum(feat, 0.0)                     # ReLU (Dropout: identity)
        o_ref[...] = feat

    return kernel


def _resident_spec(shape):
    """Whole-array block whose index_map is constant -> stays resident in VMEM."""
    rank = len(shape)

    def idx(i):
        return (0,) * rank

    return pl.BlockSpec(shape, idx)


# ----------------------------------------------------------------------------
# Forward pass (mirrors ImprovedCNN.forward, inference mode)
# ----------------------------------------------------------------------------
def improved_cnn_forward(x_nchw, params):
    N, c_in, H, W = x_nchw.shape
    assert c_in == 1, "ImprovedCNN takes single-channel input"
    n_conv = len(params["convs"])
    n_blocks = n_conv // 2
    num_fc = len(params["fc"])
    num_classes = params["fc"][-1][0].shape[1]

    # NCHW -> NHWC; with Cin == 1 this is a pure (free) reshape.
    x = x_nchw.astype(jnp.float32).reshape(N, H, W, 1)

    flat_conv = [a for triple in params["convs"] for a in triple]
    flat_fc = [a for pair in params["fc"] for a in pair]

    in_specs = [pl.BlockSpec((None, H, W, 1), lambda i: (i, 0, 0, 0))]
    in_specs += [_resident_spec(a.shape) for a in flat_conv + flat_fc]

    # One zero-padded VMEM scratch buffer per conv layer.
    scratch_shapes = []
    h, w, in_c = H, W, 1
    for li, (w_mat, _, _) in enumerate(params["convs"]):
        scratch_shapes.append(pltpu.VMEM((h + 2, w + 2, in_c), jnp.float32))
        in_c = w_mat.shape[1]
        if li % 2 == 1:
            h, w = h // 2, w // 2

    kernel = _make_fused_kernel(H, W, n_blocks, num_fc)

    out = pl.pallas_call(
        kernel,
        out_shape=jax.ShapeDtypeStruct((N, 1, num_classes), jnp.float32),
        grid_spec=pltpu.PrefetchScalarGridSpec(
            num_scalar_prefetch=0,
            grid=(N,),                                   # one image per grid step
            in_specs=in_specs,
            out_specs=pl.BlockSpec((None, 1, num_classes), lambda i: (i, 0, 0)),
            scratch_shapes=scratch_shapes,
        ),
        compiler_params=pltpu.CompilerParams(
            dimension_semantics=("parallel",),           # 2x on v7x's dual TCs
        ),
    )(x, *flat_conv, *flat_fc)
    return out.reshape(N, num_classes)


# ----------------------------------------------------------------------------
# Deterministic parameter construction (shapes follow ImprovedCNN.__init__)
# ----------------------------------------------------------------------------
def init_params(key, *, in_h, in_w, num_classes,
                conv_channels=(32, 64, 128), fc_units=(512, 256)):
    eps = 1e-5
    convs = []
    in_c = 1
    for out_c in conv_channels:
        for layer_in in (in_c, out_c):                  # two conv+BN+ReLU per block
            key, kw, kb, kg, kbe, km, kv = jax.random.split(key, 7)
            fan_in = layer_in * 9
            w = jax.random.normal(kw, (out_c, layer_in, 3, 3), jnp.float32) / jnp.sqrt(fan_in)
            b = 0.01 * jax.random.normal(kb, (out_c,), jnp.float32)
            gamma = 1.0 + 0.1 * jax.random.normal(kg, (out_c,), jnp.float32)
            beta = 0.1 * jax.random.normal(kbe, (out_c,), jnp.float32)
            mean = 0.1 * jax.random.normal(km, (out_c,), jnp.float32)
            var = 0.9 + 0.1 * jnp.abs(jax.random.normal(kv, (out_c,), jnp.float32))
            # Fold eval-mode BatchNorm (and conv bias) into per-channel scale/bias.
            scale = gamma / jnp.sqrt(var + eps)
            bias = (b - mean) * scale + beta
            # PyTorch weight (Cout, Cin, kh, kw) -> im2col matrix (9*Cin, Cout),
            # rows ordered (kh, kw, cin) to match the kernel's patch layout.
            w_mat = jnp.transpose(w, (2, 3, 1, 0)).reshape(9 * layer_in, out_c)
            convs.append((w_mat, scale.reshape(1, out_c), bias.reshape(1, out_c)))
        in_c = out_c

    hf = in_h // (2 ** len(conv_channels))
    wf = in_w // (2 ** len(conv_channels))
    c_last = conv_channels[-1]
    in_f = c_last * hf * wf
    fcs = []
    for li, out_f in enumerate(tuple(fc_units) + (num_classes,)):
        key, kw, kb = jax.random.split(key, 3)
        w = jax.random.normal(kw, (out_f, in_f), jnp.float32) / jnp.sqrt(in_f)
        b = 0.01 * jax.random.normal(kb, (out_f,), jnp.float32)
        wm = jnp.transpose(w)                           # (in_f, out_f)
        if li == 0:
            # Permute FC1 rows from PyTorch's NCHW-flatten order to the kernel's
            # NHWC-flatten order, so no runtime transpose is needed before the head.
            nchw_idx = jnp.arange(in_f).reshape(c_last, hf, wf)
            perm = jnp.transpose(nchw_idx, (1, 2, 0)).reshape(-1)
            wm = wm[perm, :]
        fcs.append((wm, b.reshape(1, out_f)))
        in_f = out_f
    return {"convs": convs, "fc": fcs}


# ----------------------------------------------------------------------------
# Plain-XLA reference built from the same folded params (sanity check only)
# ----------------------------------------------------------------------------
def reference_forward(x_nchw, params):
    hi = jax.lax.Precision.HIGHEST
    x = jnp.transpose(x_nchw.astype(jnp.float32), (0, 2, 3, 1))  # NHWC
    convs = params["convs"]
    for bi in range(len(convs) // 2):
        for (w_mat, s, b) in convs[2 * bi:2 * bi + 2]:
            n, h, w, c = x.shape
            xp = jnp.pad(x, ((0, 0), (1, 1), (1, 1), (0, 0)))
            cols = [xp[:, dy:dy + h, dx:dx + w, :].reshape(n, h * w, c)
                    for dy in range(3) for dx in range(3)]
            patches = jnp.concatenate(cols, axis=-1)
            y = jnp.einsum("npk,kc->npc", patches, w_mat, precision=hi)
            y = jnp.maximum(y * s + b, 0.0)
            x = y.reshape(n, h, w, -1)
        n, h, w, c = x.shape
        x = x.reshape(n, h // 2, 2, w // 2, 2, c).max(axis=(2, 4))
    feat = x.reshape(x.shape[0], -1)                              # NHWC flatten
    for fi, (wm, b) in enumerate(params["fc"]):
        feat = jnp.dot(feat, wm, precision=hi) + b
        if fi < len(params["fc"]) - 1:
            feat = jnp.maximum(feat, 0.0)
    return feat


if __name__ == "__main__":
    key = jax.random.PRNGKey(0)
    key, kp, kx = jax.random.split(key, 3)

    batch, in_h, in_w, num_classes = 2, 16, 16, 10
    params = init_params(kp, in_h=in_h, in_w=in_w, num_classes=num_classes)

    x = jax.random.normal(kx, (batch, 1, in_h, in_w), jnp.float32)

    fwd = jax.jit(lambda inp: improved_cnn_forward(inp, params))
    out = fwd(x)
    jax.block_until_ready(out)

    assert out.shape == (batch, num_classes), out.shape
    assert out.dtype == jnp.float32

    # Sanity-check the fused Pallas kernel against a plain-XLA reference using
    # the same (folded) parameters; loose tolerance covers MXU precision diffs.
    ref = reference_forward(x, params)
    assert jnp.allclose(out, ref, rtol=5e-2, atol=5e-2), \
        float(jnp.max(jnp.abs(out - ref)))

    print("KERNEL_OK")
</pallas_src>

<mosaic_0001>
module attributes {stable_mosaic.version = 11 : i64} {
  func.func @kernel(%arg0: i32, %arg1: memref<1x16x16x1xf32, #tpu.memory_space<vmem>>, %arg2: memref<9x32xf32, #tpu.memory_space<vmem>>, %arg3: memref<1x32xf32, #tpu.memory_space<vmem>>, %arg4: memref<1x32xf32, #tpu.memory_space<vmem>>, %arg5: memref<288x32xf32, #tpu.memory_space<vmem>>, %arg6: memref<1x32xf32, #tpu.memory_space<vmem>>, %arg7: memref<1x32xf32, #tpu.memory_space<vmem>>, %arg8: memref<288x64xf32, #tpu.memory_space<vmem>>, %arg9: memref<1x64xf32, #tpu.memory_space<vmem>>, %arg10: memref<1x64xf32, #tpu.memory_space<vmem>>, %arg11: memref<576x64xf32, #tpu.memory_space<vmem>>, %arg12: memref<1x64xf32, #tpu.memory_space<vmem>>, %arg13: memref<1x64xf32, #tpu.memory_space<vmem>>, %arg14: memref<576x128xf32, #tpu.memory_space<vmem>>, %arg15: memref<1x128xf32, #tpu.memory_space<vmem>>, %arg16: memref<1x128xf32, #tpu.memory_space<vmem>>, %arg17: memref<1152x128xf32, #tpu.memory_space<vmem>>, %arg18: memref<1x128xf32, #tpu.memory_space<vmem>>, %arg19: memref<1x128xf32, #tpu.memory_space<vmem>>, %arg20: memref<512x512xf32, #tpu.memory_space<vmem>>, %arg21: memref<1x512xf32, #tpu.memory_space<vmem>>, %arg22: memref<512x256xf32, #tpu.memory_space<vmem>>, %arg23: memref<1x256xf32, #tpu.memory_space<vmem>>, %arg24: memref<256x10xf32, #tpu.memory_space<vmem>>, %arg25: memref<1x10xf32, #tpu.memory_space<vmem>>, %arg26: memref<1x1x10xf32, #tpu.memory_space<vmem>>, %arg27: memref<18x18x1xf32, #tpu.memory_space<vmem>>, %arg28: memref<18x18x32xf32, #tpu.memory_space<vmem>>, %arg29: memref<10x10x32xf32, #tpu.memory_space<vmem>>, %arg30: memref<10x10x64xf32, #tpu.memory_space<vmem>>, %arg31: memref<6x6x64xf32, #tpu.memory_space<vmem>>, %arg32: memref<6x6x128xf32, #tpu.memory_space<vmem>>) attributes {dimension_semantics = [#tpu.dimension_semantics<parallel>], iteration_bounds = array<i64: 2>, scalar_prefetch = 0 : i64, scratch_operands = 6 : i64, tpu.core_type = #tpu.core_type<tc>, window_params = [{transform_indices = @transform_0, window_bounds = array<i64: 1, 16, 16, 1>}, {pipeline_mode = #tpu.pipeline_mode<synchronous>, transform_indices = @transform_1, window_bounds = array<i64: 9, 32>}, {pipeline_mode = #tpu.pipeline_mode<synchronous>, transform_indices = @transform_2, window_bounds = array<i64: 1, 32>}, {pipeline_mode = #tpu.pipeline_mode<synchronous>, transform_indices = @transform_3, window_bounds = array<i64: 1, 32>}, {pipeline_mode = #tpu.pipeline_mode<synchronous>, transform_indices = @transform_4, window_bounds = array<i64: 288, 32>}, {pipeline_mode = #tpu.pipeline_mode<synchronous>, transform_indices = @transform_5, window_bounds = array<i64: 1, 32>}, {pipeline_mode = #tpu.pipeline_mode<synchronous>, transform_indices = @transform_6, window_bounds = array<i64: 1, 32>}, {pipeline_mode = #tpu.pipeline_mode<synchronous>, transform_indices = @transform_7, window_bounds = array<i64: 288, 64>}, {pipeline_mode = #tpu.pipeline_mode<synchronous>, transform_indices = @transform_8, window_bounds = array<i64: 1, 64>}, {pipeline_mode = #tpu.pipeline_mode<synchronous>, transform_indices = @transform_9, window_bounds = array<i64: 1, 64>}, {pipeline_mode = #tpu.pipeline_mode<synchronous>, transform_indices = @transform_10, window_bounds = array<i64: 576, 64>}, {pipeline_mode = #tpu.pipeline_mode<synchronous>, transform_indices = @transform_11, window_bounds = array<i64: 1, 64>}, {pipeline_mode = #tpu.pipeline_mode<synchronous>, transform_indices = @transform_12, window_bounds = array<i64: 1, 64>}, {pipeline_mode = #tpu.pipeline_mode<synchronous>, transform_indices = @transform_13, window_bounds = array<i64: 576, 128>}, {pipeline_mode = #tpu.pipeline_mode<synchronous>, transform_indices = @transform_14, window_bounds = array<i64: 1, 128>}, {pipeline_mode = #tpu.pipeline_mode<synchronous>, transform_indices = @transform_15, window_bounds = array<i64: 1, 128>}, {pipeline_mode = #tpu.pipeline_mode<synchronous>, transform_indices = @transform_16, window_bounds = array<i64: 1152, 128>}, {pipeline_mode = #tpu.pipeline_mode<synchronous>, transform_indices = @transform_17, window_bounds = array<i64: 1, 128>}, {pipeline_mode = #tpu.pipeline_mode<synchronous>, transform_indices = @transform_18, window_bounds = array<i64: 1, 128>}, {pipeline_mode = #tpu.pipeline_mode<synchronous>, transform_indices = @transform_19, window_bounds = array<i64: 512, 512>}, {pipeline_mode = #tpu.pipeline_mode<synchronous>, transform_indices = @transform_20, window_bounds = array<i64: 1, 512>}, {pipeline_mode = #tpu.pipeline_mode<synchronous>, transform_indices = @transform_21, window_bounds = array<i64: 512, 256>}, {pipeline_mode = #tpu.pipeline_mode<synchronous>, transform_indices = @transform_22, window_bounds = array<i64: 1, 256>}, {pipeline_mode = #tpu.pipeline_mode<synchronous>, transform_indices = @transform_23, window_bounds = array<i64: 256, 10>}, {pipeline_mode = #tpu.pipeline_mode<synchronous>, transform_indices = @transform_24, window_bounds = array<i64: 1, 10>}, {transform_indices = @transform_25, window_bounds = array<i64: 1, 1, 10>}]} {
    %c0 = arith.constant 0 : index
    %c0_0 = arith.constant 0 : index
    %c0_1 = arith.constant 0 : index
    %c0_2 = arith.constant 0 : index
    %0 = vector.load %arg1[%c0, %c0_0, %c0_1, %c0_2] : memref<1x16x16x1xf32, #tpu.memory_space<vmem>>, vector<1x16x16x1xf32>
    %1 = vector.shape_cast %0 : vector<1x16x16x1xf32> to vector<16x16x1xf32>
    %cst = arith.constant 0.000000e+00 : f32
    %2 = vector.broadcast %cst : f32 to vector<18x18x1xf32>
    %c0_3 = arith.constant 0 : index
    %c0_4 = arith.constant 0 : index
    %c0_5 = arith.constant 0 : index
    %3 = vector.load %arg27[%c0_3, %c0_4, %c0_5] : memref<18x18x1xf32, #tpu.memory_space<vmem>>, vector<18x18x1xf32>
    tpu.vector_store %arg27[%c0_3, %c0_4, %c0_5], %2 {strides = array<i32>} : memref<18x18x1xf32, #tpu.memory_space<vmem>>, vector<18x18x1xf32>,
    %c1 = arith.constant 1 : index
    %c1_6 = arith.constant 1 : index
    %c0_7 = arith.constant 0 : index
    %4 = vector.load %arg27[%c1, %c1_6, %c0_7] : memref<18x18x1xf32, #tpu.memory_space<vmem>>, vector<16x16x1xf32>
    tpu.vector_store %arg27[%c1, %c1_6, %c0_7], %1 {strides = array<i32>} : memref<18x18x1xf32, #tpu.memory_space<vmem>>, vector<16x16x1xf32>,
    %c0_8 = arith.constant 0 : index
    %c0_9 = arith.constant 0 : index
    %c0_10 = arith.constant 0 : index
    %5 = vector.load %arg27[%c0_8, %c0_9, %c0_10] : memref<18x18x1xf32, #tpu.memory_space<vmem>>, vector<16x16x1xf32>
    %6 = vector.shape_cast %5 : vector<16x16x1xf32> to vector<256x1xf32>
    %c0_11 = arith.constant 0 : index
    %c1_12 = arith.constant 1 : index
    %c0_13 = arith.constant 0 : index
    %7 = vector.load %arg27[%c0_11, %c1_12, %c0_13] : memref<18x18x1xf32, #tpu.memory_space<vmem>>, vector<16x16x1xf32>
    %8 = vector.shape_cast %7 : vector<16x16x1xf32> to vector<256x1xf32>
    %c0_14 = arith.constant 0 : index
    %c2 = arith.constant 2 : index
    %c0_15 = arith.constant 0 : index
    %9 = vector.load %arg27[%c0_14, %c2, %c0_15] : memref<18x18x1xf32, #tpu.memory_space<vmem>>, vector<16x16x1xf32>
    %10 = vector.shape_cast %9 : vector<16x16x1xf32> to vector<256x1xf32>
    %c1_16 = arith.constant 1 : index
    %c0_17 = arith.constant 0 : index
    %c0_18 = arith.constant 0 : index
    %11 = vector.load %arg27[%c1_16, %c0_17, %c0_18] : memref<18x18x1xf32, #tpu.memory_space<vmem>>, vector<16x16x1xf32>
    %12 = vector.shape_cast %11 : vector<16x16x1xf32> to vector<256x1xf32>
    %c1_19 = arith.constant 1 : index
    %c1_20 = arith.constant 1 : index
    %c0_21 = arith.constant 0 : index
    %13 = vector.load %arg27[%c1_19, %c1_20, %c0_21] : memref<18x18x1xf32, #tpu.memory_space<vmem>>, vector<16x16x1xf32>
    %14 = vector.shape_cast %13 : vector<16x16x1xf32> to vector<256x1xf32>
    %c1_22 = arith.constant 1 : index
    %c2_23 = arith.constant 2 : index
    %c0_24 = arith.constant 0 : index
    %15 = vector.load %arg27[%c1_22, %c2_23, %c0_24] : memref<18x18x1xf32, #tpu.memory_space<vmem>>, vector<16x16x1xf32>
    %16 = vector.shape_cast %15 : vector<16x16x1xf32> to vector<256x1xf32>
    %c2_25 = arith.constant 2 : index
    %c0_26 = arith.constant 0 : index
    %c0_27 = arith.constant 0 : index
    %17 = vector.load %arg27[%c2_25, %c0_26, %c0_27] : memref<18x18x1xf32, #tpu.memory_space<vmem>>, vector<16x16x1xf32>
    %18 = vector.shape_cast %17 : vector<16x16x1xf32> to vector<256x1xf32>
    %c2_28 = arith.constant 2 : index
    %c1_29 = arith.constant 1 : index
    %c0_30 = arith.constant 0 : index
    %19 = vector.load %arg27[%c2_28, %c1_29, %c0_30] : memref<18x18x1xf32, #tpu.memory_space<vmem>>, vector<16x16x1xf32>
    %20 = vector.shape_cast %19 : vector<16x16x1xf32> to vector<256x1xf32>
    %c2_31 = arith.constant 2 : index
    %c2_32 = arith.constant 2 : index
    %c0_33 = arith.constant 0 : index
    %21 = vector.load %arg27[%c2_31, %c2_32, %c0_33] : memref<18x18x1xf32, #tpu.memory_space<vmem>>, vector<16x16x1xf32>
    %22 = vector.shape_cast %21 : vector<16x16x1xf32> to vector<256x1xf32>
    %23 = tpu.concatenate %6, %8, %10, %12, %14, %16, %18, %20, %22 in 1 : vector<256x1xf32>, vector<256x1xf32>, vector<256x1xf32>, vector<256x1xf32>, vector<256x1xf32>, vector<256x1xf32>, vector<256x1xf32>, vector<256x1xf32>, vector<256x1xf32> -> vector<256x9xf32>
    %c0_34 = arith.constant 0 : index
    %c0_35 = arith.constant 0 : index
    %24 = vector.load %arg2[%c0_34, %c0_35] : memref<9x32xf32, #tpu.memory_space<vmem>>, vector<9x32xf32>
    %cst_36 = arith.constant dense<0.000000e+00> : vector<256x32xf32>
    %25 = tpu.matmul %23, %24, %cst_36 {dimension_numbers = #tpu.dot_dimension_numbers<[1], [0], [0], [1], [0, 0, 1, 1], [], []>} : vector<256x9xf32>, vector<9x32xf32>, vector<256x32xf32> -> vector<256x32xf32>
    %c0_37 = arith.constant 0 : index
    %c0_38 = arith.constant 0 : index
    %26 = vector.load %arg3[%c0_37, %c0_38] : memref<1x32xf32, #tpu.memory_space<vmem>>, vector<1x32xf32>
    %27 = vector.broadcast %26 : vector<1x32xf32> to vector<256x32xf32>
    %28 = arith.mulf %25, %27 : vector<256x32xf32>
    %c0_39 = arith.constant 0 : index
    %c0_40 = arith.constant 0 : index
    %29 = vector.load %arg4[%c0_39, %c0_40] : memref<1x32xf32, #tpu.memory_space<vmem>>, vector<1x32xf32>
    %30 = vector.broadcast %29 : vector<1x32xf32> to vector<256x32xf32>
    %31 = arith.addf %28, %30 : vector<256x32xf32>
    %cst_41 = arith.constant 0.000000e+00 : f32
    %32 = vector.broadcast %cst_41 : f32 to vector<256x32xf32>
    %33 = arith.maximumf %31, %32 : vector<256x32xf32>
    %cst_42 = arith.constant 0.000000e+00 : f32
    %34 = vector.broadcast %cst_42 : f32 to vector<18x18x32xf32>
    %c0_43 = arith.constant 0 : index
    %c0_44 = arith.constant 0 : index
    %c0_45 = arith.constant 0 : index
    %35 = vector.load %arg28[%c0_43, %c0_44, %c0_45] : memref<18x18x32xf32, #tpu.memory_space<vmem>>, vector<18x18x32xf32>
    tpu.vector_store %arg28[%c0_43, %c0_44, %c0_45], %34 {strides = array<i32>} : memref<18x18x32xf32, #tpu.memory_space<vmem>>, vector<18x18x32xf32>,
    %36 = vector.shape_cast %33 : vector<256x32xf32> to vector<16x16x32xf32>
    %c1_46 = arith.constant 1 : index
    %c1_47 = arith.constant 1 : index
    %c0_48 = arith.constant 0 : index
    %37 = vector.load %arg28[%c1_46, %c1_47, %c0_48] : memref<18x18x32xf32, #tpu.memory_space<vmem>>, vector<16x16x32xf32>
    tpu.vector_store %arg28[%c1_46, %c1_47, %c0_48], %36 {strides = array<i32>} : memref<18x18x32xf32, #tpu.memory_space<vmem>>, vector<16x16x32xf32>,
    %c0_49 = arith.constant 0 : index
    %c0_50 = arith.constant 0 : index
    %c0_51 = arith.constant 0 : index
    %38 = vector.load %arg28[%c0_49, %c0_50, %c0_51] : memref<18x18x32xf32, #tpu.memory_space<vmem>>, vector<16x16x32xf32>
    %39 = vector.shape_cast %38 : vector<16x16x32xf32> to vector<256x32xf32>
    %c0_52 = arith.constant 0 : index
    %c1_53 = arith.constant 1 : index
    %c0_54 = arith.constant 0 : index
    %40 = vector.load %arg28[%c0_52, %c1_53, %c0_54] : memref<18x18x32xf32, #tpu.memory_space<vmem>>, vector<16x16x32xf32>
    %41 = vector.shape_cast %40 : vector<16x16x32xf32> to vector<256x32xf32>
    %c0_55 = arith.constant 0 : index
    %c2_56 = arith.constant 2 : index
    %c0_57 = arith.constant 0 : index
    %42 = vector.load %arg28[%c0_55, %c2_56, %c0_57] : memref<18x18x32xf32, #tpu.memory_space<vmem>>, vector<16x16x32xf32>
    %43 = vector.shape_cast %42 : vector<16x16x32xf32> to vector<256x32xf32>
    %c1_58 = arith.constant 1 : index
    %c0_59 = arith.constant 0 : index
    %c0_60 = arith.constant 0 : index
    %44 = vector.load %arg28[%c1_58, %c0_59, %c0_60] : memref<18x18x32xf32, #tpu.memory_space<vmem>>, vector<16x16x32xf32>
    %45 = vector.shape_cast %44 : vector<16x16x32xf32> to vector<256x32xf32>
    %c1_61 = arith.constant 1 : index
    %c1_62 = arith.constant 1 : index
    %c0_63 = arith.constant 0 : index
    %46 = vector.load %arg28[%c1_61, %c1_62, %c0_63] : memref<18x18x32xf32, #tpu.memory_space<vmem>>, vector<16x16x32xf32>
    %47 = vector.shape_cast %46 : vector<16x16x32xf32> to vector<256x32xf32>
    %c1_64 = arith.constant 1 : index
    %c2_65 = arith.constant 2 : index
    %c0_66 = arith.constant 0 : index
    %48 = vector.load %arg28[%c1_64, %c2_65, %c0_66] : memref<18x18x32xf32, #tpu.memory_space<vmem>>, vector<16x16x32xf32>
    %49 = vector.shape_cast %48 : vector<16x16x32xf32> to vector<256x32xf32>
    %c2_67 = arith.constant 2 : index
    %c0_68 = arith.constant 0 : index
    %c0_69 = arith.constant 0 : index
    %50 = vector.load %arg28[%c2_67, %c0_68, %c0_69] : memref<18x18x32xf32, #tpu.memory_space<vmem>>, vector<16x16x32xf32>
    %51 = vector.shape_cast %50 : vector<16x16x32xf32> to vector<256x32xf32>
    %c2_70 = arith.constant 2 : index
    %c1_71 = arith.constant 1 : index
    %c0_72 = arith.constant 0 : index
    %52 = vector.load %arg28[%c2_70, %c1_71, %c0_72] : memref<18x18x32xf32, #tpu.memory_space<vmem>>, vector<16x16x32xf32>
    %53 = vector.shape_cast %52 : vector<16x16x32xf32> to vector<256x32xf32>
    %c2_73 = arith.constant 2 : index
    %c2_74 = arith.constant 2 : index
    %c0_75 = arith.constant 0 : index
    %54 = vector.load %arg28[%c2_73, %c2_74, %c0_75] : memref<18x18x32xf32, #tpu.memory_space<vmem>>, vector<16x16x32xf32>
    %55 = vector.shape_cast %54 : vector<16x16x32xf32> to vector<256x32xf32>
    %56 = tpu.concatenate %39, %41, %43, %45, %47, %49, %51, %53, %55 in 1 : vector<256x32xf32>, vector<256x32xf32>, vector<256x32xf32>, vector<256x32xf32>, vector<256x32xf32>, vector<256x32xf32>, vector<256x32xf32>, vector<256x32xf32>, vector<256x32xf32> -> vector<256x288xf32>
    %c0_76 = arith.constant 0 : index
    %c0_77 = arith.constant 0 : index
    %57 = vector.load %arg5[%c0_76, %c0_77] : memref<288x32xf32, #tpu.memory_space<vmem>>, vector<288x32xf32>
    %cst_78 = arith.constant dense<0.000000e+00> : vector<256x32xf32>
    %58 = tpu.matmul %56, %57, %cst_78 {dimension_numbers = #tpu.dot_dimension_numbers<[1], [0], [0], [1], [0, 0, 1, 1], [], []>} : vector<256x288xf32>, vector<288x32xf32>, vector<256x32xf32> -> vector<256x32xf32>
    %c0_79 = arith.constant 0 : index
    %c0_80 = arith.constant 0 : index
    %59 = vector.load %arg6[%c0_79, %c0_80] : memref<1x32xf32, #tpu.memory_space<vmem>>, vector<1x32xf32>
    %60 = vector.broadcast %59 : vector<1x32xf32> to vector<256x32xf32>
    %61 = arith.mulf %58, %60 : vector<256x32xf32>
    %c0_81 = arith.constant 0 : index
    %c0_82 = arith.constant 0 : index
    %62 = vector.load %arg7[%c0_81, %c0_82] : memref<1x32xf32, #tpu.memory_space<vmem>>, vector<1x32xf32>
    %63 = vector.broadcast %62 : vector<1x32xf32> to vector<256x32xf32>
    %64 = arith.addf %61, %63 : vector<256x32xf32>
    %cst_83 = arith.constant 0.000000e+00 : f32
    %65 = vector.broadcast %cst_83 : f32 to vector<256x32xf32>
    %66 = arith.maximumf %64, %65 : vector<256x32xf32>
    %67 = vector.shape_cast %66 : vector<256x32xf32> to vector<8x2x8x2x32xf32>
    %68 = vector.extract_strided_slice %67 {offsets = [0, 0, 0, 0, 0], sizes = [8, 1, 8, 1, 32], strides = [1, 1, 1, 1, 1]} : vector<8x2x8x2x32xf32> to vector<8x1x8x1x32xf32>
    %69 = vector.shape_cast %68 : vector<8x1x8x1x32xf32> to vector<8x8x32xf32>
    %70 = vector.extract_strided_slice %67 {offsets = [0, 0, 0, 1, 0], sizes = [8, 1, 8, 1, 32], strides = [1, 1, 1, 1, 1]} : vector<8x2x8x2x32xf32> to vector<8x1x8x1x32xf32>
    %71 = vector.shape_cast %70 : vector<8x1x8x1x32xf32> to vector<8x8x32xf32>
    %72 = arith.maximumf %69, %71 : vector<8x8x32xf32>
    %73 = vector.extract_strided_slice %67 {offsets = [0, 1, 0, 0, 0], sizes = [8, 1, 8, 1, 32], strides = [1, 1, 1, 1, 1]} : vector<8x2x8x2x32xf32> to vector<8x1x8x1x32xf32>
    %74 = vector.shape_cast %73 : vector<8x1x8x1x32xf32> to vector<8x8x32xf32>
    %75 = vector.extract_strided_slice %67 {offsets = [0, 1, 0, 1, 0], sizes = [8, 1, 8, 1, 32], strides = [1, 1, 1, 1, 1]} : vector<8x2x8x2x32xf32> to vector<8x1x8x1x32xf32>
    %76 = vector.shape_cast %75 : vector<8x1x8x1x32xf32> to vector<8x8x32xf32>
    %77 = arith.maximumf %74, %76 : vector<8x8x32xf32>
    %78 = arith.maximumf %72, %77 : vector<8x8x32xf32>
    %cst_84 = arith.constant 0.000000e+00 : f32
    %79 = vector.broadcast %cst_84 : f32 to vector<10x10x32xf32>
    %c0_85 = arith.constant 0 : index
    %c0_86 = arith.constant 0 : index
    %c0_87 = arith.constant 0 : index
    %80 = vector.load %arg29[%c0_85, %c0_86, %c0_87] : memref<10x10x32xf32, #tpu.memory_space<vmem>>, vector<10x10x32xf32>
    tpu.vector_store %arg29[%c0_85, %c0_86, %c0_87], %79 {strides = array<i32>} : memref<10x10x32xf32, #tpu.memory_space<vmem>>, vector<10x10x32xf32>,
    %c1_88 = arith.constant 1 : index
    %c1_89 = arith.constant 1 : index
    %c0_90 = arith.constant 0 : index
    %81 = vector.load %arg29[%c1_88, %c1_89, %c0_90] : memref<10x10x32xf32, #tpu.memory_space<vmem>>, vector<8x8x32xf32>
    tpu.vector_store %arg29[%c1_88, %c1_89, %c0_90], %78 {strides = array<i32>} : memref<10x10x32xf32, #tpu.memory_space<vmem>>, vector<8x8x32xf32>,
    %c0_91 = arith.constant 0 : index
    %c0_92 = arith.constant 0 : index
    %c0_93 = arith.constant 0 : index
    %82 = vector.load %arg29[%c0_91, %c0_92, %c0_93] : memref<10x10x32xf32, #tpu.memory_space<vmem>>, vector<8x8x32xf32>
    %83 = vector.shape_cast %82 : vector<8x8x32xf32> to vector<64x32xf32>
    %c0_94 = arith.constant 0 : index
    %c1_95 = arith.constant 1 : index
    %c0_96 = arith.constant 0 : index
    %84 = vector.load %arg29[%c0_94, %c1_95, %c0_96] : memref<10x10x32xf32, #tpu.memory_space<vmem>>, vector<8x8x32xf32>
    %85 = vector.shape_cast %84 : vector<8x8x32xf32> to vector<64x32xf32>
    %c0_97 = arith.constant 0 : index
    %c2_98 = arith.constant 2 : index
    %c0_99 = arith.constant 0 : index
    %86 = vector.load %arg29[%c0_97, %c2_98, %c0_99] : memref<10x10x32xf32, #tpu.memory_space<vmem>>, vector<8x8x32xf32>
    %87 = vector.shape_cast %86 : vector<8x8x32xf32> to vector<64x32xf32>
    %c1_100 = arith.constant 1 : index
    %c0_101 = arith.constant 0 : index
    %c0_102 = arith.constant 0 : index
    %88 = vector.load %arg29[%c1_100, %c0_101, %c0_102] : memref<10x10x32xf32, #tpu.memory_space<vmem>>, vector<8x8x32xf32>
    %89 = vector.shape_cast %88 : vector<8x8x32xf32> to vector<64x32xf32>
    %c1_103 = arith.constant 1 : index
    %c1_104 = arith.constant 1 : index
    %c0_105 = arith.constant 0 : index
    %90 = vector.load %arg29[%c1_103, %c1_104, %c0_105] : memref<10x10x32xf32, #tpu.memory_space<vmem>>, vector<8x8x32xf32>
    %91 = vector.shape_cast %90 : vector<8x8x32xf32> to vector<64x32xf32>
    %c1_106 = arith.constant 1 : index
    %c2_107 = arith.constant 2 : index
    %c0_108 = arith.constant 0 : index
    %92 = vector.load %arg29[%c1_106, %c2_107, %c0_108] : memref<10x10x32xf32, #tpu.memory_space<vmem>>, vector<8x8x32xf32>
    %93 = vector.shape_cast %92 : vector<8x8x32xf32> to vector<64x32xf32>
    %c2_109 = arith.constant 2 : index
    %c0_110 = arith.constant 0 : index
    %c0_111 = arith.constant 0 : index
    %94 = vector.load %arg29[%c2_109, %c0_110, %c0_111] : memref<10x10x32xf32, #tpu.memory_space<vmem>>, vector<8x8x32xf32>
    %95 = vector.shape_cast %94 : vector<8x8x32xf32> to vector<64x32xf32>
    %c2_112 = arith.constant 2 : index
    %c1_113 = arith.constant 1 : index
    %c0_114 = arith.constant 0 : index
    %96 = vector.load %arg29[%c2_112, %c1_113, %c0_114] : memref<10x10x32xf32, #tpu.memory_space<vmem>>, vector<8x8x32xf32>
    %97 = vector.shape_cast %96 : vector<8x8x32xf32> to vector<64x32xf32>
    %c2_115 = arith.constant 2 : index
    %c2_116 = arith.constant 2 : index
    %c0_117 = arith.constant 0 : index
    %98 = vector.load %arg29[%c2_115, %c2_116, %c0_117] : memref<10x10x32xf32, #tpu.memory_space<vmem>>, vector<8x8x32xf32>
    %99 = vector.shape_cast %98 : vector<8x8x32xf32> to vector<64x32xf32>
    %100 = tpu.concatenate %83, %85, %87, %89, %91, %93, %95, %97, %99 in 1 : vector<64x32xf32>, vector<64x32xf32>, vector<64x32xf32>, vector<64x32xf32>, vector<64x32xf32>, vector<64x32xf32>, vector<64x32xf32>, vector<64x32xf32>, vector<64x32xf32> -> vector<64x288xf32>
    %c0_118 = arith.constant 0 : index
    %c0_119 = arith.constant 0 : index
    %101 = vector.load %arg8[%c0_118, %c0_119] : memref<288x64xf32, #tpu.memory_space<vmem>>, vector<288x64xf32>
    %cst_120 = arith.constant dense<0.000000e+00> : vector<64x64xf32>
    %102 = tpu.matmul %100, %101, %cst_120 {dimension_numbers = #tpu.dot_dimension_numbers<[1], [0], [0], [1], [0, 0, 1, 1], [], []>} : vector<64x288xf32>, vector<288x64xf32>, vector<64x64xf32> -> vector<64x64xf32>
    %c0_121 = arith.constant 0 : index
    %c0_122 = arith.constant 0 : index
    %103 = vector.load %arg9[%c0_121, %c0_122] : memref<1x64xf32, #tpu.memory_space<vmem>>, vector<1x64xf32>
    %104 = vector.broadcast %103 : vector<1x64xf32> to vector<64x64xf32>
    %105 = arith.mulf %102, %104 : vector<64x64xf32>
    %c0_123 = arith.constant 0 : index
    %c0_124 = arith.constant 0 : index
    %106 = vector.load %arg10[%c0_123, %c0_124] : memref<1x64xf32, #tpu.memory_space<vmem>>, vector<1x64xf32>
    %107 = vector.broadcast %106 : vector<1x64xf32> to vector<64x64xf32>
    %108 = arith.addf %105, %107 : vector<64x64xf32>
    %cst_125 = arith.constant 0.000000e+00 : f32
    %109 = vector.broadcast %cst_125 : f32 to vector<64x64xf32>
    %110 = arith.maximumf %108, %109 : vector<64x64xf32>
    %cst_126 = arith.constant 0.000000e+00 : f32
    %111 = vector.broadcast %cst_126 : f32 to vector<10x10x64xf32>
    %c0_127 = arith.constant 0 : index
    %c0_128 = arith.constant 0 : index
    %c0_129 = arith.constant 0 : index
    %112 = vector.load %arg30[%c0_127, %c0_128, %c0_129] : memref<10x10x64xf32, #tpu.memory_space<vmem>>, vector<10x10x64xf32>
    tpu.vector_store %arg30[%c0_127, %c0_128, %c0_129], %111 {strides = array<i32>} : memref<10x10x64xf32, #tpu.memory_space<vmem>>, vector<10x10x64xf32>,
    %113 = vector.shape_cast %110 : vector<64x64xf32> to vector<8x8x64xf32>
    %c1_130 = arith.constant 1 : index
    %c1_131 = arith.constant 1 : index
    %c0_132 = arith.constant 0 : index
    %114 = vector.load %arg30[%c1_130, %c1_131, %c0_132] : memref<10x10x64xf32, #tpu.memory_space<vmem>>, vector<8x8x64xf32>
    tpu.vector_store %arg30[%c1_130, %c1_131, %c0_132], %113 {strides = array<i32>} : memref<10x10x64xf32, #tpu.memory_space<vmem>>, vector<8x8x64xf32>,
    %c0_133 = arith.constant 0 : index
    %c0_134 = arith.constant 0 : index
    %c0_135 = arith.constant 0 : index
    %115 = vector.load %arg30[%c0_133, %c0_134, %c0_135] : memref<10x10x64xf32, #tpu.memory_space<vmem>>, vector<8x8x64xf32>
    %116 = vector.shape_cast %115 : vector<8x8x64xf32> to vector<64x64xf32>
    %c0_136 = arith.constant 0 : index
    %c1_137 = arith.constant 1 : index
    %c0_138 = arith.constant 0 : index
    %117 = vector.load %arg30[%c0_136, %c1_137, %c0_138] : memref<10x10x64xf32, #tpu.memory_space<vmem>>, vector<8x8x64xf32>
    %118 = vector.shape_cast %117 : vector<8x8x64xf32> to vector<64x64xf32>
    %c0_139 = arith.constant 0 : index
    %c2_140 = arith.constant 2 : index
    %c0_141 = arith.constant 0 : index
    %119 = vector.load %arg30[%c0_139, %c2_140, %c0_141] : memref<10x10x64xf32, #tpu.memory_space<vmem>>, vector<8x8x64xf32>
    %120 = vector.shape_cast %119 : vector<8x8x64xf32> to vector<64x64xf32>
    %c1_142 = arith.constant 1 : index
    %c0_143 = arith.constant 0 : index
    %c0_144 = arith.constant 0 : index
    %121 = vector.load %arg30[%c1_142, %c0_143, %c0_144] : memref<10x10x64xf32, #tpu.memory_space<vmem>>, vector<8x8x64xf32>
    %122 = vector.shape_cast %121 : vector<8x8x64xf32> to vector<64x64xf32>
    %c1_145 = arith.constant 1 : index
    %c1_146 = arith.constant 1 : index
    %c0_147 = arith.constant 0 : index
    %123 = vector.load %arg30[%c1_145, %c1_146, %c0_147] : memref<10x10x64xf32, #tpu.memory_space<vmem>>, vector<8x8x64xf32>
    %124 = vector.shape_cast %123 : vector<8x8x64xf32> to vector<64x64xf32>
    %c1_148 = arith.constant 1 : index
    %c2_149 = arith.constant 2 : index
    %c0_150 = arith.constant 0 : index
    %125 = vector.load %arg30[%c1_148, %c2_149, %c0_150] : memref<10x10x64xf32, #tpu.memory_space<vmem>>, vector<8x8x64xf32>
    %126 = vector.shape_cast %125 : vector<8x8x64xf32> to vector<64x64xf32>
    %c2_151 = arith.constant 2 : index
    %c0_152 = arith.constant 0 : index
    %c0_153 = arith.constant 0 : index
    %127 = vector.load %arg30[%c2_151, %c0_152, %c0_153] : memref<10x10x64xf32, #tpu.memory_space<vmem>>, vector<8x8x64xf32>
    %128 = vector.shape_cast %127 : vector<8x8x64xf32> to vector<64x64xf32>
    %c2_154 = arith.constant 2 : index
    %c1_155 = arith.constant 1 : index
    %c0_156 = arith.constant 0 : index
    %129 = vector.load %arg30[%c2_154, %c1_155, %c0_156] : memref<10x10x64xf32, #tpu.memory_space<vmem>>, vector<8x8x64xf32>
    %130 = vector.shape_cast %129 : vector<8x8x64xf32> to vector<64x64xf32>
    %c2_157 = arith.constant 2 : index
    %c2_158 = arith.constant 2 : index
    %c0_159 = arith.constant 0 : index
    %131 = vector.load %arg30[%c2_157, %c2_158, %c0_159] : memref<10x10x64xf32, #tpu.memory_space<vmem>>, vector<8x8x64xf32>
    %132 = vector.shape_cast %131 : vector<8x8x64xf32> to vector<64x64xf32>
    %133 = tpu.concatenate %116, %118, %120, %122, %124, %126, %128, %130, %132 in 1 : vector<64x64xf32>, vector<64x64xf32>, vector<64x64xf32>, vector<64x64xf32>, vector<64x64xf32>, vector<64x64xf32>, vector<64x64xf32>, vector<64x64xf32>, vector<64x64xf32> -> vector<64x576xf32>
    %c0_160 = arith.constant 0 : index
    %c0_161 = arith.constant 0 : index
    %134 = vector.load %arg11[%c0_160, %c0_161] : memref<576x64xf32, #tpu.memory_space<vmem>>, vector<576x64xf32>
    %cst_162 = arith.constant dense<0.000000e+00> : vector<64x64xf32>
    %135 = tpu.matmul %133, %134, %cst_162 {dimension_numbers = #tpu.dot_dimension_numbers<[1], [0], [0], [1], [0, 0, 1, 1], [], []>} : vector<64x576xf32>, vector<576x64xf32>, vector<64x64xf32> -> vector<64x64xf32>
    %c0_163 = arith.constant 0 : index
    %c0_164 = arith.constant 0 : index
    %136 = vector.load %arg12[%c0_163, %c0_164] : memref<1x64xf32, #tpu.memory_space<vmem>>, vector<1x64xf32>
    %137 = vector.broadcast %136 : vector<1x64xf32> to vector<64x64xf32>
    %138 = arith.mulf %135, %137 : vector<64x64xf32>
    %c0_165 = arith.constant 0 : index
    %c0_166 = arith.constant 0 : index
    %139 = vector.load %arg13[%c0_165, %c0_166] : memref<1x64xf32, #tpu.memory_space<vmem>>, vector<1x64xf32>
    %140 = vector.broadcast %139 : vector<1x64xf32> to vector<64x64xf32>
    %141 = arith.addf %138, %140 : vector<64x64xf32>
    %cst_167 = arith.constant 0.000000e+00 : f32
    %142 = vector.broadcast %cst_167 : f32 to vector<64x64xf32>
    %143 = arith.maximumf %141, %142 : vector<64x64xf32>
    %144 = vector.shape_cast %143 : vector<64x64xf32> to vector<4x2x4x2x64xf32>
    %145 = vector.extract_strided_slice %144 {offsets = [0, 0, 0, 0, 0], sizes = [4, 1, 4, 1, 64], strides = [1, 1, 1, 1, 1]} : vector<4x2x4x2x64xf32> to vector<4x1x4x1x64xf32>
    %146 = vector.shape_cast %145 : vector<4x1x4x1x64xf32> to vector<4x4x64xf32>
    %147 = vector.extract_strided_slice %144 {offsets = [0, 0, 0, 1, 0], sizes = [4, 1, 4, 1, 64], strides = [1, 1, 1, 1, 1]} : vector<4x2x4x2x64xf32> to vector<4x1x4x1x64xf32>
    %148 = vector.shape_cast %147 : vector<4x1x4x1x64xf32> to vector<4x4x64xf32>
    %149 = arith.maximumf %146, %148 : vector<4x4x64xf32>
    %150 = vector.extract_strided_slice %144 {offsets = [0, 1, 0, 0, 0], sizes = [4, 1, 4, 1, 64], strides = [1, 1, 1, 1, 1]} : vector<4x2x4x2x64xf32> to vector<4x1x4x1x64xf32>
    %151 = vector.shape_cast %150 : vector<4x1x4x1x64xf32> to vector<4x4x64xf32>
    %152 = vector.extract_strided_slice %144 {offsets = [0, 1, 0, 1, 0], sizes = [4, 1, 4, 1, 64], strides = [1, 1, 1, 1, 1]} : vector<4x2x4x2x64xf32> to vector<4x1x4x1x64xf32>
    %153 = vector.shape_cast %152 : vector<4x1x4x1x64xf32> to vector<4x4x64xf32>
    %154 = arith.maximumf %151, %153 : vector<4x4x64xf32>
    %155 = arith.maximumf %149, %154 : vector<4x4x64xf32>
    %cst_168 = arith.constant 0.000000e+00 : f32
    %156 = vector.broadcast %cst_168 : f32 to vector<6x6x64xf32>
    %c0_169 = arith.constant 0 : index
    %c0_170 = arith.constant 0 : index
    %c0_171 = arith.constant 0 : index
    %157 = vector.load %arg31[%c0_169, %c0_170, %c0_171] : memref<6x6x64xf32, #tpu.memory_space<vmem>>, vector<6x6x64xf32>
    tpu.vector_store %arg31[%c0_169, %c0_170, %c0_171], %156 {strides = array<i32>} : memref<6x6x64xf32, #tpu.memory_space<vmem>>, vector<6x6x64xf32>,
    %c1_172 = arith.constant 1 : index
    %c1_173 = arith.constant 1 : index
    %c0_174 = arith.constant 0 : index
    %158 = vector.load %arg31[%c1_172, %c1_173, %c0_174] : memref<6x6x64xf32, #tpu.memory_space<vmem>>, vector<4x4x64xf32>
    tpu.vector_store %arg31[%c1_172, %c1_173, %c0_174], %155 {strides = array<i32>} : memref<6x6x64xf32, #tpu.memory_space<vmem>>, vector<4x4x64xf32>,
    %c0_175 = arith.constant 0 : index
    %c0_176 = arith.constant 0 : index
    %c0_177 = arith.constant 0 : index
    %159 = vector.load %arg31[%c0_175, %c0_176, %c0_177] : memref<6x6x64xf32, #tpu.memory_space<vmem>>, vector<4x4x64xf32>
    %160 = vector.shape_cast %159 : vector<4x4x64xf32> to vector<16x64xf32>
    %c0_178 = arith.constant 0 : index
    %c1_179 = arith.constant 1 : index
    %c0_180 = arith.constant 0 : index
    %161 = vector.load %arg31[%c0_178, %c1_179, %c0_180] : memref<6x6x64xf32, #tpu.memory_space<vmem>>, vector<4x4x64xf32>
    %162 = vector.shape_cast %161 : vector<4x4x64xf32> to vector<16x64xf32>
    %c0_181 = arith.constant 0 : index
    %c2_182 = arith.constant 2 : index
    %c0_183 = arith.constant 0 : index
    %163 = vector.load %arg31[%c0_181, %c2_182, %c0_183] : memref<6x6x64xf32, #tpu.memory_space<vmem>>, vector<4x4x64xf32>
    %164 = vector.shape_cast %163 : vector<4x4x64xf32> to vector<16x64xf32>
    %c1_184 = arith.constant 1 : index
    %c0_185 = arith.constant 0 : index
    %c0_186 = arith.constant 0 : index
    %165 = vector.load %arg31[%c1_184, %c0_185, %c0_186] : memref<6x6x64xf32, #tpu.memory_space<vmem>>, vector<4x4x64xf32>
    %166 = vector.shape_cast %165 : vector<4x4x64xf32> to vector<16x64xf32>
    %c1_187 = arith.constant 1 : index
    %c1_188 = arith.constant 1 : index
    %c0_189 = arith.constant 0 : index
    %167 = vector.load %arg31[%c1_187, %c1_188, %c0_189] : memref<6x6x64xf32, #tpu.memory_space<vmem>>, vector<4x4x64xf32>
    %168 = vector.shape_cast %167 : vector<4x4x64xf32> to vector<16x64xf32>
    %c1_190 = arith.constant 1 : index
    %c2_191 = arith.constant 2 : index
    %c0_192 = arith.constant 0 : index
    %169 = vector.load %arg31[%c1_190, %c2_191, %c0_192] : memref<6x6x64xf32, #tpu.memory_space<vmem>>, vector<4x4x64xf32>
    %170 = vector.shape_cast %169 : vector<4x4x64xf32> to vector<16x64xf32>
    %c2_193 = arith.constant 2 : index
    %c0_194 = arith.constant 0 : index
    %c0_195 = arith.constant 0 : index
    %171 = vector.load %arg31[%c2_193, %c0_194, %c0_195] : memref<6x6x64xf32, #tpu.memory_space<vmem>>, vector<4x4x64xf32>
    %172 = vector.shape_cast %171 : vector<4x4x64xf32> to vector<16x64xf32>
    %c2_196 = arith.constant 2 : index
    %c1_197 = arith.constant 1 : index
    %c0_198 = arith.constant 0 : index
    %173 = vector.load %arg31[%c2_196, %c1_197, %c0_198] : memref<6x6x64xf32, #tpu.memory_space<vmem>>, vector<4x4x64xf32>
    %174 = vector.shape_cast %173 : vector<4x4x64xf32> to vector<16x64xf32>
    %c2_199 = arith.constant 2 : index
    %c2_200 = arith.constant 2 : index
    %c0_201 = arith.constant 0 : index
    %175 = vector.load %arg31[%c2_199, %c2_200, %c0_201] : memref<6x6x64xf32, #tpu.memory_space<vmem>>, vector<4x4x64xf32>
    %176 = vector.shape_cast %175 : vector<4x4x64xf32> to vector<16x64xf32>
    %177 = tpu.concatenate %160, %162, %164, %166, %168, %170, %172, %174, %176 in 1 : vector<16x64xf32>, vector<16x64xf32>, vector<16x64xf32>, vector<16x64xf32>, vector<16x64xf32>, vector<16x64xf32>, vector<16x64xf32>, vector<16x64xf32>, vector<16x64xf32> -> vector<16x576xf32>
    %c0_202 = arith.constant 0 : index
    %c0_203 = arith.constant 0 : index
    %178 = vector.load %arg14[%c0_202, %c0_203] : memref<576x128xf32, #tpu.memory_space<vmem>>, vector<576x128xf32>
    %cst_204 = arith.constant dense<0.000000e+00> : vector<16x128xf32>
    %179 = tpu.matmul %177, %178, %cst_204 {dimension_numbers = #tpu.dot_dimension_numbers<[1], [0], [0], [1], [0, 0, 1, 1], [], []>} : vector<16x576xf32>, vector<576x128xf32>, vector<16x128xf32> -> vector<16x128xf32>
    %c0_205 = arith.constant 0 : index
    %c0_206 = arith.constant 0 : index
    %180 = vector.load %arg15[%c0_205, %c0_206] : memref<1x128xf32, #tpu.memory_space<vmem>>, vector<1x128xf32>
    %181 = vector.broadcast %180 : vector<1x128xf32> to vector<16x128xf32>
    %182 = arith.mulf %179, %181 : vector<16x128xf32>
    %c0_207 = arith.constant 0 : index
    %c0_208 = arith.constant 0 : index
    %183 = vector.load %arg16[%c0_207, %c0_208] : memref<1x128xf32, #tpu.memory_space<vmem>>, vector<1x128xf32>
    %184 = vector.broadcast %183 : vector<1x128xf32> to vector<16x128xf32>
    %185 = arith.addf %182, %184 : vector<16x128xf32>
    %cst_209 = arith.constant 0.000000e+00 : f32
    %186 = vector.broadcast %cst_209 : f32 to vector<16x128xf32>
    %187 = arith.maximumf %185, %186 : vector<16x128xf32>
    %cst_210 = arith.constant 0.000000e+00 : f32
    %188 = vector.broadcast %cst_210 : f32 to vector<6x6x128xf32>
    %c0_211 = arith.constant 0 : index
    %c0_212 = arith.constant 0 : index
    %c0_213 = arith.constant 0 : index
    %189 = vector.load %arg32[%c0_211, %c0_212, %c0_213] : memref<6x6x128xf32, #tpu.memory_space<vmem>>, vector<6x6x128xf32>
    tpu.vector_store %arg32[%c0_211, %c0_212, %c0_213], %188 {strides = array<i32>} : memref<6x6x128xf32, #tpu.memory_space<vmem>>, vector<6x6x128xf32>,
    %190 = vector.shape_cast %187 : vector<16x128xf32> to vector<4x4x128xf32>
    %c1_214 = arith.constant 1 : index
    %c1_215 = arith.constant 1 : index
    %c0_216 = arith.constant 0 : index
    %191 = vector.load %arg32[%c1_214, %c1_215, %c0_216] : memref<6x6x128xf32, #tpu.memory_space<vmem>>, vector<4x4x128xf32>
    tpu.vector_store %arg32[%c1_214, %c1_215, %c0_216], %190 {strides = array<i32>} : memref<6x6x128xf32, #tpu.memory_space<vmem>>, vector<4x4x128xf32>,
    %c0_217 = arith.constant 0 : index
    %c0_218 = arith.constant 0 : index
    %c0_219 = arith.constant 0 : index
    %192 = vector.load %arg32[%c0_217, %c0_218, %c0_219] : memref<6x6x128xf32, #tpu.memory_space<vmem>>, vector<4x4x128xf32>
    %193 = vector.shape_cast %192 : vector<4x4x128xf32> to vector<16x128xf32>
    %c0_220 = arith.constant 0 : index
    %c1_221 = arith.constant 1 : index
    %c0_222 = arith.constant 0 : index
    %194 = vector.load %arg32[%c0_220, %c1_221, %c0_222] : memref<6x6x128xf32, #tpu.memory_space<vmem>>, vector<4x4x128xf32>
    %195 = vector.shape_cast %194 : vector<4x4x128xf32> to vector<16x128xf32>
    %c0_223 = arith.constant 0 : index
    %c2_224 = arith.constant 2 : index
    %c0_225 = arith.constant 0 : index
    %196 = vector.load %arg32[%c0_223, %c2_224, %c0_225] : memref<6x6x128xf32, #tpu.memory_space<vmem>>, vector<4x4x128xf32>
    %197 = vector.shape_cast %196 : vector<4x4x128xf32> to vector<16x128xf32>
    %c1_226 = arith.constant 1 : index
    %c0_227 = arith.constant 0 : index
    %c0_228 = arith.constant 0 : index
    %198 = vector.load %arg32[%c1_226, %c0_227, %c0_228] : memref<6x6x128xf32, #tpu.memory_space<vmem>>, vector<4x4x128xf32>
    %199 = vector.shape_cast %198 : vector<4x4x128xf32> to vector<16x128xf32>
    %c1_229 = arith.constant 1 : index
    %c1_230 = arith.constant 1 : index
    %c0_231 = arith.constant 0 : index
    %200 = vector.load %arg32[%c1_229, %c1_230, %c0_231] : memref<6x6x128xf32, #tpu.memory_space<vmem>>, vector<4x4x128xf32>
    %201 = vector.shape_cast %200 : vector<4x4x128xf32> to vector<16x128xf32>
    %c1_232 = arith.constant 1 : index
    %c2_233 = arith.constant 2 : index
    %c0_234 = arith.constant 0 : index
    %202 = vector.load %arg32[%c1_232, %c2_233, %c0_234] : memref<6x6x128xf32, #tpu.memory_space<vmem>>, vector<4x4x128xf32>
    %203 = vector.shape_cast %202 : vector<4x4x128xf32> to vector<16x128xf32>
    %c2_235 = arith.constant 2 : index
    %c0_236 = arith.constant 0 : index
    %c0_237 = arith.constant 0 : index
    %204 = vector.load %arg32[%c2_235, %c0_236, %c0_237] : memref<6x6x128xf32, #tpu.memory_space<vmem>>, vector<4x4x128xf32>
    %205 = vector.shape_cast %204 : vector<4x4x128xf32> to vector<16x128xf32>
    %c2_238 = arith.constant 2 : index
    %c1_239 = arith.constant 1 : index
    %c0_240 = arith.constant 0 : index
    %206 = vector.load %arg32[%c2_238, %c1_239, %c0_240] : memref<6x6x128xf32, #tpu.memory_space<vmem>>, vector<4x4x128xf32>
    %207 = vector.shape_cast %206 : vector<4x4x128xf32> to vector<16x128xf32>
    %c2_241 = arith.constant 2 : index
    %c2_242 = arith.constant 2 : index
    %c0_243 = arith.constant 0 : index
    %208 = vector.load %arg32[%c2_241, %c2_242, %c0_243] : memref<6x6x128xf32, #tpu.memory_space<vmem>>, vector<4x4x128xf32>
    %209 = vector.shape_cast %208 : vector<4x4x128xf32> to vector<16x128xf32>
    %210 = tpu.concatenate %193, %195, %197, %199, %201, %203, %205, %207, %209 in 1 : vector<16x128xf32>, vector<16x128xf32>, vector<16x128xf32>, vector<16x128xf32>, vector<16x128xf32>, vector<16x128xf32>, vector<16x128xf32>, vector<16x128xf32>, vector<16x128xf32> -> vector<16x1152xf32>
    %c0_244 = arith.constant 0 : index
    %c0_245 = arith.constant 0 : index
    %211 = vector.load %arg17[%c0_244, %c0_245] : memref<1152x128xf32, #tpu.memory_space<vmem>>, vector<1152x128xf32>
    %cst_246 = arith.constant dense<0.000000e+00> : vector<16x128xf32>
    %212 = tpu.matmul %210, %211, %cst_246 {dimension_numbers = #tpu.dot_dimension_numbers<[1], [0], [0], [1], [0, 0, 1, 1], [], []>} : vector<16x1152xf32>, vector<1152x128xf32>, vector<16x128xf32> -> vector<16x128xf32>
    %c0_247 = arith.constant 0 : index
    %c0_248 = arith.constant 0 : index
    %213 = vector.load %arg18[%c0_247, %c0_248] : memref<1x128xf32, #tpu.memory_space<vmem>>, vector<1x128xf32>
    %214 = vector.broadcast %213 : vector<1x128xf32> to vector<16x128xf32>
    %215 = arith.mulf %212, %214 : vector<16x128xf32>
    %c0_249 = arith.constant 0 : index
    %c0_250 = arith.constant 0 : index
    %216 = vector.load %arg19[%c0_249, %c0_250] : memref<1x128xf32, #tpu.memory_space<vmem>>, vector<1x128xf32>
    %217 = vector.broadcast %216 : vector<1x128xf32> to vector<16x128xf32>
    %218 = arith.addf %215, %217 : vector<16x128xf32>
    %cst_251 = arith.constant 0.000000e+00 : f32
    %219 = vector.broadcast %cst_251 : f32 to vector<16x128xf32>
    %220 = arith.maximumf %218, %219 : vector<16x128xf32>
    %221 = vector.shape_cast %220 : vector<16x128xf32> to vector<2x2x2x2x128xf32>
    %222 = vector.extract_strided_slice %221 {offsets = [0, 0, 0, 0, 0], sizes = [2, 1, 2, 1, 128], strides = [1, 1, 1, 1, 1]} : vector<2x2x2x2x128xf32> to vector<2x1x2x1x128xf32>
    %223 = vector.shape_cast %222 : vector<2x1x2x1x128xf32> to vector<2x2x128xf32>
    %224 = vector.extract_strided_slice %221 {offsets = [0, 0, 0, 1, 0], sizes = [2, 1, 2, 1, 128], strides = [1, 1, 1, 1, 1]} : vector<2x2x2x2x128xf32> to vector<2x1x2x1x128xf32>
    %225 = vector.shape_cast %224 : vector<2x1x2x1x128xf32> to vector<2x2x128xf32>
    %226 = arith.maximumf %223, %225 : vector<2x2x128xf32>
    %227 = vector.extract_strided_slice %221 {offsets = [0, 1, 0, 0, 0], sizes = [2, 1, 2, 1, 128], strides = [1, 1, 1, 1, 1]} : vector<2x2x2x2x128xf32> to vector<2x1x2x1x128xf32>
    %228 = vector.shape_cast %227 : vector<2x1x2x1x128xf32> to vector<2x2x128xf32>
    %229 = vector.extract_strided_slice %221 {offsets = [0, 1, 0, 1, 0], sizes = [2, 1, 2, 1, 128], strides = [1, 1, 1, 1, 1]} : vector<2x2x2x2x128xf32> to vector<2x1x2x1x128xf32>
    %230 = vector.shape_cast %229 : vector<2x1x2x1x128xf32> to vector<2x2x128xf32>
    %231 = arith.maximumf %228, %230 : vector<2x2x128xf32>
    %232 = arith.maximumf %226, %231 : vector<2x2x128xf32>
    %233 = vector.extract_strided_slice %232 {offsets = [0, 0, 0], sizes = [1, 1, 128], strides = [1, 1, 1]} : vector<2x2x128xf32> to vector<1x1x128xf32>
    %234 = vector.shape_cast %233 : vector<1x1x128xf32> to vector<1x128xf32>
    %235 = vector.extract_strided_slice %232 {offsets = [0, 1, 0], sizes = [1, 1, 128], strides = [1, 1, 1]} : vector<2x2x128xf32> to vector<1x1x128xf32>
    %236 = vector.shape_cast %235 : vector<1x1x128xf32> to vector<1x128xf32>
    %237 = vector.extract_strided_slice %232 {offsets = [1, 0, 0], sizes = [1, 1, 128], strides = [1, 1, 1]} : vector<2x2x128xf32> to vector<1x1x128xf32>
    %238 = vector.shape_cast %237 : vector<1x1x128xf32> to vector<1x128xf32>
    %239 = vector.extract_strided_slice %232 {offsets = [1, 1, 0], sizes = [1, 1, 128], strides = [1, 1, 1]} : vector<2x2x128xf32> to vector<1x1x128xf32>
    %240 = vector.shape_cast %239 : vector<1x1x128xf32> to vector<1x128xf32>
    %241 = tpu.concatenate %234, %236, %238, %240 in 1 : vector<1x128xf32>, vector<1x128xf32>, vector<1x128xf32>, vector<1x128xf32> -> vector<1x512xf32>
    %c0_252 = arith.constant 0 : index
    %c0_253 = arith.constant 0 : index
    %242 = vector.load %arg20[%c0_252, %c0_253] : memref<512x512xf32, #tpu.memory_space<vmem>>, vector<512x512xf32>
    %cst_254 = arith.constant dense<0.000000e+00> : vector<1x512xf32>
    %243 = tpu.matmul %241, %242, %cst_254 {dimension_numbers = #tpu.dot_dimension_numbers<[1], [0], [0], [1], [0, 0, 1, 1], [], []>} : vector<1x512xf32>, vector<512x512xf32>, vector<1x512xf32> -> vector<1x512xf32>
    %c0_255 = arith.constant 0 : index
    %c0_256 = arith.constant 0 : index
    %244 = vector.load %arg21[%c0_255, %c0_256] : memref<1x512xf32, #tpu.memory_space<vmem>>, vector<1x512xf32>
    %245 = arith.addf %243, %244 : vector<1x512xf32>
    %cst_257 = arith.constant 0.000000e+00 : f32
    %246 = vector.broadcast %cst_257 : f32 to vector<1x512xf32>
    %247 = arith.maximumf %245, %246 : vector<1x512xf32>
    %c0_258 = arith.constant 0 : index
    %c0_259 = arith.constant 0 : index
    %248 = vector.load %arg22[%c0_258, %c0_259] : memref<512x256xf32, #tpu.memory_space<vmem>>, vector<512x256xf32>
    %cst_260 = arith.constant dense<0.000000e+00> : vector<1x256xf32>
    %249 = tpu.matmul %247, %248, %cst_260 {dimension_numbers = #tpu.dot_dimension_numbers<[1], [0], [0], [1], [0, 0, 1, 1], [], []>} : vector<1x512xf32>, vector<512x256xf32>, vector<1x256xf32> -> vector<1x256xf32>
    %c0_261 = arith.constant 0 : index
    %c0_262 = arith.constant 0 : index
    %250 = vector.load %arg23[%c0_261, %c0_262] : memref<1x256xf32, #tpu.memory_space<vmem>>, vector<1x256xf32>
    %251 = arith.addf %249, %250 : vector<1x256xf32>
    %cst_263 = arith.constant 0.000000e+00 : f32
    %252 = vector.broadcast %cst_263 : f32 to vector<1x256xf32>
    %253 = arith.maximumf %251, %252 : vector<1x256xf32>
    %c0_264 = arith.constant 0 : index
    %c0_265 = arith.constant 0 : index
    %254 = vector.load %arg24[%c0_264, %c0_265] : memref<256x10xf32, #tpu.memory_space<vmem>>, vector<256x10xf32>
    %cst_266 = arith.constant dense<0.000000e+00> : vector<1x10xf32>
    %255 = tpu.matmul %253, %254, %cst_266 {dimension_numbers = #tpu.dot_dimension_numbers<[1], [0], [0], [1], [0, 0, 1, 1], [], []>} : vector<1x256xf32>, vector<256x10xf32>, vector<1x10xf32> -> vector<1x10xf32>
    %c0_267 = arith.constant 0 : index
    %c0_268 = arith.constant 0 : index
    %256 = vector.load %arg25[%c0_267, %c0_268] : memref<1x10xf32, #tpu.memory_space<vmem>>, vector<1x10xf32>
    %257 = arith.addf %255, %256 : vector<1x10xf32>
    %c0_269 = arith.constant 0 : index
    %c0_270 = arith.constant 0 : index
    %c0_271 = arith.constant 0 : index
    %258 = vector.load %arg26[%c0_269, %c0_270, %c0_271] : memref<1x1x10xf32, #tpu.memory_space<vmem>>, vector<1x1x10xf32>
    %259 = vector.shape_cast %258 : vector<1x1x10xf32> to vector<1x10xf32>
    %260 = vector.shape_cast %257 : vector<1x10xf32> to vector<1x1x10xf32>
    tpu.vector_store %arg26[%c0_269, %c0_270, %c0_271], %260 {strides = array<i32>} : memref<1x1x10xf32, #tpu.memory_space<vmem>>, vector<1x1x10xf32>,
    return
  }
  func.func @transform_0(%arg0: i32) -> (i32, i32, i32, i32) {
    %c0_i32 = arith.constant 0 : i32
    %c0_i32_0 = arith.constant 0 : i32
    %c0_i32_1 = arith.constant 0 : i32
    %c0_i32_2 = arith.constant 0 : i32
    return %arg0, %c0_i32, %c0_i32_0, %c0_i32_1 : i32, i32, i32, i32
  }
  func.func @transform_1(%arg0: i32) -> (i32, i32) {
    %c0_i32 = arith.constant 0 : i32
    %c0_i32_0 = arith.constant 0 : i32
    %c0_i32_1 = arith.constant 0 : i32
    return %c0_i32, %c0_i32_0 : i32, i32
  }
  func.func @transform_2(%arg0: i32) -> (i32, i32) {
    %c0_i32 = arith.constant 0 : i32
    %c0_i32_0 = arith.constant 0 : i32
    %c0_i32_1 = arith.constant 0 : i32
    return %c0_i32, %c0_i32_0 : i32, i32
  }
  func.func @transform_3(%arg0: i32) -> (i32, i32) {
    %c0_i32 = arith.constant 0 : i32
    %c0_i32_0 = arith.constant 0 : i32
    %c0_i32_1 = arith.constant 0 : i32
    return %c0_i32, %c0_i32_0 : i32, i32
  }
  func.func @transform_4(%arg0: i32) -> (i32, i32) {
    %c0_i32 = arith.constant 0 : i32
    %c0_i32_0 = arith.constant 0 : i32
    %c0_i32_1 = arith.constant 0 : i32
    return %c0_i32, %c0_i32_0 : i32, i32
  }
  func.func @transform_5(%arg0: i32) -> (i32, i32) {
    %c0_i32 = arith.constant 0 : i32
    %c0_i32_0 = arith.constant 0 : i32
    %c0_i32_1 = arith.constant 0 : i32
    return %c0_i32, %c0_i32_0 : i32, i32
  }
  func.func @transform_6(%arg0: i32) -> (i32, i32) {
    %c0_i32 = arith.constant 0 : i32
    %c0_i32_0 = arith.constant 0 : i32
    %c0_i32_1 = arith.constant 0 : i32
    return %c0_i32, %c0_i32_0 : i32, i32
  }
  func.func @transform_7(%arg0: i32) -> (i32, i32) {
    %c0_i32 = arith.constant 0 : i32
    %c0_i32_0 = arith.constant 0 : i32
    %c0_i32_1 = arith.constant 0 : i32
    return %c0_i32, %c0_i32_0 : i32, i32
  }
  func.func @transform_8(%arg0: i32) -> (i32, i32) {
    %c0_i32 = arith.constant 0 : i32
    %c0_i32_0 = arith.constant 0 : i32
    %c0_i32_1 = arith.constant 0 : i32
    return %c0_i32, %c0_i32_0 : i32, i32
  }
  func.func @transform_9(%arg0: i32) -> (i32, i32) {
    %c0_i32 = arith.constant 0 : i32
    %c0_i32_0 = arith.constant 0 : i32
    %c0_i32_1 = arith.constant 0 : i32
    return %c0_i32, %c0_i32_0 : i32, i32
  }
  func.func @transform_10(%arg0: i32) -> (i32, i32) {
    %c0_i32 = arith.constant 0 : i32
    %c0_i32_0 = arith.constant 0 : i32
    %c0_i32_1 = arith.constant 0 : i32
    return %c0_i32, %c0_i32_0 : i32, i32
  }
  func.func @transform_11(%arg0: i32) -> (i32, i32) {
    %c0_i32 = arith.constant 0 : i32
    %c0_i32_0 = arith.constant 0 : i32
    %c0_i32_1 = arith.constant 0 : i32
    return %c0_i32, %c0_i32_0 : i32, i32
  }
  func.func @transform_12(%arg0: i32) -> (i32, i32) {
    %c0_i32 = arith.constant 0 : i32
    %c0_i32_0 = arith.constant 0 : i32
    %c0_i32_1 = arith.constant 0 : i32
    return %c0_i32, %c0_i32_0 : i32, i32
  }
  func.func @transform_13(%arg0: i32) -> (i32, i32) {
    %c0_i32 = arith.constant 0 : i32
    %c0_i32_0 = arith.constant 0 : i32
    %c0_i32_1 = arith.constant 0 : i32
    return %c0_i32, %c0_i32_0 : i32, i32
  }
  func.func @transform_14(%arg0: i32) -> (i32, i32) {
    %c0_i32 = arith.constant 0 : i32
    %c0_i32_0 = arith.constant 0 : i32
    %c0_i32_1 = arith.constant 0 : i32
    return %c0_i32, %c0_i32_0 : i32, i32
  }
  func.func @transform_15(%arg0: i32) -> (i32, i32) {
    %c0_i32 = arith.constant 0 : i32
    %c0_i32_0 = arith.constant 0 : i32
    %c0_i32_1 = arith.constant 0 : i32
    return %c0_i32, %c0_i32_0 : i32, i32
  }
  func.func @transform_16(%arg0: i32) -> (i32, i32) {
    %c0_i32 = arith.constant 0 : i32
    %c0_i32_0 = arith.constant 0 : i32
    %c0_i32_1 = arith.constant 0 : i32
    return %c0_i32, %c0_i32_0 : i32, i32
  }
  func.func @transform_17(%arg0: i32) -> (i32, i32) {
    %c0_i32 = arith.constant 0 : i32
    %c0_i32_0 = arith.constant 0 : i32
    %c0_i32_1 = arith.constant 0 : i32
    return %c0_i32, %c0_i32_0 : i32, i32
  }
  func.func @transform_18(%arg0: i32) -> (i32, i32) {
    %c0_i32 = arith.constant 0 : i32
    %c0_i32_0 = arith.constant 0 : i32
    %c0_i32_1 = arith.constant 0 : i32
    return %c0_i32, %c0_i32_0 : i32, i32
  }
  func.func @transform_19(%arg0: i32) -> (i32, i32) {
    %c0_i32 = arith.constant 0 : i32
    %c0_i32_0 = arith.constant 0 : i32
    %c0_i32_1 = arith.constant 0 : i32
    return %c0_i32, %c0_i32_0 : i32, i32
  }
  func.func @transform_20(%arg0: i32) -> (i32, i32) {
    %c0_i32 = arith.constant 0 : i32
    %c0_i32_0 = arith.constant 0 : i32
    %c0_i32_1 = arith.constant 0 : i32
    return %c0_i32, %c0_i32_0 : i32, i32
  }
  func.func @transform_21(%arg0: i32) -> (i32, i32) {
    %c0_i32 = arith.constant 0 : i32
    %c0_i32_0 = arith.constant 0 : i32
    %c0_i32_1 = arith.constant 0 : i32
    return %c0_i32, %c0_i32_0 : i32, i32
  }
  func.func @transform_22(%arg0: i32) -> (i32, i32) {
    %c0_i32 = arith.constant 0 : i32
    %c0_i32_0 = arith.constant 0 : i32
    %c0_i32_1 = arith.constant 0 : i32
    return %c0_i32, %c0_i32_0 : i32, i32
  }
  func.func @transform_23(%arg0: i32) -> (i32, i32) {
    %c0_i32 = arith.constant 0 : i32
    %c0_i32_0 = arith.constant 0 : i32
    %c0_i32_1 = arith.constant 0 : i32
    return %c0_i32, %c0_i32_0 : i32, i32
  }
  func.func @transform_24(%arg0: i32) -> (i32, i32) {
    %c0_i32 = arith.constant 0 : i32
    %c0_i32_0 = arith.constant 0 : i32
    %c0_i32_1 = arith.constant 0 : i32
    return %c0_i32, %c0_i32_0 : i32, i32
  }
  func.func @transform_25(%arg0: i32) -> (i32, i32, i32) {
    %c0_i32 = arith.constant 0 : i32
    %c0_i32_0 = arith.constant 0 : i32
    %c0_i32_1 = arith.constant 0 : i32
    return %arg0, %c0_i32, %c0_i32_0 : i32, i32, i32
  }
}

</mosaic_0001>

<bundles_post_ra>
// kernel: _lambda_.1
= control target key start
LH: loop header
LB: loop body
LE: loop exit
PB: predicated region body
PF: predicated region fallthrough
CT: control target
= control target key end

     0   :  { %s15060_s0 = inlined_call_operand.vmem [shape: f32[2,16,16,1], index: 0, kind: input, shape index: {}]   ;;  %s15061_s1 = inlined_call_operand.hbm [shape: f32[9,32], index: 1, kind: input, shape index: {}]   ;;  %s15062_s2 = inlined_call_operand.hbm [shape: f32[1,32], index: 2, kind: input, shape index: {}]   ;;  %s15063_s3 = inlined_call_operand.hbm [shape: f32[1,32], index: 3, kind: input, shape index: {}]   ;;  %s15064_s4 = inlined_call_operand.hbm [shape: f32[288,32], index: 4, kind: input, shape index: {}]   ;;  %s15065_s5 = inlined_call_operand.hbm [shape: f32[1,32], index: 5, kind: input, shape index: {}]   ;;  %s15066_s6 = inlined_call_operand.hbm [shape: f32[1,32], index: 6, kind: input, shape index: {}]   ;;  %s15067_s7 = inlined_call_operand.vmem [shape: f32[288,64], index: 7, kind: input, shape index: {}]   ;;  %s15068_s8 = inlined_call_operand.hbm [shape: f32[1,64], index: 8, kind: input, shape index: {}]   ;;  %s15069_s9 = inlined_call_operand.hbm [shape: f32[1,64], index: 9, kind: input, shape index: {}]   ;;  %s15070_s10 = inlined_call_operand.hbm [shape: f32[576,64], index: 10, kind: input, shape index: {}]   ;;  %s15071_s11 = inlined_call_operand.hbm [shape: f32[1,64], index: 11, kind: input, shape index: {}]   ;;  %s15072_s12 = inlined_call_operand.hbm [shape: f32[1,64], index: 12, kind: input, shape index: {}]   ;;  %s15073_s13 = inlined_call_operand.hbm [shape: f32[576,128], index: 13, kind: input, shape index: {}]   ;;  %s15074_s14 = inlined_call_operand.vmem [shape: f32[1,128], index: 14, kind: input, shape index: {}]   ;;  %s15075_s15 = inlined_call_operand.vmem [shape: f32[1,128], index: 15, kind: input, shape index: {}]   ;;  %s15076_s16 = inlined_call_operand.hbm [shape: f32[1152,128], index: 16, kind: input, shape index: {}]   ;;  %s15077_s17 = inlined_call_operand.vmem [shape: f32[1,128], index: 17, kind: input, shape index: {}]   ;;  %s15078_s18 = inlined_call_operand.vmem [shape: f32[1,128], index: 18, kind: input, shape index: {}]   ;;  %s15079_s19 = inlined_call_operand.hbm [shape: f32[512,512], index: 19, kind: input, shape index: {}]   ;;  %s15080_s20 = inlined_call_operand.vmem [shape: f32[1,512], index: 20, kind: input, shape index: {}]   ;;  %s15081_s21 = inlined_call_operand.hbm [shape: f32[512,256], index: 21, kind: input, shape index: {}]   ;;  %s15082_s22 = inlined_call_operand.vmem [shape: f32[1,256], index: 22, kind: input, shape index: {}]   ;;  %s15083_s23 = inlined_call_operand.vmem [shape: f32[256,10], index: 23, kind: input, shape index: {}]   ;;  %s15084_s24 = inlined_call_operand.vmem [shape: f32[1,10], index: 24, kind: input, shape index: {}]   ;;  %s15085_s25 = inlined_call_operand.hbm [shape: f32[2,1,10], index: 25, kind: output, shape index: {}]  }
   0x1   :  { %15098 = sst [smem:[#allocation50_spill]] %s15060_s0 }
   0x2   :  { %15099 = sst [smem:[#allocation51_spill]] %s15061_s1 }
   0x3   :  { %15100 = sst [smem:[#allocation52_spill]] %s15062_s2 }
   0x4   :  { %15101 = sst [smem:[#allocation53_spill]] %s15063_s3 }
   0x5   :  { %15102 = sst [smem:[#allocation54_spill]] %s15064_s4 }
   0x6   :  { %15103 = sst [smem:[#allocation55_spill]] %s15065_s5 }
   0x7   :  { %15104 = sst [smem:[#allocation56_spill]] %s15066_s6 }
   0x8   :  { %15105 = sst [smem:[#allocation57_spill]] %s15067_s7 }
   0x9   :  { %15106 = sst [smem:[#allocation58_spill]] %s15068_s8 }
   0xa   :  { %15107 = sst [smem:[#allocation59_spill]] %s15069_s9 }
   0xb   :  { %15108 = sst [smem:[#allocation60_spill]] %s15071_s11 }
   0xc   :  { %15109 = sst [smem:[#allocation61_spill]] %s15073_s13 }
   0xd   :  { %15110 = sst [smem:[#allocation62_spill]] %s15082_s22 }
   0xe   :  { %15111 = sst [smem:[#allocation63_spill]] %s15083_s23 }
   0xf   :  { %15112 = sst [smem:[#allocation64_spill]] %s15084_s24 }
  0x10   :  { %15113 = sst [smem:[#allocation65_spill]] %s15085_s25 }
  0x11   :  { %30 = vsyncpa [#allocation9], 0 }
  0x12   :  { %31 = vsyncpa [#allocation12], 0 }
  0x13   :  { %32 = vsyncpa [#allocation15], 0 }
  0x14   :  { %33 = vsyncpa [#allocation18], 0 }
  0x15   :  { %34 = vsyncpa [#allocation21], 0 }
  0x16   :  { %35 = vsyncpa [#allocation24], 0 }
  0x17   :  { %36 = vsyncpa [#allocation27], 0 }
  0x18   :  { %37 = vsyncpa [#allocation30], 0 }
  0x19   :  { %38 = vsyncpa [#allocation10], 0 }
  0x1a   :  { %40 = vsyncpa [#allocation10 + $0x1], 0  ;;  %s11399_s29 = smov 0   ;;  %s11401_s2 = smov 0  }
  0x1b   :  { %s11403_s6 = smov 0   ;;  %s11405_s30 = smov 0  }
  0x1c LB: > { %15114 = sst [smem:[#allocation42_spill]] %s11222_s29  ;;  %s11420_s7 = sadd.s32 4294967295, %s11234_s30   ;;  %s11234_s30 = sphi %s11405_s30, %s15147_s30   ;;  %s11230_s6 = sphi %s11403_s6, %s15150_s6   ;;  %s11226_s2 = sphi %s11401_s2, %s15149_s2   ;;  %s11222_s29 = sphi %s11399_s29, %s15148_s29  }
  0x1d   : > { %15115 = sst [smem:[#allocation43_spill]] %s11226_s2  ;;  %s9516_s3 = sadd.s32 4294967294, %s11234_s30  }
  0x1e   : > { %15116 = sst [smem:[#allocation44_spill]] %s11230_s6  ;;  %s11424_s26 = sadd.s32 1, %s11234_s30  }
  0x1f   : > { %15117 = sst [smem:[#allocation45_spill]] %s11234_s30  ;;  %s583_s1 = sadd.s32 1, %s11230_s6 }
  0x20   : > { %15118 = sst [smem:[#allocation46_spill]] %s11424_s26  ;;  %s580_s8 = ssub.s32 %s11234_s30, %s11424_s26 }
  0x21   : > { %p593_p0 = scmp.ne.s32.totalorder %s11230_s6, %s11226_s2  ;;  %p581_p1 = scmp.eq.s32.totalorder %s580_s8, 0 }
  0x22   : > { %p594_p2 = scmp.eq.s32.totalorder %s11420_s7, 1  ;;  %p599_p3 = scmp.ne.s32.totalorder %s11226_s2, %s11222_s29 }
  0x23   : > { %p600_p4 = scmp.eq.s32.totalorder %s9516_s3, 1  ;;  %p9517_p7 = scmp.ge.s32.totalorder %s11234_s30, 1 }
  0x24   : > { %s11435_s27 = scalar_select %p581_p1, %s11230_s6, %s583_s1  }
  0x25   : > { %p11437_p5 = por %p594_p2, %p593_p0  ;;  %p11441_p6 = por %p600_p4, %p599_p3 }
  0x26   : > { %15119 = sst [smem:[#allocation47_spill]] %s11435_s27  ;;  %p607_p8 = scmp.lt.s32.totalorder %s11234_s30, 3 }
  0x27   : > { %s15120_s4 = scalar_select %p11437_p5, 1, 0 }
  0x28   : > { %s15122_s28 = scalar_select %p11441_p6, 1, 0 }
  0x29   : > { %15121 = sst [smem:[#allocation48_spill]] %s15120_s4  ;;  %p9934_p9 = scmp.eq.s32.totalorder %s11420_s7, 0 }
  0x2a   : > { %15123 = sst [smem:[#allocation49_spill]] %s15122_s28  ;;  %p11448_p10 = pnand %p9517_p7, %p607_p8 }
  0x2b   : > { %s15125_s3 = sld [smem:[#allocation52_spill]]  ;;  %s11236_s8 = smov [#allocation11]  }
  0x2c   : > { %p9884_p11 = pneg %p11448_p10  ;;  %s635_s27 = sshll.u32 %s11236_s8, 4  ;;  %s636_s27 = int_to_ptr.vmem [resolvable:$true] %s635_s27 }
  0x2d   : > { %s15127_s29 = sld [smem:[#allocation54_spill]]  ;;  %s11237_s5 = smov [#allocation14]  }
  0x2e   : > { %p11459_p12 = pnand %p9934_p9, %p9884_p11  ;;  %s658_s0 = sshll.u32 %s11237_s5, 4  ;;  %s659_s0 = int_to_ptr.vmem [resolvable:$true] %s658_s0 }
  0x2f   : > { %s15128_s4 = sld [smem:[#allocation56_spill]]  ;;  %s11238_s25 = smov 128  }
  0x30   : > { %s11239_s2 = smov 8   ;;  %s15129_s28 = sld [smem:[#allocation59_spill]] }
  0x31   : > { %s633_s1 = sshll.u32 %s15125_s3, 4  ;;  %s15130_s11 = sld [smem:[#allocation60_spill]]  ;;  %s634_s1 = int_to_ptr.hbm [resolvable:$true] %s633_s1 }
  0x32   : > { %9890 = dma.hbm_to_vmem [thread:$0]  (!%p11459_p12), %s634_s1, 16, %s636_s27, [#allocation12]  }
  0x33   : > { %s656_s30 = sshll.u32 %s15127_s29, 4  ;;  %s11240_s1 = smov [#allocation17]   ;;  %s657_s30 = int_to_ptr.hbm [resolvable:$true] %s656_s30 }
  0x34   : > { %9896 = dma.hbm_to_vmem [thread:$0]  (!%p11459_p12), %s657_s30, 4608, %s659_s0, [#allocation15], %s11238_s25, %s11238_s25, %s11239_s2  }
  0x35   : > { %s683_s24 = sshll.u32 %s15128_s4, 4  ;;  %s685_s5 = sshll.u32 %s11240_s1, 4  ;;  %s684_s24 = int_to_ptr.hbm [resolvable:$true] %s683_s24  ;;  %s686_s5 = int_to_ptr.vmem [resolvable:$true] %s685_s5 }
  0x36   : > { %s710_s27 = sshll.u32 %s15129_s28, 4  ;;  %s11241_s4 = smov [#allocation20]   ;;  %s711_s27 = int_to_ptr.hbm [resolvable:$true] %s710_s27 }
  0x37   : > { %9902 = dma.hbm_to_vmem [thread:$0]  (!%p11459_p12), %s684_s24, 16, %s686_s5, [#allocation18]  }
  0x38   : > { %s712_s3 = sshll.u32 %s11241_s4, 4  ;;  %s736_s23 = sshll.u32 %s15130_s11, 4  ;;  %s713_s3 = int_to_ptr.vmem [resolvable:$true] %s712_s3  ;;  %s737_s23 = int_to_ptr.hbm [resolvable:$true] %s736_s23 }
  0x39   : > { %9908 = dma.hbm_to_vmem [thread:$0]  (!%p11459_p12), %s711_s27, 16, %s713_s3, [#allocation21]  }
  0x3a   : > { %s15131_s13 = sld [smem:[#allocation61_spill]]  ;;  %s11242_s26 = smov [#allocation23]  }
  0x3b   : > { %s738_s28 = sshll.u32 %s11242_s26, 4  ;;  %s11243_s24 = smov [#allocation26]   ;;  %s739_s28 = int_to_ptr.vmem [resolvable:$true] %s738_s28 }
  0x3c   : > { %9914 = dma.hbm_to_vmem [thread:$0]  (!%p11459_p12), %s737_s23, 16, %s739_s28, [#allocation24]  }
  0x3d   : > { %s761_s1 = sshll.u32 %s11243_s24, 4  ;;  %s799_s4 = sshll.u32 %s15079_s19, 4  ;;  %s762_s1 = int_to_ptr.vmem [resolvable:$true] %s761_s1  ;;  %s800_s4 = int_to_ptr.hbm [resolvable:$true] %s799_s4 }
  0x3e   : > { %s11244_s27 = smov [#allocation29]   ;;  %s15132_s23 = sld [smem:[#allocation51_spill]] }
  0x3f   : > { %s801_s3 = sshll.u32 %s11244_s27, 4  ;;  %s11245_s26 = smov 512   ;;  %s802_s3 = int_to_ptr.vmem [resolvable:$true] %s801_s3 }
  0x40   : > { %s759_s29 = sshll.u32 %s15131_s13, 4  ;;  %s11246_s28 = smov 32   ;;  %s760_s29 = int_to_ptr.hbm [resolvable:$true] %s759_s29 }
  0x41   : > { %9920 = dma.hbm_to_vmem [thread:$0]  (!%p11459_p12), %s760_s29, 9216, %s762_s1, [#allocation27], %s11238_s25, %s11238_s25, %s11239_s2  }
  0x42   : > { %9926 = dma.hbm_to_vmem [thread:$0]  (!%p11459_p12), %s800_s4, 32768, %s802_s3, [#allocation30], %s11245_s26, %s11245_s26, %s11246_s28  }
  0x43   : > { %s11247_s24 = smov [#allocation8]   ;;  %s15133_s13 = sld [smem:[#allocation53_spill]] }
  0x44   : > { %s618_s0 = sshll.u32 %s15132_s23, 4  ;;  %s620_s22 = sshll.u32 %s11247_s24, 4  ;;  %s619_s0 = int_to_ptr.hbm [resolvable:$true] %s618_s0  ;;  %s621_s22 = int_to_ptr.vmem [resolvable:$true] %s620_s22 }
  0x45   : > { %9887 = dma.hbm_to_vmem [thread:$0]  (!%p11459_p12), %s619_s0, 256, %s621_s22, [#allocation9], %s11238_s25, %s11238_s25, %s11239_s2  }
  0x46   : > { %s15134_s8 = sld [smem:[#allocation55_spill]]  ;;  %s11248_s4 = smov [#allocation13]  }
  0x47   : > { %s647_s3 = sshll.u32 %s11248_s4, 4  ;;  %s11249_s11 = smov [#allocation16]   ;;  %s648_s3 = int_to_ptr.vmem [resolvable:$true] %s647_s3 }
  0x48   : > { %s15135_s28 = sld [smem:[#allocation58_spill]]  ;;  %s721_s5 = sshll.u32 %s15070_s10, 4  ;;  %s722_s5 = int_to_ptr.hbm [resolvable:$true] %s721_s5 }
  0x49   : > { %s645_s29 = sshll.u32 %s15133_s13, 4  ;;  %s673_s13 = sshll.u32 %s11249_s11, 4  ;;  %s646_s29 = int_to_ptr.hbm [resolvable:$true] %s645_s29  ;;  %s674_s13 = int_to_ptr.vmem [resolvable:$true] %s673_s13 }
  0x4a   : > { %9893 = dma.hbm_to_vmem [thread:$0]  (!%p11459_p12), %s646_s29, 16, %s648_s3, [#allocation12]  }
  0x4b   : > { %s11250_s1 = smov [#allocation19]   ;;  %s11251_s29 = smov [#allocation22]  }
  0x4c   : > { %s671_s30 = sshll.u32 %s15134_s8, 4  ;;  %s700_s27 = sshll.u32 %s11250_s1, 4  ;;  %s672_s30 = int_to_ptr.hbm [resolvable:$true] %s671_s30  ;;  %s701_s27 = int_to_ptr.vmem [resolvable:$true] %s700_s27 }
  0x4d   : > { %9899 = dma.hbm_to_vmem [thread:$0]  (!%p11459_p12), %s672_s30, 16, %s674_s13, [#allocation15]  }
  0x4e   : > { %s698_s24 = sshll.u32 %s15135_s28, 4  ;;  %s723_s8 = sshll.u32 %s11251_s29, 4  ;;  %s699_s24 = int_to_ptr.hbm [resolvable:$true] %s698_s24  ;;  %s724_s8 = int_to_ptr.vmem [resolvable:$true] %s723_s8 }
  0x4f   : > { %9905 = dma.hbm_to_vmem [thread:$0]  (!%p11459_p12), %s699_s24, 16, %s701_s27, [#allocation18]  }
  0x50   : > { %s748_s11 = sshll.u32 %s15072_s12, 4  ;;  %s779_s23 = sshll.u32 %s15076_s16, 4  ;;  %s749_s11 = int_to_ptr.hbm [resolvable:$true] %s748_s11  ;;  %s780_s23 = int_to_ptr.hbm [resolvable:$true] %s779_s23 }
  0x51   : > { %9911 = dma.hbm_to_vmem [thread:$0]  (!%p11459_p12), %s722_s5, 9216, %s724_s8, [#allocation21], %s11238_s25, %s11238_s25, %s11239_s2  }
  0x52   : > { %s11252_s26 = smov [#allocation25]   ;;  %s11253_s24 = smov [#allocation28]  }
  0x53   : > { %s750_s28 = sshll.u32 %s11252_s26, 4  ;;  %s781_s0 = sshll.u32 %s11253_s24, 4  ;;  %s751_s28 = int_to_ptr.vmem [resolvable:$true] %s750_s28  ;;  %s782_s0 = int_to_ptr.vmem [resolvable:$true] %s781_s0 }
  0x54   : > { %9917 = dma.hbm_to_vmem [thread:$0]  (!%p11459_p12), %s749_s11, 16, %s751_s28, [#allocation24]  }
  0x55   : > { %s816_s27 = sshll.u32 %s15081_s21, 4  ;;  %s11254_s5 = smov [#allocation31]   ;;  %s817_s27 = int_to_ptr.hbm [resolvable:$true] %s816_s27 }
  0x56   : > { %9923 = dma.hbm_to_vmem [thread:$0]  (!%p11459_p12), %s780_s23, 18432, %s782_s0, [#allocation27], %s11238_s25, %s11238_s25, %s11239_s2  }
  0x57   : > { %s818_s29 = sshll.u32 %s11254_s5, 4  ;;  %s11255_s8 = smov 256   ;;  %s819_s29 = int_to_ptr.vmem [resolvable:$true] %s818_s29 }
  0x58   : > { %s11256_s4 = smov 16   ;;  %851 = sbr.rel (%p11448_p10) target bundleno = 3111 (0xc27), region = 120 }
  0x59   : > { %9929 = dma.hbm_to_vmem [thread:$0]  (!%p11459_p12), %s817_s27, 16384, %s819_s29, [#allocation30], %s11255_s8, %s11255_s8, %s11256_s4  }
  0x5d   : > { %11185 = dma.done.wait (%p9934_p9), [#allocation9], 256  }
  0x5e   : > { %11187 = vsyncadd (%p9934_p9), [#allocation9], 4294967040 }
  0x5f   : > { %11189 = dma.done.wait (%p9934_p9), [#allocation12], 32  }
  0x60   : > { %11191 = vsyncadd (%p9934_p9), [#allocation12], 4294967264 }
  0x61   : > { %11193 = dma.done.wait (%p9934_p9), [#allocation15], 4624  }
  0x62   : > { %11195 = vsyncadd (%p9934_p9), [#allocation15], 4294962672 }
  0x63   : > { %11197 = dma.done.wait (%p9934_p9), [#allocation18], 32  }
  0x64   : > { %11199 = vsyncadd (%p9934_p9), [#allocation18], 4294967264 }
  0x65   : > { %11201 = dma.done.wait (%p9934_p9), [#allocation21], 9232  }
  0x66   : > { %11203 = vsyncadd (%p9934_p9), [#allocation21], 4294958064 }
  0x67   : > { %11205 = dma.done.wait (%p9934_p9), [#allocation24], 32  }
  0x68   : > { %11207 = vsyncadd (%p9934_p9), [#allocation24], 4294967264 }
  0x69   : > { %11209 = dma.done.wait (%p9934_p9), [#allocation27], 27648  }
  0x6a   : > { %11211 = vsyncadd (%p9934_p9), [#allocation27], 4294939648 }
  0x6b   : > { %11213 = dma.done.wait (%p9934_p9), [#allocation30], 49152  }
  0x6c   : > { %11215 = vsyncadd (%p9934_p9), [#allocation30], 4294918144  ;;  %vm1026_vm0 = vcmask 7168   ;;  %vm1029_vm1 = vcmask 1024   ;;  %v11257_v0 = vmov 0.0   ;;  %s11258_s25 = smov 1  }
  0x6d   : > { %1028 = vst.msk [vmem:[#allocation2 + $0x8] sm:$0xff] %vm1026_vm0, %v11257_v0  ;;  %s11259_s2 = smov 2   ;;  %p989_p13 = scmp.lt.s32.totalorder %s11420_s7, 1  ;;  %v2692_v38 = vld [vmem:[#allocation8 + $0x8] sm:$0x1]  ;;  %vm2790_vm2 = vcmask 1040384  }
  0x6e   : > { %1030 = vst.msk [vmem:[#allocation2 + $0x10] sm:$0x3] %vm1029_vm1, %v11257_v0  ;;  %s15136_s30 = sld [smem:[#allocation50_spill]]  ;;  %s11260_s23 = smov 3   ;;  %9552 = vmatpush.msk.msra.mxu0 %vm2790_vm2, %v2692_v38  ;;  %v2691_v39 = vld [vmem:[#allocation8] sm:$0xff]  ;;  %vm2460_vm3 = vcmask 15360  }
  0x6f   : > { %1027 = vst.msk [vmem:[#allocation2] sm:$0xff] %vm1026_vm0, %v11257_v0  ;;  %s990_s6 = scalar_select %p989_p13, %s11420_s7, 1  ;;  %vm2493_vm4 = vcmask 23552   ;;  %vm2526_vm5 = vcmask 31744   ;;  %vm2559_vm6 = vcmask 39936   ;;  %vm2592_vm7 = vcmask 48128  }
  0x70   : > { %1031 = vst.msk [vmem:[#allocation2 + $0x18] sm:$0xff] %vm1026_vm0, %v11257_v0  ;;  %s11261_s26 = smov 5   ;;  %s11262_s28 = smov 7   ;;  %2809 = vmatpush.msra.mxu0 %v2691_v39  ;;  %vm2625_vm8 = vcmask 56320   ;;  %vm2658_vm9 = vcmask 64512   ;;  %vm2693_vm10 = vcmask 72704  }
  0x71   : > { %1032 = vst.msk [vmem:[#allocation2 + $0x20] sm:$0xff] %vm1026_vm0, %v11257_v0  ;;  %s9805_s9 = sshll.u32 %s990_s6, 8  ;;  %s11263_s24 = smov 4   ;;  %vm3011_vm11 = vcmask 261120   ;;  %vm3014_vm12 = vcmask 254976   ;;  %vm4189_vm13 = vcmask 523264  }
  0x72   : > { %1033 = vst.msk [vmem:[#allocation2 + $0x28] sm:$0x3] %vm1029_vm1, %v11257_v0  ;;  %s11264_s0 = smov 6   ;;  %s11265_s22 = smov 8   ;;  %vm4222_vm14 = vcmask 785408   ;;  %vm5874_vm15 = vcmask 1041409  }
  0x73   : > { %1034 = vst.msk [vmem:[#allocation2 + $0x30] sm:$0xff] %vm1026_vm0, %v11257_v0  ;;  %s11266_s1 = smov 32   ;;  %s11267_s27 = smov 96   ;;  %vm5880_vm2 = vcmask 1044484  }
  0x74   : > { %1035 = vst.msk [vmem:[#allocation2 + $0x38] sm:$0xff] %vm1026_vm0, %v11257_v0  ;;  %s11701_s13 = scalar_lea.vmem %s15136_s30, %s9805_s9  ;;  %s11268_s5 = smov 64  }
  0x75   : > { %v1148_v1 = vld [vmem:[#allocation2 + $0x9] sm:$0xff]  ;;  %1036 = vst.msk [vmem:[#allocation2 + $0x40] sm:$0x3] %vm1029_vm1, %v11257_v0  ;;  %v994_v4 = vld [vmem:[%s11701_s13] sm:$0xff]  ;;  %v995_v5 = vld [vmem:[%s11701_s13 + $0x8] sm:$0xff]  ;;  %s15137_s4 = sld [smem:[#allocation57_spill]] }
  0x76   : > { %1438 = vrot.lane.b32.xlu2 %v1148_v1, %s11258_s25  ;;  %1037 = vst.msk [vmem:[#allocation2 + $0x48] sm:$0xff] %vm1026_vm0, %v11257_v0  ;;  %v1147_v2 = vld [vmem:[#allocation2 + $0x1] sm:$0xff]  ;;  %v997_v7 = vld [vmem:[%s11701_s13 + $0x18] sm:$0xff]  ;;  %v998_v14 = vld [vmem:[%s11701_s13 + $0x20] sm:$0xff]  ;;  %s15138_s8 = sld [smem:[#allocation63_spill]] }
  0x77   : > { %1038 = vst.msk [vmem:[#allocation2 + $0x50] sm:$0xff] %vm1026_vm0, %v11257_v0  ;;  %1436 = vrot.lane.b32.xlu0 %v1147_v2, %s11258_s25  ;;  %v1179_v3 = vld [vmem:[#allocation2 + $0x2] sm:$0xff]  ;;  %v1180_v13 = vld [vmem:[#allocation2 + $0xa] sm:$0xff]  ;;  %v1002_v34 = vld [vmem:[%s11701_s13 + $0x40] sm:$0xff] }
  0x78   : > { %1039 = vst.msk [vmem:[#allocation2 + $0x58] sm:$0x3] %vm1029_vm1, %v11257_v0  ;;  %v996_v6 = vld [vmem:[%s11701_s13 + $0x10] sm:$0xff]  ;;  %v999_v15 = vld [vmem:[%s11701_s13 + $0x28] sm:$0xff]  ;;  %v1001_v27 = vld [vmem:[%s11701_s13 + $0x38] sm:$0xff] }
  0x79   : > { %1040 = vst.msk [vmem:[#allocation2 + $0x60] sm:$0xff] %vm1026_vm0, %v11257_v0  ;;  %v1000_v25 = vld [vmem:[%s11701_s13 + $0x30] sm:$0xff]  ;;  %v1003_v42 = vld [vmem:[%s11701_s13 + $0x48] sm:$0xff] }
  0x7a   : > { %1041 = vst.msk [vmem:[#allocation2 + $0x68] sm:$0xff] %vm1026_vm0, %v11257_v0  ;;  %v1115_v47 = vld [vmem:[#allocation2] sm:$0xff] }
  0x7b   : > { %1042 = vst.msk [vmem:[#allocation2 + $0x70] sm:$0x3] %vm1029_vm1, %v11257_v0 }
  0x7c   : > { %1043 = vst.msk [vmem:[#allocation2 + $0x78] sm:$0xff] %vm1026_vm0, %v11257_v0 }
  0x7d   : > { %1044 = vst.msk [vmem:[#allocation2 + $0x80] sm:$0xff] %vm1026_vm0, %v11257_v0 }
  0x7e   : > { %1045 = vst.msk [vmem:[#allocation2 + $0x88] sm:$0x3] %vm1029_vm1, %v11257_v0 }
  0x7f   : > { %1046 = vst.msk [vmem:[#allocation2 + $0x90] sm:$0xff] %vm1026_vm0, %v11257_v0  ;;  %1564 = vrot.lane.b32.xlu0 %v1179_v3, %s11259_s2 }
  0x80   : > { %1047 = vst.msk [vmem:[#allocation2 + $0x98] sm:$0xff] %vm1026_vm0, %v11257_v0 }
  0x81   : > { %1048 = vst.msk [vmem:[#allocation2 + $0xa0] sm:$0x3] %vm1029_vm1, %v11257_v0 }
  0x82   : > { %1049 = vst.msk [vmem:[#allocation2 + $0xa8] sm:$0xff] %vm1026_vm0, %v11257_v0 }
  0x83   : > { %1050 = vst.msk [vmem:[#allocation2 + $0xb0] sm:$0xff] %vm1026_vm0, %v11257_v0 }
  0x84   : > { %1051 = vst.msk [vmem:[#allocation2 + $0xb8] sm:$0x3] %vm1029_vm1, %v11257_v0 }
  0x85   : > { %1052 = vst.msk [vmem:[#allocation2 + $0xc0] sm:$0xff] %vm1026_vm0, %v11257_v0 }
  0x86   : > { %1053 = vst.msk [vmem:[#allocation2 + $0xc8] sm:$0xff] %vm1026_vm0, %v11257_v0 }
  0x87   : > { %1054 = vst.msk [vmem:[#allocation2 + $0xd0] sm:$0x3] %vm1029_vm1, %v11257_v0 }
  0x88   : > { %1055 = vst.msk [vmem:[#allocation2 + $0xd8] sm:$0xff] %vm1026_vm0, %v11257_v0 }
  0x89   : > { %1056 = vst.msk [vmem:[#allocation2 + $0xe0] sm:$0xff] %vm1026_vm0, %v11257_v0 }
  0x8a   : > { %1057 = vst.msk [vmem:[#allocation2 + $0xe8] sm:$0x3] %vm1029_vm1, %v11257_v0 }
  0x8b   : > { %1058 = vst.msk [vmem:[#allocation2 + $0xf0] sm:$0xff] %vm1026_vm0, %v11257_v0 }
  0x8c   : > { %1059 = vst.msk [vmem:[#allocation2 + $0xf8] sm:$0xff] %vm1026_vm0, %v11257_v0 }
  0x8d   : > { %1060 = vst.msk [vmem:[#allocation2 + $0x100] sm:$0x3] %vm1029_vm1, %v11257_v0 }
  0x8e   : > { %1061 = vst.msk [vmem:[#allocation2 + $0x108] sm:$0xff] %vm1026_vm0, %v11257_v0 }
  0x8f   : > { %1062 = vst.msk [vmem:[#allocation2 + $0x110] sm:$0xff] %vm1026_vm0, %v11257_v0 }
  0x90   : > { %1063 = vst.msk [vmem:[#allocation2 + $0x118] sm:$0x3] %vm1029_vm1, %v11257_v0 }
  0x91   : > { %1064 = vst.msk [vmem:[#allocation2 + $0x120] sm:$0xff] %vm1026_vm0, %v11257_v0 }
  0x92   : > { %1065 = vst.msk [vmem:[#allocation2 + $0x128] sm:$0xff] %vm1026_vm0, %v11257_v0 }
  0x93   : > { %1066 = vst.msk [vmem:[#allocation2 + $0x130] sm:$0x3] %vm1029_vm1, %v11257_v0 }
  0x94   : > { %1067 = vst.msk [vmem:[#allocation2 + $0x138] sm:$0xff] %vm1026_vm0, %v11257_v0 }
  0x95   : > { %1068 = vst.msk [vmem:[#allocation2 + $0x140] sm:$0xff] %vm1026_vm0, %v11257_v0 }
  0x96   : > { %1069 = vst.msk [vmem:[#allocation2 + $0x148] sm:$0x3] %vm1029_vm1, %v11257_v0 }
  0x97   : > { %1070 = vst.msk [vmem:[#allocation2 + $0x150] sm:$0xff] %vm1026_vm0, %v11257_v0 }
  0x98   : > { %1071 = vst.msk [vmem:[#allocation2 + $0x158] sm:$0xff] %vm1026_vm0, %v11257_v0 }
  0x99   : > { %1072 = vst.msk [vmem:[#allocation2 + $0x160] sm:$0x3] %vm1029_vm1, %v11257_v0 }
  0x9a   : > { %1073 = vst.msk [vmem:[#allocation2 + $0x168] sm:$0xff] %vm1026_vm0, %v11257_v0 }
  0x9b   : > { %1074 = vst.msk [vmem:[#allocation2 + $0x170] sm:$0xff] %vm1026_vm0, %v11257_v0 }
  0x9c   : > { %1075 = vst.msk [vmem:[#allocation2 + $0x178] sm:$0x3] %vm1029_vm1, %v11257_v0 }
  0x9d   : > { %1076 = vst.msk [vmem:[#allocation2 + $0x180] sm:$0xff] %vm1026_vm0, %v11257_v0 }
  0x9e   : > { %1077 = vst.msk [vmem:[#allocation2 + $0x188] sm:$0xff] %vm1026_vm0, %v11257_v0 }
  0x9f   : > { %1078 = vst.msk [vmem:[#allocation2 + $0x190] sm:$0x3] %vm1029_vm1, %v11257_v0 }
  0xa0   : > { %1079 = vst.msk [vmem:[#allocation2 + $0x198] sm:$0xff] %vm1026_vm0, %v11257_v0 }
  0xa1   : > { %1080 = vst.msk [vmem:[#allocation2 + $0x1a0] sm:$0xff] %vm1026_vm0, %v11257_v0 }
  0xa2   : > { %1081 = vst.msk [vmem:[#allocation2 + $0x1a8] sm:$0x3] %vm1029_vm1, %v11257_v0  ;;  %vm5878_vm1 = vcmask 1043459  }
  0xa3   : > { %7738 = vst [vmem:[#allocation7] sm:$0x3f] %v11257_v0 }
  0xa4   : > { %7739 = vst [vmem:[#allocation7 + $0x8] sm:$0x3f] %v11257_v0 }
  0xa5   : > { %7740 = vst [vmem:[#allocation7 + $0x10] sm:$0x3f] %v11257_v0 }
  0xa6   : > { %7741 = vst [vmem:[#allocation7 + $0x18] sm:$0x3f] %v11257_v0 }
  0xa7   : > { %7742 = vst [vmem:[#allocation7 + $0x20] sm:$0x3f] %v11257_v0 }
  0xa8   : > { %7743 = vst [vmem:[#allocation7 + $0x28] sm:$0x3f] %v11257_v0 }
  0xa9   : > { %1083 = vst.msk [vmem:[#allocation2 + $0x19] sm:$0xff] %vm1026_vm0, %v994_v4  ;;  %v1116_v4 = vld [vmem:[#allocation2 + $0x8] sm:$0xff] }
  0xaa   : > { %1084 = vst.msk [vmem:[#allocation2 + $0x21] sm:$0xff] %vm1026_vm0, %v995_v5  ;;  %v1004_v5 = vld [vmem:[%s11701_s13 + $0x50] sm:$0xff] }
  0xab   : > { %1085 = vst.msk [vmem:[#allocation2 + $0x31] sm:$0xff] %vm1026_vm0, %v996_v6  ;;  %v1005_v6 = vld [vmem:[%s11701_s13 + $0x58] sm:$0xff] }
  0xac   : > { %1086 = vst.msk [vmem:[#allocation2 + $0x39] sm:$0xff] %vm1026_vm0, %v997_v7 }
  0xad   : > { %1087 = vst.msk [vmem:[#allocation2 + $0x49] sm:$0xff] %vm1026_vm0, %v998_v14 }
  0xae   : > { %1088 = vst.msk [vmem:[#allocation2 + $0x51] sm:$0xff] %vm1026_vm0, %v999_v15 }
  0xaf   : > { %1089 = vst.msk [vmem:[#allocation2 + $0x61] sm:$0xff] %vm1026_vm0, %v1000_v25 }
  0xb0   : > { %v11716_v8 = vld [vmem:[#allocation2 + $0x18] sm:$0xff]  ;;  %1090 = vst.msk [vmem:[#allocation2 + $0x69] sm:$0xff] %vm1026_vm0, %v1001_v27 }
  0xb1   : > { %1692 = vrot.lane.b32.xlu1 %v11716_v8, %s11260_s23  ;;  %v1275_v9 = vld [vmem:[#allocation2 + $0x1a] sm:$0xff]  ;;  %v1276_v18 = vld [vmem:[#allocation2 + $0x22] sm:$0xff]  ;;  %1091 = vst.msk [vmem:[#allocation2 + $0x79] sm:$0xff] %vm1026_vm0, %v1002_v34 }
  0xb2   : > { %1948 = vrot.lane.b32.xlu2 %v1275_v9, %s11261_s26  ;;  %v1340_v10 = vld [vmem:[#allocation2 + $0x31] sm:$0xff]  ;;  %v1243_v11 = vld [vmem:[#allocation2 + $0x19] sm:$0xff]  ;;  %v1244_v17 = vld [vmem:[#allocation2 + $0x21] sm:$0xff]  ;;  %1092 = vst.msk [vmem:[#allocation2 + $0x81] sm:$0xff] %vm1026_vm0, %v1003_v42 }
  0xb3   : > { %2204 = vrot.lane.b32.xlu0 %v1340_v10, %s11262_s28  ;;  %v11722_v12 = vld [vmem:[#allocation2 + $0x30] sm:$0xff]  ;;  %v11735_v19 = vld [vmem:[#allocation2 + $0x20] sm:$0xff]  ;;  %v11741_v22 = vld [vmem:[#allocation2 + $0x38] sm:$0xff]  ;;  %1093 = vst.msk [vmem:[#allocation2 + $0x91] sm:$0xff] %vm1026_vm0, %v1004_v5 }
  0xb4   : > { %v1372_v16 = vld [vmem:[#allocation2 + $0x32] sm:$0xff]  ;;  %v1373_v21 = vld [vmem:[#allocation2 + $0x3a] sm:$0xff]  ;;  %v11748_v23 = vld [vmem:[#allocation2 + $0x48] sm:$0xff]  ;;  %1094 = vst.msk [vmem:[#allocation2 + $0x99] sm:$0xff] %vm1026_vm0, %v1005_v6 }
  0xb5   : > { %v1341_v20 = vld [vmem:[#allocation2 + $0x39] sm:$0xff]  ;;  %v11754_v24 = vld [vmem:[#allocation2 + $0x4a] sm:$0xff]  ;;  %3016 = vst.msk [vmem:[#allocation3 + $0x18] sm:$0xff] %vm3011_vm11, %v11257_v0 }
  0xb6   : > { %v1342_v26 = vld [vmem:[#allocation2 + $0x49] sm:$0xff]  ;;  %v11770_v29 = vld [vmem:[#allocation2 + $0x51] sm:$0xff]  ;;  %v11789_v32 = vld [vmem:[#allocation2 + $0x61] sm:$0xff]  ;;  %3017 = vst.msk [vmem:[#allocation3 + $0x20] sm:$0xff] %vm3011_vm11, %v11257_v0 }
  0xb7   : > { %v11768_v28 = vld [vmem:[#allocation2 + $0x50] sm:$0xff]  ;;  %v11791_v33 = vld [vmem:[#allocation2 + $0x62] sm:$0xff]  ;;  %3012 = vst.msk [vmem:[#allocation3] sm:$0xff] %vm3011_vm11, %v11257_v0 }
  0xb8   : > { %v11780_v30 = vld [vmem:[#allocation2 + $0x52] sm:$0xff]  ;;  %v11801_v36 = vld [vmem:[#allocation2 + $0x60] sm:$0xff]  ;;  %v11808_v41 = vld [vmem:[#allocation2 + $0x68] sm:$0xff]  ;;  %3013 = vst.msk [vmem:[#allocation3 + $0x8] sm:$0xff] %vm3011_vm11, %v11257_v0 }
  0xb9   : > { %1820 = vrot.lane.b32.xlu1 %v1243_v11, %s11263_s24  ;;  %v11817_v45 = vld [vmem:[#allocation2 + $0x6a] sm:$0xff]  ;;  %v11837_v59 = vld [vmem:[#allocation2 + $0x78] sm:$0xff]  ;;  %v11879_v27 = vld [vmem:[#allocation2 + $0x81] sm:$0xff]  ;;  %3019 = vst.msk [vmem:[#allocation3 + $0x30] sm:$0xff] %vm3011_vm11, %v11257_v0 }
  0xba   : > { %2076 = vrot.lane.b32.xlu2 %v11722_v12, %s11264_s0  ;;  %v11824_v50 = vld [vmem:[#allocation2 + $0x69] sm:$0xff]  ;;  %v11840_v61 = vld [vmem:[#allocation2 + $0x79] sm:$0xff]  ;;  %3020 = vst.msk [vmem:[#allocation3 + $0x38] sm:$0xff] %vm3011_vm11, %v11257_v0 }
  0xbb   : > { %1566 = vrot.lane.b32.xlu0 %v1180_v13, %s11259_s2  ;;  %v11865_v15 = vld [vmem:[#allocation2 + $0x7a] sm:$0xff]  ;;  %3022 = vst.msk [vmem:[#allocation3 + $0x48] sm:$0xff] %vm3011_vm11, %v11257_v0 }
  0xbc   : > { %v11944_v6 = vld [vmem:[#allocation2 + $0x99] sm:$0xff]  ;;  %3023 = vst.msk [vmem:[#allocation3 + $0x50] sm:$0xff] %vm3011_vm11, %v11257_v0 }
  0xbd   : > { %3025 = vst.msk [vmem:[#allocation3 + $0x60] sm:$0xff] %vm3011_vm11, %v11257_v0 }
  0xbe   : > { %3026 = vst.msk [vmem:[#allocation3 + $0x68] sm:$0xff] %vm3011_vm11, %v11257_v0 }
  0xbf   : > { %3028 = vst.msk [vmem:[#allocation3 + $0x78] sm:$0xff] %vm3011_vm11, %v11257_v0 }
  0xc0   : > { %3029 = vst.msk [vmem:[#allocation3 + $0x80] sm:$0xff] %vm3011_vm11, %v11257_v0 }
  0xc1   : > { %2332 = vrot.lane.b32.xlu1 %v1372_v16, %s11265_s22  ;;  %3031 = vst.msk [vmem:[#allocation3 + $0x90] sm:$0xff] %vm3011_vm11, %v11257_v0 }
  0xc2   : > { %1822 = vrot.lane.b32.xlu2 %v1244_v17, %s11263_s24  ;;  %3032 = vst.msk [vmem:[#allocation3 + $0x98] sm:$0xff] %vm3011_vm11, %v11257_v0 }
  0xc3   : > { %1950 = vrot.lane.b32.xlu0 %v1276_v18, %s11261_s26  ;;  %3034 = vst.msk [vmem:[#allocation3 + $0xa8] sm:$0xff] %vm3011_vm11, %v11257_v0 }
  0xc4   : > { %3035 = vst.msk [vmem:[#allocation3 + $0xb0] sm:$0xff] %vm3011_vm11, %v11257_v0 }
  0xc5   : > { %3037 = vst.msk [vmem:[#allocation3 + $0xc0] sm:$0xff] %vm3011_vm11, %v11257_v0 }
  0xc6   : > { %3038 = vst.msk [vmem:[#allocation3 + $0xc8] sm:$0xff] %vm3011_vm11, %v11257_v0 }
  0xc7   : > { %3040 = vst.msk [vmem:[#allocation3 + $0xd8] sm:$0xff] %vm3011_vm11, %v11257_v0 }
  0xc8   : > { %3041 = vst.msk [vmem:[#allocation3 + $0xe0] sm:$0xff] %vm3011_vm11, %v11257_v0 }
  0xc9   : > { %1694 = vrot.lane.b32.xlu1 %v11735_v19, %s11260_s23  ;;  %3043 = vst.msk [vmem:[#allocation3 + $0xf0] sm:$0xff] %vm3011_vm11, %v11257_v0 }
  0xca   : > { %2206 = vrot.lane.b32.xlu2 %v1341_v20, %s11262_s28  ;;  %3044 = vst.msk [vmem:[#allocation3 + $0xf8] sm:$0xff] %vm3011_vm11, %v11257_v0 }
  0xcb   : > { %2334 = vrot.lane.b32.xlu0 %v1373_v21, %s11265_s22  ;;  %3046 = vst.msk [vmem:[#allocation3 + $0x108] sm:$0xff] %vm3011_vm11, %v11257_v0 }
  0xcc   : > { %3047 = vst.msk [vmem:[#allocation3 + $0x110] sm:$0xff] %vm3011_vm11, %v11257_v0 }
  0xcd   : > { %3049 = vst.msk [vmem:[#allocation3 + $0x120] sm:$0xff] %vm3011_vm11, %v11257_v0 }
  0xce   : > { %3050 = vst.msk [vmem:[#allocation3 + $0x128] sm:$0xff] %vm3011_vm11, %v11257_v0 }
  0xcf   : > { %3052 = vst.msk [vmem:[#allocation3 + $0x138] sm:$0xff] %vm3011_vm11, %v11257_v0 }
  0xd0   : > { %v11785_v31 = vpop.permute.xlu2 %1438  ;;  %3053 = vst.msk [vmem:[#allocation3 + $0x140] sm:$0xff] %vm3011_vm11, %v11257_v0 }
  0xd1   : > { %2078 = vrot.lane.b32.xlu1 %v11741_v22, %s11264_s0  ;;  %v2429_v7 = vsel %vm1026_vm0, %v1116_v4, %v11785_v31  ;;  %v11941_v4 = vld [vmem:[#allocation2 + $0x98] sm:$0xff]  ;;  %3055 = vst.msk [vmem:[#allocation3 + $0x150] sm:$0xff] %vm3011_vm11, %v11257_v0 }
  0xd2   : > { %1568 = vrot.lane.b32.xlu2 %v1275_v9, %s11259_s2  ;;  %3056 = vst.msk [vmem:[#allocation3 + $0x158] sm:$0xff] %vm3011_vm11, %v11257_v0 }
  0xd3   : > { %1696 = vrot.lane.b32.xlu0 %v11722_v12, %s11260_s23  ;;  %3058 = vst.msk [vmem:[#allocation3 + $0x168] sm:$0xff] %vm3011_vm11, %v11257_v0 }
  0xd4   : > { %3059 = vst.msk [vmem:[#allocation3 + $0x170] sm:$0xff] %vm3011_vm11, %v11257_v0 }
  0xd5   : > { %3061 = vst.msk [vmem:[#allocation3 + $0x180] sm:$0xff] %vm3011_vm11, %v11257_v0 }
  0xd6   : > { %3062 = vst.msk [vmem:[#allocation3 + $0x188] sm:$0xff] %vm3011_vm11, %v11257_v0 }
  0xd7   : > { %3064 = vst.msk [vmem:[#allocation3 + $0x198] sm:$0xff] %vm3011_vm11, %v11257_v0 }
  0xd8   : > { %3065 = vst.msk [vmem:[#allocation3 + $0x1a0] sm:$0xff] %vm3011_vm11, %v11257_v0 }
  0xd9   : > { %1440 = vrot.lane.b32.xlu1 %v1243_v11, %s11258_s25  ;;  %5726 = vst.msk [vmem:[#allocation4] sm:$0xff] %vm3011_vm11, %v11257_v0 }
  0xda   : > { %1952 = vrot.lane.b32.xlu2 %v1372_v16, %s11261_s26  ;;  %5728 = vst.msk [vmem:[#allocation4 + $0x10] sm:$0xff] %vm3011_vm11, %v11257_v0 }
  0xdb   : > { %2080 = vrot.lane.b32.xlu0 %v11748_v23, %s11264_s0  ;;  %5730 = vst.msk [vmem:[#allocation4 + $0x20] sm:$0xff] %vm3011_vm11, %v11257_v0 }
  0xdc   : > { %5732 = vst.msk [vmem:[#allocation4 + $0x30] sm:$0xff] %vm3011_vm11, %v11257_v0 }
  0xdd   : > { %5734 = vst.msk [vmem:[#allocation4 + $0x40] sm:$0xff] %vm3011_vm11, %v11257_v0 }
  0xde   : > { %5736 = vst.msk [vmem:[#allocation4 + $0x50] sm:$0xff] %vm3011_vm11, %v11257_v0 }
  0xdf   : > { %5738 = vst.msk [vmem:[#allocation4 + $0x60] sm:$0xff] %vm3011_vm11, %v11257_v0 }
  0xe0   : > { %5740 = vst.msk [vmem:[#allocation4 + $0x70] sm:$0xff] %vm3011_vm11, %v11257_v0 }
  0xe1   : > { %1824 = vrot.lane.b32.xlu1 %v1340_v10, %s11263_s24  ;;  %5742 = vst.msk [vmem:[#allocation4 + $0x80] sm:$0xff] %vm3011_vm11, %v11257_v0 }
  0xe2   : > { %2336 = vrot.lane.b32.xlu2 %v11754_v24, %s11265_s22  ;;  %5744 = vst.msk [vmem:[#allocation4 + $0x90] sm:$0xff] %vm3011_vm11, %v11257_v0 }
  0xe3   : > { %1442 = vrot.lane.b32.xlu0 %v1244_v17, %s11258_s25  ;;  %3018 = vst.msk [vmem:[#allocation3 + $0x28] sm:$0x3] %vm3014_vm12, %v11257_v0 }
  0xe4   : > { %3015 = vst.msk [vmem:[#allocation3 + $0x10] sm:$0x3] %vm3014_vm12, %v11257_v0 }
  0xe5   : > { %3021 = vst.msk [vmem:[#allocation3 + $0x40] sm:$0x3] %vm3014_vm12, %v11257_v0 }
  0xe6   : > { %3024 = vst.msk [vmem:[#allocation3 + $0x58] sm:$0x3] %vm3014_vm12, %v11257_v0 }
  0xe7   : > { %3027 = vst.msk [vmem:[#allocation3 + $0x70] sm:$0x3] %vm3014_vm12, %v11257_v0 }
  0xe8   : > { %3030 = vst.msk [vmem:[#allocation3 + $0x88] sm:$0x3] %vm3014_vm12, %v11257_v0 }
  0xe9   : > { %2208 = vrot.lane.b32.xlu1 %v1342_v26, %s11262_s28  ;;  %v1437_v37 = vpop.permute.xlu0 %1436  ;;  %3033 = vst.msk [vmem:[#allocation3 + $0xa0] sm:$0x3] %vm3014_vm12, %v11257_v0 }
  0xea   : > { %1698 = vrot.lane.b32.xlu2 %v11741_v22, %s11260_s23  ;;  %v2428_v51 = vsel %vm1026_vm0, %v1115_v47, %v1437_v37  ;;  %v11891_v37 = vld [vmem:[#allocation2 + $0x80] sm:$0xff]  ;;  %3036 = vst.msk [vmem:[#allocation3 + $0xb8] sm:$0x3] %vm3014_vm12, %v11257_v0 }
  0xeb   : > { %1826 = vrot.lane.b32.xlu0 %v1341_v20, %s11263_s24  ;;  %3039 = vst.msk [vmem:[#allocation3 + $0xd0] sm:$0x3] %vm3014_vm12, %v11257_v0 }
  0xec   : > { %3042 = vst.msk [vmem:[#allocation3 + $0xe8] sm:$0x3] %vm3014_vm12, %v11257_v0 }
  0xed   : > { %3045 = vst.msk [vmem:[#allocation3 + $0x100] sm:$0x3] %vm3014_vm12, %v11257_v0 }
  0xee   : > { %3048 = vst.msk [vmem:[#allocation3 + $0x118] sm:$0x3] %vm3014_vm12, %v11257_v0 }
  0xef   : > { %3051 = vst.msk [vmem:[#allocation3 + $0x130] sm:$0x3] %vm3014_vm12, %v11257_v0 }
  0xf0   : > { %3054 = vst.msk [vmem:[#allocation3 + $0x148] sm:$0x3] %vm3014_vm12, %v11257_v0 }
  0xf1   : > { %1570 = vrot.lane.b32.xlu1 %v1276_v18, %s11259_s2  ;;  %v1565_v43 = vpop.permute.xlu0 %1564  ;;  %3057 = vst.msk [vmem:[#allocation3 + $0x160] sm:$0x3] %vm3014_vm12, %v11257_v0 }
  0xf2   : > { %2082 = vrot.lane.b32.xlu2 %v11768_v28, %s11264_s0  ;;  %v2461_v52 = vsel %vm2460_vm3, %v2428_v51, %v1565_v43  ;;  %3060 = vst.msk [vmem:[#allocation3 + $0x178] sm:$0x3] %vm3014_vm12, %v11257_v0 }
  0xf3   : > { %2210 = vrot.lane.b32.xlu0 %v11770_v29, %s11262_s28  ;;  %3063 = vst.msk [vmem:[#allocation3 + $0x190] sm:$0x3] %vm3014_vm12, %v11257_v0 }
  0xf4   : > { %3066 = vst.msk [vmem:[#allocation3 + $0x1a8] sm:$0x3] %vm3014_vm12, %v11257_v0 }
  0xf5   : > { %5727 = vst.msk [vmem:[#allocation4 + $0x8] sm:$0x3] %vm3014_vm12, %v11257_v0 }
  0xf6   : > { %5729 = vst.msk [vmem:[#allocation4 + $0x18] sm:$0x3] %vm3014_vm12, %v11257_v0 }
  0xf7   : > { %5731 = vst.msk [vmem:[#allocation4 + $0x28] sm:$0x3] %vm3014_vm12, %v11257_v0 }
  0xf8   : > { %5733 = vst.msk [vmem:[#allocation4 + $0x38] sm:$0x3] %vm3014_vm12, %v11257_v0 }
  0xf9   : > { %1954 = vrot.lane.b32.xlu1 %v1373_v21, %s11261_s26  ;;  %5735 = vst.msk [vmem:[#allocation4 + $0x48] sm:$0x3] %vm3014_vm12, %v11257_v0 }
  0xfa   : > { %1444 = vrot.lane.b32.xlu2 %v1340_v10, %s11258_s25  ;;  %5737 = vst.msk [vmem:[#allocation4 + $0x58] sm:$0x3] %vm3014_vm12, %v11257_v0 }
  0xfb   : > { %1572 = vrot.lane.b32.xlu0 %v1372_v16, %s11259_s2  ;;  %5739 = vst.msk [vmem:[#allocation4 + $0x68] sm:$0x3] %vm3014_vm12, %v11257_v0 }
  0xfc   : > { %5741 = vst.msk [vmem:[#allocation4 + $0x78] sm:$0x3] %vm3014_vm12, %v11257_v0 }
  0xfd   : > { %5743 = vst.msk [vmem:[#allocation4 + $0x88] sm:$0x3] %vm3014_vm12, %v11257_v0 }
  0xfe   : > { %5745 = vst.msk [vmem:[#allocation4 + $0x98] sm:$0x3] %vm3014_vm12, %v11257_v0 }
  0xff   : > { %6482 = vst.msk [vmem:[#allocation5] sm:$0xff] %vm4189_vm13, %v11257_v0 }
 0x100   : > { %6485 = vst.msk [vmem:[#allocation5 + $0x10] sm:$0xff] %vm4189_vm13, %v11257_v0 }
 0x101   : > { %2338 = vrot.lane.b32.xlu1 %v11780_v30, %s11265_s22  ;;  %6487 = vst.msk [vmem:[#allocation5 + $0x20] sm:$0xff] %vm4189_vm13, %v11257_v0 }
 0x102   : > { %1828 = vrot.lane.b32.xlu2 %v1342_v26, %s11263_s24  ;;  %6489 = vst.msk [vmem:[#allocation5 + $0x30] sm:$0xff] %vm4189_vm13, %v11257_v0 }
 0x103   : > { %1956 = vrot.lane.b32.xlu0 %v11754_v24, %s11261_s26  ;;  %6491 = vst.msk [vmem:[#allocation5 + $0x40] sm:$0xff] %vm4189_vm13, %v11257_v0 }
 0x104   : > { %6493 = vst.msk [vmem:[#allocation5 + $0x50] sm:$0xff] %vm4189_vm13, %v11257_v0 }
 0x105   : > { %6495 = vst.msk [vmem:[#allocation5 + $0x60] sm:$0xff] %vm4189_vm13, %v11257_v0 }
 0x106   : > { %6497 = vst.msk [vmem:[#allocation5 + $0x70] sm:$0xff] %vm4189_vm13, %v11257_v0 }
 0x107   : > { %6499 = vst.msk [vmem:[#allocation5 + $0x80] sm:$0xff] %vm4189_vm13, %v11257_v0 }
 0x108   : > { %6501 = vst.msk [vmem:[#allocation5 + $0x90] sm:$0xff] %vm4189_vm13, %v11257_v0 }
 0x109   : > { %1700 = vrot.lane.b32.xlu1 %v11748_v23, %s11260_s23 }
 0x10a   : > { %2212 = vrot.lane.b32.xlu2 %v11789_v32, %s11262_s28 }
 0x10b   : > { %2340 = vrot.lane.b32.xlu0 %v11791_v33, %s11265_s22 }
 0x10c   : > { %v1949_v35 = vpop.permute.xlu2 %1948 }
 0x111   : > { %2084 = vrot.lane.b32.xlu1 %v11801_v36, %s11264_s0 }
 0x112   : > { %1574 = vrot.lane.b32.xlu2 %v1373_v21, %s11259_s2 }
 0x113   : > { %1702 = vrot.lane.b32.xlu0 %v11768_v28, %s11260_s23 }
 0x114   : > { %v2077_v40 = vpop.permute.xlu2 %2076 }
 0x119   : > { %1446 = vrot.lane.b32.xlu1 %v1341_v20, %s11258_s25 }
 0x11a   : > { %1958 = vrot.lane.b32.xlu2 %v11780_v30, %s11261_s26 }
 0x11b   : > { %2086 = vrot.lane.b32.xlu0 %v11808_v41, %s11264_s0 }
 0x11c   : > { %v1823_v44 = vpop.permute.xlu2 %1822 }
 0x121   : > { %1830 = vrot.lane.b32.xlu1 %v11770_v29, %s11263_s24 }
 0x122   : > { %2342 = vrot.lane.b32.xlu2 %v11817_v45, %s11265_s22 }
 0x123   : > { %v1693_v46 = vpop.permute.xlu1 %1692  ;;  %1448 = vrot.lane.b32.xlu0 %v1342_v26, %s11258_s25 }
 0x124   : > { %v2207_v48 = vpop.permute.xlu2 %2206  ;;  %v2494_v53 = vsel %vm2493_vm4, %v2461_v52, %v1693_v46  ;;  %v11903_v46 = vld [vmem:[#allocation2 + $0x90] sm:$0xff] }
 0x125   : > { %v2205_v49 = vpop.permute.xlu0 %2204 }
 0x129   : > { %2214 = vrot.lane.b32.xlu1 %v11824_v50, %s11262_s28 }
 0x12a   : > { %1704 = vrot.lane.b32.xlu2 %v11801_v36, %s11260_s23 }
 0x12b   : > { %v1821_v54 = vpop.permute.xlu1 %1820  ;;  %1832 = vrot.lane.b32.xlu0 %v11789_v32, %s11263_s24 }
 0x12c   : > { %v2527_v55 = vsel %vm2526_vm5, %v2494_v53, %v1821_v54  ;;  %v1569_v56 = vpop.permute.xlu2 %1568  ;;  %v11915_v53 = vld [vmem:[#allocation2 + $0x92] sm:$0xff] }
 0x12d   : > { %v2560_v57 = vsel %vm2559_vm6, %v2527_v55, %v1949_v35  ;;  %v1567_v58 = vpop.permute.xlu0 %1566 }
 0x12e   : > { %v2593_v60 = vsel %vm2592_vm7, %v2560_v57, %v2077_v40  ;;  %v2462_v10 = vsel %vm2460_vm3, %v2429_v7, %v1567_v58 }
 0x12f   : > { %v2626_v62 = vsel %vm2625_vm8, %v2593_v60, %v2205_v49  ;;  %v11928_v60 = vld [vmem:[#allocation2 + $0x91] sm:$0xff] }
 0x131   : > { %1576 = vrot.lane.b32.xlu1 %v11754_v24, %s11259_s2 }
 0x132   : > { %2088 = vrot.lane.b32.xlu2 %v11837_v59, %s11264_s0 }
 0x133   : > { %v2333_v63 = vpop.permute.xlu1 %2332  ;;  %2216 = vrot.lane.b32.xlu0 %v11840_v61, %s11262_s28 }
 0x134   : > { %v1953_v1 = vpop.permute.xlu2 %1952  ;;  %v2659_v2 = vsel %vm2658_vm9, %v2626_v62, %v2333_v63  ;;  %v1007_v63 = vld [vmem:[%s11701_s13 + $0x68] sm:$0xff] }
 0x135   : > { %9553 = vmatmul.msk.f32.vlgmr.msra.gmra.mxu0 %vm2693_vm10, %v2659_v2  ;;  %v1951_v3 = vpop.permute.xlu0 %1950  ;;  %1096 = vst.msk [vmem:[#allocation2 + $0xb1] sm:$0xff] %vm1026_vm0, %v1007_v63 }
 0x139   : > { %1960 = vrot.lane.b32.xlu1 %v11791_v33, %s11261_s26 }
 0x13a   : > { %1450 = vrot.lane.b32.xlu2 %v11770_v29, %s11258_s25  ;;  %v11881_v29 = vld [vmem:[#allocation2 + $0x82] sm:$0xff] }
 0x13b   : > { %v1695_v9 = vpop.permute.xlu1 %1694  ;;  %1578 = vrot.lane.b32.xlu0 %v11780_v30, %s11259_s2 }
 0x13c   : > { %v2337_v11 = vpop.permute.xlu2 %2336  ;;  %v2495_v13 = vsel %vm2493_vm4, %v2462_v10, %v1695_v9 }
 0x13d   : > { %v2335_v14 = vpop.permute.xlu0 %2334  ;;  %v2528_v16 = vsel %vm2526_vm5, %v2495_v13, %v1823_v44 }
 0x13e   : > { %v2561_v17 = vsel %vm2559_vm6, %v2528_v16, %v1951_v3 }
 0x141   : > { %2344 = vrot.lane.b32.xlu1 %v11865_v15, %s11265_s22 }
 0x142   : > { %1834 = vrot.lane.b32.xlu2 %v11824_v50, %s11263_s24 }
 0x143   : > { %v2079_v18 = vpop.permute.xlu1 %2078  ;;  %1962 = vrot.lane.b32.xlu0 %v11817_v45, %s11261_s26 }
 0x144   : > { %v2594_v20 = vsel %vm2592_vm7, %v2561_v17, %v2079_v18  ;;  %v1699_v21 = vpop.permute.xlu2 %1698 }
 0x145   : > { %v2627_v24 = vsel %vm2625_vm8, %v2594_v20, %v2207_v48  ;;  %v1697_v25 = vpop.permute.xlu0 %1696 }
 0x146   : > { %v2660_v26 = vsel %vm2658_vm9, %v2627_v24, %v2335_v14 }
 0x147   : > { %9554 = vmatmul.msk.f32.gmra.mxu0 %vm2693_vm10, %v2660_v26 }
 0x149   : > { %1706 = vrot.lane.b32.xlu1 %v11808_v41, %s11260_s23 }
 0x14a   : > { %2218 = vrot.lane.b32.xlu2 %v11879_v27, %s11262_s28 }
 0x14b   : > { %v1441_v30 = vpop.permute.xlu1 %1440  ;;  %2346 = vrot.lane.b32.xlu0 %v11881_v29, %s11265_s22 }
 0x14c   : > { %v2083_v31 = vpop.permute.xlu2 %2082  ;;  %v2430_v35 = vsel %vm1026_vm0, %v11716_v8, %v1441_v30 }
 0x14d   : > { %v2081_v34 = vpop.permute.xlu0 %2080  ;;  %v2463_v38 = vsel %vm2460_vm3, %v2430_v35, %v1569_v56 }
 0x14e   : > { %v2496_v40 = vsel %vm2493_vm4, %v2463_v38, %v1697_v25  ;;  %v1008_v38 = vld [vmem:[%s11701_s13 + $0x70] sm:$0xff] }
 0x14f   : > { %1097 = vst.msk [vmem:[#allocation2 + $0xc1] sm:$0xff] %vm1026_vm0, %v1008_v38 }
 0x151   : > { %2090 = vrot.lane.b32.xlu1 %v11891_v37, %s11264_s0 }
 0x152   : > { %1580 = vrot.lane.b32.xlu2 %v11791_v33, %s11259_s2 }
 0x153   : > { %v1825_v39 = vpop.permute.xlu1 %1824  ;;  %1708 = vrot.lane.b32.xlu0 %v11837_v59, %s11260_s23 }
 0x154   : > { %v1445_v42 = vpop.permute.xlu2 %1444  ;;  %v2529_v43 = vsel %vm2526_vm5, %v2496_v40, %v1825_v39 }
 0x155   : > { %v1443_v8 = vpop.permute.xlu0 %1442  ;;  %v2562_v44 = vsel %vm2559_vm6, %v2529_v43, %v1953_v1  ;;  %v2432_v14 = vsel %vm1026_vm0, %v11722_v12, %v1445_v42 }
 0x156   : > { %v2595_v33 = vsel %vm2592_vm7, %v2562_v44, %v2081_v34  ;;  %v2431_v56 = vsel %vm1026_vm0, %v11735_v19, %v1443_v8 }
 0x159   : > { %1452 = vrot.lane.b32.xlu1 %v11789_v32, %s11258_s25  ;;  %v1006_v32 = vld [vmem:[%s11701_s13 + $0x60] sm:$0xff] }
 0x15a   : > { %1964 = vrot.lane.b32.xlu2 %v11865_v15, %s11261_s26  ;;  %1095 = vst.msk [vmem:[#allocation2 + $0xa9] sm:$0xff] %vm1026_vm0, %v1006_v32 }
 0x15b   : > { %v2209_v47 = vpop.permute.xlu1 %2208  ;;  %2092 = vrot.lane.b32.xlu0 %v11903_v46, %s11264_s0 }
 0x15c   : > { %v2628_v48 = vsel %vm2625_vm8, %v2595_v33, %v2209_v47  ;;  %v1829_v49 = vpop.permute.xlu2 %1828 }
 0x15d   : > { %v2661_v51 = vsel %vm2658_vm9, %v2628_v48, %v2337_v11  ;;  %v1827_v52 = vpop.permute.xlu0 %1826 }
 0x15e   : > { %9555 = vmatmul.msk.f32.gmra.mxu0 %vm2693_vm10, %v2661_v51 }
 0x161   : > { %1836 = vrot.lane.b32.xlu1 %v11840_v61, %s11263_s24  ;;  %v11981_v34 = vld [vmem:[#allocation2 + $0xa9] sm:$0xff] }
 0x162   : > { %2348 = vrot.lane.b32.xlu2 %v11915_v53, %s11265_s22  ;;  %v11983_v35 = vld [vmem:[#allocation2 + $0xaa] sm:$0xff] }
 0x163   : > { %v1571_v54 = vpop.permute.xlu1 %1570  ;;  %1454 = vrot.lane.b32.xlu0 %v11824_v50, %s11258_s25  ;;  %v11997_v8 = vld [vmem:[#allocation2 + $0xa8] sm:$0xff] }
 0x164   : > { %v2213_v55 = vpop.permute.xlu2 %2212  ;;  %v2464_v58 = vsel %vm2460_vm3, %v2431_v56, %v1571_v54 }
 0x165   : > { %v2211_v57 = vpop.permute.xlu0 %2210  ;;  %v2497_v62 = vsel %vm2493_vm4, %v2464_v58, %v1699_v21  ;;  %v11965_v21 = vld [vmem:[#allocation2 + $0x9a] sm:$0xff] }
 0x166   : > { %v2530_v19 = vsel %vm2526_vm5, %v2497_v62, %v1827_v52  ;;  %v12011_v52 = vld [vmem:[#allocation2 + $0xb0] sm:$0xff] }
 0x169   : > { %2220 = vrot.lane.b32.xlu1 %v11928_v60, %s11262_s28 }
 0x16a   : > { %1710 = vrot.lane.b32.xlu2 %v11891_v37, %s11260_s23 }
 0x16b   : > { %v1955_v50 = vpop.permute.xlu1 %1954  ;;  %1838 = vrot.lane.b32.xlu0 %v11879_v27, %s11263_s24 }
 0x16c   : > { %v1575_v1 = vpop.permute.xlu2 %1574  ;;  %v2563_v2 = vsel %vm2559_vm6, %v2530_v19, %v1955_v50 }
 0x16d   : > { %v1573_v3 = vpop.permute.xlu0 %1572  ;;  %v2596_v5 = vsel %vm2592_vm7, %v2563_v2, %v2083_v31 }
 0x16e   : > { %v2629_v7 = vsel %vm2625_vm8, %v2596_v5, %v2211_v57  ;;  %v2465_v16 = vsel %vm2460_vm3, %v2432_v14, %v1573_v3  ;;  %v12039_v57 = vld [vmem:[#allocation2 + $0xb2] sm:$0xff] }
 0x16f   : > { %v12112_v14 = vld [vmem:[#allocation13] ss:$0 sm:$0xff] }
 0x171   : > { %1582 = vrot.lane.b32.xlu1 %v11817_v45, %s11259_s2 }
 0x172   : > { %2094 = vrot.lane.b32.xlu2 %v11941_v4, %s11264_s0 }
 0x173   : > { %v2339_v9 = vpop.permute.xlu1 %2338  ;;  %2222 = vrot.lane.b32.xlu0 %v11944_v6, %s11262_s28 }
 0x174   : > { %v1959_v10 = vpop.permute.xlu2 %1958  ;;  %v2662_v11 = vsel %vm2658_vm9, %v2629_v7, %v2339_v9  ;;  %v12098_v9 = vld [vmem:[#allocation11] ss:$0 sm:$0xff] }
 0x175   : > { %9556 = vmatmul.msk.f32.gmra.mxu0 %vm2693_vm10, %v2662_v11  ;;  %v1957_v13 = vpop.permute.xlu0 %1956 }
 0x179   : > { %1966 = vrot.lane.b32.xlu1 %v11881_v29, %s11261_s26 }
 0x17a   : > { %1456 = vrot.lane.b32.xlu2 %v11840_v61, %s11258_s25 }
 0x17b   : > { %v1701_v45 = vpop.permute.xlu1 %1700  ;;  %1584 = vrot.lane.b32.xlu0 %v11865_v15, %s11259_s2 }
 0x17c   : > { %v2343_v17 = vpop.permute.xlu2 %2342  ;;  %v2498_v18 = vsel %vm2493_vm4, %v2465_v16, %v1701_v45 }
 0x17d   : > { %v2341_v20 = vpop.permute.xlu0 %2340  ;;  %v2531_v12 = vsel %vm2526_vm5, %v2498_v18, %v1829_v49 }
 0x17e   : > { %v2564_v61 = vsel %vm2559_vm6, %v2531_v12, %v1957_v13  ;;  %v12108_v13 = vld [vmem:[#allocation2 + $0xc1] sm:$0xff] }
 0x181   : > { %2350 = vrot.lane.b32.xlu1 %v11965_v21, %s11265_s22 }
 0x182   : > { %1840 = vrot.lane.b32.xlu2 %v11928_v60, %s11263_s24 }
 0x183   : > { %v2085_v15 = vpop.permute.xlu1 %2084  ;;  %1968 = vrot.lane.b32.xlu0 %v11915_v53, %s11261_s26 }
 0x184   : > { %v2597_v24 = vsel %vm2592_vm7, %v2564_v61, %v2085_v15  ;;  %v11976_v25 = vpop.permute.xlu2 %1704 }
 0x185   : > { %v2630_v26 = vsel %vm2625_vm8, %v2597_v24, %v2213_v55  ;;  %v1703_v30 = vpop.permute.xlu0 %1702 }
 0x186   : > { %v2663_v31 = vsel %vm2658_vm9, %v2630_v26, %v2341_v20 }
 0x187   : > { %9557 = vmatmul.msk.f32.gmra.mxu0 %vm2693_vm10, %v2663_v31 }
 0x189   : > { %1712 = vrot.lane.b32.xlu1 %v11903_v46, %s11260_s23 }
 0x18a   : > { %2224 = vrot.lane.b32.xlu2 %v11981_v34, %s11262_s28 }
 0x18b   : > { %v1447_v39 = vpop.permute.xlu1 %1446  ;;  %2352 = vrot.lane.b32.xlu0 %v11983_v35, %s11265_s22 }
 0x18c   : > { %v11993_v40 = vpop.permute.xlu2 %2088  ;;  %v2433_v43 = vsel %vm1026_vm0, %v11741_v22, %v1447_v39  ;;  %v1009_v39 = vld [vmem:[%s11701_s13 + $0x78] sm:$0xff] }
 0x18d   : > { %v2087_v42 = vpop.permute.xlu0 %2086  ;;  %v2466_v44 = vsel %vm2460_vm3, %v2433_v43, %v1575_v1  ;;  %v12066_v1 = vld [vmem:[#allocation2 + $0xb1] sm:$0xff]  ;;  %1098 = vst.msk [vmem:[#allocation2 + $0xc9] sm:$0xff] %vm1026_vm0, %v1009_v39 }
 0x18e   : > { %v2499_v47 = vsel %vm2493_vm4, %v2466_v44, %v1703_v30 }
 0x191   : > { %2096 = vrot.lane.b32.xlu1 %v11997_v8, %s11264_s0 }
 0x192   : > { %1586 = vrot.lane.b32.xlu2 %v11881_v29, %s11259_s2 }
 0x193   : > { %v1831_v33 = vpop.permute.xlu1 %1830  ;;  %1714 = vrot.lane.b32.xlu0 %v11941_v4, %s11260_s23 }
 0x194   : > { %v12007_v48 = vpop.permute.xlu2 %1450  ;;  %v2532_v22 = vsel %vm2526_vm5, %v2499_v47, %v1831_v33 }
 0x195   : > { %v1449_v49 = vpop.permute.xlu0 %1448  ;;  %v2565_v51 = vsel %vm2559_vm6, %v2532_v22, %v1959_v10  ;;  %v12102_v10 = vld [vmem:[#allocation2 + $0xc0] sm:$0xff]  ;;  %v2435_v24 = vsel %vm1026_vm0, %v11768_v28, %v12007_v48 }
 0x196   : > { %v2598_v29 = vsel %vm2592_vm7, %v2565_v51, %v2087_v42  ;;  %v2434_v63 = vsel %vm1026_vm0, %v11748_v23, %v1449_v49 }
 0x199   : > { %1458 = vrot.lane.b32.xlu1 %v11879_v27, %s11258_s25 }
 0x19a   : > { %1970 = vrot.lane.b32.xlu2 %v11965_v21, %s11261_s26 }
 0x19b   : > { %v2215_v32 = vpop.permute.xlu1 %2214  ;;  %2098 = vrot.lane.b32.xlu0 %v12011_v52, %s11264_s0 }
 0x19c   : > { %v2631_v27 = vsel %vm2625_vm8, %v2598_v29, %v2215_v32  ;;  %v12029_v54 = vpop.permute.xlu2 %1834 }
 0x19d   : > { %v2664_v55 = vsel %vm2658_vm9, %v2631_v27, %v2343_v17  ;;  %v1833_v56 = vpop.permute.xlu0 %1832  ;;  %v12212_v27 = vld [vmem:[#allocation2 + $0xc2] sm:$0xff] }
 0x19e   : > { %9558 = vmatmul.msk.f32.gmra.mxu0 %vm2693_vm10, %v2664_v55 }
 0x1a1   : > { %1842 = vrot.lane.b32.xlu1 %v11944_v6, %s11263_s24 }
 0x1a2   : > { %2354 = vrot.lane.b32.xlu2 %v12039_v57, %s11265_s22 }
 0x1a3   : > { %v1577_v58 = vpop.permute.xlu1 %1576  ;;  %1460 = vrot.lane.b32.xlu0 %v11928_v60, %s11258_s25 }
 0x1a4   : > { %v12057_v62 = vpop.permute.xlu2 %2218  ;;  %v2467_v19 = vsel %vm2460_vm3, %v2434_v63, %v1577_v58 }
 0x1a5   : > { %v2217_v50 = vpop.permute.xlu0 %2216  ;;  %v2500_v23 = vsel %vm2493_vm4, %v2467_v19, %v11976_v25 }
 0x1a6   : > { %v2533_v2 = vsel %vm2526_vm5, %v2500_v23, %v1833_v56  ;;  %v12226_v56 = vld [vmem:[#allocation2 + $0xca] sm:$0xff] }
 0x1a9   : > { %2226 = vrot.lane.b32.xlu1 %v12066_v1, %s11262_s28 }
 0x1aa   : > { %1716 = vrot.lane.b32.xlu2 %v11997_v8, %s11260_s23 }
 0x1ab   : > { %v1961_v60 = vpop.permute.xlu1 %1960  ;;  %1844 = vrot.lane.b32.xlu0 %v11981_v34, %s11263_s24 }
 0x1ac   : > { %v12089_v3 = vpop.permute.xlu2 %1580  ;;  %v2566_v5 = vsel %vm2559_vm6, %v2533_v2, %v1961_v60 }
 0x1ad   : > { %v1579_v7 = vpop.permute.xlu0 %1578  ;;  %v2599_v11 = vsel %vm2592_vm7, %v2566_v5, %v11993_v40 }
 0x1ae   : > { %v2632_v16 = vsel %vm2625_vm8, %v2599_v11, %v2217_v50  ;;  %v2468_v28 = vsel %vm2460_vm3, %v2435_v24, %v1579_v7 }
 0x1b1   : > { %1588 = vrot.lane.b32.xlu1 %v11915_v53, %s11259_s2 }
 0x1b2   : > { %v2811_v45 = vpop.f32.mrf.mxu0  ;;  %2100 = vrot.lane.b32.xlu2 %v12102_v10, %s11264_s0 }
 0x1b3   : > { %v2911_v17 = vmul.f32 %v12098_v9, %v2811_v45  ;;  %v2345_v53 = vpop.permute.xlu1 %2344  ;;  %2228 = vrot.lane.b32.xlu0 %v12108_v13, %s11262_s28 }
 0x1b4   : > { %v12128_v18 = vpop.permute.xlu2 %1964  ;;  %v2665_v20 = vsel %vm2658_vm9, %v2632_v16, %v2345_v53 }
 0x1b5   : > { %v2947_v12 = vadd.f32 %v12112_v14, %v2911_v17  ;;  %9559 = vmatmul.msk.f32.gmra.mxu0 %vm2693_vm10, %v2665_v20  ;;  %v1963_v61 = vpop.permute.xlu0 %1962 }
 0x1b7   : > { %v2979_v15 = vmax.f32 %v2947_v12, 0.0  ;;  %v1011_v12 = vld [vmem:[%s11701_s13 + $0x88] sm:$0xff] }
 0x1b8   : > { %1100 = vst.msk [vmem:[#allocation2 + $0xe1] sm:$0xff] %vm1026_vm0, %v1011_v12 }
 0x1b9   : > { %3068 = vst.msk [vmem:[#allocation3 + $0x19] sm:$0xff] %vm3011_vm11, %v2979_v15  ;;  %1972 = vrot.lane.b32.xlu1 %v11983_v35, %s11261_s26 }
 0x1ba   : > { %1462 = vrot.lane.b32.xlu2 %v11944_v6, %s11258_s25 }
 0x1bb   : > { %v1707_v25 = vpop.permute.xlu1 %1706  ;;  %1590 = vrot.lane.b32.xlu0 %v11965_v21, %s11259_s2 }
 0x1bc   : > { %v12158_v26 = vpop.permute.xlu2 %2348  ;;  %v2501_v6 = vsel %vm2493_vm4, %v2468_v28, %v1707_v25  ;;  %v4386_v28 = vld [vmem:[#allocation14 + $0x118] sm:$0xff] }
 0x1bd   : > { %v2347_v30 = vpop.permute.xlu0 %2346  ;;  %v2534_v21 = vsel %vm2526_vm5, %v2501_v6, %v12029_v54  ;;  %v12216_v54 = vld [vmem:[#allocation2 + $0xc9] sm:$0xff]  ;;  %4721 = vmatpush.msra.mxu3 %v4386_v28 }
 0x1be   : > { %v2567_v31 = vsel %vm2559_vm6, %v2534_v21, %v1963_v61  ;;  %v4383_v21 = vld [vmem:[#allocation14 + $0x100] sm:$0xff] }
 0x1c1   : > { %2356 = vrot.lane.b32.xlu1 %v12212_v27, %s11265_s22 }
 0x1c2   : > { %1846 = vrot.lane.b32.xlu2 %v12066_v1, %s11263_s24 }
 0x1c3   : > { %v2091_v38 = vpop.permute.xlu1 %2090  ;;  %1974 = vrot.lane.b32.xlu0 %v12039_v57, %s11261_s26 }
 0x1c4   : > { %v2600_v40 = vsel %vm2592_vm7, %v2567_v31, %v2091_v38  ;;  %v2814_v42 = vpop.f32.mrf.mxu0  ;;  %v12186_v43 = vpop.permute.xlu2 %1710 }
 0x1c5   : > { %v2912_v44 = vmul.f32 %v12098_v9, %v2814_v42  ;;  %v2633_v33 = vsel %vm2625_vm8, %v2600_v40, %v12057_v62  ;;  %v1709_v47 = vpop.permute.xlu0 %1708 }
 0x1c6   : > { %v2666_v48 = vsel %vm2658_vm9, %v2633_v33, %v2347_v30  ;;  %v4384_v30 = vld [vmem:[#allocation14 + $0x108] sm:$0xff] }
 0x1c7   : > { %v2948_v22 = vadd.f32 %v12112_v14, %v2912_v44  ;;  %9560 = vmatmul.msk.f32.gmra.mxu0 %vm2693_vm10, %v2666_v48 }
 0x1c9   : > { %v2980_v49 = vmax.f32 %v2948_v22, 0.0  ;;  %1718 = vrot.lane.b32.xlu1 %v12011_v52, %s11260_s23 }
 0x1ca   : > { %2230 = vrot.lane.b32.xlu2 %v12216_v54, %s11262_s28 }
 0x1cb   : > { %3069 = vst.msk [vmem:[#allocation3 + $0x21] sm:$0xff] %vm3011_vm11, %v2980_v49  ;;  %v1453_v51 = vpop.permute.xlu1 %1452  ;;  %2358 = vrot.lane.b32.xlu0 %v12226_v56, %s11265_s22 }
 0x1cc   : > { %v12208_v29 = vpop.permute.xlu2 %2094  ;;  %v2436_v55 = vsel %vm1026_vm0, %v11801_v36, %v1453_v51 }
 0x1cd   : > { %v2093_v32 = vpop.permute.xlu0 %2092  ;;  %v2469_v36 = vsel %vm2460_vm3, %v2436_v55, %v12089_v3  ;;  %v12271_v3 = vld [vmem:[#allocation2 + $0xc8] sm:$0xff] }
 0x1ce   : > { %v2502_v62 = vsel %vm2493_vm4, %v2469_v36, %v1709_v47 }
 0x1d1   : > { %2102 = vrot.lane.b32.xlu1 %v12271_v3, %s11264_s0 }
 0x1d2   : > { %1592 = vrot.lane.b32.xlu2 %v11983_v35, %s11259_s2 }
 0x1d3   : > { %v1837_v58 = vpop.permute.xlu1 %1836  ;;  %1720 = vrot.lane.b32.xlu0 %v12102_v10, %s11260_s23 }
 0x1d4   : > { %v12243_v63 = vpop.permute.xlu2 %1456  ;;  %v2535_v50 = vsel %vm2526_vm5, %v2502_v62, %v1837_v58  ;;  %v1013_v58 = vld [vmem:[%s11701_s13 + $0x98] sm:$0xff] }
 0x1d5   : > { %v1455_v19 = vpop.permute.xlu0 %1454  ;;  %v2568_v23 = vsel %vm2559_vm6, %v2535_v50, %v12128_v18  ;;  %v1010_v18 = vld [vmem:[%s11701_s13 + $0x80] sm:$0xff]  ;;  %1102 = vst.msk [vmem:[#allocation2 + $0xf9] sm:$0xff] %vm1026_vm0, %v1013_v58  ;;  %v2438_v62 = vsel %vm1026_vm0, %v11837_v59, %v12243_v63 }
 0x1d6   : > { %v2601_v35 = vsel %vm2592_vm7, %v2568_v23, %v2093_v32  ;;  %v2437_v15 = vsel %vm1026_vm0, %v11808_v41, %v1455_v19  ;;  %1099 = vst.msk [vmem:[#allocation2 + $0xd9] sm:$0xff] %vm1026_vm0, %v1010_v18 }
 0x1d9   : > { %1464 = vrot.lane.b32.xlu1 %v11981_v34, %s11258_s25 }
 0x1da   : > { %1976 = vrot.lane.b32.xlu2 %v12212_v27, %s11261_s26 }
 0x1db   : > { %v2221_v60 = vpop.permute.xlu1 %2220  ;;  %v2817_v2 = vpop.f32.mrf.mxu0 }
 0x1dc   : > { %v2634_v5 = vsel %vm2625_vm8, %v2601_v35, %v2221_v60  ;;  %v2913_v7 = vmul.f32 %v12098_v9, %v2817_v2  ;;  %v12275_v11 = vpop.permute.xlu2 %1840  ;;  %v12367_v2 = vld [vmem:[#allocation2 + $0xe1] sm:$0xff] }
 0x1dd   : > { %v2667_v45 = vsel %vm2658_vm9, %v2634_v5, %v12158_v26  ;;  %v1839_v16 = vpop.permute.xlu0 %1838  ;;  %v4385_v26 = vld [vmem:[#allocation14 + $0x110] sm:$0xff]  ;;  %v12318_v39 = vld [vmem:[#allocation2 + $0xd8] sm:$0xff] }
 0x1de   : > { %v2949_v17 = vadd.f32 %v12112_v14, %v2913_v7  ;;  %9561 = vmatmul.msk.f32.gmra.mxu0 %vm2693_vm10, %v2667_v45  ;;  %4722 = vmatpush.msra.mxu3 %v4385_v26  ;;  %v12323_v42 = vld [vmem:[#allocation2 + $0xda] sm:$0xff] }
 0x1df   : > { %2104 = vrot.lane.b32.xlu0 %v12318_v39, %s11264_s0  ;;  %v12335_v49 = vld [vmem:[#allocation2 + $0xd9] sm:$0xff] }
 0x1e0   : > { %v2981_v53 = vmax.f32 %v2949_v17, 0.0  ;;  %4723 = vmatpush.msra.mxu3 %v4384_v30  ;;  %v12354_v19 = vld [vmem:[#allocation2 + $0xe0] sm:$0xff] }
 0x1e1   : > { %1848 = vrot.lane.b32.xlu1 %v12108_v13, %s11263_s24 }
 0x1e2   : > { %3070 = vst.msk [vmem:[#allocation3 + $0x31] sm:$0xff] %vm3011_vm11, %v2981_v53  ;;  %4724 = vmatpush.msra.mxu3 %v4383_v21  ;;  %2360 = vrot.lane.b32.xlu2 %v12323_v42, %s11265_s22  ;;  %v1014_v21 = vld [vmem:[%s11701_s13 + $0xa0] sm:$0xff] }
 0x1e3   : > { %v1583_v20 = vpop.permute.xlu1 %1582  ;;  %1103 = vst.msk [vmem:[#allocation2 + $0x109] sm:$0xff] %vm1026_vm0, %v1014_v21 }
 0x1e4   : > { %v12303_v61 = vpop.permute.xlu2 %2224  ;;  %v2470_v25 = vsel %vm2460_vm3, %v2437_v15, %v1583_v20 }
 0x1e5   : > { %v2223_v24 = vpop.permute.xlu0 %2222  ;;  %v2503_v6 = vsel %vm2493_vm4, %v2470_v25, %v12186_v43  ;;  %v1012_v43 = vld [vmem:[%s11701_s13 + $0x90] sm:$0xff] }
 0x1e6   : > { %v2536_v31 = vsel %vm2526_vm5, %v2503_v6, %v1839_v16  ;;  %1101 = vst.msk [vmem:[#allocation2 + $0xf1] sm:$0xff] %vm1026_vm0, %v1012_v43 }
 0x1e7   : > { %1466 = vrot.lane.b32.xlu0 %v12066_v1, %s11258_s25 }
 0x1e9   : > { %2232 = vrot.lane.b32.xlu1 %v12335_v49, %s11262_s28 }
 0x1ea   : > { %1722 = vrot.lane.b32.xlu2 %v12271_v3, %s11260_s23 }
 0x1eb   : > { %v1967_v41 = vpop.permute.xlu1 %1966 }
 0x1ec   : > { %v12316_v38 = vpop.permute.xlu2 %1586  ;;  %v2569_v34 = vsel %vm2559_vm6, %v2536_v31, %v1967_v41 }
 0x1ed   : > { %v1585_v40 = vpop.permute.xlu0 %1584  ;;  %v2602_v44 = vsel %vm2592_vm7, %v2569_v34, %v12208_v29  ;;  %v12401_v30 = vld [vmem:[#allocation2 + $0xf1] sm:$0xff] }
 0x1ee   : > { %v2635_v47 = vsel %vm2625_vm8, %v2602_v44, %v2223_v24  ;;  %v2471_v1 = vsel %vm2460_vm3, %v2438_v62, %v1585_v40  ;;  %v12387_v24 = vld [vmem:[#allocation2 + $0xe2] sm:$0xff]  ;;  %v12417_v34 = vld [vmem:[#allocation2 + $0xf2] sm:$0xff] }
 0x1ef   : > { %1850 = vrot.lane.b32.xlu0 %v12216_v54, %s11263_s24 }
 0x1f1   : > { %1594 = vrot.lane.b32.xlu1 %v12039_v57, %s11259_s2 }
 0x1f2   : > { %v2820_v33 = vpop.f32.mrf.mxu0  ;;  %2106 = vrot.lane.b32.xlu2 %v12354_v19, %s11264_s0 }
 0x1f3   : > { %v2914_v48 = vmul.f32 %v12098_v9, %v2820_v33  ;;  %v2351_v22 = vpop.permute.xlu1 %2350  ;;  %v12420_v33 = vld [vmem:[#allocation2 + $0xf0] sm:$0xff] }
 0x1f4   : > { %v12337_v51 = vpop.permute.xlu2 %1970  ;;  %v2668_v32 = vsel %vm2658_vm9, %v2635_v47, %v2351_v22 }
 0x1f5   : > { %v2950_v55 = vadd.f32 %v12112_v14, %v2914_v48  ;;  %9562 = vmatmul.msk.f32.gmra.mxu0 %vm2693_vm10, %v2668_v32  ;;  %v1969_v29 = vpop.permute.xlu0 %1968 }
 0x1f7   : > { %v2982_v36 = vmax.f32 %v2950_v55, 0.0  ;;  %2234 = vrot.lane.b32.xlu0 %v12367_v2, %s11262_s28 }
 0x1f9   : > { %3071 = vst.msk [vmem:[#allocation3 + $0x39] sm:$0xff] %vm3011_vm11, %v2982_v36  ;;  %1978 = vrot.lane.b32.xlu1 %v12226_v56, %s11261_s26  ;;  %v1015_v36 = vld [vmem:[%s11701_s13 + $0xa8] sm:$0xff] }
 0x1fa   : > { %1468 = vrot.lane.b32.xlu2 %v12108_v13, %s11258_s25  ;;  %1104 = vst.msk [vmem:[#allocation2 + $0x111] sm:$0xff] %vm1026_vm0, %v1015_v36 }
 0x1fb   : > { %v1713_v50 = vpop.permute.xlu1 %1712 }
 0x1fc   : > { %v2355_v23 = vpop.permute.xlu2 %2354  ;;  %v2504_v35 = vsel %vm2493_vm4, %v2471_v1, %v1713_v50  ;;  %v12449_v50 = vld [vmem:[#allocation2 + $0xfa] sm:$0xff] }
 0x1fd   : > { %v2353_v60 = vpop.permute.xlu0 %2352  ;;  %v2537_v59 = vsel %vm2526_vm5, %v2504_v35, %v12275_v11 }
 0x1fe   : > { %v2570_v5 = vsel %vm2559_vm6, %v2537_v59, %v1969_v29 }
 0x1ff   : > { %1596 = vrot.lane.b32.xlu0 %v12212_v27, %s11259_s2 }
 0x200   : > { %v3357_v63 = vld [vmem:[#allocation3 + $0x32] sm:$0xff]  ;;  %v3358_v12 = vld [vmem:[#allocation3 + $0x3a] sm:$0xff] }
 0x201   : > { %9585 = vmatmul.msk.f32.vlgmr.msra.gmra.mxu3 %vm3011_vm11, %v3357_v63  ;;  %2362 = vrot.lane.b32.xlu1 %v12387_v24, %s11265_s22 }
 0x202   : > { %1852 = vrot.lane.b32.xlu2 %v12335_v49, %s11263_s24 }
 0x203   : > { %v2097_v7 = vpop.permute.xlu1 %2096 }
 0x204   : > { %v2603_v45 = vsel %vm2592_vm7, %v2570_v5, %v2097_v7  ;;  %v12371_v16 = vpop.permute.xlu2 %1716  ;;  %v2823_v17 = vpop.f32.mrf.mxu0  ;;  %v12462_v5 = vld [vmem:[#allocation2 + $0xf9] sm:$0xff] }
 0x205   : > { %v2915_v57 = vmul.f32 %v12098_v9, %v2823_v17  ;;  %v2636_v53 = vsel %vm2625_vm8, %v2603_v45, %v12303_v61  ;;  %v1715_v18 = vpop.permute.xlu0 %1714 }
 0x206   : > { %v2669_v11 = vsel %vm2658_vm9, %v2636_v53, %v2353_v60 }
 0x207   : > { %v2951_v20 = vadd.f32 %v12112_v14, %v2915_v57  ;;  %9563 = vmatmul.msk.f32.gmra.mxu0 %vm2693_vm10, %v2669_v11  ;;  %1980 = vrot.lane.b32.xlu0 %v12323_v42, %s11261_s26 }
 0x209   : > { %v2983_v15 = vmax.f32 %v2951_v20, 0.0  ;;  %9586 = vmatmul.msk.f32.gmra.mxu3 %vm3011_vm11, %v3358_v12  ;;  %1724 = vrot.lane.b32.xlu1 %v12318_v39, %s11260_s23  ;;  %v12478_v20 = vld [vmem:[#allocation2 + $0x108] sm:$0xff] }
 0x20a   : > { %2236 = vrot.lane.b32.xlu2 %v12401_v30, %s11262_s28 }
 0x20b   : > { %3072 = vst.msk [vmem:[#allocation3 + $0x49] sm:$0xff] %vm3011_vm11, %v2983_v15  ;;  %v1459_v61 = vpop.permute.xlu1 %1458 }
 0x20c   : > { %v12389_v25 = vpop.permute.xlu2 %2100  ;;  %v2439_v13 = vsel %vm1026_vm0, %v11891_v37, %v1459_v61 }
 0x20d   : > { %v2099_v28 = vpop.permute.xlu0 %2098  ;;  %v2472_v26 = vsel %vm2460_vm3, %v2439_v13, %v12316_v38 }
 0x20e   : > { %v2505_v41 = vsel %vm2493_vm4, %v2472_v26, %v1715_v18 }
 0x20f   : > { %2364 = vrot.lane.b32.xlu0 %v12417_v34, %s11265_s22 }
 0x211   : > { %2108 = vrot.lane.b32.xlu1 %v12420_v33, %s11264_s0 }
 0x212   : > { %1598 = vrot.lane.b32.xlu2 %v12226_v56, %s11259_s2  ;;  %v12445_v56 = vld [vmem:[#allocation2 + $0xf8] sm:$0xff] }
 0x213   : > { %v1843_v6 = vpop.permute.xlu1 %1842 }
 0x214   : > { %v2538_v27 = vsel %vm2526_vm5, %v2505_v41, %v1843_v6  ;;  %v12411_v37 = vpop.permute.xlu2 %1462  ;;  %v1016_v41 = vld [vmem:[%s11701_s13 + $0xb0] sm:$0xff] }
 0x215   : > { %v2571_v31 = vsel %vm2559_vm6, %v2538_v27, %v12337_v51  ;;  %v1461_v38 = vpop.permute.xlu0 %1460  ;;  %v2441_v26 = vsel %vm1026_vm0, %v11941_v4, %v12411_v37  ;;  %v1017_v27 = vld [vmem:[%s11701_s13 + $0xb8] sm:$0xff]  ;;  %1105 = vst.msk [vmem:[#allocation2 + $0x121] sm:$0xff] %vm1026_vm0, %v1016_v41 }
 0x216   : > { %v2604_v40 = vsel %vm2592_vm7, %v2571_v31, %v2099_v28  ;;  %v2440_v60 = vsel %vm1026_vm0, %v11903_v46, %v1461_v38  ;;  %1106 = vst.msk [vmem:[#allocation2 + $0x129] sm:$0xff] %vm1026_vm0, %v1017_v27  ;;  %v12513_v37 = vld [vmem:[#allocation2 + $0x10a] sm:$0xff] }
 0x217   : > { %1726 = vrot.lane.b32.xlu0 %v12354_v19, %s11260_s23 }
 0x219   : > { %1470 = vrot.lane.b32.xlu1 %v12216_v54, %s11258_s25 }
 0x21a   : > { %1982 = vrot.lane.b32.xlu2 %v12387_v24, %s11261_s26 }
 0x21b   : > { %v2227_v43 = vpop.permute.xlu1 %2226  ;;  %v2826_v44 = vpop.f32.mrf.mxu0 }
 0x21c   : > { %v2637_v47 = vsel %vm2625_vm8, %v2604_v40, %v2227_v43  ;;  %v2916_v48 = vmul.f32 %v12098_v9, %v2826_v44  ;;  %v12433_v55 = vpop.permute.xlu2 %1846 }
 0x21d   : > { %v2670_v22 = vsel %vm2658_vm9, %v2637_v47, %v2355_v23  ;;  %v1845_v29 = vpop.permute.xlu0 %1844 }
 0x21e   : > { %v2952_v51 = vadd.f32 %v12112_v14, %v2916_v48  ;;  %9564 = vmatmul.msk.f32.gmra.mxu0 %vm2693_vm10, %v2670_v22 }
 0x21f   : > { %2110 = vrot.lane.b32.xlu0 %v12445_v56, %s11264_s0 }
 0x220   : > { %v2984_v32 = vmax.f32 %v2952_v51, 0.0 }
 0x221   : > { %1854 = vrot.lane.b32.xlu1 %v12367_v2, %s11263_s24 }
 0x222   : > { %3073 = vst.msk [vmem:[#allocation3 + $0x51] sm:$0xff] %vm3011_vm11, %v2984_v32  ;;  %2366 = vrot.lane.b32.xlu2 %v12449_v50, %s11265_s22 }
 0x223   : > { %v1589_v1 = vpop.permute.xlu1 %1588 }
 0x224   : > { %v12447_v62 = vpop.permute.xlu2 %2230  ;;  %v2473_v63 = vsel %vm2460_vm3, %v2440_v60, %v1589_v1  ;;  %v12538_v1 = vld [vmem:[#allocation2 + $0x112] sm:$0xff] }
 0x225   : > { %v2229_v23 = vpop.permute.xlu0 %2228  ;;  %v2506_v17 = vsel %vm2493_vm4, %v2473_v63, %v12371_v16 }
 0x226   : > { %v2539_v11 = vsel %vm2526_vm5, %v2506_v17, %v1845_v29 }
 0x227   : > { %1472 = vrot.lane.b32.xlu0 %v12335_v49, %s11258_s25 }
 0x229   : > { %v3359_v58 = vld [vmem:[#allocation3 + $0x4a] sm:$0xff]  ;;  %v3360_v54 = vld [vmem:[#allocation3 + $0x52] sm:$0xff]  ;;  %2238 = vrot.lane.b32.xlu1 %v12462_v5, %s11262_s28 }
 0x22a   : > { %9587 = vmatmul.msk.f32.gmra.mxu3 %vm3011_vm11, %v3359_v58  ;;  %1728 = vrot.lane.b32.xlu2 %v12420_v33, %s11260_s23 }
 0x22b   : > { %v1973_v46 = vpop.permute.xlu1 %1972 }
 0x22c   : > { %v12464_v7 = vpop.permute.xlu2 %1592  ;;  %v2572_v18 = vsel %vm2559_vm6, %v2539_v11, %v1973_v46 }
 0x22d   : > { %v1591_v53 = vpop.permute.xlu0 %1590  ;;  %v2605_v49 = vsel %vm2592_vm7, %v2572_v18, %v12389_v25  ;;  %v12493_v25 = vld [vmem:[#allocation2 + $0x109] sm:$0xff] }
 0x22e   : > { %v2638_v12 = vsel %vm2625_vm8, %v2605_v49, %v2229_v23  ;;  %v2474_v40 = vsel %vm2460_vm3, %v2441_v26, %v1591_v53 }
 0x22f   : > { %1856 = vrot.lane.b32.xlu0 %v12401_v30, %s11263_s24 }
 0x231   : > { %1600 = vrot.lane.b32.xlu1 %v12323_v42, %s11259_s2 }
 0x232   : > { %v2829_v35 = vpop.f32.mrf.mxu0  ;;  %9588 = vmatmul.msk.f32.gmra.mxu3 %vm3011_vm11, %v3360_v54  ;;  %2112 = vrot.lane.b32.xlu2 %v12478_v20, %s11264_s0 }
 0x233   : > { %v2917_v59 = vmul.f32 %v12098_v9, %v2829_v35  ;;  %v2357_v15 = vpop.permute.xlu1 %2356  ;;  %v12543_v35 = vld [vmem:[#allocation2 + $0x110] sm:$0xff] }
 0x234   : > { %v12488_v16 = vpop.permute.xlu2 %1976  ;;  %v2671_v61 = vsel %vm2658_vm9, %v2638_v12, %v2357_v15  ;;  %v12571_v15 = vld [vmem:[#allocation2 + $0x120] sm:$0xff] }
 0x235   : > { %v2953_v45 = vadd.f32 %v12112_v14, %v2917_v59  ;;  %v1975_v13 = vpop.permute.xlu0 %1974  ;;  %9565 = vmatmul.msk.f32.gmra.mxu0 %vm2693_vm10, %v2671_v61  ;;  %v12574_v61 = vld [vmem:[#allocation2 + $0x122] sm:$0xff] }
 0x237   : > { %v2985_v57 = vmax.f32 %v2953_v45, 0.0  ;;  %2240 = vrot.lane.b32.xlu0 %v12493_v25, %s11262_s28 }
 0x239   : > { %3074 = vst.msk [vmem:[#allocation3 + $0x61] sm:$0xff] %vm3011_vm11, %v2985_v57  ;;  %1984 = vrot.lane.b32.xlu1 %v12417_v34, %s11261_s26 }
 0x23a   : > { %1474 = vrot.lane.b32.xlu2 %v12367_v2, %s11258_s25 }
 0x23b   : > { %v1719_v21 = vpop.permute.xlu1 %1718 }
 0x23c   : > { %v2361_v31 = vpop.permute.xlu2 %2360  ;;  %v2507_v4 = vsel %vm2493_vm4, %v2474_v40, %v1719_v21  ;;  %v12588_v21 = vld [vmem:[#allocation2 + $0x121] sm:$0xff] }
 0x23d   : > { %v2359_v2 = vpop.permute.xlu0 %2358  ;;  %v2540_v43 = vsel %vm2526_vm5, %v2507_v4, %v12433_v55  ;;  %v12529_v55 = vld [vmem:[#allocation2 + $0x111] sm:$0xff]  ;;  %v1019_v40 = vld [vmem:[%s11701_s13 + $0xc8] sm:$0xff] }
 0x23e   : > { %v2573_v44 = vsel %vm2559_vm6, %v2540_v43, %v1975_v13  ;;  %1108 = vst.msk [vmem:[#allocation2 + $0x141] sm:$0xff] %vm1026_vm0, %v1019_v40 }
 0x23f   : > { %1602 = vrot.lane.b32.xlu0 %v12387_v24, %s11259_s2 }
 0x241   : > { %2368 = vrot.lane.b32.xlu1 %v12513_v37, %s11265_s22 }
 0x242   : > { %1858 = vrot.lane.b32.xlu2 %v12462_v5, %s11263_s24 }
 0x243   : > { %v2103_v47 = vpop.permute.xlu1 %2102 }
 0x244   : > { %v2832_v28 = vpop.f32.mrf.mxu0  ;;  %v1723_v48 = vpop.permute.xlu2 %1722  ;;  %v2606_v22 = vsel %vm2592_vm7, %v2573_v44, %v2103_v47  ;;  %v12605_v47 = vld [vmem:[#allocation2 + $0x128] sm:$0xff] }
 0x245   : > { %v2918_v42 = vmul.f32 %v12098_v9, %v2832_v28  ;;  %v2639_v32 = vsel %vm2625_vm8, %v2606_v22, %v12447_v62  ;;  %v1721_v29 = vpop.permute.xlu0 %1720 }
 0x246   : > { %v2672_v24 = vsel %vm2658_vm9, %v2639_v32, %v2359_v2 }
 0x247   : > { %v2954_v6 = vadd.f32 %v12112_v14, %v2918_v42  ;;  %9566 = vmatmul.msk.f32.gmra.mxu0 %vm2693_vm10, %v2672_v24  ;;  %1986 = vrot.lane.b32.xlu0 %v12449_v50, %s11261_s26 }
 0x249   : > { %v2986_v38 = vmax.f32 %v2954_v6, 0.0  ;;  %1730 = vrot.lane.b32.xlu1 %v12445_v56, %s11260_s23 }
 0x24a   : > { %2242 = vrot.lane.b32.xlu2 %v12529_v55, %s11262_s28 }
 0x24b   : > { %3075 = vst.msk [vmem:[#allocation3 + $0x69] sm:$0xff] %vm3011_vm11, %v2986_v38  ;;  %v1465_v36 = vpop.permute.xlu1 %1464 }
 0x24c   : > { %v2107_v58 = vpop.permute.xlu2 %2106  ;;  %v2442_v54 = vsel %vm1026_vm0, %v11997_v8, %v1465_v36 }
 0x24d   : > { %v2475_v63 = vsel %vm2460_vm3, %v2442_v54, %v12464_v7 }
 0x24e   : > { %v2508_v57 = vsel %vm2493_vm4, %v2475_v63, %v1721_v29 }
 0x24f   : > { %2370 = vrot.lane.b32.xlu0 %v12538_v1, %s11265_s22 }
 0x251   : > { %2114 = vrot.lane.b32.xlu1 %v12543_v35, %s11264_s0  ;;  %v2105_v45 = vpop.permute.xlu0 %2104 }
 0x252   : > { %v3361_v51 = vld [vmem:[#allocation3 + $0x62] sm:$0xff]  ;;  %v3362_v62 = vld [vmem:[#allocation3 + $0x6a] sm:$0xff]  ;;  %1604 = vrot.lane.b32.xlu2 %v12417_v34, %s11259_s2 }
 0x253   : > { %9589 = vmatmul.msk.f32.gmra.mxu3 %vm3011_vm11, %v3361_v51  ;;  %v1849_v17 = vpop.permute.xlu1 %1848 }
 0x254   : > { %v1469_v46 = vpop.permute.xlu2 %1468  ;;  %v2541_v53 = vsel %vm2526_vm5, %v2508_v57, %v1849_v17 }
 0x255   : > { %v2574_v11 = vsel %vm2559_vm6, %v2541_v53, %v12488_v16 }
 0x256   : > { %v2607_v7 = vsel %vm2592_vm7, %v2574_v11, %v2105_v45 }
 0x257   : > { %1732 = vrot.lane.b32.xlu0 %v12478_v20, %s11260_s23 }
 0x259   : > { %1476 = vrot.lane.b32.xlu1 %v12401_v30, %s11258_s25  ;;  %v1467_v34 = vpop.permute.xlu0 %1466  ;;  %v1018_v30 = vld [vmem:[%s11701_s13 + $0xc0] sm:$0xff] }
 0x25a   : > { %1988 = vrot.lane.b32.xlu2 %v12513_v37, %s11261_s26  ;;  %1107 = vst.msk [vmem:[#allocation2 + $0x139] sm:$0xff] %vm1026_vm0, %v1018_v30  ;;  %v2443_v6 = vsel %vm1026_vm0, %v12011_v52, %v1467_v34 }
 0x25b   : > { %v2835_v23 = vpop.f32.mrf.mxu0  ;;  %9590 = vmatmul.msk.f32.gmra.mxu3 %vm3011_vm11, %v3362_v62  ;;  %v2233_v18 = vpop.permute.xlu1 %2232 }
 0x25c   : > { %v2919_v60 = vmul.f32 %v12098_v9, %v2835_v23  ;;  %v12567_v49 = vpop.permute.xlu2 %1852  ;;  %v2640_v12 = vsel %vm2625_vm8, %v2607_v7, %v2233_v18  ;;  %v2444_v23 = vsel %vm1026_vm0, %v12102_v10, %v1469_v46  ;;  %v12633_v10 = vld [vmem:[#allocation2 + $0x12a] sm:$0xff] }
 0x25d   : > { %v2673_v16 = vsel %vm2658_vm9, %v2640_v12, %v2361_v31 }
 0x25e   : > { %v2955_v59 = vadd.f32 %v12112_v14, %v2919_v60  ;;  %9567 = vmatmul.msk.f32.gmra.mxu0 %vm2693_vm10, %v2673_v16 }
 0x25f   : > { %2116 = vrot.lane.b32.xlu0 %v12571_v15, %s11264_s0 }
 0x260   : > { %v2987_v8 = vmax.f32 %v2955_v59, 0.0 }
 0x261   : > { %1860 = vrot.lane.b32.xlu1 %v12493_v25, %s11263_s24  ;;  %v1851_v13 = vpop.permute.xlu0 %1850  ;;  %v12648_v12 = vld [vmem:[#allocation2 + $0x139] sm:$0xff] }
 0x262   : > { %3076 = vst.msk [vmem:[#allocation3 + $0x79] sm:$0xff] %vm3011_vm11, %v2987_v8  ;;  %2372 = vrot.lane.b32.xlu2 %v12574_v61, %s11265_s22 }
 0x263   : > { %v1595_v28 = vpop.permute.xlu1 %1594 }
 0x264   : > { %v2237_v42 = vpop.permute.xlu2 %2236  ;;  %v2476_v27 = vsel %vm2460_vm3, %v2443_v6, %v1595_v28  ;;  %v12659_v28 = vld [vmem:[#allocation2 + $0x13a] sm:$0xff] }
 0x265   : > { %v2509_v38 = vsel %vm2493_vm4, %v2476_v27, %v1723_v48  ;;  %v1330_v6 = vld [vmem:[#allocation2 + $0x138] sm:$0xff] }
 0x267   : > { %1478 = vrot.lane.b32.xlu0 %v12462_v5, %s11258_s25  ;;  %v2542_v5 = vsel %vm2526_vm5, %v2509_v38, %v1851_v13 }
 0x269   : > { %2244 = vrot.lane.b32.xlu1 %v12588_v21, %s11262_s28  ;;  %v2235_v4 = vpop.permute.xlu0 %2234 }
 0x26a   : > { %1734 = vrot.lane.b32.xlu2 %v12543_v35, %s11260_s23 }
 0x26b   : > { %v1979_v2 = vpop.permute.xlu1 %1978 }
 0x26c   : > { %v12600_v43 = vpop.permute.xlu2 %1598  ;;  %v2575_v44 = vsel %vm2559_vm6, %v2542_v5, %v1979_v2 }
 0x26d   : > { %v2608_v48 = vsel %vm2592_vm7, %v2575_v44, %v2107_v58  ;;  %v12618_v58 = vld [vmem:[#allocation2 + $0x129] sm:$0xff] }
 0x26e   : > { %v2641_v32 = vsel %vm2625_vm8, %v2608_v48, %v2235_v4 }
 0x26f   : > { %1862 = vrot.lane.b32.xlu0 %v12529_v55, %s11263_s24 }
 0x271   : > { %1606 = vrot.lane.b32.xlu1 %v12449_v50, %s11259_s2  ;;  %v1597_v22 = vpop.permute.xlu0 %1596 }
 0x272   : > { %v2838_v26 = vpop.f32.mrf.mxu0  ;;  %2118 = vrot.lane.b32.xlu2 %v12605_v47, %s11264_s0  ;;  %v2477_v8 = vsel %vm2460_vm3, %v2444_v23, %v1597_v22 }
 0x273   : > { %v2920_v41 = vmul.f32 %v12098_v9, %v2838_v26  ;;  %v2363_v24 = vpop.permute.xlu1 %2362 }
 0x274   : > { %v1983_v29 = vpop.permute.xlu2 %1982  ;;  %v2674_v36 = vsel %vm2658_vm9, %v2641_v32, %v2363_v24 }
 0x275   : > { %v2956_v31 = vadd.f32 %v12112_v14, %v2920_v41  ;;  %9568 = vmatmul.msk.f32.gmra.mxu0 %vm2693_vm10, %v2674_v36 }
 0x277   : > { %v2988_v52 = vmax.f32 %v2956_v31, 0.0  ;;  %2246 = vrot.lane.b32.xlu0 %v12618_v58, %s11262_s28 }
 0x279   : > { %3077 = vst.msk [vmem:[#allocation3 + $0x81] sm:$0xff] %vm3011_vm11, %v2988_v52  ;;  %1990 = vrot.lane.b32.xlu1 %v12538_v1, %s11261_s26  ;;  %v1981_v54 = vpop.permute.xlu0 %1980 }
 0x27a   : > { %1480 = vrot.lane.b32.xlu2 %v12493_v25, %s11258_s25 }
 0x27b   : > { %v1725_v63 = vpop.permute.xlu1 %1724 }
 0x27c   : > { %v2367_v45 = vpop.permute.xlu2 %2366  ;;  %v2510_v57 = vsel %vm2493_vm4, %v2477_v8, %v1725_v63 }
 0x27d   : > { %v2543_v25 = vsel %vm2526_vm5, %v2510_v57, %v12567_v49 }
 0x27e   : > { %v2576_v53 = vsel %vm2559_vm6, %v2543_v25, %v1981_v54 }
 0x27f   : > { %1608 = vrot.lane.b32.xlu0 %v12513_v37, %s11259_s2  ;;  %v1020_v37 = vld [vmem:[%s11701_s13 + $0xd0] sm:$0xff] }
 0x280   : > { %v3363_v51 = vld [vmem:[#allocation3 + $0x7a] sm:$0xff]  ;;  %v3364_v59 = vld [vmem:[#allocation3 + $0x82] sm:$0xff]  ;;  %1109 = vst.msk [vmem:[#allocation2 + $0x151] sm:$0xff] %vm1026_vm0, %v1020_v37 }
 0x281   : > { %9591 = vmatmul.msk.f32.gmra.mxu3 %vm3011_vm11, %v3363_v51  ;;  %2374 = vrot.lane.b32.xlu1 %v12633_v10, %s11265_s22  ;;  %v2365_v46 = vpop.permute.xlu0 %2364 }
 0x282   : > { %1864 = vrot.lane.b32.xlu2 %v12588_v21, %s11263_s24 }
 0x283   : > { %v2109_v11 = vpop.permute.xlu1 %2108 }
 0x284   : > { %v2841_v62 = vpop.f32.mrf.mxu0  ;;  %v1729_v34 = vpop.permute.xlu2 %1728  ;;  %v2609_v7 = vsel %vm2592_vm7, %v2576_v53, %v2109_v11 }
 0x285   : > { %v2921_v50 = vmul.f32 %v12098_v9, %v2841_v62  ;;  %v2642_v18 = vsel %vm2625_vm8, %v2609_v7, %v2237_v42 }
 0x286   : > { %v2675_v49 = vsel %vm2658_vm9, %v2642_v18, %v2365_v46 }
 0x287   : > { %v2957_v60 = vadd.f32 %v12112_v14, %v2921_v50  ;;  %9569 = vmatmul.msk.f32.gmra.mxu0 %vm2693_vm10, %v2675_v49  ;;  %1992 = vrot.lane.b32.xlu0 %v12574_v61, %s11261_s26  ;;  %v12715_v25 = vld [vmem:[#allocation2 + $0x150] sm:$0xff] }
 0x289   : > { %9592 = vmatmul.msk.f32.gmra.mxu3 %vm3011_vm11, %v3364_v59  ;;  %v2989_v17 = vmax.f32 %v2957_v60, 0.0  ;;  %1736 = vrot.lane.b32.xlu1 %v12571_v15, %s11260_s23  ;;  %v1727_v16 = vpop.permute.xlu0 %1726  ;;  %v12703_v59 = vld [vmem:[#allocation2 + $0x141] sm:$0xff] }
 0x28a   : > { %2248 = vrot.lane.b32.xlu2 %v12648_v12, %s11262_s28 }
 0x28b   : > { %3078 = vst.msk [vmem:[#allocation3 + $0x91] sm:$0xff] %vm3011_vm11, %v2989_v17  ;;  %v1471_v30 = vpop.permute.xlu1 %1470 }
 0x28c   : > { %v2113_v13 = vpop.permute.xlu2 %2112  ;;  %v2445_v26 = vsel %vm1026_vm0, %v12271_v3, %v1471_v30 }
 0x28d   : > { %v2478_v31 = vsel %vm2460_vm3, %v2445_v26, %v12600_v43  ;;  %v1021_v43 = vld [vmem:[%s11701_s13 + $0xd8] sm:$0xff] }
 0x28e   : > { %v2511_v4 = vsel %vm2493_vm4, %v2478_v31, %v1727_v16  ;;  %1110 = vst.msk [vmem:[#allocation2 + $0x159] sm:$0xff] %vm1026_vm0, %v1021_v43  ;;  %v12731_v16 = vld [vmem:[#allocation2 + $0x151] sm:$0xff] }
 0x28f   : > { %2376 = vrot.lane.b32.xlu0 %v12659_v28, %s11265_s22  ;;  %v3132_v26 = vld [vmem:[#allocation3 + $0x1] sm:$0xff] }
 0x291   : > { %2120 = vrot.lane.b32.xlu1 %v1330_v6, %s11264_s0  ;;  %v2111_v38 = vpop.permute.xlu0 %2110 }
 0x292   : > { %1610 = vrot.lane.b32.xlu2 %v12538_v1, %s11259_s2 }
 0x293   : > { %v1855_v3 = vpop.permute.xlu1 %1854 }
 0x294   : > { %v1475_v40 = vpop.permute.xlu2 %1474  ;;  %v2544_v2 = vsel %vm2526_vm5, %v2511_v4, %v1855_v3 }
 0x295   : > { %v2577_v5 = vsel %vm2559_vm6, %v2544_v2, %v1983_v29  ;;  %v12688_v29 = vld [vmem:[#allocation2 + $0x140] sm:$0xff]  ;;  %v2447_v30 = vsel %vm1026_vm0, %v12354_v19, %v1475_v40  ;;  %v12748_v19 = vld [vmem:[#allocation2 + $0x152] sm:$0xff]  ;;  %v12761_v2 = vld [vmem:[#allocation11] ss:$0 sm:$0xff] }
 0x296   : > { %v2610_v44 = vsel %vm2592_vm7, %v2577_v5, %v2111_v38 }
 0x297   : > { %1738 = vrot.lane.b32.xlu0 %v12605_v47, %s11260_s23 }
 0x299   : > { %1482 = vrot.lane.b32.xlu1 %v12529_v55, %s11258_s25  ;;  %v1473_v1 = vpop.permute.xlu0 %1472  ;;  %v12691_v55 = vld [vmem:[#allocation2 + $0x142] sm:$0xff] }
 0x29a   : > { %1994 = vrot.lane.b32.xlu2 %v12633_v10, %s11261_s26  ;;  %v2446_v54 = vsel %vm1026_vm0, %v12318_v39, %v1473_v1  ;;  %v12766_v1 = vld [vmem:[#allocation13] ss:$0 sm:$0xff] }
 0x29b   : > { %v2844_v42 = vpop.f32.mrf.mxu0  ;;  %v2239_v48 = vpop.permute.xlu1 %2238 }
 0x29c   : > { %v2922_v41 = vmul.f32 %v12098_v9, %v2844_v42  ;;  %v1859_v22 = vpop.permute.xlu2 %1858  ;;  %v2643_v32 = vsel %vm2625_vm8, %v2610_v44, %v2239_v48 }
 0x29d   : > { %v2676_v24 = vsel %vm2658_vm9, %v2643_v32, %v2367_v45 }
 0x29e   : > { %v2958_v27 = vadd.f32 %v12112_v14, %v2922_v41  ;;  %9570 = vmatmul.msk.f32.gmra.mxu0 %vm2693_vm10, %v2676_v24 }
 0x29f   : > { %2122 = vrot.lane.b32.xlu0 %v12688_v29, %s11264_s0 }
 0x2a0   : > { %v2990_v52 = vmax.f32 %v2958_v27, 0.0 }
 0x2a1   : > { %1866 = vrot.lane.b32.xlu1 %v12618_v58, %s11263_s24  ;;  %v1857_v36 = vpop.permute.xlu0 %1856 }
 0x2a2   : > { %3079 = vst.msk [vmem:[#allocation3 + $0x99] sm:$0xff] %vm3011_vm11, %v2990_v52  ;;  %2378 = vrot.lane.b32.xlu2 %v12691_v55, %s11265_s22 }
 0x2a3   : > { %v1601_v62 = vpop.permute.xlu1 %1600 }
 0x2a4   : > { %v2243_v50 = vpop.permute.xlu2 %2242  ;;  %v2479_v60 = vsel %vm2460_vm3, %v2446_v54, %v1601_v62  ;;  %v12782_v62 = vld [vmem:[#allocation3 + $0x31] sm:$0xff] }
 0x2a5   : > { %v2512_v63 = vsel %vm2493_vm4, %v2479_v60, %v1729_v34  ;;  %v12789_v60 = vld [vmem:[#allocation2 + $0x159] sm:$0xff] }
 0x2a6   : > { %v2545_v39 = vsel %vm2526_vm5, %v2512_v63, %v1857_v36 }
 0x2a7   : > { %1484 = vrot.lane.b32.xlu0 %v12588_v21, %s11258_s25 }
 0x2a9   : > { %v3365_v51 = vld [vmem:[#allocation3 + $0x92] sm:$0xff]  ;;  %v3366_v23 = vld [vmem:[#allocation3 + $0x9a] sm:$0xff]  ;;  %2250 = vrot.lane.b32.xlu1 %v12703_v59, %s11262_s28  ;;  %v2241_v45 = vpop.permute.xlu0 %2240 }
 0x2aa   : > { %9593 = vmatmul.msk.f32.gmra.mxu3 %vm3011_vm11, %v3365_v51  ;;  %1740 = vrot.lane.b32.xlu2 %v1330_v6, %s11260_s23  ;;  %v12745_v6 = vld [vmem:[#allocation3 + $0x1a] sm:$0xff]  ;;  %v1023_v51 = vld [vmem:[%s11701_s13 + $0xe8] sm:$0xff] }
 0x2ab   : > { %v1985_v8 = vpop.permute.xlu1 %1984  ;;  %v10030_v27 = vpack.i.bf16 %v3132_v26, %v12745_v6  ;;  %1112 = vst.msk [vmem:[#allocation2 + $0x171] sm:$0xff] %vm1026_vm0, %v1023_v51 }
 0x2ac   : > { %v12711_v17 = vpop.permute.xlu2 %1604  ;;  %v2578_v57 = vsel %vm2559_vm6, %v2545_v39, %v1985_v8 }
 0x2ad   : > { %v2611_v46 = vsel %vm2592_vm7, %v2578_v57, %v2113_v13 }
 0x2ae   : > { %v2644_v11 = vsel %vm2625_vm8, %v2611_v46, %v2241_v45 }
 0x2af   : > { %1868 = vrot.lane.b32.xlu0 %v12648_v12, %s11263_s24 }
 0x2b1   : > { %1612 = vrot.lane.b32.xlu1 %v12574_v61, %s11259_s2  ;;  %v1603_v53 = vpop.permute.xlu0 %1602 }
 0x2b2   : > { %9594 = vmatmul.msk.f32.gmra.mxu3 %vm3011_vm11, %v3366_v23  ;;  %2124 = vrot.lane.b32.xlu2 %v12715_v25, %s11264_s0  ;;  %v2847_v21 = vpop.f32.mrf.mxu0  ;;  %v2480_v42 = vsel %vm2460_vm3, %v2447_v30, %v1603_v53  ;;  %v12784_v23 = vld [vmem:[#allocation3 + $0x30] sm:$0xff] }
 0x2b3   : > { %v2923_v34 = vmul.f32 %v12098_v9, %v2847_v21  ;;  %v2369_v7 = vpop.permute.xlu1 %2368 }
 0x2b4   : > { %v12726_v18 = vpop.permute.xlu2 %1988  ;;  %v2677_v49 = vsel %vm2658_vm9, %v2644_v11, %v2369_v7  ;;  %v12804_v11 = vld [vmem:[#allocation2 + $0x15a] sm:$0xff] }
 0x2b5   : > { %v2959_v37 = vadd.f32 %v12112_v14, %v2923_v34  ;;  %9571 = vmatmul.msk.f32.gmra.mxu0 %vm2693_vm10, %v2677_v49 }
 0x2b7   : > { %v2991_v61 = vmax.f32 %v2959_v37, 0.0  ;;  %2252 = vrot.lane.b32.xlu0 %v12731_v16, %s11262_s28 }
 0x2b9   : > { %3080 = vst.msk [vmem:[#allocation3 + $0xa9] sm:$0xff] %vm3011_vm11, %v2991_v61  ;;  %1996 = vrot.lane.b32.xlu1 %v12659_v28, %s11261_s26  ;;  %v1987_v9 = vpop.permute.xlu0 %1986 }
 0x2ba   : > { %1486 = vrot.lane.b32.xlu2 %v12618_v58, %s11258_s25 }
 0x2bb   : > { %v1731_v14 = vpop.permute.xlu1 %1730 }
 0x2bc   : > { %v12742_v13 = vpop.permute.xlu2 %2372  ;;  %v2513_v41 = vsel %vm2493_vm4, %v2480_v42, %v1731_v14 }
 0x2bd   : > { %v2546_v31 = vsel %vm2526_vm5, %v2513_v41, %v1859_v22  ;;  %v1022_v22 = vld [vmem:[%s11701_s13 + $0xe0] sm:$0xff] }
 0x2be   : > { %v2579_v38 = vsel %vm2559_vm6, %v2546_v31, %v1987_v9  ;;  %1111 = vst.msk [vmem:[#allocation2 + $0x169] sm:$0xff] %vm1026_vm0, %v1022_v22  ;;  %v3165_v31 = vld [vmem:[#allocation3 + $0xa] sm:$0xff] }
 0x2bf   : > { %1614 = vrot.lane.b32.xlu0 %v12633_v10, %s11259_s2 }
 0x2c1   : > { %2380 = vrot.lane.b32.xlu1 %v12748_v19, %s11265_s22  ;;  %v2371_v58 = vpop.permute.xlu0 %2370 }
 0x2c2   : > { %10031 = vrot.lane.b32.xlu2 %v10030_v27, %s11266_s1 }
 0x2c3   : > { %v2115_v52 = vpop.permute.xlu1 %2114 }
 0x2c4   : > { %v12758_v3 = vpop.permute.xlu2 %1734  ;;  %v2612_v40 = vsel %vm2592_vm7, %v2579_v38, %v2115_v52  ;;  %v2850_v4 = vpop.f32.mrf.mxu0  ;;  %v3133_v38 = vld [vmem:[#allocation3 + $0x9] sm:$0xff] }
 0x2c5   : > { %v2924_v10 = vmul.f32 %v12761_v2, %v2850_v4  ;;  %v2645_v5 = vsel %vm2625_vm8, %v2612_v40, %v2243_v50  ;;  %v3164_v50 = vld [vmem:[#allocation3 + $0x2] sm:$0xff]  ;;  %v12839_v40 = vld [vmem:[#allocation3 + $0x39] sm:$0xff] }
 0x2c6   : > { %v2678_v43 = vsel %vm2658_vm9, %v2645_v5, %v2371_v58  ;;  %v10035_v45 = vpack.i.bf16 %v3164_v50, %v12784_v23  ;;  %v12837_v52 = vld [vmem:[#allocation3 + $0x22] sm:$0xff]  ;;  %v12858_v50 = vld [vmem:[#allocation2 + $0x16a] sm:$0xff] }
 0x2c7   : > { %v2960_v44 = vadd.f32 %v12766_v1, %v2924_v10  ;;  %9572 = vmatmul.msk.f32.gmra.mxu0 %vm2693_vm10, %v2678_v43  ;;  %1870 = vrot.lane.b32.xlu0 %v12703_v59, %s11263_s24  ;;  %v3197_v4 = vld [vmem:[#allocation3 + $0x20] sm:$0xff]  ;;  %v10045_v5 = vpack.i.bf16 %v3133_v38, %v12837_v52 }
 0x2c8   : > { %v10055_v43 = vpack.i.bf16 %v3197_v4, %v12839_v40 }
 0x2c9   : > { %v2992_v48 = vmax.f32 %v2960_v44, 0.0  ;;  %1742 = vrot.lane.b32.xlu1 %v12688_v29, %s11260_s23  ;;  %v1733_v32 = vpop.permute.xlu0 %1732  ;;  %v3196_v29 = vld [vmem:[#allocation3 + $0x18] sm:$0xff] }
 0x2ca   : > { %1998 = vrot.lane.b32.xlu2 %v12691_v55, %s11261_s26  ;;  %v10040_v63 = vpack.i.bf16 %v3196_v29, %v12782_v62 }
 0x2cb   : > { %3081 = vst.msk [vmem:[#allocation3 + $0xb1] sm:$0xff] %vm3011_vm11, %v2992_v48  ;;  %v1477_v24 = vpop.permute.xlu1 %1476 }
 0x2cc   : > { %v12780_v36 = vpop.permute.xlu2 %2118  ;;  %v2448_v54 = vsel %vm1026_vm0, %v12420_v33, %v1477_v24  ;;  %v12856_v24 = vld [vmem:[#allocation2 + $0x168] sm:$0xff] }
 0x2cd   : > { %v2481_v8 = vsel %vm2460_vm3, %v2448_v54, %v12711_v17  ;;  %v12806_v17 = vld [vmem:[#allocation2 + $0x158] sm:$0xff] }
 0x2ce   : > { %v2514_v21 = vsel %vm2493_vm4, %v2481_v8, %v1733_v32 }
 0x2cf   : > { %10041 = vrot.lane.b32.xlu0 %v10040_v63, %s11267_s27 }
 0x2d1   : > { %10036 = vrot.lane.b32.xlu1 %v10035_v45, %s11268_s5  ;;  %v2117_v33 = vpop.permute.xlu0 %2116 }
 0x2d2   : > { %2254 = vrot.lane.b32.xlu2 %v12789_v60, %s11262_s28  ;;  %v3367_v39 = vld [vmem:[#allocation3 + $0xaa] sm:$0xff]  ;;  %v3368_v7 = vld [vmem:[#allocation3 + $0xb2] sm:$0xff] }
 0x2d3   : > { %v1861_v57 = vpop.permute.xlu1 %1860  ;;  %9595 = vmatmul.msk.f32.gmra.mxu3 %vm3011_vm11, %v3367_v39 }
 0x2d4   : > { %v12800_v46 = vpop.permute.xlu2 %1480  ;;  %v2547_v53 = vsel %vm2526_vm5, %v2514_v21, %v1861_v57  ;;  %v12875_v57 = vld [vmem:[#allocation2 + $0x169] sm:$0xff] }
 0x2d5   : > { %v2580_v34 = vsel %vm2559_vm6, %v2547_v53, %v12726_v18  ;;  %v2450_v53 = vsel %vm1026_vm0, %v12478_v20, %v12800_v46  ;;  %v12893_v20 = vld [vmem:[#allocation3 + $0x19] sm:$0xff]  ;;  %v12895_v46 = vld [vmem:[#allocation3 + $0x48] sm:$0xff] }
 0x2d6   : > { %v2613_v37 = vsel %vm2592_vm7, %v2580_v34, %v2117_v33 }
 0x2d7   : > { %2382 = vrot.lane.b32.xlu0 %v12804_v11, %s11265_s22 }
 0x2d9   : > { %2126 = vrot.lane.b32.xlu1 %v12806_v17, %s11264_s0  ;;  %v1479_v49 = vpop.permute.xlu0 %1478 }
 0x2da   : > { %1616 = vrot.lane.b32.xlu2 %v12659_v28, %s11259_s2 }
 0x2db   : > { %v2245_v61 = vpop.permute.xlu1 %2244  ;;  %v2853_v30 = vpop.f32.mrf.mxu0  ;;  %9596 = vmatmul.msk.f32.gmra.mxu3 %vm3011_vm11, %v3368_v7 }
 0x2dc   : > { %v2646_v9 = vsel %vm2625_vm8, %v2613_v37, %v2245_v61  ;;  %v2925_v18 = vmul.f32 %v12761_v2, %v2853_v30  ;;  %v12820_v14 = vpop.permute.xlu2 %1864 }
 0x2dd   : > { %v2679_v42 = vsel %vm2658_vm9, %v2646_v9, %v12742_v13  ;;  %v12833_v13 = vld [vmem:[#allocation3 + $0x38] sm:$0xff] }
 0x2de   : > { %v2961_v26 = vadd.f32 %v12766_v1, %v2925_v18  ;;  %9573 = vmatmul.msk.f32.gmra.mxu0 %vm2693_vm10, %v2679_v42  ;;  %v10050_v10 = vpack.i.bf16 %v3165_v31, %v12833_v13  ;;  %v10065_v18 = vpack.i.bf16 %v12745_v6, %v12895_v46  ;;  %v1024_v42 = vld [vmem:[%s11701_s13 + $0xf0] sm:$0xff] }
 0x2df   : > { %1744 = vrot.lane.b32.xlu0 %v12715_v25, %s11260_s23  ;;  %1113 = vst.msk [vmem:[#allocation2 + $0x181] sm:$0xff] %vm1026_vm0, %v1024_v42  ;;  %v12955_v42 = vld [vmem:[#allocation2 + $0x172] sm:$0xff] }
 0x2e0   : > { %v2993_v28 = vmax.f32 %v2961_v26, 0.0 }
 0x2e1   : > { %1488 = vrot.lane.b32.xlu1 %v12648_v12, %s11258_s25  ;;  %v1863_v41 = vpop.permute.xlu0 %1862  ;;  %v2449_v12 = vsel %vm1026_vm0, %v12445_v56, %v1479_v49  ;;  %v12887_v49 = vld [vmem:[#allocation3 + $0x32] sm:$0xff] }
 0x2e2   : > { %1872 = vrot.lane.b32.xlu2 %v12731_v16, %s11263_s24  ;;  %3082 = vst.msk [vmem:[#allocation3 + $0xc1] sm:$0xff] %vm3011_vm11, %v2993_v28  ;;  %v10060_v30 = vpack.i.bf16 %v12893_v20, %v12887_v49 }
 0x2e3   : > { %v1607_v27 = vpop.permute.xlu1 %1606 }
 0x2e4   : > { %v12835_v58 = vpop.permute.xlu2 %2248  ;;  %v2482_v25 = vsel %vm2460_vm3, %v2449_v12, %v1607_v27  ;;  %v4366_v12 = vld [vmem:[#allocation14 + $0x78] sm:$0xff] }
 0x2e5   : > { %v2515_v44 = vsel %vm2493_vm4, %v2482_v25, %v12758_v3  ;;  %v4382_v25 = vld [vmem:[#allocation14 + $0xf8] sm:$0xff]  ;;  %4483 = vmatpush.msra.mxu1 %v4366_v12  ;;  %v4373_v12 = vld [vmem:[#allocation14 + $0xb0] sm:$0xff] }
 0x2e6   : > { %v2548_v22 = vsel %vm2526_vm5, %v2515_v44, %v1863_v41  ;;  %4596 = vmatpush.msra.mxu2 %v4382_v25 }
 0x2e7   : > { %10051 = vrot.lane.b32.xlu0 %v10050_v10, %s11268_s5  ;;  %v12920_v10 = vld [vmem:[#allocation2 + $0x170] sm:$0xff] }
 0x2e9   : > { %10046 = vrot.lane.b32.xlu1 %v10045_v5, %s11266_s1  ;;  %v2247_v48 = vpop.permute.xlu0 %2246 }
 0x2ea   : > { %10056 = vrot.lane.b32.xlu2 %v10055_v43, %s11267_s27 }
 0x2eb   : > { %v1991_v56 = vpop.permute.xlu1 %1990 }
 0x2ec   : > { %v12853_v51 = vpop.permute.xlu2 %1610  ;;  %v2581_v32 = vsel %vm2559_vm6, %v2548_v22, %v1991_v56  ;;  %v4381_v56 = vld [vmem:[#allocation14 + $0xf0] sm:$0xff] }
 0x2ed   : > { %v2614_v29 = vsel %vm2592_vm7, %v2581_v32, %v12780_v36  ;;  %4597 = vmatpush.msra.mxu2 %v4381_v56  ;;  %v4355_v56 = vld [vmem:[#allocation14 + $0x20] sm:$0xff] }
 0x2ee   : > { %v2647_v63 = vsel %vm2625_vm8, %v2614_v29, %v2247_v48  ;;  %v4365_v48 = vld [vmem:[#allocation14 + $0x70] sm:$0xff]  ;;  %v12934_v29 = vld [vmem:[#allocation3 + $0x49] sm:$0xff] }
 0x2ef   : > { %2128 = vrot.lane.b32.xlu0 %v12856_v24, %s11264_s0  ;;  %4484 = vmatpush.msra.mxu1 %v4365_v48 }
 0x2f1   : > { %2000 = vrot.lane.b32.xlu1 %v12748_v19, %s11261_s26  ;;  %v1609_v54 = vpop.permute.xlu0 %1608 }
 0x2f2   : > { %2384 = vrot.lane.b32.xlu2 %v12858_v50, %s11265_s22  ;;  %v2856_v3 = vpop.f32.mrf.mxu0  ;;  %v2483_v37 = vsel %vm2460_vm3, %v2450_v53, %v1609_v54  ;;  %v4380_v54 = vld [vmem:[#allocation14 + $0xe8] sm:$0xff]  ;;  %v4378_v53 = vld [vmem:[#allocation14 + $0xd8] sm:$0xff] }
 0x2f3   : > { %v2926_v45 = vmul.f32 %v12761_v2, %v2856_v3  ;;  %v2375_v8 = vpop.permute.xlu1 %2374  ;;  %v4364_v3 = vld [vmem:[#allocation14 + $0x68] sm:$0xff]  ;;  %4598 = vmatpush.msra.mxu2 %v4380_v54  ;;  %v4354_v54 = vld [vmem:[#allocation14 + $0x18] sm:$0xff] }
 0x2f4   : > { %v12870_v39 = vpop.permute.xlu2 %1994  ;;  %v2680_v36 = vsel %vm2658_vm9, %v2647_v63, %v2375_v8  ;;  %v12936_v63 = vld [vmem:[#allocation2 + $0x171] sm:$0xff]  ;;  %4485 = vmatpush.msra.mxu1 %v4364_v3 }
 0x2f5   : > { %v2962_v33 = vadd.f32 %v12766_v1, %v2926_v45  ;;  %9574 = vmatmul.msk.f32.gmra.mxu0 %vm2693_vm10, %v2680_v36  ;;  %v4363_v8 = vld [vmem:[#allocation14 + $0x60] sm:$0xff] }
 0x2f6   : > { %v4379_v36 = vld [vmem:[#allocation14 + $0xe0] sm:$0xff]  ;;  %4486 = vmatpush.msra.mxu1 %v4363_v8 }
 0x2f7   : > { %v2994_v21 = vmax.f32 %v2962_v33, 0.0  ;;  %1490 = vrot.lane.b32.xlu0 %v12703_v59, %s11258_s25  ;;  %v4362_v33 = vld [vmem:[#allocation14 + $0x58] sm:$0xff]  ;;  %4599 = vmatpush.msra.mxu2 %v4379_v36  ;;  %v4353_v36 = vld [vmem:[#allocation14 + $0x10] sm:$0xff] }
 0x2f8   : > { %4487 = vmatpush.msra.mxu1 %v4362_v33  ;;  %v4369_v33 = vld [vmem:[#allocation14 + $0x90] sm:$0xff] }
 0x2f9   : > { %3083 = vst.msk [vmem:[#allocation3 + $0xc9] sm:$0xff] %vm3011_vm11, %v2994_v21  ;;  %2256 = vrot.lane.b32.xlu1 %v12875_v57, %s11262_s28  ;;  %v1993_v34 = vpop.permute.xlu0 %1992  ;;  %v10070_v21 = vpack.i.bf16 %v12784_v23, %v12934_v29  ;;  %4600 = vmatpush.msra.mxu2 %v4378_v53  ;;  %v12984_v53 = vld [vmem:[#allocation3 + $0x51] sm:$0xff] }
 0x2fa   : > { %1746 = vrot.lane.b32.xlu2 %v12806_v17, %s11260_s23 }
 0x2fb   : > { %v1737_v7 = vpop.permute.xlu1 %1736 }
 0x2fc   : > { %v12890_v59 = vpop.permute.xlu2 %2378  ;;  %v2516_v61 = vsel %vm2493_vm4, %v2483_v37, %v1737_v7  ;;  %v4361_v7 = vld [vmem:[#allocation14 + $0x50] sm:$0xff] }
 0x2fd   : > { %v2549_v17 = vsel %vm2526_vm5, %v2516_v61, %v12820_v14  ;;  %v4377_v37 = vld [vmem:[#allocation14 + $0xd0] sm:$0xff]  ;;  %4488 = vmatpush.msra.mxu1 %v4361_v7  ;;  %v4368_v7 = vld [vmem:[#allocation14 + $0x88] sm:$0xff] }
 0x2fe   : > { %v2582_v28 = vsel %vm2559_vm6, %v2549_v17, %v1993_v34  ;;  %4601 = vmatpush.msra.mxu2 %v4377_v37  ;;  %v4360_v17 = vld [vmem:[#allocation14 + $0x48] sm:$0xff] }
 0x2ff   : > { %10061 = vrot.lane.b32.xlu0 %v10060_v30, %s11266_s1  ;;  %4489 = vmatpush.msra.mxu1 %v4360_v17  ;;  %v4351_v17 = vld [vmem:[#allocation14] sm:$0xff] }
 0x300   : > { %v3369_v9 = vld [vmem:[#allocation3 + $0xc2] sm:$0xff]  ;;  %v3370_v5 = vld [vmem:[#allocation3 + $0xca] sm:$0xff] }
 0x301   : > { %1618 = vrot.lane.b32.xlu1 %v12691_v55, %s11259_s2  ;;  %9597 = vmatmul.msk.f32.gmra.mxu3 %vm3011_vm11, %v3369_v9  ;;  %v2377_v26 = vpop.permute.xlu0 %2376  ;;  %v4376_v9 = vld [vmem:[#allocation14 + $0xc8] sm:$0xff] }
 0x302   : > { %10066 = vrot.lane.b32.xlu2 %v10065_v18, %s11268_s5  ;;  %v12953_v18 = vld [vmem:[#allocation3 + $0x3a] sm:$0xff]  ;;  %4602 = vmatpush.msra.mxu2 %v4376_v9  ;;  %v4367_v9 = vld [vmem:[#allocation14 + $0x80] sm:$0xff] }
 0x303   : > { %v2121_v14 = vpop.permute.xlu1 %2120 }
 0x304   : > { %v2615_v41 = vsel %vm2592_vm7, %v2582_v28, %v2121_v14  ;;  %v12912_v27 = vpop.permute.xlu2 %1740  ;;  %v2859_v31 = vpop.f32.mrf.mxu0  ;;  %v12957_v28 = vld [vmem:[#allocation3 + $0x21] sm:$0xff] }
 0x305   : > { %v2927_v6 = vmul.f32 %v12761_v2, %v2859_v31  ;;  %v2648_v55 = vsel %vm2625_vm8, %v2615_v41, %v12835_v58  ;;  %v1025_v58 = vld [vmem:[%s11701_s13 + $0xf8] sm:$0xff]  ;;  %v10075_v41 = vpack.i.bf16 %v12957_v28, %v12953_v18  ;;  %s15139_s13 = sld [smem:[#allocation62_spill]] }
 0x306   : > { %v2681_v38 = vsel %vm2658_vm9, %v2648_v55, %v2377_v26  ;;  %1114 = vst.msk [vmem:[#allocation2 + $0x189] sm:$0xff] %vm1026_vm0, %v1025_v58  ;;  %v4375_v26 = vld [vmem:[#allocation14 + $0xc0] sm:$0xff]  ;;  %v4358_v31 = vld [vmem:[#allocation14 + $0x38] sm:$0xff]  ;;  %v4356_v58 = vld [vmem:[#allocation14 + $0x28] sm:$0xff] }
 0x307   : > { %v2963_v4 = vadd.f32 %v12766_v1, %v2927_v6  ;;  %9575 = vmatmul.msk.f32.gmra.mxu0 %vm2693_vm10, %v2681_v38  ;;  %2002 = vrot.lane.b32.xlu0 %v12804_v11, %s11261_s26  ;;  %v4374_v6 = vld [vmem:[#allocation14 + $0xb8] sm:$0xff]  ;;  %v4357_v38 = vld [vmem:[#allocation14 + $0x30] sm:$0xff] }
 0x308   : > { %4603 = vmatpush.msra.mxu2 %v4375_v26 }
 0x309   : > { %v2995_v43 = vmax.f32 %v2963_v4, 0.0  ;;  %1874 = vrot.lane.b32.xlu1 %v12789_v60, %s11263_s24  ;;  %9598 = vmatmul.msk.f32.gmra.mxu3 %vm3011_vm11, %v3370_v5  ;;  %v1739_v44 = vpop.permute.xlu0 %1738 }
 0x30a   : > { %2130 = vrot.lane.b32.xlu2 %v12920_v10, %s11264_s0  ;;  %4604 = vmatpush.msra.mxu2 %v4374_v6  ;;  %v13028_v6 = vld [vmem:[#allocation2 + $0x180] sm:$0xff] }
 0x30b   : > { %3084 = vst.msk [vmem:[#allocation3 + $0xd9] sm:$0xff] %vm3011_vm11, %v2995_v43  ;;  %v1483_v22 = vpop.permute.xlu1 %1482 }
 0x30c   : > { %v12932_v32 = vpop.permute.xlu2 %2124  ;;  %v2451_v45 = vsel %vm1026_vm0, %v12543_v35, %v1483_v22  ;;  %4605 = vmatpush.msra.mxu2 %v4373_v12  ;;  %v4371_v22 = vld [vmem:[#allocation14 + $0xa0] sm:$0xff] }
 0x30d   : > { %v2484_v34 = vsel %vm2460_vm3, %v2451_v45, %v12853_v51  ;;  %v4370_v45 = vld [vmem:[#allocation14 + $0x98] sm:$0xff] }
 0x30e   : > { %v2517_v61 = vsel %vm2493_vm4, %v2484_v34, %v1739_v44  ;;  %v4372_v44 = vld [vmem:[#allocation14 + $0xa8] sm:$0xff] }
 0x30f   : > { %2258 = vrot.lane.b32.xlu0 %v12936_v63, %s11262_s28  ;;  %4606 = vmatpush.msra.mxu2 %v4372_v44 }
 0x311   : > { %10071 = vrot.lane.b32.xlu1 %v10070_v21, %s11267_s27  ;;  %v2123_v35 = vpop.permute.xlu0 %2122  ;;  %4607 = vmatpush.msra.mxu2 %v4371_v22 }
 0x312   : > { %1492 = vrot.lane.b32.xlu2 %v12731_v16, %s11258_s25  ;;  %v4359_v16 = vld [vmem:[#allocation14 + $0x40] sm:$0xff] }
 0x313   : > { %v1867_v23 = vpop.permute.xlu1 %1866  ;;  %4490 = vmatpush.msra.mxu1 %v4359_v16  ;;  %4608 = vmatpush.msra.mxu2 %v4370_v45  ;;  %v12999_v16 = vld [vmem:[#allocation2 + $0x181] sm:$0xff] }
 0x314   : > { %v12950_v30 = vpop.permute.xlu2 %1486  ;;  %v2550_v51 = vsel %vm2526_vm5, %v2517_v61, %v1867_v23  ;;  %v10085_v61 = vpack.i.bf16 %v12833_v13, %v12984_v53 }
 0x315   : > { %v2583_v14 = vsel %vm2559_vm6, %v2550_v51, %v12870_v39  ;;  %4491 = vmatpush.msra.mxu1 %v4358_v31  ;;  %4609 = vmatpush.msra.mxu2 %v4369_v33  ;;  %v13024_v31 = vld [vmem:[#allocation2 + $0x182] sm:$0xff]  ;;  %v3100_v33 = vld [vmem:[#allocation3] sm:$0xff] }
 0x316   : > { %v2616_v39 = vsel %vm2592_vm7, %v2583_v14, %v2123_v35  ;;  %v12988_v35 = vld [vmem:[#allocation3 + $0x50] sm:$0xff] }
 0x317   : > { %1620 = vrot.lane.b32.xlu0 %v12748_v19, %s11259_s2  ;;  %4492 = vmatpush.msra.mxu1 %v4357_v38  ;;  %v10080_v51 = vpack.i.bf16 %v12837_v52, %v12988_v35 }
 0x318   : > { %4610 = vmatpush.msra.mxu2 %v4368_v7 }
 0x319   : > { %2386 = vrot.lane.b32.xlu1 %v12955_v42, %s11265_s22  ;;  %v1485_v55 = vpop.permute.xlu0 %1484  ;;  %4493 = vmatpush.msra.mxu1 %v4356_v58 }
 0x31a   : > { %10076 = vrot.lane.b32.xlu2 %v10075_v41, %s11266_s1  ;;  %v2452_v37 = vsel %vm1026_vm0, %v12571_v15, %v1485_v55  ;;  %4611 = vmatpush.msra.mxu2 %v4367_v9 }
 0x31b   : > { %v2251_v25 = vpop.permute.xlu1 %2250  ;;  %v2862_v19 = vpop.f32.mrf.mxu0  ;;  %4494 = vmatpush.msra.mxu1 %v4355_v56  ;;  %v13057_v56 = vld [vmem:[#allocation3 + $0x60] sm:$0xff] }
 0x31c   : > { %v2649_v4 = vsel %vm2625_vm8, %v2616_v39, %v2251_v25  ;;  %v2928_v5 = vmul.f32 %v12761_v2, %v2862_v19  ;;  %v12971_v43 = vpop.permute.xlu2 %10031 }
 0x31d   : > { %v2682_v48 = vsel %vm2658_vm9, %v2649_v4, %v12890_v59  ;;  %4495 = vmatpush.msra.mxu1 %v4354_v54  ;;  %v13063_v54 = vld [vmem:[#allocation3 + $0x61] sm:$0xff] }
 0x31e   : > { %v2964_v3 = vadd.f32 %v12766_v1, %v2928_v5  ;;  %9576 = vmatmul.msk.f32.gmra.mxu0 %vm2693_vm10, %v2682_v48 }
 0x31f   : > { %1876 = vrot.lane.b32.xlu0 %v12875_v57, %s11263_s24  ;;  %4496 = vmatpush.msra.mxu1 %v4353_v36  ;;  %v10033_v36 = vunpack.i.l.bf16 %v12971_v43 }
 0x320   : > { %v2996_v8 = vmax.f32 %v2964_v3, 0.0  ;;  %v13061_v3 = vld [vmem:[#allocation3 + $0x4a] sm:$0xff] }
 0x321   : > { %1748 = vrot.lane.b32.xlu1 %v12856_v24, %s11260_s23  ;;  %v1869_v59 = vpop.permute.xlu0 %1868  ;;  %v4352_v24 = vld [vmem:[#allocation14 + $0x8] sm:$0xff]  ;;  %v10090_v45 = vpack.i.bf16 %v12782_v62, %v13061_v3 }
 0x322   : > { %3085 = vst.msk [vmem:[#allocation3 + $0xe1] sm:$0xff] %vm3011_vm11, %v2996_v8  ;;  %2004 = vrot.lane.b32.xlu2 %v12858_v50, %s11261_s26  ;;  %4497 = vmatpush.msra.mxu1 %v4352_v24  ;;  %v2453_v8 = vsel %vm1026_vm0, %v12605_v47, %v12950_v30 }
 0x323   : > { %v1613_v21 = vpop.permute.xlu1 %1612 }
 0x324   : > { %v12986_v34 = vpop.permute.xlu2 %1998  ;;  %v2485_v23 = vsel %vm2460_vm3, %v2452_v37, %v1613_v21  ;;  %4498 = vmatpush.msra.mxu1 %v4351_v17  ;;  %v4255_v17 = vsel %vm3011_vm11, %v12893_v20, %v10033_v36 }
 0x325   : > { %v2518_v15 = vsel %vm2493_vm4, %v2485_v23, %v12912_v27 }
 0x326   : > { %v2551_v27 = vsel %vm2526_vm5, %v2518_v15, %v1869_v59  ;;  %v10034_v59 = vunpack.i.h.bf16 %v12971_v43  ;;  %v13089_v15 = vld [vmem:[#allocation2 + $0x188] sm:$0xff] }
 0x327   : > { %10086 = vrot.lane.b32.xlu0 %v10085_v61, %s11267_s27 }
 0x328   : > { %v4157_v61 = vsel %vm3011_vm11, %v3100_v33, %v10034_v59 }
 0x329   : > { %10081 = vrot.lane.b32.xlu1 %v10080_v51, %s11268_s5  ;;  %v3371_v13 = vld [vmem:[#allocation3 + $0xda] sm:$0xff]  ;;  %v2253_v52 = vpop.permute.xlu0 %2252  ;;  %v3372_v38 = vld [vmem:[#allocation3 + $0xe2] sm:$0xff] }
 0x32a   : > { %2260 = vrot.lane.b32.xlu2 %v12999_v16, %s11262_s28  ;;  %9599 = vmatmul.msk.f32.gmra.mxu3 %vm3011_vm11, %v3371_v13 }
 0x32b   : > { %v1997_v26 = vpop.permute.xlu1 %1996 }
 0x32c   : > { %v13019_v14 = vpop.permute.xlu2 %2254  ;;  %v2584_v41 = vsel %vm2559_vm6, %v2551_v27, %v1997_v26  ;;  %v13094_v27 = vld [vmem:[#allocation2 + $0x18a] sm:$0xff] }
 0x32d   : > { %v2617_v55 = vsel %vm2592_vm7, %v2584_v41, %v12932_v32 }
 0x32e   : > { %v2650_v25 = vsel %vm2625_vm8, %v2617_v55, %v2253_v52 }
 0x32f   : > { %2388 = vrot.lane.b32.xlu0 %v13024_v31, %s11265_s22 }
 0x331   : > { %2132 = vrot.lane.b32.xlu1 %v13028_v6, %s11264_s0  ;;  %v1615_v39 = vpop.permute.xlu0 %1614 }
 0x332   : > { %1622 = vrot.lane.b32.xlu2 %v12804_v11, %s11259_s2  ;;  %v2865_v12 = vpop.f32.mrf.mxu0  ;;  %9600 = vmatmul.msk.f32.gmra.mxu3 %vm3011_vm11, %v3372_v38 }
 0x333   : > { %v2929_v19 = vmul.f32 %v12761_v2, %v2865_v12  ;;  %v2381_v4 = vpop.permute.xlu1 %2380 }
 0x334   : > { %v2683_v32 = vsel %vm2658_vm9, %v2650_v25, %v2381_v4  ;;  %v13046_v5 = vpop.permute.xlu2 %1616 }
 0x335   : > { %v2965_v58 = vadd.f32 %v12766_v1, %v2929_v19  ;;  %9577 = vmatmul.msk.f32.gmra.mxu0 %vm2693_vm10, %v2683_v32  ;;  %v13112_v32 = vld [vmem:[#allocation2 + $0x189] sm:$0xff] }
 0x337   : > { %v2997_v44 = vmax.f32 %v2965_v58, 0.0  ;;  %1750 = vrot.lane.b32.xlu0 %v12920_v10, %s11260_s23  ;;  %v10095_v10 = vpack.i.bf16 %v12887_v49, %v13057_v56 }
 0x339   : > { %3086 = vst.msk [vmem:[#allocation3 + $0xf1] sm:$0xff] %vm3011_vm11, %v2997_v44  ;;  %1494 = vrot.lane.b32.xlu1 %v12789_v60, %s11258_s25  ;;  %v1871_v11 = vpop.permute.xlu0 %1870  ;;  %v10100_v60 = vpack.i.bf16 %v12895_v46, %v13063_v54  ;;  %v2486_v46 = vsel %vm2460_vm3, %v2453_v8, %v1615_v39 }
 0x33a   : > { %1878 = vrot.lane.b32.xlu2 %v12936_v63, %s11263_s24 }
 0x33b   : > { %v1743_v48 = vpop.permute.xlu1 %1742 }
 0x33c   : > { %v13059_v22 = vpop.permute.xlu2 %1872  ;;  %v2519_v30 = vsel %vm2493_vm4, %v2486_v46, %v1743_v48  ;;  %v13129_v48 = vld [vmem:[#allocation3 + $0x68] sm:$0xff] }
 0x33d   : > { %v2552_v41 = vsel %vm2526_vm5, %v2519_v30, %v1871_v11  ;;  %v13127_v11 = vld [vmem:[#allocation3 + $0x52] sm:$0xff] }
 0x33e   : > { %v2585_v38 = vsel %vm2559_vm6, %v2552_v41, %v12986_v34  ;;  %v13168_v41 = vld [vmem:[#allocation3 + $0x69] sm:$0xff] }
 0x33f   : > { %10096 = vrot.lane.b32.xlu0 %v10095_v10, %s11268_s5  ;;  %v10105_v10 = vpack.i.bf16 %v12839_v40, %v13127_v11 }
 0x341   : > { %10091 = vrot.lane.b32.xlu1 %v10090_v45, %s11266_s1  ;;  %v10042_v49 = vpop.permute.xlu0 %10041 }
 0x342   : > { %10101 = vrot.lane.b32.xlu2 %v10100_v60, %s11267_s27  ;;  %v10044_v21 = vunpack.i.h.bf16 %v10042_v49  ;;  %v10043_v24 = vunpack.i.l.bf16 %v10042_v49  ;;  %v1141_v60 = vld [vmem:[#allocation2 + $0x138] sm:$0xff] }
 0x343   : > { %v10037_v62 = vpop.permute.xlu1 %10036  ;;  %v3101_v49 = vld [vmem:[#allocation3 + $0x8] sm:$0xff] }
 0x344   : > { %v10039_v7 = vunpack.i.h.bf16 %v10037_v62  ;;  %v10038_v37 = vunpack.i.l.bf16 %v10037_v62  ;;  %v13080_v23 = vpop.permute.xlu2 %10056  ;;  %v2868_v47 = vpop.f32.mrf.mxu0 }
 0x345   : > { %v2930_v43 = vmul.f32 %v12761_v2, %v2868_v47 }
 0x346   : > { %v4190_v9 = vsel %vm4189_vm13, %v4157_v61, %v10039_v7  ;;  %v4287_v51 = vsel %vm4189_vm13, %v4255_v17, %v10038_v37 }
 0x347   : > { %v2966_v13 = vadd.f32 %v12766_v1, %v2930_v43  ;;  %v4223_v52 = vsel %vm4222_vm14, %v4190_v9, %v10044_v21  ;;  %v4319_v26 = vsel %vm4222_vm14, %v4287_v51, %v10043_v24  ;;  %2134 = vrot.lane.b32.xlu0 %v13089_v15, %s11264_s0  ;;  %v10059_v21 = vunpack.i.h.bf16 %v13080_v23  ;;  %v1338_v51 = vld [vmem:[#allocation2 + $0x198] sm:$0xff] }
 0x348   : > { %4499 = vmatmul.f32.vlgmr.msra.gmra.mxu1 %v4223_v52  ;;  %4612 = vmatmul.f32.vlgmr.msra.gmra.mxu2 %v4319_v26  ;;  %v10058_v24 = vunpack.i.l.bf16 %v13080_v23 }
 0x349   : > { %v2998_v55 = vmax.f32 %v2966_v13, 0.0  ;;  %2006 = vrot.lane.b32.xlu1 %v12955_v42, %s11261_s26  ;;  %v2383_v20 = vpop.permute.xlu0 %2382 }
 0x34a   : > { %2390 = vrot.lane.b32.xlu2 %v13094_v27, %s11265_s22 }
 0x34b   : > { %3087 = vst.msk [vmem:[#allocation3 + $0xf9] sm:$0xff] %vm3011_vm11, %v2998_v55  ;;  %v2127_v12 = vpop.permute.xlu1 %2126  ;;  %v1370_v55 = vld [vmem:[#allocation2 + $0x199] sm:$0xff] }
 0x34c   : > { %v2618_v39 = vsel %vm2592_vm7, %v2585_v38, %v2127_v12  ;;  %v13107_v25 = vpop.permute.xlu2 %2384 }
 0x34d   : > { %v2651_v19 = vsel %vm2625_vm8, %v2618_v39, %v13019_v14 }
 0x34e   : > { %v2684_v4 = vsel %vm2658_vm9, %v2651_v19, %v2383_v20 }
 0x34f   : > { %9578 = vmatmul.msk.f32.gmra.mxu0 %vm2693_vm10, %v2684_v4  ;;  %1496 = vrot.lane.b32.xlu0 %v12875_v57, %s11258_s25  ;;  %v10110_v57 = vpack.i.bf16 %v12953_v18, %v13129_v48  ;;  %v1402_v4 = vld [vmem:[#allocation2 + $0x19a] sm:$0xff] }
 0x351   : > { %2262 = vrot.lane.b32.xlu1 %v13112_v32, %s11262_s28  ;;  %v1745_v58 = vpop.permute.xlu0 %1744 }
 0x352   : > { %1752 = vrot.lane.b32.xlu2 %v13028_v6, %s11260_s23  ;;  %v13121_v34 = vld [vmem:[#allocation3 + $0xf2] sm:$0xff]  ;;  %v13139_v6 = vld [vmem:[#allocation3 + $0xfa] sm:$0xff] }
 0x353   : > { %v1489_v44 = vpop.permute.xlu1 %1488  ;;  %9601 = vmatmul.msk.f32.gmra.mxu3 %vm3011_vm11, %v13121_v34 }
 0x354   : > { %v13125_v14 = vpop.permute.xlu2 %1746  ;;  %v2454_v46 = vsel %vm1026_vm0, %v1141_v60, %v1489_v44 }
 0x355   : > { %v2487_v23 = vsel %vm2460_vm3, %v2454_v46, %v13046_v5  ;;  %v3230_v46 = vld [vmem:[#allocation3 + $0x31] sm:$0xff] }
 0x356   : > { %v2520_v52 = vsel %vm2493_vm4, %v2487_v23, %v1745_v58 }
 0x357   : > { %10106 = vrot.lane.b32.xlu0 %v10105_v10, %s11266_s1  ;;  %v2553_v5 = vsel %vm2526_vm5, %v2520_v52, %v13059_v22 }
 0x359   : > { %1624 = vrot.lane.b32.xlu1 %v12858_v50, %s11259_s2  ;;  %v10052_v45 = vpop.permute.xlu0 %10051 }
 0x35a   : > { %10111 = vrot.lane.b32.xlu2 %v10110_v57, %s11268_s5  ;;  %v10054_v40 = vunpack.i.h.bf16 %v10052_v45  ;;  %v10053_v36 = vunpack.i.l.bf16 %v10052_v45 }
 0x35b   : > { %v10047_v8 = vpop.permute.xlu1 %10046  ;;  %v2871_v59 = vpop.f32.mrf.mxu0  ;;  %9602 = vmatmul.msk.f32.gmra.mxu3 %vm3011_vm11, %v13139_v6 }
 0x35c   : > { %v10049_v18 = vunpack.i.h.bf16 %v10047_v8  ;;  %v10048_v33 = vunpack.i.l.bf16 %v10047_v8  ;;  %v2931_v50 = vmul.f32 %v12761_v2, %v2871_v59  ;;  %v13144_v62 = vpop.permute.xlu2 %10066  ;;  %v1142_v8 = vld [vmem:[#allocation2 + $0x140] sm:$0xff] }
 0x35e   : > { %v2967_v7 = vadd.f32 %v12766_v1, %v2931_v50  ;;  %v4158_v37 = vsel %vm3011_vm11, %v3101_v49, %v10049_v18  ;;  %v4256_v47 = vsel %vm3011_vm11, %v12957_v28, %v10048_v33 }
 0x35f   : > { %v4191_v30 = vsel %vm4189_vm13, %v4158_v37, %v10054_v40  ;;  %v4288_v43 = vsel %vm4189_vm13, %v4256_v47, %v10053_v36  ;;  %2008 = vrot.lane.b32.xlu0 %v13024_v31, %s11261_s26  ;;  %v13207_v40 = vld [vmem:[#allocation3 + $0x78] sm:$0xff]  ;;  %v10069_v47 = vunpack.i.h.bf16 %v13144_v62 }
 0x360   : > { %v2999_v61 = vmax.f32 %v2967_v7, 0.0  ;;  %v4224_v17 = vsel %vm4222_vm14, %v4191_v30, %v10059_v21  ;;  %v4320_v9 = vsel %vm4222_vm14, %v4288_v43, %v10058_v24  ;;  %v13209_v36 = vld [vmem:[#allocation3 + $0x79] sm:$0xff]  ;;  %v10068_v30 = vunpack.i.l.bf16 %v13144_v62 }
 0x361   : > { %4502 = vmatmul.f32.gmra.mxu1 %v4224_v17  ;;  %4615 = vmatmul.f32.gmra.mxu2 %v4320_v9  ;;  %v2129_v28 = vpop.permute.xlu0 %2128  ;;  %v10130_v21 = vpack.i.bf16 %v13057_v56, %v13209_v36  ;;  %v3102_v24 = vld [vmem:[#allocation3 + $0x18] sm:$0xff] }
 0x362   : > { %3088 = vst.msk [vmem:[#allocation3 + $0x109] sm:$0xff] %vm3011_vm11, %v2999_v61  ;;  %1880 = vrot.lane.b32.xlu1 %v12999_v16, %s11263_s24  ;;  %2136 = vrot.lane.b32.xlu2 %v1338_v51, %s11264_s0  ;;  %v10115_v16 = vpack.i.bf16 %v12988_v35, %v13168_v41  ;;  %v13186_v35 = vld [vmem:[#allocation3 + $0x62] sm:$0xff] }
 0x363   : > { %v2001_v13 = vpop.permute.xlu1 %2000  ;;  %v10120_v58 = vpack.i.bf16 %v12934_v29, %v13186_v35 }
 0x364   : > { %v13166_v26 = vpop.permute.xlu2 %2130  ;;  %v2586_v20 = vsel %vm2559_vm6, %v2553_v5, %v2001_v13  ;;  %v13238_v5 = vld [vmem:[#allocation3 + $0x80] sm:$0xff] }
 0x365   : > { %v2619_v38 = vsel %vm2592_vm7, %v2586_v20, %v2129_v28 }
 0x367   : > { %2264 = vrot.lane.b32.xlu0 %v1370_v55, %s11262_s28 }
 0x369   : > { %v1491_v31 = vpop.permute.xlu0 %1490 }
 0x36a   : > { %10116 = vrot.lane.b32.xlu1 %v10115_v16, %s11267_s27  ;;  %1498 = vrot.lane.b32.xlu2 %v12936_v63, %s11258_s25  ;;  %v2455_v33 = vsel %vm1026_vm0, %v1142_v8, %v1491_v31  ;;  %v1339_v16 = vld [vmem:[#allocation2 + $0x1a0] sm:$0xff]  ;;  %v3268_v8 = vld [vmem:[#allocation3 + $0x7a] sm:$0xff] }
 0x36b   : > { %v2257_v12 = vpop.permute.xlu1 %2256  ;;  %v1403_v31 = vld [vmem:[#allocation2 + $0x1a2] sm:$0xff] }
 0x36c   : > { %v2652_v39 = vsel %vm2625_vm8, %v2619_v38, %v2257_v12  ;;  %v13181_v22 = vpop.permute.xlu2 %1492  ;;  %v10140_v12 = vpack.i.bf16 %v13127_v11, %v13238_v5  ;;  %v3267_v11 = vld [vmem:[#allocation3 + $0x6a] sm:$0xff] }
 0x36d   : > { %v2685_v19 = vsel %vm2658_vm9, %v2652_v39, %v13107_v25 }
 0x36e   : > { %9579 = vmatmul.msk.f32.gmra.mxu0 %vm2693_vm10, %v2685_v19 }
 0x36f   : > { %1626 = vrot.lane.b32.xlu0 %v12955_v42, %s11259_s2  ;;  %s15142_s2 = sld [smem:[#allocation64_spill]] }
 0x371   : > { %v10062_v44 = vpop.permute.xlu0 %10061 }
 0x372   : > { %2392 = vrot.lane.b32.xlu1 %v1402_v4, %s11265_s22  ;;  %v2874_v63 = vpop.f32.mrf.mxu0  ;;  %10121 = vrot.lane.b32.xlu2 %v10120_v58, %s11266_s1  ;;  %v10064_v49 = vunpack.i.h.bf16 %v10062_v44  ;;  %v10063_v18 = vunpack.i.l.bf16 %v10062_v44  ;;  %v13261_v44 = vld [vmem:[#allocation3 + $0x90] sm:$0xff] }
 0x373   : > { %v2932_v10 = vmul.f32 %v12761_v2, %v2874_v63  ;;  %v1619_v25 = vpop.permute.xlu1 %1618 }
 0x374   : > { %v13195_v57 = vpop.permute.xlu2 %10076  ;;  %v4159_v37 = vsel %vm3011_vm11, %v3102_v24, %v10064_v49  ;;  %v13273_v49 = vld [vmem:[#allocation3 + $0x91] sm:$0xff] }
 0x375   : > { %v2968_v45 = vadd.f32 %v12766_v1, %v2932_v10  ;;  %v4192_v13 = vsel %vm4189_vm13, %v4159_v37, %v10069_v47  ;;  %v10135_v10 = vpack.i.bf16 %v12984_v53, %v3267_v11  ;;  %v1143_v53 = vld [vmem:[#allocation2 + $0x150] sm:$0xff] }
 0x377   : > { %v3000_v60 = vmax.f32 %v2968_v45, 0.0  ;;  %1882 = vrot.lane.b32.xlu0 %v13112_v32, %s11263_s24  ;;  %v10125_v32 = vpack.i.bf16 %v13061_v3, %v13207_v40  ;;  %v4257_v3 = vsel %vm3011_vm11, %v3230_v46, %v10063_v18  ;;  %v10155_v45 = vpack.i.bf16 %v13186_v35, %v13261_v44  ;;  %v13275_v18 = vld [vmem:[#allocation3 + $0x98] sm:$0xff] }
 0x378   : > { %v4289_v52 = vsel %vm4189_vm13, %v4257_v3, %v10068_v30  ;;  %v10160_v35 = vpack.i.bf16 %v13207_v40, %v13273_v49  ;;  %v13289_v3 = vld [vmem:[#allocation11] ss:$0 sm:$0xff] }
 0x379   : > { %3089 = vst.msk [vmem:[#allocation3 + $0x111] sm:$0xff] %vm3011_vm11, %v3000_v60  ;;  %v2003_v29 = vpop.permute.xlu0 %2002  ;;  %v3103_v30 = vld [vmem:[#allocation3 + $0x20] sm:$0xff] }
 0x37a   : > { %1754 = vrot.lane.b32.xlu1 %v13089_v15, %s11260_s23  ;;  %2010 = vrot.lane.b32.xlu2 %v13094_v27, %s11261_s26  ;;  %v2488_v15 = vsel %vm2460_vm3, %v2455_v33, %v1619_v25  ;;  %v1371_v27 = vld [vmem:[#allocation2 + $0x1a1] sm:$0xff]  ;;  %v2456_v33 = vsel %vm1026_vm0, %v1143_v53, %v13181_v22  ;;  %s15140_s23 = sld [smem:[#allocation43_spill]] }
 0x37b   : > { %v1875_v42 = vpop.permute.xlu1 %1874  ;;  %v2521_v56 = vsel %vm2493_vm4, %v2488_v15, %v13125_v14  ;;  %v10079_v15 = vunpack.i.h.bf16 %v13195_v57 }
 0x37c   : > { %v13205_v59 = vpop.permute.xlu2 %2004  ;;  %v2554_v61 = vsel %vm2526_vm5, %v2521_v56, %v1875_v42  ;;  %v3231_v56 = vld [vmem:[#allocation3 + $0x39] sm:$0xff] }
 0x37d   : > { %v2587_v55 = vsel %vm2559_vm6, %v2554_v61, %v2003_v29  ;;  %v4160_v61 = vsel %vm3011_vm11, %v3103_v30, %v10079_v15  ;;  %v3104_v30 = vld [vmem:[#allocation3 + $0x30] sm:$0xff] }
 0x37e   : > { %v2620_v39 = vsel %vm2592_vm7, %v2587_v55, %v13166_v26  ;;  %v13259_v26 = vld [vmem:[#allocation3 + $0x81] sm:$0xff] }
 0x37f   : > { %10131 = vrot.lane.b32.xlu0 %v10130_v21, %s11267_s27  ;;  %v10145_v25 = vpack.i.bf16 %v13129_v48, %v13259_v26  ;;  %v10150_v48 = vpack.i.bf16 %v13063_v54, %v3268_v8 }
 0x380   : > { %v13215_v50 = vld [vmem:[#allocation3 + $0x10a] sm:$0xff]  ;;  %v13242_v38 = vld [vmem:[#allocation3 + $0x112] sm:$0xff]  ;;  %s987_s26 = sand.u32 1, %s15140_s23  }
 0x381   : > { %9603 = vmatmul.msk.f32.gmra.mxu3 %vm3011_vm11, %v13215_v50  ;;  %v2259_v7 = vpop.permute.xlu0 %2258  ;;  %s988_s9 = scalar_lea.vmem [#allocation32], %s987_s26 }
 0x382   : > { %10126 = vrot.lane.b32.xlu1 %v10125_v32, %s11268_s5  ;;  %2266 = vrot.lane.b32.xlu2 %v1371_v27, %s11262_s28  ;;  %v2653_v19 = vsel %vm2625_vm8, %v2620_v39, %v2259_v7  ;;  %v10078_v32 = vunpack.i.l.bf16 %v13195_v57  ;;  %v10170_v27 = vpack.i.bf16 %v3267_v11, %v13275_v18  ;;  %v3270_v11 = vld [vmem:[#allocation3 + $0x92] sm:$0xff]  ;;  %s9314_s3 = sshll.u32 %s988_s9, 4  ;;  %s9315_s3 = int_to_ptr.vmem [resolvable:$true] %s9314_s3 }
 0x383   : > { %v10072_v43 = vpop.permute.xlu1 %10071 }
 0x384   : > { %v10074_v17 = vunpack.i.h.bf16 %v10072_v43  ;;  %v10073_v9 = vunpack.i.l.bf16 %v10072_v43  ;;  %v13231_v51 = vpop.permute.xlu2 %2260  ;;  %v2877_v23 = vpop.f32.mrf.mxu0 }
 0x385   : > { %v2933_v28 = vmul.f32 %v12761_v2, %v2877_v23  ;;  %v13297_v23 = vld [vmem:[#allocation3 + $0x99] sm:$0xff] }
 0x386   : > { %v4225_v62 = vsel %vm4222_vm14, %v4192_v13, %v10074_v17  ;;  %v4321_v14 = vsel %vm4222_vm14, %v4289_v52, %v10073_v9  ;;  %v4258_v17 = vsel %vm3011_vm11, %v3231_v56, %v10078_v32  ;;  %v3269_v9 = vld [vmem:[#allocation3 + $0x82] sm:$0xff] }
 0x387   : > { %v2969_v20 = vadd.f32 %v12766_v1, %v2933_v28  ;;  %4505 = vmatmul.f32.gmra.mxu1 %v4225_v62  ;;  %4618 = vmatmul.f32.gmra.mxu2 %v4321_v14  ;;  %v13299_v28 = vld [vmem:[#allocation13] ss:$0 sm:$0xff]  ;;  %v13304_v14 = vld [vmem:[#allocation3 + $0xa8] sm:$0xff] }
 0x388   : > { %2394 = vrot.lane.b32.xlu0 %v1403_v31, %s11265_s22  ;;  %v10185_v39 = vpack.i.bf16 %v3268_v8, %v13304_v14 }
 0x389   : > { %v3001_v2 = vmax.f32 %v2969_v20, 0.0  ;;  %9604 = vmatmul.msk.f32.gmra.mxu3 %vm3011_vm11, %v13242_v38  ;;  %v1621_v1 = vpop.permute.xlu0 %1620 }
 0x38a   : > { %2138 = vrot.lane.b32.xlu1 %v1339_v16, %s11264_s0  ;;  %10141 = vrot.lane.b32.xlu2 %v10140_v12, %s11268_s5  ;;  %v2489_v7 = vsel %vm2460_vm3, %v2456_v33, %v1621_v1  ;;  %v10175_v12 = vpack.i.bf16 %v13238_v5, %v13297_v23  ;;  %s15141_s0 = sld [smem:[#allocation65_spill]] }
 0x38b   : > { %3090 = vst.msk [vmem:[#allocation3 + $0x121] sm:$0xff] %vm3011_vm11, %v3001_v2  ;;  %v2387_v4 = vpop.permute.xlu1 %2386  ;;  %v10165_v2 = vpack.i.bf16 %v13168_v41, %v3269_v9 }
 0x38c   : > { %v2686_v58 = vsel %vm2658_vm9, %v2653_v19, %v2387_v4  ;;  %v13256_v63 = vpop.permute.xlu2 %1622 }
 0x38d   : > { %9580 = vmatmul.msk.f32.gmra.mxu0 %vm2693_vm10, %v2686_v58 }
 0x390   : > { %10146 = vrot.lane.b32.xlu0 %v10145_v25, %s11267_s27  ;;  %s9312_s22 = scalar_lea.hbm %s15141_s0, %s11420_s7 }
 0x391   : > { %v1877_v60 = vpop.permute.xlu0 %1876  ;;  %s9316_s11 = sshll.u32 %s9312_s22, 4  ;;  %s9317_s11 = int_to_ptr.hbm [resolvable:$true] %s9316_s11 }
 0x392   : > { %10136 = vrot.lane.b32.xlu1 %v10135_v10, %s11266_s1  ;;  %10156 = vrot.lane.b32.xlu2 %v10155_v45, %s11268_s5  ;;  %v13324_v10 = vld [vmem:[#allocation3 + $0xa9] sm:$0xff] }
 0x393   : > { %v1749_v29 = vpop.permute.xlu1 %1748  ;;  %v13327_v45 = vld [vmem:[#allocation3 + $0xb0] sm:$0xff] }
 0x394   : > { %v13271_v42 = vpop.permute.xlu2 %1878  ;;  %v2522_v43 = vsel %vm2493_vm4, %v2489_v7, %v1749_v29  ;;  %v10200_v29 = vpack.i.bf16 %v3269_v9, %v13327_v45  ;;  %v13363_v9 = vld [vmem:[#allocation3 + $0xc1] sm:$0xff] }
 0x395   : > { %v2555_v16 = vsel %vm2526_vm5, %v2522_v43, %v1877_v60  ;;  %v10180_v60 = vpack.i.bf16 %v13209_v36, %v3270_v11  ;;  %v3271_v36 = vld [vmem:[#allocation3 + $0x9a] sm:$0xff] }
 0x396   : > { %v2588_v19 = vsel %vm2559_vm6, %v2555_v16, %v13205_v59  ;;  %v10190_v59 = vpack.i.bf16 %v13261_v44, %v13324_v10  ;;  %v13345_v44 = vld [vmem:[#allocation3 + $0xc0] sm:$0xff]  ;;  %v10195_v33 = vpack.i.bf16 %v13259_v26, %v3271_v36 }
 0x397   : > { %v10215_v32 = vpack.i.bf16 %v3270_v11, %v13345_v44 }
 0x398   : > { %10161 = vrot.lane.b32.xlu0 %v10160_v35, %s11267_s27  ;;  %v13343_v35 = vld [vmem:[#allocation3 + $0xb1] sm:$0xff] }
 0x399   : > { %v10087_v21 = vpop.permute.xlu0 %10086  ;;  %v10205_v15 = vpack.i.bf16 %v13275_v18, %v13343_v35 }
 0x39a   : > { %10151 = vrot.lane.b32.xlu1 %v10150_v48, %s11266_s1  ;;  %10171 = vrot.lane.b32.xlu2 %v10170_v27, %s11268_s5  ;;  %v10089_v46 = vunpack.i.h.bf16 %v10087_v21  ;;  %v10088_v40 = vunpack.i.l.bf16 %v10087_v21 }
 0x39b   : > { %v10082_v54 = vpop.permute.xlu1 %10081  ;;  %v2880_v24 = vpop.f32.mrf.mxu0 }
 0x39c   : > { %v10084_v22 = vunpack.i.h.bf16 %v10082_v54  ;;  %v10083_v37 = vunpack.i.l.bf16 %v10082_v54  ;;  %v2934_v57 = vmul.f32 %v13289_v3, %v2880_v24  ;;  %v13292_v47 = vpop.permute.xlu2 %10101  ;;  %v1144_v24 = vld [vmem:[#allocation2 + $0x158] sm:$0xff] }
 0x39d   : > { %v10104_v56 = vunpack.i.h.bf16 %v13292_v47 }
 0x39e   : > { %v2970_v13 = vadd.f32 %v13299_v28, %v2934_v57  ;;  %v4193_v52 = vsel %vm4189_vm13, %v4160_v61, %v10084_v22  ;;  %v4290_v62 = vsel %vm4189_vm13, %v4258_v17, %v10083_v37  ;;  %v3232_v61 = vld [vmem:[#allocation3 + $0x49] sm:$0xff] }
 0x39f   : > { %v4226_v55 = vsel %vm4222_vm14, %v4193_v52, %v10089_v46  ;;  %v4322_v20 = vsel %vm4222_vm14, %v4290_v62, %v10088_v40  ;;  %v3272_v17 = vld [vmem:[#allocation3 + $0xaa] sm:$0xff] }
 0x3a0   : > { %v3002_v31 = vmax.f32 %v2970_v13, 0.0  ;;  %4508 = vmatmul.f32.gmra.mxu1 %v4226_v55  ;;  %4621 = vmatmul.f32.gmra.mxu2 %v4322_v20  ;;  %v10103_v13 = vunpack.i.l.bf16 %v13292_v47  ;;  %v3306_v20 = vld [vmem:[#allocation3 + $0xc8] sm:$0xff]  ;;  %v10220_v47 = vpack.i.bf16 %v13304_v14, %v13363_v9  ;;  %v3273_v14 = vld [vmem:[#allocation3 + $0xb2] sm:$0xff] }
 0x3a1   : > { %10176 = vrot.lane.b32.xlu0 %v10175_v12, %s11267_s27  ;;  %v2389_v1 = vpop.permute.xlu0 %2388 }
 0x3a2   : > { %3091 = vst.msk [vmem:[#allocation3 + $0x129] sm:$0xff] %vm3011_vm11, %v3002_v31  ;;  %10166 = vrot.lane.b32.xlu1 %v10165_v2, %s11266_s1  ;;  %10186 = vrot.lane.b32.xlu2 %v10185_v39, %s11268_s5 }
 0x3a3   : > { %v2133_v4 = vpop.permute.xlu1 %2132 }
 0x3a4   : > { %v2621_v41 = vsel %vm2592_vm7, %v2588_v19, %v2133_v4  ;;  %v13320_v58 = vpop.permute.xlu2 %2390  ;;  %v10230_v4 = vpack.i.bf16 %v3271_v36, %v3306_v20 }
 0x3a5   : > { %v2654_v5 = vsel %vm2625_vm8, %v2621_v41, %v13231_v51 }
 0x3a6   : > { %v2687_v25 = vsel %vm2658_vm9, %v2654_v5, %v2389_v1  ;;  %v10210_v1 = vpack.i.bf16 %v13273_v49, %v3272_v17 }
 0x3a7   : > { %9581 = vmatmul.msk.f32.gmra.mxu0 %vm2693_vm10, %v2687_v25  ;;  %v13385_v25 = vld [vmem:[#allocation3 + $0xc9] sm:$0xff] }
 0x3a9   : > { %v13334_v8 = vld [vmem:[#allocation3 + $0x122] sm:$0xff]  ;;  %10191 = vrot.lane.b32.xlu0 %v10190_v59, %s11267_s27  ;;  %v1751_v51 = vpop.permute.xlu0 %1750  ;;  %v13353_v21 = vld [vmem:[#allocation3 + $0x12a] sm:$0xff] }
 0x3aa   : > { %10181 = vrot.lane.b32.xlu1 %v10180_v60, %s11266_s1  ;;  %10201 = vrot.lane.b32.xlu2 %v10200_v29, %s11268_s5  ;;  %v10225_v29 = vpack.i.bf16 %v13297_v23, %v3273_v14 }
 0x3ab   : > { %9605 = vmatmul.msk.f32.gmra.mxu3 %vm3011_vm11, %v13334_v8  ;;  %v1495_v53 = vpop.permute.xlu1 %1494 }
 0x3ac   : > { %v13341_v48 = vpop.permute.xlu2 %1752  ;;  %v2457_v52 = vsel %vm1026_vm0, %v1144_v24, %v1495_v53  ;;  %v10235_v53 = vpack.i.bf16 %v13327_v45, %v13385_v25  ;;  %v13402_v45 = vld [vmem:[#allocation3 + $0xd9] sm:$0xff] }
 0x3ad   : > { %v2490_v19 = vsel %vm2460_vm3, %v2457_v52, %v13256_v63  ;;  %v3307_v63 = vld [vmem:[#allocation3 + $0xd8] sm:$0xff] }
 0x3ae   : > { %v2523_v49 = vsel %vm2493_vm4, %v2490_v19, %v1751_v51  ;;  %v10245_v36 = vpack.i.bf16 %v3272_v17, %v3307_v63 }
 0x3af   : > { %v2556_v60 = vsel %vm2526_vm5, %v2523_v49, %v13271_v42  ;;  %v3233_v49 = vld [vmem:[#allocation3 + $0x51] sm:$0xff] }
 0x3b1   : > { %10206 = vrot.lane.b32.xlu0 %v10205_v15, %s11267_s27  ;;  %v10097_v54 = vpop.permute.xlu0 %10096 }
 0x3b2   : > { %10196 = vrot.lane.b32.xlu1 %v10195_v33, %s11266_s1  ;;  %v2883_v27 = vpop.f32.mrf.mxu0  ;;  %10216 = vrot.lane.b32.xlu2 %v10215_v32, %s11268_s5  ;;  %v10099_v18 = vunpack.i.h.bf16 %v10097_v54  ;;  %v10098_v7 = vunpack.i.l.bf16 %v10097_v54  ;;  %v13405_v54 = vld [vmem:[#allocation3 + $0xe0] sm:$0xff] }
 0x3b3   : > { %v2935_v46 = vmul.f32 %v13289_v3, %v2883_v27  ;;  %9606 = vmatmul.msk.f32.gmra.mxu3 %vm3011_vm11, %v13353_v21  ;;  %v10092_v40 = vpop.permute.xlu1 %10091  ;;  %v3274_v27 = vld [vmem:[#allocation3 + $0xc2] sm:$0xff] }
 0x3b4   : > { %v10094_v22 = vunpack.i.h.bf16 %v10092_v40  ;;  %v10093_v37 = vunpack.i.l.bf16 %v10092_v40  ;;  %v13359_v57 = vpop.permute.xlu2 %10111  ;;  %v10240_v24 = vpack.i.bf16 %v13324_v10, %v3274_v27  ;;  %v10260_v40 = vpack.i.bf16 %v3273_v14, %v13405_v54  ;;  %v13417_v10 = vld [vmem:[#allocation3 + $0xe1] sm:$0xff] }
 0x3b5   : > { %v2971_v43 = vadd.f32 %v13299_v28, %v2935_v46  ;;  %v10250_v46 = vpack.i.bf16 %v13345_v44, %v13402_v45 }
 0x3b6   : > { %v4161_v62 = vsel %vm3011_vm11, %v3104_v30, %v10094_v22  ;;  %v4259_v55 = vsel %vm3011_vm11, %v3232_v61, %v10093_v37  ;;  %v3275_v30 = vld [vmem:[#allocation3 + $0xca] sm:$0xff]  ;;  %v10265_v61 = vpack.i.bf16 %v3306_v20, %v13417_v10  ;;  %v13433_v20 = vld [vmem:[#allocation3 + $0xf8] sm:$0xff] }
 0x3b7   : > { %v3003_v16 = vmax.f32 %v2971_v43, 0.0  ;;  %v4194_v31 = vsel %vm4189_vm13, %v4161_v62, %v10099_v18  ;;  %v4291_v2 = vsel %vm4189_vm13, %v4259_v55, %v10098_v7  ;;  %v10255_v43 = vpack.i.bf16 %v13343_v35, %v3275_v30  ;;  %v1145_v55 = vld [vmem:[#allocation2 + $0x168] sm:$0xff] }
 0x3b8   : > { %v4227_v12 = vsel %vm4222_vm14, %v4194_v31, %v10104_v56  ;;  %v4323_v39 = vsel %vm4222_vm14, %v4291_v2, %v10103_v13  ;;  %v13419_v56 = vld [vmem:[#allocation3 + $0xf0] sm:$0xff]  ;;  %v3276_v31 = vld [vmem:[#allocation3 + $0xda] sm:$0xff] }
 0x3b9   : > { %3092 = vst.msk [vmem:[#allocation3 + $0x139] sm:$0xff] %vm3011_vm11, %v3003_v16  ;;  %4511 = vmatmul.f32.gmra.mxu1 %v4227_v12  ;;  %4624 = vmatmul.f32.gmra.mxu2 %v4323_v39  ;;  %v2135_v5 = vpop.permute.xlu0 %2134  ;;  %v10275_v13 = vpack.i.bf16 %v3274_v27, %v13419_v56  ;;  %v13431_v35 = vld [vmem:[#allocation3 + $0xf1] sm:$0xff] }
 0x3ba   : > { %10211 = vrot.lane.b32.xlu1 %v10210_v1, %s11266_s1  ;;  %10221 = vrot.lane.b32.xlu0 %v10220_v47, %s11267_s27  ;;  %v10270_v1 = vpack.i.bf16 %v13363_v9, %v3276_v31  ;;  %v10280_v47 = vpack.i.bf16 %v3307_v63, %v13431_v35  ;;  %v10114_v63 = vunpack.i.h.bf16 %v13359_v57 }
 0x3bb   : > { %10231 = vrot.lane.b32.xlu2 %v10230_v4, %s11268_s5  ;;  %v2007_v41 = vpop.permute.xlu1 %2006  ;;  %v10290_v4 = vpack.i.bf16 %v3275_v30, %v13433_v20 }
 0x3bc   : > { %v13383_v11 = vpop.permute.xlu2 %2136  ;;  %v2589_v59 = vsel %vm2559_vm6, %v2556_v60, %v2007_v41  ;;  %v10113_v60 = vunpack.i.l.bf16 %v13359_v57 }
 0x3bd   : > { %v2622_v51 = vsel %vm2592_vm7, %v2589_v59, %v2135_v5  ;;  %v3105_v5 = vld [vmem:[#allocation3 + $0x38] sm:$0xff] }
 0x3c1   : > { %v1497_v15 = vpop.permute.xlu0 %1496 }
 0x3c2   : > { %10226 = vrot.lane.b32.xlu1 %v10225_v29, %s11266_s1  ;;  %10236 = vrot.lane.b32.xlu0 %v10235_v53, %s11267_s27  ;;  %v2458_v39 = vsel %vm1026_vm0, %v1145_v55, %v1497_v15 }
 0x3c3   : > { %10246 = vrot.lane.b32.xlu2 %v10245_v36, %s11268_s5  ;;  %v2263_v33 = vpop.permute.xlu1 %2262 }
 0x3c4   : > { %v2655_v42 = vsel %vm2625_vm8, %v2622_v51, %v2263_v33  ;;  %v13398_v32 = vpop.permute.xlu2 %1498 }
 0x3c5   : > { %v2688_v23 = vsel %vm2658_vm9, %v2655_v42, %v13320_v58  ;;  %v3277_v42 = vld [vmem:[#allocation3 + $0xe2] sm:$0xff] }
 0x3c6   : > { %9582 = vmatmul.msk.f32.gmra.mxu0 %vm2693_vm10, %v2688_v23  ;;  %v13456_v23 = vld [vmem:[#allocation3 + $0xf9] sm:$0xff] }
 0x3c9   : > { %v10107_v18 = vpop.permute.xlu0 %10106 }
 0x3ca   : > { %10241 = vrot.lane.b32.xlu1 %v10240_v24, %s11266_s1  ;;  %10251 = vrot.lane.b32.xlu0 %v10250_v46, %s11267_s27  ;;  %v10109_v2 = vunpack.i.h.bf16 %v10107_v18  ;;  %v10108_v12 = vunpack.i.l.bf16 %v10107_v18  ;;  %v13460_v46 = vld [vmem:[#allocation3 + $0x108] sm:$0xff]  ;;  %v10295_v18 = vpack.i.bf16 %v13405_v54, %v13456_v23 }
 0x3cb   : > { %10261 = vrot.lane.b32.xlu2 %v10260_v40, %s11268_s5  ;;  %v1625_v58 = vpop.permute.xlu1 %1624 }
 0x3cc   : > { %v2886_v7 = vpop.f32.mrf.mxu0  ;;  %v13414_v22 = vpop.permute.xlu2 %10121  ;;  %v2491_v19 = vsel %vm2460_vm3, %v2458_v39, %v1625_v58  ;;  %v4162_v9 = vsel %vm3011_vm11, %v3105_v5, %v10109_v2  ;;  %v4260_v14 = vsel %vm3011_vm11, %v3233_v49, %v10108_v12  ;;  %v10285_v58 = vpack.i.bf16 %v13385_v25, %v3277_v42 }
 0x3cd   : > { %v2936_v37 = vmul.f32 %v13289_v3, %v2886_v7  ;;  %v2524_v59 = vsel %vm2493_vm4, %v2491_v19, %v13341_v48  ;;  %v4195_v27 = vsel %vm4189_vm13, %v4162_v9, %v10114_v63  ;;  %v4292_v24 = vsel %vm4189_vm13, %v4260_v14, %v10113_v60 }
 0x3ce   : > { %v10305_v7 = vpack.i.bf16 %v3276_v31, %v13460_v46  ;;  %v10124_v49 = vunpack.i.h.bf16 %v13414_v22  ;;  %v10123_v63 = vunpack.i.l.bf16 %v13414_v22  ;;  %v3234_v22 = vld [vmem:[#allocation3 + $0x61] sm:$0xff] }
 0x3cf   : > { %v2972_v44 = vadd.f32 %v13299_v28, %v2936_v37 }
 0x3d1   : > { %v3004_v17 = vmax.f32 %v2972_v44, 0.0  ;;  %v2009_v62 = vpop.permute.xlu0 %2008 }
 0x3d2   : > { %10256 = vrot.lane.b32.xlu1 %v10255_v43, %s11266_s1  ;;  %10266 = vrot.lane.b32.xlu0 %v10265_v61, %s11267_s27 }
 0x3d3   : > { %3093 = vst.msk [vmem:[#allocation3 + $0x141] sm:$0xff] %vm3011_vm11, %v3004_v17  ;;  %10276 = vrot.lane.b32.xlu2 %v10275_v13, %s11268_s5  ;;  %v13482_v17 = vld [vmem:[#allocation3 + $0x109] sm:$0xff] }
 0x3d4   : > { %v1881_v52 = vpop.permute.xlu1 %1880  ;;  %v13429_v16 = vpop.permute.xlu2 %2010  ;;  %v13485_v13 = vld [vmem:[#allocation3 + $0x110] sm:$0xff] }
 0x3d5   : > { %v2557_v36 = vsel %vm2526_vm5, %v2524_v59, %v1881_v52  ;;  %v10310_v52 = vpack.i.bf16 %v13419_v56, %v13482_v17  ;;  %v13501_v56 = vld [vmem:[#allocation3 + $0x120] sm:$0xff] }
 0x3d6   : > { %v2590_v40 = vsel %vm2559_vm6, %v2557_v36, %v2009_v62  ;;  %v10320_v62 = vpack.i.bf16 %v3277_v42, %v13485_v13  ;;  %v10335_v9 = vpack.i.bf16 %v13121_v34, %v13501_v56  ;;  %v13521_v36 = vld [vmem:[#allocation3 + $0x121] sm:$0xff] }
 0x3d7   : > { %v2623_v30 = vsel %vm2592_vm7, %v2590_v40, %v13383_v11  ;;  %v10300_v11 = vpack.i.bf16 %v13402_v45, %v13121_v34 }
 0x3d9   : > { %v2265_v53 = vpop.permute.xlu0 %2264 }
 0x3da   : > { %10271 = vrot.lane.b32.xlu1 %v10270_v1, %s11266_s1  ;;  %10281 = vrot.lane.b32.xlu0 %v10280_v47, %s11267_s27  ;;  %v13442_v41 = vld [vmem:[#allocation3 + $0x13a] sm:$0xff]  ;;  %v13471_v37 = vld [vmem:[#allocation3 + $0x142] sm:$0xff]  ;;  %v2656_v25 = vsel %vm2625_vm8, %v2623_v30, %v2265_v53  ;;  %v13498_v1 = vld [vmem:[#allocation3 + $0x111] sm:$0xff]  ;;  %v4500_v30 = vpop.f32.mrf.mxu1 }
 0x3db   : > { %10291 = vrot.lane.b32.xlu2 %v10290_v4, %s11268_s5  ;;  %9607 = vmatmul.msk.f32.gmra.mxu3 %vm3011_vm11, %v13442_v41  ;;  %v1146_v47 = vld [vmem:[#allocation2 + $0x170] sm:$0xff]  ;;  %v10315_v4 = vpack.i.bf16 %v13417_v10, %v13139_v6  ;;  %v10325_v5 = vpack.i.bf16 %v13433_v20, %v13498_v1  ;;  %v3106_v20 = vld [vmem:[#allocation3 + $0x48] sm:$0xff] }
 0x3dc   : > { %v10117_v29 = vpop.permute.xlu1 %10116  ;;  %v13454_v15 = vpop.permute.xlu2 %2266  ;;  %v2459_v14 = vsel %vm1026_vm0, %v1146_v47, %v13398_v32  ;;  %v4163_v32 = vsel %vm3011_vm11, %v3106_v20, %v10124_v49  ;;  %v13553_v47 = vld [vmem:[#allocation16] ss:$0 sm:$0xff]  ;;  %vm5876_vm0 = vcmask 1042434  }
 0x3dd   : > { %v10119_v51 = vunpack.i.h.bf16 %v10117_v29  ;;  %v10118_v33 = vunpack.i.l.bf16 %v10117_v29 }
 0x3df   : > { %v4228_v57 = vsel %vm4222_vm14, %v4195_v27, %v10119_v51  ;;  %v4324_v48 = vsel %vm4222_vm14, %v4292_v24, %v10118_v33  ;;  %v4261_v27 = vsel %vm3011_vm11, %v3234_v22, %v10123_v63  ;;  %v13525_v24 = vld [vmem:[#allocation3 + $0x128] sm:$0xff]  ;;  %v13572_v22 = vld [vmem:[#allocation3 + $0x139] sm:$0xff] }
 0x3e0   : > { %4514 = vmatmul.f32.gmra.mxu1 %v4228_v57  ;;  %4627 = vmatmul.f32.gmra.mxu2 %v4324_v48 }
 0x3e1   : > { %v1627_v43 = vpop.permute.xlu0 %1626 }
 0x3e2   : > { %10286 = vrot.lane.b32.xlu1 %v10285_v58, %s11266_s1  ;;  %10296 = vrot.lane.b32.xlu0 %v10295_v18, %s11267_s27  ;;  %v2492_v60 = vsel %vm2460_vm3, %v2459_v14, %v1627_v43  ;;  %v10330_v18 = vpack.i.bf16 %v13431_v35, %v13215_v50  ;;  %v4726_v43 = vpop.f32.mrf.mxu3  ;;  %v13566_v14 = vld [vmem:[#allocation17] ss:$0 sm:$0xff]  ;;  %vm5882_vm3 = vcmask 1045509  }
 0x3e3   : > { %10306 = vrot.lane.b32.xlu2 %v10305_v7, %s11268_s5  ;;  %9608 = vmatmul.msk.f32.gmra.mxu3 %vm3011_vm11, %v13471_v37  ;;  %v10340_v7 = vpack.i.bf16 %v13460_v46, %v13521_v36 }
 0x3e4   : > { %v2393_v44 = vpop.permute.xlu1 %2392  ;;  %v13480_v61 = vpop.permute.xlu2 %10141 }
 0x3e5   : > { %v2689_v54 = vsel %vm2658_vm9, %v2656_v25, %v2393_v44  ;;  %v4613_v25 = vpop.f32.mrf.mxu2 }
 0x3e6   : > { %9583 = vmatmul.msk.f32.gmra.mxu0 %vm2693_vm10, %v2689_v54  ;;  %v10350_v54 = vpack.i.bf16 %v13139_v6, %v13525_v24  ;;  %v4614_v35 = vadd.f32 %v4613_v25, %v4500_v30  ;;  %v10370_v30 = vpack.i.bf16 %v13501_v56, %v13572_v22 }
 0x3e9   : > { %v1883_v12 = vpop.permute.xlu0 %1882 }
 0x3ea   : > { %10301 = vrot.lane.b32.xlu1 %v10300_v11, %s11266_s1  ;;  %10311 = vrot.lane.b32.xlu0 %v10310_v52, %s11267_s27  ;;  %v4729_v49 = vpop.f32.mrf.mxu3 }
 0x3eb   : > { %10321 = vrot.lane.b32.xlu2 %v10320_v62, %s11268_s5  ;;  %v2889_v55 = vpop.f32.mrf.mxu0 }
 0x3ec   : > { %v1755_v31 = vpop.permute.xlu1 %1754  ;;  %v2937_v2 = vmul.f32 %v13289_v3, %v2889_v55  ;;  %v13496_v39 = vpop.permute.xlu2 %10156 }
 0x3ed   : > { %v2525_v51 = vsel %vm2493_vm4, %v2492_v60, %v1755_v31  ;;  %v13546_v31 = vld [vmem:[#allocation3 + $0x129] sm:$0xff]  ;;  %v10143_v60 = vunpack.i.l.bf16 %v13480_v61  ;;  %vm5884_vm4 = vcmask 1046534  }
 0x3ee   : > { %v2973_v45 = vadd.f32 %v13299_v28, %v2937_v2  ;;  %v2558_v44 = vsel %vm2526_vm5, %v2525_v51, %v1883_v12  ;;  %v13550_v2 = vld [vmem:[#allocation3 + $0x138] sm:$0xff]  ;;  %vm5886_vm5 = vcmask 1047559  }
 0x3ef   : > { %v2591_v46 = vsel %vm2559_vm6, %v2558_v44, %v13429_v16  ;;  %v10345_v16 = vpack.i.bf16 %v13456_v23, %v13242_v38  ;;  %vm6483_vm6 = vcmask 517120  }
 0x3f0   : > { %v3005_v19 = vmax.f32 %v2973_v45, 0.0  ;;  %v4727_v45 = vadd.f32 %v4726_v43, %v4614_v35  ;;  %6486 = vst.msk [vmem:[#allocation5 + $0x18] sm:$0x3] %vm6483_vm6, %v11257_v0 }
 0x3f1   : > { %v10132_v34 = vpop.permute.xlu0 %10131  ;;  %6484 = vst.msk [vmem:[#allocation5 + $0x8] sm:$0x3] %vm6483_vm6, %v11257_v0 }
 0x3f2   : > { %3094 = vst.msk [vmem:[#allocation3 + $0x151] sm:$0xff] %vm3011_vm11, %v3005_v19  ;;  %10316 = vrot.lane.b32.xlu1 %v10315_v4, %s11266_s1  ;;  %10326 = vrot.lane.b32.xlu0 %v10325_v5, %s11267_s27  ;;  %v10134_v33 = vunpack.i.h.bf16 %v10132_v34  ;;  %v10133_v42 = vunpack.i.l.bf16 %v10132_v34  ;;  %v10355_v19 = vpack.i.bf16 %v13485_v13, %v13546_v31  ;;  %v4503_v4 = vpop.f32.mrf.mxu1  ;;  %v10365_v5 = vpack.i.bf16 %v13215_v50, %v13550_v2  ;;  %v3107_v34 = vld [vmem:[#allocation3 + $0x50] sm:$0xff] }
 0x3f3   : > { %10336 = vrot.lane.b32.xlu2 %v10335_v9, %s11268_s5  ;;  %v4826_v9 = vmul.f32 %v13553_v47, %v4727_v45  ;;  %v10144_v50 = vunpack.i.h.bf16 %v13480_v61  ;;  %6488 = vst.msk [vmem:[#allocation5 + $0x28] sm:$0x3] %vm6483_vm6, %v11257_v0 }
 0x3f4   : > { %v10127_v10 = vpop.permute.xlu1 %10126  ;;  %v13518_v53 = vpop.permute.xlu2 %10171  ;;  %6490 = vst.msk [vmem:[#allocation5 + $0x38] sm:$0x3] %vm6483_vm6, %v11257_v0 }
 0x3f5   : > { %v10129_v59 = vunpack.i.h.bf16 %v10127_v10  ;;  %v10128_v29 = vunpack.i.l.bf16 %v10127_v10  ;;  %6492 = vst.msk [vmem:[#allocation5 + $0x48] sm:$0x3] %vm6483_vm6, %v11257_v0 }
 0x3f6   : > { %6494 = vst.msk [vmem:[#allocation5 + $0x58] sm:$0x3] %vm6483_vm6, %v11257_v0 }
 0x3f7   : > { %v4196_v57 = vsel %vm4189_vm13, %v4163_v32, %v10129_v59  ;;  %v4293_v48 = vsel %vm4189_vm13, %v4261_v27, %v10128_v29  ;;  %v3235_v32 = vld [vmem:[#allocation3 + $0x69] sm:$0xff]  ;;  %v4862_v27 = vadd.f32 %v13566_v14, %v4826_v9  ;;  %v3108_v9 = vld [vmem:[#allocation3 + $0x60] sm:$0xff]  ;;  %6496 = vst.msk [vmem:[#allocation5 + $0x68] sm:$0x3] %vm6483_vm6, %v11257_v0 }
 0x3f8   : > { %v4229_v40 = vsel %vm4222_vm14, %v4196_v57, %v10134_v33  ;;  %v4325_v58 = vsel %vm4222_vm14, %v4293_v48, %v10133_v42  ;;  %v13576_v42 = vld [vmem:[#allocation3 + $0x140] sm:$0xff]  ;;  %6498 = vst.msk [vmem:[#allocation5 + $0x78] sm:$0x3] %vm6483_vm6, %v11257_v0 }
 0x3f9   : > { %4517 = vmatmul.f32.gmra.mxu1 %v4229_v40  ;;  %4630 = vmatmul.f32.gmra.mxu2 %v4325_v58  ;;  %v10380_v44 = vpack.i.bf16 %v13242_v38, %v13576_v42  ;;  %6500 = vst.msk [vmem:[#allocation5 + $0x88] sm:$0x3] %vm6483_vm6, %v11257_v0 }
 0x3fa   : > { %10331 = vrot.lane.b32.xlu1 %v10330_v18, %s11266_s1  ;;  %10341 = vrot.lane.b32.xlu0 %v10340_v7, %s11267_s27  ;;  %v2395_v62 = vpop.permute.xlu0 %2394  ;;  %v10360_v7 = vpack.i.bf16 %v13482_v17, %v13334_v8  ;;  %6502 = vst.msk [vmem:[#allocation5 + $0x98] sm:$0x3] %vm6483_vm6, %v11257_v0 }
 0x3fb   : > { %10351 = vrot.lane.b32.xlu2 %v10350_v54, %s11268_s5 }
 0x3fc   : > { %v2139_v11 = vpop.permute.xlu1 %2138  ;;  %v13544_v55 = vpop.permute.xlu2 %10186 }
 0x3fd   : > { %v2624_v52 = vsel %vm2592_vm7, %v2591_v46, %v2139_v11  ;;  %v4732_v46 = vpop.f32.mrf.mxu3  ;;  %v13592_v11 = vmax.f32 %v4862_v27, 0.0  ;;  %vm7278_vm7 = vcmask 521216  }
 0x3fe   : > { %v2657_v6 = vsel %vm2625_vm8, %v2624_v52, %v13454_v15  ;;  %v4616_v15 = vpop.f32.mrf.mxu2  ;;  %v10375_v52 = vpack.i.bf16 %v13498_v1, %v13353_v21  ;;  %7279 = vst.msk [vmem:[#allocation6] sm:$0x3f] %vm7278_vm7, %v11257_v0  ;;  %vm7334_vm8 = vcmask 519168  }
 0x3ff   : > { %v2690_v12 = vsel %vm2658_vm9, %v2657_v6, %v2395_v62  ;;  %v4617_v57 = vadd.f32 %v4616_v15, %v4503_v4  ;;  %v10158_v4 = vunpack.i.l.bf16 %v13496_v39  ;;  %v4959_v27 = vrot.slane %v13592_v11, 4  ;;  %7280 = vst.msk [vmem:[#allocation6 + $0x8] sm:$0x3f] %vm7278_vm7, %v11257_v0 }
 0x400   : > { %9584 = vmatmul.msk.f32.gmra.mxu0 %vm2693_vm10, %v2690_v12  ;;  %7284 = vst.msk [vmem:[#allocation6 + $0x28] sm:$0x3f] %vm7278_vm7, %v11257_v0  ;;  %vm9301_vm9 = vcmask 73728  }
 0x401   : > { %v4730_v17 = vadd.f32 %v4729_v49, %v4617_v57  ;;  %v4960_v57 = vrot.slane %v13592_v11, 6  ;;  %7281 = vst.msk [vmem:[#allocation6 + $0x10] sm:$0x3f] %vm7278_vm7, %v11257_v0 }
 0x402   : > { %10346 = vrot.lane.b32.xlu1 %v10345_v16, %s11266_s1  ;;  %10356 = vrot.lane.b32.xlu0 %v10355_v19, %s11267_s27  ;;  %v10147_v13 = vpop.permute.xlu0 %10146  ;;  %v13598_v16 = vld [vmem:[#allocation3 + $0x141] sm:$0xff]  ;;  %v10159_v19 = vunpack.i.h.bf16 %v13496_v39  ;;  %7282 = vst.msk [vmem:[#allocation6 + $0x18] sm:$0x3f] %vm7278_vm7, %v11257_v0 }
 0x403   : > { %10366 = vrot.lane.b32.xlu2 %v10365_v5, %s11268_s5  ;;  %v10149_v59 = vunpack.i.h.bf16 %v10147_v13  ;;  %v10148_v29 = vunpack.i.l.bf16 %v10147_v13  ;;  %7283 = vst.msk [vmem:[#allocation6 + $0x20] sm:$0x3f] %vm7278_vm7, %v11257_v0 }
 0x404   : > { %v10137_v23 = vpop.permute.xlu1 %10136  ;;  %v13568_v20 = vpop.permute.xlu2 %10201 }
 0x405   : > { %v10139_v63 = vunpack.i.h.bf16 %v10137_v23  ;;  %v10138_v10 = vunpack.i.l.bf16 %v10137_v23  ;;  %v4506_v61 = vpop.f32.mrf.mxu1  ;;  %v3236_v23 = vld [vmem:[#allocation3 + $0x79] sm:$0xff] }
 0x407   : > { %v4164_v51 = vsel %vm3011_vm11, %v3107_v34, %v10139_v63  ;;  %v4262_v33 = vsel %vm3011_vm11, %v3235_v32, %v10138_v10  ;;  %v4827_v34 = vmul.f32 %v13553_v47, %v4730_v17  ;;  %v10173_v17 = vunpack.i.l.bf16 %v13518_v53 }
 0x408   : > { %v4197_v48 = vsel %vm4189_vm13, %v4164_v51, %v10144_v50  ;;  %v4294_v40 = vsel %vm4189_vm13, %v4262_v33, %v10143_v60  ;;  %v13607_v50 = vld [vmem:[#allocation3 + $0x150] sm:$0xff]  ;;  %v4958_v60 = vrot.slane %v13592_v11, 2 }
 0x409   : > { %v4230_v58 = vsel %vm4222_vm14, %v4197_v48, %v10149_v59  ;;  %v4326_v18 = vsel %vm4222_vm14, %v4294_v40, %v10148_v29  ;;  %v10385_v29 = vpack.i.bf16 %v13525_v24, %v13598_v16  ;;  %v10395_v48 = vpack.i.bf16 %v13334_v8, %v13607_v50 }
 0x40a   : > { %4520 = vmatmul.f32.gmra.mxu1 %v4230_v58  ;;  %4633 = vmatmul.f32.gmra.mxu2 %v4326_v18  ;;  %v4619_v25 = vpop.f32.mrf.mxu2  ;;  %v2892_v54 = vpop.f32.mrf.mxu0  ;;  %v9617_v24 = vrot.slane %v13592_v11, 9  ;;  %v9618_v58 = vrot.slane %v4958_v60, 9  ;;  %v4863_v18 = vadd.f32 %v13566_v14, %v4827_v34 }
 0x40b   : > { %10361 = vrot.lane.b32.xlu1 %v10360_v7, %s11266_s1  ;;  %v4620_v43 = vadd.f32 %v4619_v25, %v4506_v61  ;;  %10371 = vrot.lane.b32.xlu0 %v10370_v30, %s11267_s27  ;;  %v2938_v35 = vmul.f32 %v13289_v3, %v2892_v54  ;;  %v10162_v45 = vpop.permute.xlu0 %10161  ;;  %v9619_v25 = vrot.slane %v4959_v27, 9 }
 0x40c   : > { %10381 = vrot.lane.b32.xlu2 %v10380_v44, %s11268_s5  ;;  %v10152_v56 = vpop.permute.xlu1 %10151  ;;  %v10164_v5 = vunpack.i.h.bf16 %v10162_v45  ;;  %v10163_v15 = vunpack.i.l.bf16 %v10162_v45  ;;  %v13602_v49 = vpop.permute.xlu2 %10216  ;;  %v9620_v44 = vrot.slane %v4960_v57, 9 }
 0x40d   : > { %v4733_v62 = vadd.f32 %v4732_v46, %v4620_v43  ;;  %v2974_v38 = vadd.f32 %v13299_v28, %v2938_v35  ;;  %v10154_v6 = vunpack.i.h.bf16 %v10152_v56  ;;  %v10153_v12 = vunpack.i.l.bf16 %v10152_v56  ;;  %v13631_v43 = vld [vmem:[#allocation3 + $0x151] sm:$0xff] }
 0x40e   : > { %v13634_v35 = vmax.f32 %v13592_v11, %v9617_v24  ;;  %v10174_v46 = vunpack.i.h.bf16 %v13518_v53  ;;  %v10390_v53 = vpack.i.bf16 %v13521_v36, %v13442_v41  ;;  %v3110_v24 = vld [vmem:[#allocation3 + $0x78] sm:$0xff] }
 0x40f   : > { %v4828_v1 = vmul.f32 %v13553_v47, %v4733_v62  ;;  %v3006_v63 = vmax.f32 %v2974_v38, 0.0  ;;  %v4165_v10 = vsel %vm3011_vm11, %v3108_v9, %v10154_v6  ;;  %v4263_v13 = vsel %vm3011_vm11, %v3236_v23, %v10153_v12 }
 0x410   : > { %v4198_v59 = vsel %vm4189_vm13, %v4165_v10, %v10159_v19  ;;  %v4295_v39 = vsel %vm4189_vm13, %v4263_v13, %v10158_v4  ;;  %v13648_v4 = vmax.f32 %v4863_v18, 0.0  ;;  %v13656_v9 = vmax.f32 %v4958_v60, %v9618_v58 }
 0x411   : > { %v4864_v32 = vadd.f32 %v13566_v14, %v4828_v1  ;;  %3095 = vst.msk [vmem:[#allocation3 + $0x159] sm:$0xff] %vm3011_vm11, %v3006_v63  ;;  %v4231_v51 = vsel %vm4222_vm14, %v4198_v59, %v10164_v5  ;;  %v4327_v33 = vsel %vm4222_vm14, %v4295_v39, %v10163_v15  ;;  %v10400_v15 = vpack.i.bf16 %v13550_v2, %v13631_v43 }
 0x412   : > { %4523 = vmatmul.f32.gmra.mxu1 %v4231_v51  ;;  %4636 = vmatmul.f32.gmra.mxu2 %v4327_v33  ;;  %v13662_v63 = vmax.f32 %v4959_v27, %v9619_v25  ;;  %v13664_v10 = vmax.f32 %v4960_v57, %v9620_v44  ;;  %v10405_v2 = vpack.i.bf16 %v13546_v31, %v13471_v37  ;;  %v4962_v34 = vrot.slane %v13648_v4, 4  ;;  %v3238_v25 = vld [vmem:[#allocation3 + $0x91] sm:$0xff] }
 0x413   : > { %v13624_v40 = vmax.f32 %v4864_v32, 0.0  ;;  %10376 = vrot.lane.b32.xlu1 %v10375_v52, %s11266_s1  ;;  %10386 = vrot.lane.b32.xlu0 %v10385_v29, %s11267_s27  ;;  %v10177_v30 = vpop.permute.xlu0 %10176  ;;  %v3109_v52 = vld [vmem:[#allocation3 + $0x68] sm:$0xff]  ;;  %v4961_v29 = vrot.slane %v13648_v4, 2  ;;  %v10189_v31 = vunpack.i.h.bf16 %v13544_v55  ;;  %v4963_v58 = vrot.slane %v13648_v4, 6 }
 0x414   : > { %10396 = vrot.lane.b32.xlu2 %v10395_v48, %s11268_s5  ;;  %v10167_v61 = vpop.permute.xlu1 %10166  ;;  %v10179_v62 = vunpack.i.h.bf16 %v10177_v30  ;;  %v10178_v38 = vunpack.i.l.bf16 %v10177_v30  ;;  %v10188_v18 = vunpack.i.l.bf16 %v13544_v55 }
 0x415   : > { %v4964_v7 = vrot.slane %v13624_v40, 2  ;;  %v10169_v8 = vunpack.i.h.bf16 %v10167_v61  ;;  %v10168_v54 = vunpack.i.l.bf16 %v10167_v61  ;;  %v4965_v56 = vrot.slane %v13624_v40, 4  ;;  %v13639_v6 = vpop.permute.xlu2 %10231 }
 0x416   : > { %v9681_v36 = vrot.slane %v13624_v40, 9  ;;  %v4966_v13 = vrot.slane %v13624_v40, 6 }
 0x417   : > { %v4166_v12 = vsel %vm3011_vm11, %v3109_v52, %v10169_v8  ;;  %v4264_v45 = vsel %vm3011_vm11, %v13259_v26, %v10168_v54  ;;  %v9682_v5 = vrot.slane %v4964_v7, 9  ;;  %v9683_v60 = vrot.slane %v4965_v56, 9 }
 0x418   : > { %v13644_v19 = vld [vmem:[#allocation3 + $0x152] sm:$0xff]  ;;  %v4199_v26 = vsel %vm4189_vm13, %v4166_v12, %v10174_v46  ;;  %v4296_v23 = vsel %vm4189_vm13, %v4264_v45, %v10173_v17  ;;  %v5598_v30 = vmax.f32 %v13624_v40, %v9681_v36  ;;  %v9684_v44 = vrot.slane %v4966_v13, 9  ;;  %v13686_v17 = vld [vmem:[#allocation3 + $0x15a] sm:$0xff] }
 0x419   : > { %v13646_v11 = vld [vmem:[#allocation3 + $0x158] sm:$0xff]  ;;  %9609 = vmatmul.msk.f32.gmra.mxu3 %vm3011_vm11, %v13644_v19  ;;  %v4232_v59 = vsel %vm4222_vm14, %v4199_v26, %v10179_v62  ;;  %v5599_v32 = vmax.f32 %v4964_v7, %v9682_v5  ;;  %v5600_v8 = vmax.f32 %v4965_v56, %v9683_v60  ;;  %v9621_v52 = vrot.slane %v13648_v4, 9 }
 0x41a   : > { %v10410_v1 = vpack.i.bf16 %v13353_v21, %v13646_v11  ;;  %v4328_v21 = vsel %vm4222_vm14, %v4296_v23, %v10178_v38  ;;  %4526 = vmatmul.f32.gmra.mxu1 %v4232_v59  ;;  %v13678_v61 = vld [vmem:[#allocation3 + $0x159] sm:$0xff]  ;;  %v9622_v40 = vrot.slane %v4961_v29, 9  ;;  %v9623_v56 = vrot.slane %v4962_v34, 9 }
 0x41b   : > { %10391 = vrot.lane.b32.xlu1 %v10390_v53, %s11266_s1  ;;  %10401 = vrot.lane.b32.xlu0 %v10400_v15, %s11267_s27  ;;  %v10192_v33 = vpop.permute.xlu0 %10191  ;;  %v5663_v62 = vmax.f32 %v13656_v9, %v5599_v32  ;;  %v10415_v55 = vpack.i.bf16 %v13576_v42, %v13678_v61  ;;  %v9624_v53 = vrot.slane %v4963_v58, 9  ;;  %v5662_v15 = vmax.f32 %v13634_v35, %v5598_v30 }
 0x41c   : > { %v10182_v39 = vpop.permute.xlu1 %10181  ;;  %10411 = vrot.lane.b32.xlu2 %v10410_v1, %s11268_s5  ;;  %4639 = vmatmul.f32.gmra.mxu2 %v4328_v21  ;;  %v10194_v57 = vunpack.i.h.bf16 %v10192_v33  ;;  %v10193_v48 = vunpack.i.l.bf16 %v10192_v33  ;;  %v10204_v26 = vunpack.i.h.bf16 %v13568_v20  ;;  %v5601_v23 = vmax.f32 %v4966_v13, %v9684_v44  ;;  %v4735_v21 = vpop.f32.mrf.mxu3  ;;  %v3111_v13 = vld [vmem:[#allocation3 + $0x80] sm:$0xff] }
 0x41d   : > { %v10184_v51 = vunpack.i.h.bf16 %v10182_v39  ;;  %v10183_v27 = vunpack.i.l.bf16 %v10182_v39  ;;  %v13699_v12 = vpop.permute.xlu2 %10246  ;;  %v4509_v42 = vpop.f32.mrf.mxu1  ;;  %v5664_v1 = vmax.f32 %v13662_v63, %v5600_v8  ;;  %v5811_v39 = vperm.slane %v5663_v62, 0 }
 0x41e   : > { %v10203_v33 = vunpack.i.l.bf16 %v13568_v20  ;;  %v5810_v63 = vperm.slane %v5662_v15, 0  ;;  %v5665_v20 = vmax.f32 %v13664_v10, %v5601_v23  ;;  %v5348_v10 = vmax.f32 %v4962_v34, %v9623_v56 }
 0x41f   : > { %v4167_v7 = vsel %vm3011_vm11, %v3110_v24, %v10184_v51  ;;  %v4265_v46 = vsel %vm3011_vm11, %v3238_v25, %v10183_v27  ;;  %v10218_v15 = vunpack.i.l.bf16 %v13602_v49  ;;  %v10234_v34 = vunpack.i.h.bf16 %v13639_v6 }
 0x420   : > { %v4200_v54 = vsel %vm4189_vm13, %v4167_v7, %v10189_v31  ;;  %v4297_v38 = vsel %vm4189_vm13, %v4265_v46, %v10188_v18  ;;  %v5812_v7 = vperm.slane %v5664_v1, 0  ;;  %v5875_v8 = vsel %vm5874_vm15, %v5811_v39, %v5810_v63 }
 0x421   : > { %9610 = vmatmul.msk.f32.gmra.mxu3 %vm3011_vm11, %v13686_v17  ;;  %v4233_v45 = vsel %vm4222_vm14, %v4200_v54, %v10194_v57  ;;  %v4329_v5 = vsel %vm4222_vm14, %v4297_v38, %v10193_v48  ;;  %v3239_v48 = vld [vmem:[#allocation3 + $0x99] sm:$0xff]  ;;  %v10420_v46 = vpack.i.bf16 %v13572_v22, %v13644_v19 }
 0x422   : > { %4529 = vmatmul.f32.gmra.mxu1 %v4233_v45  ;;  %v5347_v45 = vmax.f32 %v4961_v29, %v9622_v40  ;;  %v5877_v22 = vsel %vm5876_vm0, %v5812_v7, %v5875_v8  ;;  %v5813_v40 = vperm.slane %v5665_v20, 0 }
 0x423   : > { %10406 = vrot.lane.b32.xlu1 %v10405_v2, %s11266_s1  ;;  %10416 = vrot.lane.b32.xlu0 %v10415_v55, %s11267_s27  ;;  %v4622_v9 = vpop.f32.mrf.mxu2  ;;  %v10207_v51 = vpop.permute.xlu0 %10206 }
 0x424   : > { %v4623_v36 = vadd.f32 %v4622_v9, %v4509_v42  ;;  %v10197_v60 = vpop.permute.xlu1 %10196  ;;  %v2895_v59 = vpop.f32.mrf.mxu0  ;;  %4642 = vmatmul.f32.gmra.mxu2 %v4329_v5  ;;  %v10209_v27 = vunpack.i.h.bf16 %v10207_v51  ;;  %v10208_v57 = vunpack.i.l.bf16 %v10207_v51  ;;  %v13732_v5 = vmax.f32 %v4963_v58, %v9624_v53 }
 0x425   : > { %v10199_v35 = vunpack.i.h.bf16 %v10197_v60  ;;  %v10198_v32 = vunpack.i.l.bf16 %v10197_v60  ;;  %v2939_v2 = vmul.f32 %v13289_v3, %v2895_v59  ;;  %v13740_v1 = vpop.permute.xlu2 %10261 }
 0x426   : > { %v4736_v31 = vadd.f32 %v4735_v21, %v4623_v36  ;;  %v5879_v36 = vsel %vm5878_vm1, %v5813_v40, %v5877_v22  ;;  %v3113_v22 = vld [vmem:[#allocation3 + $0x98] sm:$0xff] }
 0x427   : > { %v2975_v24 = vadd.f32 %v13299_v28, %v2939_v2  ;;  %v4168_v18 = vsel %vm3011_vm11, %v3111_v13, %v10199_v35  ;;  %v4266_v30 = vsel %vm3011_vm11, %v3239_v48, %v10198_v32  ;;  %v5346_v28 = vmax.f32 %v13648_v4, %v9621_v52  ;;  %v3112_v35 = vld [vmem:[#allocation3 + $0x90] sm:$0xff] }
 0x428   : > { %v4829_v25 = vmul.f32 %v13553_v47, %v4736_v31  ;;  %v4201_v44 = vsel %vm4189_vm13, %v4168_v18, %v10204_v26  ;;  %v4298_v3 = vsel %vm4189_vm13, %v4266_v30, %v10203_v33  ;;  %v10219_v52 = vunpack.i.h.bf16 %v13602_v49  ;;  %v3240_v32 = vld [vmem:[#allocation3 + $0xa9] sm:$0xff] }
 0x429   : > { %v3007_v54 = vmax.f32 %v2975_v24, 0.0  ;;  %v4234_v38 = vsel %vm4222_vm14, %v4201_v44, %v10209_v27  ;;  %v4330_v55 = vsel %vm4222_vm14, %v4298_v3, %v10208_v57  ;;  %v10435_v49 = vpack.i.bf16 %v13598_v16, %v13686_v17 }
 0x42a   : > { %v4865_v62 = vadd.f32 %v13566_v14, %v4829_v25  ;;  %4532 = vmatmul.f32.gmra.mxu1 %v4234_v38 }
 0x42b   : > { %3096 = vst.msk [vmem:[#allocation3 + $0x169] sm:$0xff] %vm3011_vm11, %v3007_v54  ;;  %10421 = vrot.lane.b32.xlu1 %v10420_v46, %s11266_s1 }
 0x42c   : > { %v4897_v42 = vmax.f32 %v4865_v62, 0.0  ;;  %v10212_v29 = vpop.permute.xlu1 %10211  ;;  %4645 = vmatmul.f32.gmra.mxu2 %v4330_v55  ;;  %v10222_v56 = vpop.permute.xlu0 %10221 }
 0x42d   : > { %v10214_v4 = vunpack.i.h.bf16 %v10212_v29  ;;  %v10213_v58 = vunpack.i.l.bf16 %v10212_v29  ;;  %v10224_v51 = vunpack.i.h.bf16 %v10222_v56  ;;  %v10223_v2 = vunpack.i.l.bf16 %v10222_v56  ;;  %v13766_v29 = vpop.permute.xlu2 %10276 }
 0x42e   : > { %v4967_v53 = vrot.slane %v4897_v42, 2  ;;  %v4968_v9 = vrot.slane %v4897_v42, 4  ;;  %v4969_v26 = vrot.slane %v4897_v42, 6  ;;  %v9685_v23 = vrot.slane %v4897_v42, 9 }
 0x42f   : > { %v4169_v33 = vsel %vm3011_vm11, %v3112_v35, %v10214_v4  ;;  %v4267_v31 = vsel %vm3011_vm11, %v3240_v32, %v10213_v58 }
 0x430   : > { %v9686_v60 = vrot.slane %v4967_v53, 9  ;;  %v9687_v59 = vrot.slane %v4968_v9, 9  ;;  %v9688_v21 = vrot.slane %v4969_v26, 9  ;;  %v5602_v39 = vmax.f32 %v4897_v42, %v9685_v23 }
 0x431   : > { %v4202_v16 = vsel %vm4189_vm13, %v4169_v33, %v10219_v52  ;;  %v4299_v18 = vsel %vm4189_vm13, %v4267_v31, %v10218_v15  ;;  %v3241_v52 = vld [vmem:[#allocation3 + $0xb1] sm:$0xff] }
 0x432   : > { %v5603_v27 = vmax.f32 %v4967_v53, %v9686_v60  ;;  %v5604_v57 = vmax.f32 %v4968_v9, %v9687_v59  ;;  %v5605_v13 = vmax.f32 %v4969_v26, %v9688_v21  ;;  %v5666_v48 = vmax.f32 %v5346_v28, %v5602_v39  ;;  %v13747_v63 = vld [vmem:[#allocation3 + $0x169] sm:$0xff]  ;;  %v3242_v39 = vld [vmem:[#allocation3 + $0xc1] sm:$0xff] }
 0x433   : > { %v13749_v24 = vld [vmem:[#allocation3 + $0x168] sm:$0xff]  ;;  %10436 = vrot.lane.b32.xlu1 %v10435_v49, %s11266_s1  ;;  %v10430_v30 = vpack.i.bf16 %v13607_v50, %v13747_v63  ;;  %v4235_v54 = vsel %vm4222_vm14, %v4202_v16, %v10224_v51  ;;  %v4331_v46 = vsel %vm4222_vm14, %v4299_v18, %v10223_v2  ;;  %v10249_v21 = vunpack.i.h.bf16 %v13699_v12  ;;  %v13789_v16 = vld [vmem:[#allocation11] ss:$0 sm:$0xff] }
 0x434   : > { %v10425_v7 = vpack.i.bf16 %v13442_v41, %v13749_v24  ;;  %v5667_v25 = vmax.f32 %v5347_v45, %v5603_v27  ;;  %v5668_v44 = vmax.f32 %v5348_v10, %v5604_v57  ;;  %v5669_v3 = vmax.f32 %v13732_v5, %v5605_v13  ;;  %v10227_v8 = vpop.permute.xlu1 %10226  ;;  %v10237_v38 = vpop.permute.xlu0 %10236  ;;  %4535 = vmatmul.f32.gmra.mxu1 %v4235_v54 }
 0x435   : > { %v5814_v20 = vperm.slane %v5666_v48, 0  ;;  %v10229_v28 = vunpack.i.h.bf16 %v10227_v8  ;;  %v10228_v62 = vunpack.i.l.bf16 %v10227_v8  ;;  %10431 = vrot.lane.b32.xlu0 %v10430_v30, %s11267_s27  ;;  %4648 = vmatmul.f32.gmra.mxu2 %v4331_v46  ;;  %v10233_v45 = vunpack.i.l.bf16 %v13639_v6  ;;  %v13785_v27 = vpop.permute.xlu2 %10291  ;;  %v3115_v46 = vld [vmem:[#allocation3 + $0xb0] sm:$0xff] }
 0x436   : > { %10426 = vrot.lane.b32.xlu2 %v10425_v7, %s11268_s5  ;;  %v5815_v50 = vperm.slane %v5667_v25, 0  ;;  %v5816_v55 = vperm.slane %v5668_v44, 0  ;;  %v10239_v10 = vunpack.i.h.bf16 %v10237_v38  ;;  %v10238_v5 = vunpack.i.l.bf16 %v10237_v38  ;;  %v13792_v44 = vld [vmem:[#allocation13] ss:$0 sm:$0xff] }
 0x437   : > { %v5881_v41 = vsel %vm5880_vm2, %v5814_v20, %v5879_v36  ;;  %v5817_v15 = vperm.slane %v5669_v3, 0  ;;  %v4170_v40 = vsel %vm3011_vm11, %v3113_v22, %v10229_v28  ;;  %v4268_v4 = vsel %vm3011_vm11, %v3241_v52, %v10228_v62  ;;  %v3243_v28 = vld [vmem:[#allocation3 + $0xc9] sm:$0xff] }
 0x438   : > { %v5883_v42 = vsel %vm5882_vm3, %v5815_v50, %v5881_v41  ;;  %v4203_v56 = vsel %vm4189_vm13, %v4170_v40, %v10234_v34  ;;  %v4300_v53 = vsel %vm4189_vm13, %v4268_v4, %v10233_v45  ;;  %v10248_v6 = vunpack.i.l.bf16 %v13699_v12  ;;  %v3114_v34 = vld [vmem:[#allocation3 + $0xa8] sm:$0xff] }
 0x439   : > { %v5885_v58 = vsel %vm5884_vm4, %v5816_v55, %v5883_v42  ;;  %v4236_v26 = vsel %vm4222_vm14, %v4203_v56, %v10239_v10  ;;  %v4332_v23 = vsel %vm4222_vm14, %v4300_v53, %v10238_v5  ;;  %v10264_v20 = vunpack.i.h.bf16 %v13740_v1  ;;  %v3244_v56 = vld [vmem:[#allocation3 + $0xd9] sm:$0xff] }
 0x43a   : > { %v5887_v9 = vsel %vm5886_vm5, %v5817_v15, %v5885_v58  ;;  %v10263_v8 = vunpack.i.l.bf16 %v13740_v1  ;;  %v10279_v40 = vunpack.i.h.bf16 %v13766_v29  ;;  %v10278_v4 = vunpack.i.l.bf16 %v13766_v29  ;;  %v3116_v58 = vld [vmem:[#allocation3 + $0xc0] sm:$0xff] }
 0x43b   : > { %5946 = vst.msk [vmem:[#allocation4 + $0x11] sm:$0xff] %vm3011_vm11, %v5887_v9 }
 0x43c   : > { %v10242_v36 = vpop.permute.xlu1 %10241  ;;  %v10252_v59 = vpop.permute.xlu0 %10251  ;;  %4538 = vmatmul.f32.gmra.mxu1 %v4236_v26 }
 0x43d   : > { %v10244_v49 = vunpack.i.h.bf16 %v10242_v36  ;;  %v10243_v60 = vunpack.i.l.bf16 %v10242_v36  ;;  %4651 = vmatmul.f32.gmra.mxu2 %v4332_v23  ;;  %v10254_v35 = vunpack.i.h.bf16 %v10252_v59  ;;  %v10253_v32 = vunpack.i.l.bf16 %v10252_v59  ;;  %v13803_v5 = vpop.permute.xlu2 %10306 }
 0x43f   : > { %v4171_v51 = vsel %vm3011_vm11, %v3114_v34, %v10244_v49  ;;  %v4269_v2 = vsel %vm3011_vm11, %v3242_v39, %v10243_v60 }
 0x440   : > { %v4204_v33 = vsel %vm4189_vm13, %v4171_v51, %v10249_v21  ;;  %v4301_v31 = vsel %vm4189_vm13, %v4269_v2, %v10248_v6 }
 0x441   : > { %v4237_v57 = vsel %vm4222_vm14, %v4204_v33, %v10254_v35  ;;  %v4333_v12 = vsel %vm4222_vm14, %v4301_v31, %v10253_v32 }
 0x443   : > { %v2898_v13 = vpop.f32.mrf.mxu0 }
 0x444   : > { %v10257_v48 = vpop.permute.xlu1 %10256  ;;  %v2940_v18 = vmul.f32 %v13789_v16, %v2898_v13  ;;  %v10267_v25 = vpop.permute.xlu0 %10266  ;;  %4541 = vmatmul.f32.gmra.mxu1 %v4237_v57  ;;  %v3245_v57 = vld [vmem:[#allocation3 + $0xe1] sm:$0xff] }
 0x445   : > { %v10259_v30 = vunpack.i.h.bf16 %v10257_v48  ;;  %v10258_v7 = vunpack.i.l.bf16 %v10257_v48  ;;  %4654 = vmatmul.f32.gmra.mxu2 %v4333_v12  ;;  %v10269_v54 = vunpack.i.h.bf16 %v10267_v25  ;;  %v10268_v38 = vunpack.i.l.bf16 %v10267_v25  ;;  %v10322_v31 = vpop.permute.xlu2 %10321 }
 0x446   : > { %v2976_v3 = vadd.f32 %v13792_v44, %v2940_v18 }
 0x447   : > { %v4172_v50 = vsel %vm3011_vm11, %v3115_v46, %v10259_v30  ;;  %v4270_v55 = vsel %vm3011_vm11, %v3243_v28, %v10258_v7 }
 0x448   : > { %v3008_v62 = vmax.f32 %v2976_v3, 0.0  ;;  %v4205_v41 = vsel %vm4189_vm13, %v4172_v50, %v10264_v20  ;;  %v4302_v45 = vsel %vm4189_vm13, %v4270_v55, %v10263_v8  ;;  %v3118_v50 = vld [vmem:[#allocation3 + $0xd8] sm:$0xff] }
 0x449   : > { %v4238_v10 = vsel %vm4222_vm14, %v4205_v41, %v10269_v54  ;;  %v4334_v1 = vsel %vm4222_vm14, %v4302_v45, %v10268_v38  ;;  %v10308_v38 = vunpack.i.l.bf16 %v13803_v5  ;;  %v3246_v55 = vld [vmem:[#allocation3 + $0xf1] sm:$0xff] }
 0x44a   : > { %3097 = vst.msk [vmem:[#allocation3 + $0x171] sm:$0xff] %vm3011_vm11, %v3008_v62  ;;  %v10309_v62 = vunpack.i.h.bf16 %v13803_v5 }
 0x44c   : > { %v10272_v22 = vpop.permute.xlu1 %10271  ;;  %v10282_v42 = vpop.permute.xlu0 %10281  ;;  %4544 = vmatmul.f32.gmra.mxu1 %v4238_v10 }
 0x44d   : > { %v10274_v52 = vunpack.i.h.bf16 %v10272_v22  ;;  %v10273_v15 = vunpack.i.l.bf16 %v10272_v22  ;;  %4657 = vmatmul.f32.gmra.mxu2 %v4334_v1  ;;  %v10284_v53 = vunpack.i.h.bf16 %v10282_v42  ;;  %v10283_v9 = vunpack.i.l.bf16 %v10282_v42  ;;  %v10337_v1 = vpop.permute.xlu2 %10336 }
 0x44f   : > { %v4173_v26 = vsel %vm3011_vm11, %v3116_v58, %v10274_v52  ;;  %v4271_v23 = vsel %vm3011_vm11, %v3244_v56, %v10273_v15  ;;  %v4625_v58 = vpop.f32.mrf.mxu2 }
 0x450   : > { %v4206_v36 = vsel %vm4189_vm13, %v4173_v26, %v10279_v40  ;;  %v4303_v49 = vsel %vm4189_vm13, %v4271_v23, %v10278_v4  ;;  %v4738_v26 = vpop.f32.mrf.mxu3  ;;  %v10324_v23 = vunpack.i.h.bf16 %v10322_v31 }
 0x451   : > { %v13812_v60 = vld [vmem:[#allocation3 + $0x16a] sm:$0xff]  ;;  %v4239_v39 = vsel %vm4222_vm14, %v4206_v36, %v10284_v53  ;;  %v4335_v35 = vsel %vm4222_vm14, %v4303_v49, %v10283_v9  ;;  %v13837_v25 = vld [vmem:[#allocation3 + $0x172] sm:$0xff]  ;;  %v10323_v36 = vunpack.i.l.bf16 %v10322_v31 }
 0x452   : > { %v13814_v59 = vld [vmem:[#allocation3 + $0x171] sm:$0xff]  ;;  %9611 = vmatmul.msk.f32.gmra.mxu3 %vm3011_vm11, %v13812_v60  ;;  %v10450_v34 = vpack.i.bf16 %v13631_v43, %v13812_v60  ;;  %v3117_v43 = vld [vmem:[#allocation3 + $0xc8] sm:$0xff]  ;;  %v10465_v20 = vpack.i.bf16 %v13678_v61, %v13837_v25 }
 0x453   : > { %v13816_v21 = vld [vmem:[#allocation3 + $0x170] sm:$0xff]  ;;  %v10445_v29 = vpack.i.bf16 %v13646_v11, %v13814_v59  ;;  %v10294_v11 = vunpack.i.h.bf16 %v13785_v27 }
 0x454   : > { %v10440_v6 = vpack.i.bf16 %v13471_v37, %v13816_v21  ;;  %v10287_v32 = vpop.permute.xlu1 %10286  ;;  %v10297_v33 = vpop.permute.xlu0 %10296  ;;  %10451 = vrot.lane.b32.xlu1 %v10450_v34, %s11266_s1  ;;  %v10293_v37 = vunpack.i.l.bf16 %v13785_v27  ;;  %4547 = vmatmul.f32.gmra.mxu1 %v4239_v39 }
 0x455   : > { %10446 = vrot.lane.b32.xlu0 %v10445_v29, %s11267_s27  ;;  %v10289_v51 = vunpack.i.h.bf16 %v10287_v32  ;;  %v10288_v2 = vunpack.i.l.bf16 %v10287_v32  ;;  %4660 = vmatmul.f32.gmra.mxu2 %v4335_v35  ;;  %v10299_v12 = vunpack.i.h.bf16 %v10297_v33  ;;  %v10298_v13 = vunpack.i.l.bf16 %v10297_v33  ;;  %v3119_v29 = vld [vmem:[#allocation3 + $0xe0] sm:$0xff]  ;;  %v4512_v34 = vpop.f32.mrf.mxu1  ;;  %v10352_v31 = vpop.permute.xlu2 %10351 }
 0x456   : > { %10441 = vrot.lane.b32.xlu2 %v10440_v6, %s11268_s5  ;;  %v3247_v6 = vld [vmem:[#allocation3 + $0xf9] sm:$0xff] }
 0x457   : > { %v4174_v48 = vsel %vm3011_vm11, %v3117_v43, %v10289_v51  ;;  %v4272_v18 = vsel %vm3011_vm11, %v3245_v57, %v10288_v2  ;;  %v4626_v2 = vadd.f32 %v4625_v58, %v4512_v34 }
 0x458   : > { %v4207_v30 = vsel %vm4189_vm13, %v4174_v48, %v10294_v11  ;;  %v4304_v7 = vsel %vm4189_vm13, %v4272_v18, %v10293_v37 }
 0x459   : > { %v4240_v27 = vsel %vm4222_vm14, %v4207_v30, %v10299_v12  ;;  %v4336_v3 = vsel %vm4222_vm14, %v4304_v7, %v10298_v13  ;;  %v4739_v12 = vadd.f32 %v4738_v26, %v4626_v2  ;;  %v10353_v26 = vunpack.i.l.bf16 %v10352_v31 }
 0x45a   : > { %9612 = vmatmul.msk.f32.gmra.mxu3 %vm3011_vm11, %v13837_v25 }
 0x45c   : > { %v10302_v8 = vpop.permute.xlu1 %10301  ;;  %v10312_v28 = vpop.permute.xlu0 %10311  ;;  %10466 = vrot.lane.b32.xlu1 %v10465_v20, %s11266_s1  ;;  %4550 = vmatmul.f32.gmra.mxu1 %v4240_v27  ;;  %v4830_v20 = vmul.f32 %v13553_v47, %v4739_v12 }
 0x45d   : > { %v10304_v54 = vunpack.i.h.bf16 %v10302_v8  ;;  %v10303_v46 = vunpack.i.l.bf16 %v10302_v8  ;;  %4663 = vmatmul.f32.gmra.mxu2 %v4336_v3  ;;  %v10314_v41 = vunpack.i.h.bf16 %v10312_v28  ;;  %v10313_v45 = vunpack.i.l.bf16 %v10312_v28  ;;  %v4741_v3 = vpop.f32.mrf.mxu3  ;;  %v3248_v28 = vld [vmem:[#allocation3 + $0x109] sm:$0xff] }
 0x45e   : > { %v10339_v8 = vunpack.i.h.bf16 %v10337_v1 }
 0x45f   : > { %v4175_v10 = vsel %vm3011_vm11, %v3118_v50, %v10304_v54  ;;  %v4273_v61 = vsel %vm3011_vm11, %v3246_v55, %v10303_v46  ;;  %v3120_v46 = vld [vmem:[#allocation3 + $0xf0] sm:$0xff] }
 0x460   : > { %v4208_v22 = vsel %vm4189_vm13, %v4175_v10, %v10309_v62  ;;  %v4305_v52 = vsel %vm4189_vm13, %v4273_v61, %v10308_v38  ;;  %v10338_v62 = vunpack.i.l.bf16 %v10337_v1  ;;  %v4515_v38 = vpop.f32.mrf.mxu1 }
 0x461   : > { %v4241_v15 = vsel %vm4222_vm14, %v4208_v22, %v10314_v41  ;;  %v4337_v42 = vsel %vm4222_vm14, %v4305_v52, %v10313_v45 }
 0x463   : > { %v2901_v5 = vpop.f32.mrf.mxu0  ;;  %v4628_v7 = vpop.f32.mrf.mxu2 }
 0x464   : > { %v2941_v40 = vmul.f32 %v13789_v16, %v2901_v5  ;;  %v10317_v4 = vpop.permute.xlu1 %10316  ;;  %v10327_v9 = vpop.permute.xlu0 %10326  ;;  %4553 = vmatmul.f32.gmra.mxu1 %v4241_v15  ;;  %v4629_v10 = vadd.f32 %v4628_v7, %v4515_v38  ;;  %v3250_v38 = vld [vmem:[#allocation3 + $0x121] sm:$0xff] }
 0x465   : > { %v10319_v56 = vunpack.i.h.bf16 %v10317_v4  ;;  %v10318_v53 = vunpack.i.l.bf16 %v10317_v4  ;;  %4666 = vmatmul.f32.gmra.mxu2 %v4337_v42  ;;  %v10329_v39 = vunpack.i.h.bf16 %v10327_v9  ;;  %v10328_v35 = vunpack.i.l.bf16 %v10327_v9  ;;  %v10367_v5 = vpop.permute.xlu2 %10366  ;;  %v4744_v34 = vpop.f32.mrf.mxu3 }
 0x466   : > { %v2977_v49 = vadd.f32 %v13792_v44, %v2941_v40  ;;  %v4866_v42 = vadd.f32 %v13566_v14, %v4830_v20  ;;  %v10354_v9 = vunpack.i.h.bf16 %v10352_v31  ;;  %v10369_v12 = vunpack.i.h.bf16 %v10367_v5 }
 0x467   : > { %v4176_v32 = vsel %vm3011_vm11, %v3119_v29, %v10319_v56  ;;  %v4274_v51 = vsel %vm3011_vm11, %v3247_v6, %v10318_v53 }
 0x468   : > { %v3009_v33 = vmax.f32 %v2977_v49, 0.0  ;;  %v4209_v11 = vsel %vm4189_vm13, %v4176_v32, %v10324_v23  ;;  %v4306_v37 = vsel %vm4189_vm13, %v4274_v51, %v10323_v36  ;;  %v4742_v23 = vadd.f32 %v4741_v3, %v4629_v10 }
 0x469   : > { %v4242_v43 = vsel %vm4222_vm14, %v4209_v11, %v10329_v39  ;;  %v4338_v57 = vsel %vm4222_vm14, %v4306_v37, %v10328_v35  ;;  %v13880_v39 = vmax.f32 %v4866_v42, 0.0 }
 0x46a   : > { %3098 = vst.msk [vmem:[#allocation3 + $0x181] sm:$0xff] %vm3011_vm11, %v3009_v33  ;;  %v4831_v51 = vmul.f32 %v13553_v47, %v4742_v23 }
 0x46b   : > { %v4970_v11 = vrot.slane %v13880_v39, 2 }
 0x46c   : > { %v10332_v13 = vpop.permute.xlu1 %10331  ;;  %v10342_v30 = vpop.permute.xlu0 %10341  ;;  %4556 = vmatmul.f32.gmra.mxu1 %v4242_v43  ;;  %v4971_v43 = vrot.slane %v13880_v39, 4  ;;  %v4867_v7 = vadd.f32 %v13566_v14, %v4831_v51  ;;  %v3123_v51 = vld [vmem:[#allocation3 + $0x110] sm:$0xff] }
 0x46d   : > { %v10334_v48 = vunpack.i.h.bf16 %v10332_v13  ;;  %v10333_v18 = vunpack.i.l.bf16 %v10332_v13  ;;  %4669 = vmatmul.f32.gmra.mxu2 %v4338_v57  ;;  %v10344_v27 = vunpack.i.h.bf16 %v10342_v30  ;;  %v10343_v54 = vunpack.i.l.bf16 %v10342_v30  ;;  %v13891_v47 = vpop.permute.xlu2 %10381 }
 0x46e   : > { %v4972_v57 = vrot.slane %v13880_v39, 6  ;;  %v10368_v30 = vunpack.i.l.bf16 %v10367_v5  ;;  %v13905_v42 = vmax.f32 %v4867_v7, 0.0 }
 0x46f   : > { %v4177_v50 = vsel %vm3011_vm11, %v3120_v46, %v10334_v48  ;;  %v4275_v55 = vsel %vm3011_vm11, %v3248_v28, %v10333_v18 }
 0x470   : > { %v4210_v61 = vsel %vm4189_vm13, %v4177_v50, %v10339_v8  ;;  %v4307_v52 = vsel %vm4189_vm13, %v4275_v55, %v10338_v62  ;;  %v3122_v62 = vld [vmem:[#allocation3 + $0x108] sm:$0xff]  ;;  %v9625_v50 = vrot.slane %v13880_v39, 9  ;;  %v9626_v55 = vrot.slane %v4970_v11, 9 }
 0x471   : > { %v3353_v41 = vld [vmem:[#allocation3 + $0x181] sm:$0xff]  ;;  %v4243_v22 = vsel %vm4222_vm14, %v4210_v61, %v10344_v27  ;;  %v4339_v40 = vsel %vm4222_vm14, %v4307_v52, %v10343_v54 }
 0x472   : > { %v13866_v45 = vld [vmem:[#allocation3 + $0x180] sm:$0xff]  ;;  %v10460_v15 = vpack.i.bf16 %v13749_v24, %v3353_v41  ;;  %v3121_v24 = vld [vmem:[#allocation3 + $0xf8] sm:$0xff] }
 0x473   : > { %v10455_v1 = vpack.i.bf16 %v13644_v19, %v13866_v45  ;;  %v3249_v19 = vld [vmem:[#allocation3 + $0x111] sm:$0xff]  ;;  %v13897_v61 = vld [vmem:[#allocation16] ss:$0 sm:$0xff] }
 0x474   : > { %v10347_v4 = vpop.permute.xlu1 %10346  ;;  %10461 = vrot.lane.b32.xlu0 %v10460_v15, %s11267_s27  ;;  %v10357_v53 = vpop.permute.xlu0 %10356  ;;  %4559 = vmatmul.f32.gmra.mxu1 %v4243_v22 }
 0x475   : > { %v10349_v58 = vunpack.i.h.bf16 %v10347_v4  ;;  %v10348_v56 = vunpack.i.l.bf16 %v10347_v4  ;;  %10456 = vrot.lane.b32.xlu2 %v10455_v1, %s11268_s5  ;;  %4672 = vmatmul.f32.gmra.mxu2 %v4339_v40  ;;  %v10359_v36 = vunpack.i.h.bf16 %v10357_v53  ;;  %v10358_v49 = vunpack.i.l.bf16 %v10357_v53 }
 0x476   : > { %v4518_v37 = vpop.f32.mrf.mxu1  ;;  %v13915_v53 = vmax.f32 %v13880_v39, %v9625_v50 }
 0x477   : > { %v4178_v29 = vsel %vm3011_vm11, %v3121_v24, %v10349_v58  ;;  %v4276_v6 = vsel %vm3011_vm11, %v3249_v19, %v10348_v56  ;;  %v9627_v56 = vrot.slane %v4971_v43, 9  ;;  %v10384_v24 = vunpack.i.h.bf16 %v13891_v47 }
 0x478   : > { %v4211_v35 = vsel %vm4189_vm13, %v4178_v29, %v10354_v9  ;;  %v4308_v32 = vsel %vm4189_vm13, %v4276_v6, %v10353_v26  ;;  %v13917_v9 = vmax.f32 %v4970_v11, %v9626_v55  ;;  %v10383_v19 = vunpack.i.l.bf16 %v13891_v47 }
 0x479   : > { %v4244_v2 = vsel %vm4222_vm14, %v4211_v35, %v10359_v36  ;;  %v4340_v33 = vsel %vm4222_vm14, %v4308_v32, %v10358_v49  ;;  %v4973_v29 = vrot.slane %v13905_v42, 2  ;;  %v4974_v6 = vrot.slane %v13905_v42, 4 }
 0x47c   : > { %v4631_v31 = vpop.f32.mrf.mxu2  ;;  %4562 = vmatmul.f32.gmra.mxu1 %v4244_v2  ;;  %v3251_v2 = vld [vmem:[#allocation3 + $0x129] sm:$0xff] }
 0x47d   : > { %v4632_v13 = vadd.f32 %v4631_v31, %v4518_v37  ;;  %v10362_v48 = vpop.permute.xlu1 %10361  ;;  %v10372_v18 = vpop.permute.xlu0 %10371  ;;  %4675 = vmatmul.f32.gmra.mxu2 %v4340_v33 }
 0x47e   : > { %v10364_v27 = vunpack.i.h.bf16 %v10362_v48  ;;  %v10363_v3 = vunpack.i.l.bf16 %v10362_v48  ;;  %v2904_v20 = vpop.f32.mrf.mxu0  ;;  %v10374_v54 = vunpack.i.h.bf16 %v10372_v18  ;;  %v10373_v46 = vunpack.i.l.bf16 %v10372_v18  ;;  %v13928_v33 = vpop.permute.xlu2 %10396 }
 0x47f   : > { %v4745_v8 = vadd.f32 %v4744_v34, %v4632_v13  ;;  %v2942_v28 = vmul.f32 %v13789_v16, %v2904_v20  ;;  %v13903_v16 = vpop.f32.mrf.mxu3  ;;  %v13932_v13 = vld [vmem:[#allocation3 + $0x198] sm:$0xff]  ;;  %v4975_v48 = vrot.slane %v13905_v42, 6  ;;  %v9629_v18 = vrot.slane %v13905_v42, 9 }
 0x480   : > { %v4179_v41 = vsel %vm3011_vm11, %v3122_v62, %v10364_v27  ;;  %v4277_v10 = vsel %vm3011_vm11, %v3250_v38, %v10363_v3  ;;  %v13941_v27 = vmax.f32 %v4971_v43, %v9627_v56  ;;  %v10485_v62 = vpack.i.bf16 %v13812_v60, %v13932_v13 }
 0x481   : > { %v4832_v22 = vmul.f32 %v13897_v61, %v4745_v8  ;;  %v2978_v52 = vadd.f32 %v13792_v44, %v2942_v28  ;;  %v4212_v15 = vsel %vm4189_vm13, %v4179_v41, %v10369_v12  ;;  %v4309_v1 = vsel %vm4189_vm13, %v4277_v10, %v10368_v30 }
 0x482   : > { %v4245_v4 = vsel %vm4222_vm14, %v4212_v15, %v10374_v54  ;;  %v4341_v58 = vsel %vm4222_vm14, %v4309_v1, %v10373_v46  ;;  %v9628_v44 = vrot.slane %v4972_v57, 9  ;;  %v9630_v38 = vrot.slane %v4973_v29, 9 }
 0x483   : > { %v4868_v5 = vadd.f32 %v13566_v14, %v4832_v22  ;;  %v3010_v40 = vmax.f32 %v2978_v52, 0.0  ;;  %v10399_v50 = vunpack.i.h.bf16 %v13928_v33  ;;  %v9631_v22 = vrot.slane %v4974_v6, 9 }
 0x484   : > { %4565 = vmatmul.f32.gmra.mxu1 %v4245_v4  ;;  %v13948_v54 = vmax.f32 %v4972_v57, %v9628_v44  ;;  %v9632_v39 = vrot.slane %v4975_v48, 9  ;;  %v13958_v57 = vmax.f32 %v13905_v42, %v9629_v18 }
 0x485   : > { %v13919_v26 = vmax.f32 %v4868_v5, 0.0  ;;  %3099 = vst.msk [vmem:[#allocation3 + $0x189] sm:$0xff] %vm3011_vm11, %v3010_v40  ;;  %v10377_v14 = vpop.permute.xlu1 %10376  ;;  %v10387_v23 = vpop.permute.xlu0 %10386  ;;  %4678 = vmatmul.f32.gmra.mxu2 %v4341_v58 }
 0x486   : > { %v10379_v36 = vunpack.i.h.bf16 %v10377_v14  ;;  %v10378_v49 = vunpack.i.l.bf16 %v10377_v14  ;;  %v10389_v11 = vunpack.i.h.bf16 %v10387_v23  ;;  %v10388_v37 = vunpack.i.l.bf16 %v10387_v23 }
 0x487   : > { %v4976_v34 = vrot.slane %v13919_v26, 2  ;;  %v4977_v35 = vrot.slane %v13919_v26, 4  ;;  %v4521_v32 = vpop.f32.mrf.mxu1  ;;  %v9689_v30 = vrot.slane %v13919_v26, 9  ;;  %v13937_v47 = vpop.f32.mrf.mxu3  ;;  %v4978_v3 = vrot.slane %v13919_v26, 6 }
 0x488   : > { %v4180_v31 = vsel %vm3011_vm11, %v3123_v51, %v10379_v36  ;;  %v4278_v12 = vsel %vm3011_vm11, %v3251_v2, %v10378_v49  ;;  %v3124_v51 = vld [vmem:[#allocation3 + $0x120] sm:$0xff]  ;;  %v13973_v2 = vmax.f32 %v4974_v6, %v9631_v22 }
 0x489   : > { %v9690_v7 = vrot.slane %v4976_v34, 9  ;;  %v4213_v20 = vsel %vm4189_vm13, %v4180_v31, %v10384_v24  ;;  %v4310_v8 = vsel %vm4189_vm13, %v4278_v12, %v10383_v19  ;;  %v9691_v46 = vrot.slane %v4977_v35, 9 }
 0x48a   : > { %v4246_v43 = vsel %vm4222_vm14, %v4213_v20, %v10389_v11  ;;  %v4342_v55 = vsel %vm4222_vm14, %v4310_v8, %v10388_v37  ;;  %v5606_v52 = vmax.f32 %v13919_v26, %v9689_v30  ;;  %v9692_v40 = vrot.slane %v4978_v3, 9 }
 0x48b   : > { %v5607_v28 = vmax.f32 %v4976_v34, %v9690_v7  ;;  %v5608_v14 = vmax.f32 %v4977_v35, %v9691_v46  ;;  %v13966_v26 = vmax.f32 %v4973_v29, %v9630_v38  ;;  %v3355_v29 = vld [vmem:[#allocation3 + $0x199] sm:$0xff]  ;;  %v10398_v11 = vunpack.i.l.bf16 %v13928_v33  ;;  %v13991_v7 = vld [vmem:[#allocation17] ss:$0 sm:$0xff] }
 0x48c   : > { %v3385_v41 = vld [vmem:[#allocation3 + $0x182] sm:$0xff]  ;;  %4568 = vmatmul.f32.gmra.mxu1 %v4246_v43  ;;  %v5609_v37 = vmax.f32 %v4978_v3, %v9692_v40  ;;  %v13989_v33 = vmax.f32 %v4975_v48, %v9632_v39  ;;  %v3386_v8 = vld [vmem:[#allocation3 + $0x18a] sm:$0xff] }
 0x48d   : > { %v3354_v10 = vld [vmem:[#allocation3 + $0x189] sm:$0xff]  ;;  %v10392_v15 = vpop.permute.xlu1 %10391  ;;  %9613 = vmatmul.msk.f32.gmra.mxu3 %vm3011_vm11, %v3385_v41  ;;  %v4634_v1 = vpop.f32.mrf.mxu2  ;;  %4681 = vmatmul.f32.gmra.mxu2 %v4342_v55  ;;  %v5671_v23 = vmax.f32 %v13917_v9, %v5607_v28  ;;  %v10480_v34 = vpack.i.bf16 %v13747_v63, %v3385_v41  ;;  %v3252_v63 = vld [vmem:[#allocation3 + $0x139] sm:$0xff]  ;;  %v5672_v6 = vmax.f32 %v13941_v27, %v5608_v14 }
 0x48e   : > { %v13962_v5 = vld [vmem:[#allocation3 + $0x188] sm:$0xff]  ;;  %v10394_v4 = vunpack.i.h.bf16 %v10392_v15  ;;  %v4635_v58 = vadd.f32 %v4634_v1, %v4521_v32  ;;  %v10402_v56 = vpop.permute.xlu0 %10401  ;;  %v10475_v44 = vpack.i.bf16 %v13816_v21, %v3354_v10  ;;  %v10393_v24 = vunpack.i.l.bf16 %v10392_v15 }
 0x48f   : > { %v10404_v19 = vunpack.i.h.bf16 %v10402_v56  ;;  %v10470_v49 = vpack.i.bf16 %v13686_v17, %v13962_v5  ;;  %v4524_v32 = vpop.f32.mrf.mxu1  ;;  %v5670_v21 = vmax.f32 %v13915_v53, %v5606_v52  ;;  %v10403_v9 = vunpack.i.l.bf16 %v10402_v56  ;;  %10481 = vrot.lane.b32.xlu1 %v10480_v34, %s11266_s1  ;;  %v13985_v30 = vpop.f32.mrf.mxu3  ;;  %v3125_v56 = vld [vmem:[#allocation3 + $0x128] sm:$0xff] }
 0x490   : > { %v4748_v36 = vadd.f32 %v13903_v16, %v4635_v58  ;;  %10476 = vrot.lane.b32.xlu0 %v10475_v44, %s11267_s27  ;;  %v4181_v35 = vsel %vm3011_vm11, %v3124_v51, %v10394_v4  ;;  %v10412_v16 = vpop.permute.xlu2 %10411  ;;  %v5819_v53 = vperm.slane %v5671_v23, 0  ;;  %v4279_v18 = vsel %vm3011_vm11, %v3252_v63, %v10393_v24 }
 0x491   : > { %10471 = vrot.lane.b32.xlu2 %v10470_v49, %s11268_s5  ;;  %v4214_v17 = vsel %vm4189_vm13, %v4181_v35, %v10399_v50  ;;  %v4311_v20 = vsel %vm4189_vm13, %v4279_v18, %v10398_v11  ;;  %v10490_v27 = vpack.i.bf16 %v13866_v45, %v3355_v29  ;;  %v10414_v46 = vunpack.i.h.bf16 %v10412_v16 }
 0x492   : > { %v4833_v31 = vmul.f32 %v13897_v61, %v4748_v36  ;;  %v4247_v12 = vsel %vm4222_vm14, %v4214_v17, %v10404_v19  ;;  %v10413_v28 = vunpack.i.l.bf16 %v10412_v16  ;;  %v5818_v38 = vperm.slane %v5670_v21, 0 }
 0x493   : > { %v4343_v50 = vsel %vm4222_vm14, %v4311_v20, %v10403_v9  ;;  %v5673_v48 = vmax.f32 %v13948_v54, %v5609_v37  ;;  %v5820_v39 = vperm.slane %v5672_v6, 0  ;;  %v10495_v15 = vpack.i.bf16 %v13814_v59, %v3386_v8  ;;  %v3253_v54 = vld [vmem:[#allocation3 + $0x141] sm:$0xff] }
 0x494   : > { %v4869_v3 = vadd.f32 %v13991_v7, %v4833_v31  ;;  %4571 = vmatmul.f32.gmra.mxu1 %v4247_v12  ;;  %v5888_v45 = vsel %vm5874_vm15, %v5819_v53, %v5818_v38 }
 0x495   : > { %v10407_v43 = vpop.permute.xlu1 %10406  ;;  %9614 = vmatmul.msk.f32.gmra.mxu3 %vm3011_vm11, %v3386_v8  ;;  %v4637_v42 = vpop.f32.mrf.mxu2  ;;  %4684 = vmatmul.f32.gmra.mxu2 %v4343_v50  ;;  %v5821_v31 = vperm.slane %v5673_v48, 0 }
 0x496   : > { %v4901_v55 = vmax.f32 %v4869_v3, 0.0  ;;  %v10409_v41 = vunpack.i.h.bf16 %v10407_v43  ;;  %v10408_v10 = vunpack.i.l.bf16 %v10407_v43  ;;  %v10417_v22 = vpop.permute.xlu0 %10416  ;;  %v4638_v52 = vadd.f32 %v4637_v42, %v4524_v32  ;;  %v5962_v43 = vld [vmem:[#allocation4 + $0x1] sm:$0xff]  ;;  %v14028_v42 = vld [vmem:[#allocation4 + $0x12] sm:$0xff] }
 0x497   : > { %v10419_v44 = vunpack.i.h.bf16 %v10417_v22  ;;  %v10418_v14 = vunpack.i.l.bf16 %v10417_v22  ;;  %10496 = vrot.lane.b32.xlu1 %v10495_v15, %s11266_s1  ;;  %v4527_v59 = vpop.f32.mrf.mxu1  ;;  %v5889_v32 = vsel %vm5876_vm0, %v5820_v39, %v5888_v45  ;;  %v4756_v37 = vpop.f32.mrf.mxu3  ;;  %v3254_v22 = vld [vmem:[#allocation3 + $0x151] sm:$0xff]  ;;  %v10500_v45 = vpack.i.bf16 %v5962_v43, %v14028_v42 }
 0x498   : > { %v4979_v1 = vrot.slane %v4901_v55, 2  ;;  %v4980_v40 = vrot.slane %v4901_v55, 4  ;;  %v4981_v4 = vrot.slane %v4901_v55, 6  ;;  %v9693_v58 = vrot.slane %v4901_v55, 9  ;;  %10491 = vrot.lane.b32.xlu0 %v10490_v27, %s11267_s27 }
 0x499   : > { %v4182_v23 = vsel %vm3011_vm11, %v3125_v56, %v10409_v41  ;;  %v4280_v24 = vsel %vm3011_vm11, %v3253_v54, %v10408_v10  ;;  %10486 = vrot.lane.b32.xlu2 %v10485_v62, %s11268_s5  ;;  %v4751_v51 = vadd.f32 %v13937_v47, %v4638_v52  ;;  %v3356_v62 = vld [vmem:[#allocation3 + $0x1a1] sm:$0xff]  ;;  %v5890_v12 = vsel %vm5878_vm1, %v5821_v31, %v5889_v32  ;;  %v3126_v10 = vld [vmem:[#allocation3 + $0x138] sm:$0xff] }
 0x49a   : > { %v9694_v19 = vrot.slane %v4979_v1, 9  ;;  %v9695_v36 = vrot.slane %v4980_v40, 9  ;;  %v9696_v49 = vrot.slane %v4981_v4, 9  ;;  %v5610_v34 = vmax.f32 %v4901_v55, %v9693_v58  ;;  %v10427_v55 = vpop.permute.xlu2 %10426  ;;  %v5978_v31 = vld [vmem:[#allocation4 + $0x10] sm:$0xff] }
 0x49b   : > { %v4215_v21 = vsel %vm4189_vm13, %v4182_v23, %v10414_v46  ;;  %v4312_v9 = vsel %vm4189_vm13, %v4280_v24, %v10413_v28  ;;  %v4834_v8 = vmul.f32 %v13897_v61, %v4751_v51  ;;  %v5963_v51 = vld [vmem:[#allocation4 + $0x11] sm:$0xff] }
 0x49c   : > { %v5611_v35 = vmax.f32 %v4979_v1, %v9694_v19  ;;  %v5612_v29 = vmax.f32 %v4980_v40, %v9695_v36  ;;  %v5613_v11 = vmax.f32 %v4981_v4, %v9696_v49  ;;  %v5674_v16 = vmax.f32 %v13958_v57, %v5610_v34  ;;  %v3324_v57 = vld [vmem:[#allocation3 + $0x1a0] sm:$0xff]  ;;  %v5970_v34 = vld [vmem:[#allocation4 + $0x2] sm:$0xff] }
 0x49d   : > { %v4248_v60 = vsel %vm4222_vm14, %v4215_v21, %v10419_v44  ;;  %v4344_v13 = vsel %vm4222_vm14, %v4312_v9, %v10418_v14  ;;  %v10422_v53 = vpop.permute.xlu1 %10421  ;;  %v4870_v41 = vadd.f32 %v13991_v7, %v4834_v8  ;;  %v10429_v1 = vunpack.i.h.bf16 %v10427_v55 }
 0x49e   : > { %v5675_v17 = vmax.f32 %v13966_v26, %v5611_v35  ;;  %v5676_v47 = vmax.f32 %v13973_v2, %v5612_v29  ;;  %v5677_v63 = vmax.f32 %v13989_v33, %v5613_v11  ;;  %v5822_v6 = vperm.slane %v5674_v16, 0  ;;  %4574 = vmatmul.f32.gmra.mxu1 %v4248_v60  ;;  %4687 = vmatmul.f32.gmra.mxu2 %v4344_v13 }
 0x49f   : > { %v4640_v27 = vpop.f32.mrf.mxu2  ;;  %v10424_v26 = vunpack.i.h.bf16 %v10422_v53  ;;  %v10423_v46 = vunpack.i.l.bf16 %v10422_v53  ;;  %3611 = vrot.lane.b32.xlu1 %v13837_v25, %s11268_s5  ;;  %v4530_v38 = vpop.f32.mrf.mxu1  ;;  %v10428_v40 = vunpack.i.l.bf16 %v10427_v55  ;;  %v14037_v58 = vmax.f32 %v4870_v41, 0.0 }
 0x4a0   : > { %v5823_v18 = vperm.slane %v5675_v17, 0  ;;  %v5824_v3 = vperm.slane %v5676_v47, 0  ;;  %v5891_v20 = vsel %vm5880_vm2, %v5822_v6, %v5890_v12  ;;  %4123 = vrot.lane.b32.xlu0 %v3356_v62, %s11267_s27  ;;  %v5825_v2 = vperm.slane %v5677_v63, 0  ;;  %v4759_v15 = vpop.f32.mrf.mxu3 }
 0x4a1   : > { %v4641_v28 = vadd.f32 %v4640_v27, %v4527_v59  ;;  %3995 = vrot.lane.b32.xlu2 %v3324_v57, %s11268_s5  ;;  %v4183_v25 = vsel %vm3011_vm11, %v3126_v10, %v10424_v26  ;;  %v4281_v52 = vsel %vm3011_vm11, %v3254_v22, %v10423_v46  ;;  %v4982_v32 = vrot.slane %v14037_v58, 2 }
 0x4a2   : > { %v5892_v33 = vsel %vm5882_vm3, %v5823_v18, %v5891_v20  ;;  %v4313_v23 = vsel %vm4189_vm13, %v4281_v52, %v10428_v40  ;;  %v4983_v16 = vrot.slane %v14037_v58, 4  ;;  %v4984_v17 = vrot.slane %v14037_v58, 6 }
 0x4a3   : > { %v5893_v50 = vsel %vm5884_vm4, %v5824_v3, %v5892_v33  ;;  %v4754_v39 = vadd.f32 %v13985_v30, %v4641_v28  ;;  %v4216_v30 = vsel %vm4189_vm13, %v4183_v25, %v10429_v1  ;;  %v9633_v47 = vrot.slane %v14037_v58, 9 }
 0x4a4   : > { %v5894_v48 = vsel %vm5886_vm5, %v5825_v2, %v5893_v50  ;;  %v9634_v63 = vrot.slane %v4982_v32, 9  ;;  %v9635_v57 = vrot.slane %v4983_v16, 9  ;;  %v9636_v2 = vrot.slane %v4984_v17, 9 }
 0x4a5   : > { %5947 = vst.msk [vmem:[#allocation4 + $0x21] sm:$0xff] %vm3011_vm11, %v5894_v48  ;;  %v4835_v24 = vmul.f32 %v13897_v61, %v4754_v39  ;;  %v5358_v33 = vmax.f32 %v14037_v58, %v9633_v47 }
 0x4a6   : > { %v5359_v46 = vmax.f32 %v4982_v32, %v9634_v63  ;;  %v5360_v55 = vmax.f32 %v4983_v16, %v9635_v57  ;;  %v5361_v1 = vmax.f32 %v4984_v17, %v9636_v2 }
 0x4a7   : > { %v10432_v4 = vpop.permute.xlu0 %10431  ;;  %v4643_v56 = vpop.f32.mrf.mxu2 }
 0x4a8   : > { %10501 = vrot.lane.b32.xlu0 %v10500_v45, %s11266_s1  ;;  %v10434_v54 = vunpack.i.h.bf16 %v10432_v4  ;;  %v10433_v44 = vunpack.i.l.bf16 %v10432_v4  ;;  %v4644_v14 = vadd.f32 %v4643_v56, %v4530_v38  ;;  %v4533_v19 = vpop.f32.mrf.mxu1  ;;  %v4762_v60 = vpop.f32.mrf.mxu3 }
 0x4a9   : > { %3739 = vrot.lane.b32.xlu2 %v13962_v5, %s11267_s27 }
 0x4aa   : > { %v4249_v36 = vsel %vm4222_vm14, %v4216_v30, %v10434_v54  ;;  %v4345_v49 = vsel %vm4222_vm14, %v4313_v23, %v10433_v44  ;;  %v4757_v59 = vadd.f32 %v4756_v37, %v4644_v14  ;;  %v4871_v37 = vadd.f32 %v13991_v7, %v4835_v24 }
 0x4ab   : > { %4577 = vmatmul.f32.gmra.mxu1 %v4249_v36  ;;  %4690 = vmatmul.f32.gmra.mxu2 %v4345_v49 }
 0x4ac   : > { %v14048_v21 = vld [vmem:[#allocation4 + $0x22] sm:$0xff]  ;;  %v4836_v35 = vmul.f32 %v13897_v61, %v4757_v59  ;;  %v4903_v18 = vmax.f32 %v4871_v37, 0.0 }
 0x4ad   : > { %v14050_v9 = vld [vmem:[#allocation4 + $0x20] sm:$0xff]  ;;  %v10515_v5 = vpack.i.bf16 %v5963_v51, %v14048_v21 }
 0x4ae   : > { %v10505_v29 = vpack.i.bf16 %v5970_v34, %v14050_v9  ;;  %v14055_v11 = vld [vmem:[#allocation4 + $0x21] sm:$0xff]  ;;  %v4872_v13 = vadd.f32 %v13991_v7, %v4836_v35  ;;  %v4985_v41 = vrot.slane %v4903_v18, 2  ;;  %v4986_v10 = vrot.slane %v4903_v18, 4 }
 0x4af   : > { %v10510_v62 = vpack.i.bf16 %v5978_v31, %v14055_v11  ;;  %v4646_v6 = vpop.f32.mrf.mxu2  ;;  %v4987_v39 = vrot.slane %v4903_v18, 6  ;;  %v9637_v58 = vrot.slane %v4903_v18, 9 }
 0x4b0   : > { %10506 = vrot.lane.b32.xlu1 %v10505_v29, %s11268_s5  ;;  %10516 = vrot.lane.b32.xlu0 %v10515_v5, %s11266_s1  ;;  %v4904_v53 = vmax.f32 %v4872_v13, 0.0  ;;  %v4647_v12 = vadd.f32 %v4646_v6, %v4533_v19  ;;  %v4765_v4 = vpop.f32.mrf.mxu3  ;;  %v9638_v14 = vrot.slane %v4985_v41, 9  ;;  %v9639_v30 = vrot.slane %v4986_v10, 9 }
 0x4b1   : > { %10511 = vrot.lane.b32.xlu2 %v10510_v62, %s11267_s27  ;;  %v4536_v26 = vpop.f32.mrf.mxu1  ;;  %v9640_v19 = vrot.slane %v4987_v39, 9  ;;  %v5362_v29 = vmax.f32 %v4903_v18, %v9637_v58 }
 0x4b2   : > { %v4988_v3 = vrot.slane %v4904_v53, 2  ;;  %v4989_v20 = vrot.slane %v4904_v53, 4  ;;  %v4990_v8 = vrot.slane %v4904_v53, 6  ;;  %v9697_v27 = vrot.slane %v4904_v53, 9 }
 0x4b3   : > { %v4760_v28 = vadd.f32 %v4759_v15, %v4647_v12  ;;  %v5363_v13 = vmax.f32 %v4985_v41, %v9638_v14  ;;  %v5364_v63 = vmax.f32 %v4986_v10, %v9639_v30  ;;  %v5365_v6 = vmax.f32 %v4987_v39, %v9640_v19 }
 0x4b4   : > { %v9698_v38 = vrot.slane %v4988_v3, 9  ;;  %v9699_v50 = vrot.slane %v4989_v20, 9  ;;  %v9700_v43 = vrot.slane %v4990_v8, 9  ;;  %v5614_v48 = vmax.f32 %v4904_v53, %v9697_v27 }
 0x4b5   : > { %v4837_v22 = vmul.f32 %v13897_v61, %v4760_v28 }
 0x4b6   : > { %v5615_v45 = vmax.f32 %v4988_v3, %v9698_v38  ;;  %v5616_v25 = vmax.f32 %v4989_v20, %v9699_v50  ;;  %v5678_v52 = vmax.f32 %v5358_v33, %v5614_v48  ;;  %v5617_v56 = vmax.f32 %v4990_v8, %v9700_v43  ;;  %v10437_v33 = vpop.permute.xlu1 %10436  ;;  %v10442_v38 = vpop.permute.xlu2 %10441 }
 0x4b7   : > { %v4873_v40 = vadd.f32 %v13991_v7, %v4837_v22 }
 0x4b8   : > { %v5679_v15 = vmax.f32 %v5359_v46, %v5615_v45  ;;  %v5680_v54 = vmax.f32 %v5360_v55, %v5616_v25  ;;  %v4649_v44 = vpop.f32.mrf.mxu2  ;;  %v5826_v36 = vperm.slane %v5678_v52, 0  ;;  %v5681_v16 = vmax.f32 %v5361_v1, %v5617_v56  ;;  %v4768_v27 = vpop.f32.mrf.mxu3 }
 0x4b9   : > { %v4905_v23 = vmax.f32 %v4873_v40, 0.0  ;;  %v4650_v24 = vadd.f32 %v4649_v44, %v4536_v26  ;;  %v4539_v59 = vpop.f32.mrf.mxu1  ;;  %v10439_v45 = vunpack.i.h.bf16 %v10437_v33  ;;  %v10438_v25 = vunpack.i.l.bf16 %v10437_v33 }
 0x4ba   : > { %v5827_v49 = vperm.slane %v5679_v15, 0  ;;  %v5828_v34 = vperm.slane %v5680_v54, 0  ;;  %v5829_v18 = vperm.slane %v5681_v16, 0  ;;  %v10444_v1 = vunpack.i.h.bf16 %v10442_v38 }
 0x4bb   : > { %v4991_v32 = vrot.slane %v4905_v23, 2  ;;  %v4992_v51 = vrot.slane %v4905_v23, 4  ;;  %v4993_v35 = vrot.slane %v4905_v23, 6  ;;  %v9701_v5 = vrot.slane %v4905_v23, 9 }
 0x4bc   : > { %v5895_v37 = vsel %vm5874_vm15, %v5827_v49, %v5826_v36  ;;  %v4763_v31 = vadd.f32 %v4762_v60, %v4650_v24  ;;  %v10443_v56 = vunpack.i.l.bf16 %v10442_v38  ;;  %v3255_v24 = vld [vmem:[#allocation3 + $0x159] sm:$0xff] }
 0x4bd   : > { %v9702_v62 = vrot.slane %v4991_v32, 9  ;;  %v9703_v17 = vrot.slane %v4992_v51, 9  ;;  %v9704_v47 = vrot.slane %v4993_v35, 9  ;;  %v5896_v53 = vsel %vm5876_vm0, %v5828_v34, %v5895_v37 }
 0x4be   : > { %v5618_v12 = vmax.f32 %v4905_v23, %v9701_v5  ;;  %v4838_v8 = vmul.f32 %v13897_v61, %v4763_v31  ;;  %v5897_v43 = vsel %vm5878_vm1, %v5829_v18, %v5896_v53 }
 0x4bf   : > { %v5619_v57 = vmax.f32 %v4991_v32, %v9702_v62  ;;  %v5620_v3 = vmax.f32 %v4992_v51, %v9703_v17  ;;  %v5621_v20 = vmax.f32 %v4993_v35, %v9704_v47 }
 0x4c0   : > { %v5682_v26 = vmax.f32 %v5362_v29, %v5618_v12  ;;  %v4652_v2 = vpop.f32.mrf.mxu2  ;;  %v4874_v22 = vadd.f32 %v13991_v7, %v4838_v8  ;;  %v4771_v5 = vpop.f32.mrf.mxu3 }
 0x4c1   : > { %v5683_v60 = vmax.f32 %v5363_v13, %v5619_v57  ;;  %v5684_v46 = vmax.f32 %v5364_v63, %v5620_v3  ;;  %v5685_v28 = vmax.f32 %v5365_v6, %v5621_v20  ;;  %v4653_v50 = vadd.f32 %v4652_v2, %v4539_v59  ;;  %v4542_v55 = vpop.f32.mrf.mxu1 }
 0x4c2   : > { %v5830_v48 = vperm.slane %v5682_v26, 0  ;;  %v14079_v30 = vmax.f32 %v4874_v22, 0.0  ;;  %v4282_v59 = vsel %vm3011_vm11, %v3255_v24, %v10438_v25 }
 0x4c3   : > { %v5831_v41 = vperm.slane %v5683_v60, 0  ;;  %v5832_v10 = vperm.slane %v5684_v46, 0  ;;  %v4766_v39 = vadd.f32 %v4765_v4, %v4653_v50  ;;  %v5833_v40 = vperm.slane %v5685_v28, 0  ;;  %v3127_v4 = vld [vmem:[#allocation3 + $0x140] sm:$0xff] }
 0x4c4   : > { %v5898_v52 = vsel %vm5880_vm2, %v5830_v48, %v5897_v43  ;;  %v4184_v34 = vsel %vm3011_vm11, %v3127_v4, %v10439_v45  ;;  %v4314_v35 = vsel %vm4189_vm13, %v4282_v59, %v10443_v56  ;;  %v4994_v31 = vrot.slane %v14079_v30, 2 }
 0x4c5   : > { %v5899_v58 = vsel %vm5882_vm3, %v5831_v41, %v5898_v52  ;;  %v4839_v15 = vmul.f32 %v13897_v61, %v4766_v39  ;;  %v4217_v51 = vsel %vm4189_vm13, %v4184_v34, %v10444_v1  ;;  %v4995_v17 = vrot.slane %v14079_v30, 4 }
 0x4c6   : > { %v5900_v44 = vsel %vm5884_vm4, %v5832_v10, %v5899_v58  ;;  %v4996_v47 = vrot.slane %v14079_v30, 6  ;;  %v9641_v6 = vrot.slane %v14079_v30, 9  ;;  %v9642_v53 = vrot.slane %v4994_v31, 9 }
 0x4c7   : > { %v10447_v54 = vpop.permute.xlu0 %10446  ;;  %v5901_v14 = vsel %vm5886_vm5, %v5833_v40, %v5900_v44  ;;  %v4875_v19 = vadd.f32 %v13991_v7, %v4839_v15  ;;  %v9643_v46 = vrot.slane %v4995_v17, 9 }
 0x4c8   : > { %v10449_v23 = vunpack.i.h.bf16 %v10447_v54  ;;  %5948 = vst.msk [vmem:[#allocation4 + $0x31] sm:$0xff] %vm3011_vm11, %v5901_v14  ;;  %v4655_v36 = vpop.f32.mrf.mxu2  ;;  %v10448_v49 = vunpack.i.l.bf16 %v10447_v54  ;;  %v4774_v60 = vpop.f32.mrf.mxu3  ;;  %v9644_v28 = vrot.slane %v4996_v47, 9  ;;  %v5366_v43 = vmax.f32 %v14079_v30, %v9641_v6 }
 0x4c9   : > { %v4656_v32 = vadd.f32 %v4655_v36, %v4542_v55  ;;  %v4545_v29 = vpop.f32.mrf.mxu1  ;;  %v14090_v13 = vmax.f32 %v4875_v19, 0.0  ;;  %v5367_v48 = vmax.f32 %v4994_v31, %v9642_v53  ;;  %v5368_v56 = vmax.f32 %v4995_v17, %v9643_v46  ;;  %v10452_v46 = vpop.permute.xlu1 %10451 }
 0x4ca   : > { %v4250_v16 = vsel %vm4222_vm14, %v4217_v51, %v10449_v23  ;;  %v4346_v37 = vsel %vm4222_vm14, %v4314_v35, %v10448_v49  ;;  %v5369_v15 = vmax.f32 %v4996_v47, %v9644_v28 }
 0x4cb   : > { %4580 = vmatmul.f32.gmra.mxu1 %v4250_v16  ;;  %4693 = vmatmul.f32.gmra.mxu2 %v4346_v37  ;;  %v4769_v62 = vadd.f32 %v4768_v27, %v4656_v32  ;;  %v4997_v20 = vrot.slane %v14090_v13, 2  ;;  %v4998_v55 = vrot.slane %v14090_v13, 4  ;;  %v9645_v39 = vrot.slane %v14090_v13, 9 }
 0x4cd   : > { %v4840_v63 = vmul.f32 %v13897_v61, %v4769_v62  ;;  %v9646_v45 = vrot.slane %v4997_v20, 9  ;;  %v9647_v54 = vrot.slane %v4998_v55, 9  ;;  %v5370_v36 = vmax.f32 %v14090_v13, %v9645_v39 }
 0x4cf   : > { %v14096_v12 = vld [vmem:[#allocation4 + $0x32] sm:$0xff]  ;;  %v4876_v8 = vadd.f32 %v13991_v7, %v4840_v63  ;;  %v5371_v59 = vmax.f32 %v4997_v20, %v9646_v45 }
 0x4d0   : > { %v14098_v57 = vld [vmem:[#allocation4 + $0x30] sm:$0xff]  ;;  %v4658_v27 = vpop.f32.mrf.mxu2  ;;  %v10530_v26 = vpack.i.bf16 %v14055_v11, %v14096_v12  ;;  %v4777_v62 = vpop.f32.mrf.mxu3 }
 0x4d1   : > { %v14100_v3 = vld [vmem:[#allocation4 + $0x31] sm:$0xff]  ;;  %v4659_v18 = vadd.f32 %v4658_v27, %v4545_v29  ;;  %v10520_v2 = vpack.i.bf16 %v14028_v42, %v14098_v57  ;;  %v4908_v38 = vmax.f32 %v4876_v8, 0.0  ;;  %v4548_v50 = vpop.f32.mrf.mxu1 }
 0x4d2   : > { %v10525_v33 = vpack.i.bf16 %v14050_v9, %v14100_v3  ;;  %10531 = vrot.lane.b32.xlu0 %v10530_v26, %s11266_s1  ;;  %v4999_v9 = vrot.slane %v14090_v13, 6 }
 0x4d3   : > { %v4772_v41 = vadd.f32 %v4771_v5, %v4659_v18  ;;  %10521 = vrot.lane.b32.xlu1 %v10520_v2, %s11268_s5  ;;  %v5000_v11 = vrot.slane %v4908_v38, 2  ;;  %v5001_v42 = vrot.slane %v4908_v38, 4  ;;  %v5002_v10 = vrot.slane %v4908_v38, 6 }
 0x4d4   : > { %v9705_v22 = vrot.slane %v4908_v38, 9  ;;  %10526 = vrot.lane.b32.xlu2 %v10525_v33, %s11267_s27  ;;  %v9648_v19 = vrot.slane %v4999_v9, 9  ;;  %v5372_v18 = vmax.f32 %v4998_v55, %v9647_v54 }
 0x4d5   : > { %v4841_v25 = vmul.f32 %v13897_v61, %v4772_v41  ;;  %v9706_v52 = vrot.slane %v5000_v11, 9  ;;  %v9707_v1 = vrot.slane %v5001_v42, 9  ;;  %v9708_v40 = vrot.slane %v5002_v10, 9 }
 0x4d6   : > { %v5622_v58 = vmax.f32 %v4908_v38, %v9705_v22  ;;  %v5373_v26 = vmax.f32 %v4999_v9, %v9648_v19  ;;  %v10454_v9 = vunpack.i.h.bf16 %v10452_v46 }
 0x4d7   : > { %v4877_v44 = vadd.f32 %v13991_v7, %v4841_v25  ;;  %v5623_v14 = vmax.f32 %v5000_v11, %v9706_v52  ;;  %v5624_v30 = vmax.f32 %v5001_v42, %v9707_v1  ;;  %v5625_v23 = vmax.f32 %v5002_v10, %v9708_v40  ;;  %v10457_v10 = vpop.permute.xlu2 %10456 }
 0x4d8   : > { %v5686_v4 = vmax.f32 %v5366_v43, %v5622_v58  ;;  %v4661_v24 = vpop.f32.mrf.mxu2  ;;  %v4780_v58 = vpop.f32.mrf.mxu3  ;;  %v10459_v54 = vunpack.i.h.bf16 %v10457_v10 }
 0x4d9   : > { %v4909_v49 = vmax.f32 %v4877_v44, 0.0  ;;  %v4662_v34 = vadd.f32 %v4661_v24, %v4548_v50  ;;  %v5687_v32 = vmax.f32 %v5367_v48, %v5623_v14  ;;  %v5688_v51 = vmax.f32 %v5368_v56, %v5624_v30  ;;  %v4551_v5 = vpop.f32.mrf.mxu1 }
 0x4da   : > { %v5689_v35 = vmax.f32 %v5369_v15, %v5625_v23  ;;  %v5834_v17 = vperm.slane %v5686_v4, 0  ;;  %v10453_v56 = vunpack.i.l.bf16 %v10452_v46  ;;  %v10458_v30 = vunpack.i.l.bf16 %v10457_v10  ;;  %v3128_v23 = vld [vmem:[#allocation3 + $0x150] sm:$0xff] }
 0x4db   : > { %v5003_v29 = vrot.slane %v4909_v49, 2  ;;  %v5004_v16 = vrot.slane %v4909_v49, 4  ;;  %v5005_v37 = vrot.slane %v4909_v49, 6  ;;  %v9709_v31 = vrot.slane %v4909_v49, 9 }
 0x4dc   : > { %v5835_v47 = vperm.slane %v5687_v32, 0  ;;  %v5836_v63 = vperm.slane %v5688_v51, 0  ;;  %v4775_v6 = vadd.f32 %v4774_v60, %v4662_v34  ;;  %v5837_v43 = vperm.slane %v5689_v35, 0  ;;  %v3256_v32 = vld [vmem:[#allocation3 + $0x169] sm:$0xff] }
 0x4dd   : > { %v9710_v53 = vrot.slane %v5003_v29, 9  ;;  %v9711_v8 = vrot.slane %v5004_v16, 9  ;;  %v9712_v27 = vrot.slane %v5005_v37, 9  ;;  %v5626_v13 = vmax.f32 %v4909_v49, %v9709_v31 }
 0x4de   : > { %v5902_v20 = vsel %vm5874_vm15, %v5835_v47, %v5834_v17  ;;  %v4842_v2 = vmul.f32 %v13897_v61, %v4775_v6  ;;  %v4185_v19 = vsel %vm3011_vm11, %v3128_v23, %v10454_v9 }
 0x4df   : > { %v5903_v33 = vsel %vm5876_vm0, %v5836_v63, %v5902_v20  ;;  %v5627_v28 = vmax.f32 %v5003_v29, %v9710_v53  ;;  %v5628_v38 = vmax.f32 %v5004_v16, %v9711_v8  ;;  %v5629_v50 = vmax.f32 %v5005_v37, %v9712_v27  ;;  %v6282_v53 = vld [vmem:[%s15137_s4 + $0x78] sm:$0xff] }
 0x4e0   : > { %v5690_v48 = vmax.f32 %v5370_v36, %v5626_v13  ;;  %v4664_v41 = vpop.f32.mrf.mxu2  ;;  %v5904_v55 = vsel %vm5878_vm1, %v5837_v43, %v5903_v33  ;;  %v4878_v1 = vadd.f32 %v13991_v7, %v4842_v2  ;;  %v4283_v29 = vsel %vm3011_vm11, %v3256_v32, %v10453_v56  ;;  %v6298_v8 = vld [vmem:[%s15137_s4 + $0xf8] sm:$0xff]  ;;  %v4783_v27 = vpop.f32.mrf.mxu3  ;;  %6327 = vmatpush.msrb.mxu0 %v6282_v53 }
 0x4e1   : > { %v5691_v60 = vmax.f32 %v5371_v59, %v5627_v28  ;;  %v5692_v11 = vmax.f32 %v5372_v18, %v5628_v38  ;;  %v5693_v42 = vmax.f32 %v5373_v26, %v5629_v50  ;;  %v4665_v22 = vadd.f32 %v4664_v41, %v4551_v5  ;;  %v4554_v45 = vpop.f32.mrf.mxu1  ;;  %6368 = vmatpush.msrb.mxu3 %v6298_v8 }
 0x4e2   : > { %v5838_v39 = vperm.slane %v5690_v48, 0  ;;  %v14130_v49 = vmax.f32 %v4878_v1, 0.0  ;;  %v4218_v5 = vsel %vm4189_vm13, %v4185_v19, %v10459_v54  ;;  %v4315_v31 = vsel %vm4189_vm13, %v4283_v29, %v10458_v30 }
 0x4e3   : > { %v5839_v25 = vperm.slane %v5691_v60, 0  ;;  %v5840_v52 = vperm.slane %v5692_v11, 0  ;;  %v4778_v40 = vadd.f32 %v4777_v62, %v4665_v22  ;;  %v5841_v44 = vperm.slane %v5693_v42, 0  ;;  %v6281_v60 = vld [vmem:[%s15137_s4 + $0x70] sm:$0xff] }
 0x4e4   : > { %v5905_v15 = vsel %vm5880_vm2, %v5838_v39, %v5904_v55  ;;  %v5006_v47 = vrot.slane %v14130_v49, 2  ;;  %v5007_v13 = vrot.slane %v14130_v49, 4  ;;  %v5008_v18 = vrot.slane %v14130_v49, 6  ;;  %v6297_v11 = vld [vmem:[%s15137_s4 + $0xf0] sm:$0xff]  ;;  %6328 = vmatpush.msrb.mxu0 %v6281_v60 }
 0x4e5   : > { %v5906_v14 = vsel %vm5882_vm3, %v5839_v25, %v5905_v15  ;;  %v4843_v34 = vmul.f32 %v13897_v61, %v4778_v40  ;;  %v9649_v20 = vrot.slane %v14130_v49, 9  ;;  %6369 = vmatpush.msrb.mxu3 %v6297_v11 }
 0x4e6   : > { %v5907_v4 = vsel %vm5884_vm4, %v5840_v52, %v5906_v14  ;;  %v10462_v24 = vpop.permute.xlu0 %10461  ;;  %v9650_v2 = vrot.slane %v5006_v47, 9  ;;  %v9652_v10 = vrot.slane %v5008_v18, 9 }
 0x4e7   : > { %v5908_v36 = vsel %vm5886_vm5, %v5841_v44, %v5907_v4  ;;  %v10464_v59 = vunpack.i.h.bf16 %v10462_v24  ;;  %v10463_v35 = vunpack.i.l.bf16 %v10462_v24  ;;  %v4879_v63 = vadd.f32 %v13991_v7, %v4843_v34  ;;  %v14186_v44 = vld [vmem:[#allocation16] ss:$0 sm:$0xff] }
 0x4e8   : > { %5949 = vst.msk [vmem:[#allocation4 + $0x41] sm:$0xff] %vm3011_vm11, %v5908_v36  ;;  %v4667_v51 = vpop.f32.mrf.mxu2  ;;  %v5374_v9 = vmax.f32 %v14130_v49, %v9649_v20  ;;  %v5375_v39 = vmax.f32 %v5006_v47, %v9650_v2  ;;  %v4786_v30 = vpop.f32.mrf.mxu3  ;;  %v6279_v36 = vld [vmem:[%s15137_s4 + $0x60] sm:$0xff]  ;;  %v6294_v47 = vld [vmem:[%s15137_s4 + $0xd8] sm:$0xff]  ;;  %v6277_v20 = vld [vmem:[%s15137_s4 + $0x50] sm:$0xff] }
 0x4e9   : > { %v4668_v16 = vadd.f32 %v4667_v51, %v4554_v45  ;;  %v4251_v37 = vsel %vm4222_vm14, %v4218_v5, %v10464_v59  ;;  %v4557_v62 = vpop.f32.mrf.mxu1  ;;  %v4347_v17 = vsel %vm4222_vm14, %v4315_v31, %v10463_v35  ;;  %v14151_v33 = vmax.f32 %v4879_v63, 0.0  ;;  %v6295_v49 = vld [vmem:[%s15137_s4 + $0xe0] sm:$0xff]  ;;  %v3387_v35 = vld [vmem:[#allocation3 + $0x19a] sm:$0xff] }
 0x4ea   : > { %4583 = vmatmul.f32.gmra.mxu1 %v4251_v37  ;;  %4696 = vmatmul.f32.gmra.mxu2 %v4347_v17  ;;  %v5377_v59 = vmax.f32 %v5008_v18, %v9652_v10  ;;  %v6278_v17 = vld [vmem:[%s15137_s4 + $0x58] sm:$0xff]  ;;  %v6293_v2 = vld [vmem:[%s15137_s4 + $0xd0] sm:$0xff]  ;;  %v6292_v10 = vld [vmem:[%s15137_s4 + $0xc8] sm:$0xff] }
 0x4eb   : > { %v4781_v6 = vadd.f32 %v4780_v58, %v4668_v16  ;;  %v5009_v45 = vrot.slane %v14151_v33, 2  ;;  %v5010_v56 = vrot.slane %v14151_v33, 4  ;;  %v5011_v15 = vrot.slane %v14151_v33, 6  ;;  %v14198_v31 = vpop.permute.xlu2 %10471  ;;  %9615 = vmatmul.msk.f32.gmra.mxu3 %vm3011_vm11, %v3387_v35 }
 0x4ec   : > { %v9653_v54 = vrot.slane %v14151_v33, 9 }
 0x4ed   : > { %v4844_v26 = vmul.f32 %v13897_v61, %v4781_v6  ;;  %v9654_v32 = vrot.slane %v5009_v45, 9  ;;  %v9655_v63 = vrot.slane %v5010_v56, 9  ;;  %v9656_v6 = vrot.slane %v5011_v15, 9 }
 0x4ef   : > { %v14153_v46 = vld [vmem:[#allocation4 + $0x42] sm:$0xff]  ;;  %v4880_v50 = vadd.f32 %v13991_v7, %v4844_v26 }
 0x4f0   : > { %v14155_v28 = vld [vmem:[#allocation4 + $0x40] sm:$0xff]  ;;  %v4670_v43 = vpop.f32.mrf.mxu2  ;;  %v10545_v48 = vpack.i.bf16 %v14100_v3, %v14153_v46 }
 0x4f1   : > { %v14157_v38 = vld [vmem:[#allocation4 + $0x41] sm:$0xff]  ;;  %v10535_v61 = vpack.i.bf16 %v14048_v21, %v14155_v28  ;;  %v4671_v42 = vadd.f32 %v4670_v43, %v4557_v62  ;;  %v4912_v22 = vmax.f32 %v4880_v50, 0.0  ;;  %v4560_v55 = vpop.f32.mrf.mxu1  ;;  %v14216_v50 = vpop.permute.xlu1 %10466 }
 0x4f2   : > { %v10540_v41 = vpack.i.bf16 %v14098_v57, %v14157_v38  ;;  %v6280_v3 = vld [vmem:[%s15137_s4 + $0x68] sm:$0xff]  ;;  %v9651_v57 = vrot.slane %v5007_v13, 9  ;;  %10546 = vrot.lane.b32.xlu0 %v10545_v48, %s11266_s1 }
 0x4f3   : > { %v6296_v21 = vld [vmem:[%s15137_s4 + $0xe8] sm:$0xff]  ;;  %10536 = vrot.lane.b32.xlu1 %v10535_v61, %s11268_s5  ;;  %v4784_v25 = vadd.f32 %v4783_v27, %v4671_v42  ;;  %6329 = vmatpush.msrb.mxu0 %v6280_v3  ;;  %v5012_v52 = vrot.slane %v4912_v22, 2  ;;  %v5013_v1 = vrot.slane %v4912_v22, 4  ;;  %v5014_v40 = vrot.slane %v4912_v22, 6 }
 0x4f4   : > { %10541 = vrot.lane.b32.xlu2 %v10540_v41, %s11267_s27  ;;  %v9713_v58 = vrot.slane %v4912_v22, 9  ;;  %6370 = vmatpush.msrb.mxu3 %v6296_v21  ;;  %v5376_v34 = vmax.f32 %v5007_v13, %v9651_v57  ;;  %v5378_v27 = vmax.f32 %v14151_v33, %v9653_v54  ;;  %v6276_v57 = vld [vmem:[%s15137_s4 + $0x48] sm:$0xff]  ;;  %v6291_v54 = vld [vmem:[%s15137_s4 + $0xc0] sm:$0xff]  ;;  %v6274_v33 = vld [vmem:[%s15137_s4 + $0x38] sm:$0xff] }
 0x4f5   : > { %v4845_v14 = vmul.f32 %v14186_v44, %v4784_v25  ;;  %v9714_v23 = vrot.slane %v5012_v52, 9  ;;  %v9715_v4 = vrot.slane %v5013_v1, 9  ;;  %v9716_v24 = vrot.slane %v5014_v40, 9  ;;  %6330 = vmatpush.msrb.mxu0 %v6279_v36 }
 0x4f6   : > { %v5630_v19 = vmax.f32 %v4912_v22, %v9713_v58  ;;  %6371 = vmatpush.msrb.mxu3 %v6295_v49  ;;  %v5379_v25 = vmax.f32 %v5009_v45, %v9654_v32  ;;  %v6275_v58 = vld [vmem:[%s15137_s4 + $0x40] sm:$0xff]  ;;  %v5381_v45 = vmax.f32 %v5011_v15, %v9656_v6  ;;  %v6290_v15 = vld [vmem:[%s15137_s4 + $0xb8] sm:$0xff]  ;;  %v6301_v32 = vld [vmem:[%s15137_s4 + $0x110] sm:$0xff] }
 0x4f7   : > { %v4881_v51 = vadd.f32 %v13991_v7, %v4845_v14  ;;  %v5631_v5 = vmax.f32 %v5012_v52, %v9714_v23  ;;  %v5632_v29 = vmax.f32 %v5013_v1, %v9715_v4  ;;  %v5633_v16 = vmax.f32 %v5014_v40, %v9716_v24  ;;  %6331 = vmatpush.msrb.mxu0 %v6278_v17  ;;  %v6302_v14 = vld [vmem:[%s15137_s4 + $0x118] sm:$0xff]  ;;  %v4789_v24 = vpop.f32.mrf.mxu3  ;;  %v6289_v6 = vld [vmem:[%s15137_s4 + $0xb0] sm:$0xff] }
 0x4f8   : > { %v5694_v37 = vmax.f32 %v5374_v9, %v5630_v19  ;;  %v4673_v62 = vpop.f32.mrf.mxu2  ;;  %6372 = vmatpush.msrb.mxu3 %v6294_v47  ;;  %v5380_v52 = vmax.f32 %v5010_v56, %v9655_v63  ;;  %v3388_v4 = vld [vmem:[#allocation3 + $0x1a2] sm:$0xff]  ;;  %6421 = vmatpush.msrb.mxu1 %v6302_v14  ;;  %v14254_v47 = vpop.permute.xlu2 %10486  ;;  %v6273_v63 = vld [vmem:[%s15137_s4 + $0x30] sm:$0xff] }
 0x4f9   : > { %v4913_v53 = vmax.f32 %v4881_v51, 0.0  ;;  %v4674_v8 = vadd.f32 %v4673_v62, %v4560_v55  ;;  %v5695_v13 = vmax.f32 %v5375_v39, %v5631_v5  ;;  %v5696_v18 = vmax.f32 %v5376_v34, %v5632_v29  ;;  %6332 = vmatpush.msrb.mxu0 %v6277_v20  ;;  %v4563_v21 = vpop.f32.mrf.mxu1  ;;  %9616 = vmatmul.msk.f32.gmra.mxu3 %vm3011_vm11, %v3388_v4 }
 0x4fa   : > { %v5697_v26 = vmax.f32 %v5377_v59, %v5633_v16  ;;  %6373 = vmatpush.msrb.mxu3 %v6293_v2  ;;  %v5842_v60 = vperm.slane %v5694_v37, 0  ;;  %v10469_v16 = vunpack.i.h.bf16 %v14216_v50  ;;  %v10468_v37 = vunpack.i.l.bf16 %v14216_v50  ;;  %6422 = vmatpush.msrb.mxu1 %v6301_v32 }
 0x4fb   : > { %v5015_v43 = vrot.slane %v4913_v53, 2  ;;  %v5016_v48 = vrot.slane %v4913_v53, 4  ;;  %v5017_v61 = vrot.slane %v4913_v53, 6  ;;  %v9717_v41 = vrot.slane %v4913_v53, 9  ;;  %6333 = vmatpush.msrb.mxu0 %v6276_v57 }
 0x4fc   : > { %v5843_v11 = vperm.slane %v5695_v13, 0  ;;  %v5844_v42 = vperm.slane %v5696_v18, 0  ;;  %v4787_v3 = vadd.f32 %v4786_v30, %v4674_v8  ;;  %6374 = vmatpush.msrb.mxu3 %v6292_v10  ;;  %v5845_v19 = vperm.slane %v5697_v26, 0 }
 0x4fd   : > { %v9718_v22 = vrot.slane %v5015_v43, 9  ;;  %v9719_v55 = vrot.slane %v5016_v48, 9  ;;  %v9720_v9 = vrot.slane %v5017_v61, 9  ;;  %v5634_v39 = vmax.f32 %v4913_v53, %v9717_v41  ;;  %6334 = vmatpush.msrb.mxu0 %v6275_v58  ;;  %v6300_v53 = vld [vmem:[%s15137_s4 + $0x108] sm:$0xff] }
 0x4fe   : > { %v5909_v1 = vsel %vm5874_vm15, %v5843_v11, %v5842_v60  ;;  %v4846_v40 = vmul.f32 %v14186_v44, %v4787_v3  ;;  %6375 = vmatpush.msrb.mxu3 %v6291_v54  ;;  %v10474_v62 = vunpack.i.h.bf16 %v14198_v31  ;;  %v10473_v20 = vunpack.i.l.bf16 %v14198_v31  ;;  %v3129_v31 = vld [vmem:[#allocation3 + $0x158] sm:$0xff]  ;;  %6423 = vmatpush.msrb.mxu1 %v6300_v53  ;;  %v6299_v3 = vld [vmem:[%s15137_s4 + $0x100] sm:$0xff] }
 0x4ff   : > { %v5635_v56 = vmax.f32 %v5015_v43, %v9718_v22  ;;  %v5636_v30 = vmax.f32 %v5016_v48, %v9719_v55  ;;  %v5637_v23 = vmax.f32 %v5017_v61, %v9720_v9  ;;  %v5910_v36 = vsel %vm5876_vm0, %v5844_v42, %v5909_v1  ;;  %6335 = vmatpush.msrb.mxu0 %v6274_v33  ;;  %v6272_v43 = vld [vmem:[%s15137_s4 + $0x28] sm:$0xff]  ;;  %v6271_v9 = vld [vmem:[%s15137_s4 + $0x20] sm:$0xff]  ;;  %v4792_v58 = vpop.f32.mrf.mxu3 }
 0x500   : > { %v5698_v49 = vmax.f32 %v5378_v27, %v5634_v39  ;;  %v4882_v34 = vadd.f32 %v13991_v7, %v4846_v40  ;;  %v4676_v59 = vpop.f32.mrf.mxu2  ;;  %6376 = vmatpush.msrb.mxu3 %v6290_v15  ;;  %v5911_v8 = vsel %vm5878_vm1, %v5845_v19, %v5910_v36  ;;  %v6288_v48 = vld [vmem:[%s15137_s4 + $0xa8] sm:$0xff]  ;;  %v4186_v22 = vsel %vm3011_vm11, %v3129_v31, %v10469_v16  ;;  %v6287_v40 = vld [vmem:[%s15137_s4 + $0xa0] sm:$0xff]  ;;  %v6286_v36 = vld [vmem:[%s15137_s4 + $0x98] sm:$0xff] }
 0x501   : > { %v5699_v51 = vmax.f32 %v5379_v25, %v5635_v56  ;;  %v5700_v35 = vmax.f32 %v5380_v52, %v5636_v30  ;;  %v5701_v5 = vmax.f32 %v5381_v45, %v5637_v23  ;;  %v4677_v29 = vadd.f32 %v4676_v59, %v4563_v21  ;;  %v10482_v26 = vpop.permute.xlu1 %10481  ;;  %6336 = vmatpush.msrb.mxu0 %v6273_v63  ;;  %v3257_v42 = vld [vmem:[#allocation3 + $0x171] sm:$0xff]  ;;  %v4566_v57 = vpop.f32.mrf.mxu1  ;;  %v6270_v56 = vld [vmem:[%s15137_s4 + $0x18] sm:$0xff]  ;;  %v3130_v19 = vld [vmem:[#allocation3 + $0x168] sm:$0xff] }
 0x502   : > { %v10477_v7 = vpop.permute.xlu0 %10476  ;;  %v5846_v17 = vperm.slane %v5698_v49, 0  ;;  %6377 = vmatpush.msrb.mxu3 %v6289_v6  ;;  %v14275_v60 = vmax.f32 %v4882_v34, 0.0  ;;  %v10484_v10 = vunpack.i.h.bf16 %v10482_v26  ;;  %v4284_v55 = vsel %vm3011_vm11, %v3257_v42, %v10468_v37  ;;  %6424 = vmatpush.msrb.mxu1 %v6299_v3  ;;  %v3258_v33 = vld [vmem:[#allocation3 + $0x181] sm:$0xff]  ;;  %v6269_v15 = vld [vmem:[%s15137_s4 + $0x10] sm:$0xff]  ;;  %v6268_v63 = vld [vmem:[%s15137_s4 + $0x8] sm:$0xff] }
 0x503   : > { %v5847_v27 = vperm.slane %v5699_v51, 0  ;;  %v5848_v13 = vperm.slane %v5700_v35, 0  ;;  %v4790_v18 = vadd.f32 %v4789_v24, %v4677_v29  ;;  %v10479_v50 = vunpack.i.h.bf16 %v10477_v7  ;;  %6337 = vmatpush.msrb.mxu0 %v6272_v43  ;;  %v14309_v51 = vld [vmem:[#allocation17] ss:$0 sm:$0xff]  ;;  %v6285_v16 = vld [vmem:[%s15137_s4 + $0x90] sm:$0xff] }
 0x504   : > { %v5912_v2 = vsel %vm5880_vm2, %v5846_v17, %v5911_v8  ;;  %v5849_v61 = vperm.slane %v5701_v5, 0  ;;  %v10478_v11 = vunpack.i.l.bf16 %v10477_v7  ;;  %6378 = vmatpush.msrb.mxu3 %v6288_v48  ;;  %v10483_v52 = vunpack.i.l.bf16 %v10482_v26 }
 0x505   : > { %v5913_v41 = vsel %vm5882_vm3, %v5847_v27, %v5912_v2  ;;  %v4847_v25 = vmul.f32 %v14186_v44, %v4790_v18  ;;  %v4219_v1 = vsel %vm4189_vm13, %v4186_v22, %v10474_v62  ;;  %v4316_v14 = vsel %vm4189_vm13, %v4284_v55, %v10473_v20  ;;  %6338 = vmatpush.msrb.mxu0 %v6271_v9  ;;  %v14317_v62 = vpop.permute.xlu2 %3995  ;;  %v6267_v2 = vld [vmem:[%s15137_s4] sm:$0xff] }
 0x506   : > { %v5914_v21 = vsel %vm5884_vm4, %v5848_v13, %v5913_v41  ;;  %v4252_v54 = vsel %vm4222_vm14, %v4219_v1, %v10479_v50  ;;  %v5018_v30 = vrot.slane %v14275_v60, 2  ;;  %v4348_v23 = vsel %vm4222_vm14, %v4316_v14, %v10478_v11  ;;  %6379 = vmatpush.msrb.mxu3 %v6287_v40 }
 0x507   : > { %v5915_v39 = vsel %vm5886_vm5, %v5849_v61, %v5914_v21  ;;  %4586 = vmatmul.f32.gmra.mxu1 %v4252_v54  ;;  %v5019_v49 = vrot.slane %v14275_v60, 4  ;;  %4699 = vmatmul.f32.gmra.mxu2 %v4348_v23  ;;  %v4187_v59 = vsel %vm3011_vm11, %v3130_v19, %v10484_v10  ;;  %v10489_v32 = vunpack.i.h.bf16 %v14254_v47  ;;  %v3259_v54 = vld [vmem:[#allocation3 + $0x189] sm:$0xff] }
 0x508   : > { %5950 = vst.msk [vmem:[#allocation4 + $0x51] sm:$0xff] %vm3011_vm11, %v5915_v39  ;;  %v4679_v45 = vpop.f32.mrf.mxu2  ;;  %v4883_v35 = vadd.f32 %v14309_v51, %v4847_v25  ;;  %v4285_v7 = vsel %vm3011_vm11, %v3258_v33, %v10483_v52  ;;  %6339 = vmatpush.msrb.mxu0 %v6270_v56  ;;  %v10488_v37 = vunpack.i.l.bf16 %v14254_v47  ;;  %6380 = vmatpush.msrb.mxu3 %v6286_v36  ;;  %v5020_v6 = vrot.slane %v14275_v60, 6  ;;  %v6284_v47 = vld [vmem:[%s15137_s4 + $0x88] sm:$0xff]  ;;  %v6283_v39 = vld [vmem:[%s15137_s4 + $0x80] sm:$0xff]  ;;  %v4795_v25 = vpop.f32.mrf.mxu3 }
 0x509   : > { %v4680_v4 = vadd.f32 %v4679_v45, %v4566_v57  ;;  %v10497_v29 = vpop.permute.xlu1 %10496  ;;  %v9657_v53 = vrot.slane %v14275_v60, 9  ;;  %v9658_v8 = vrot.slane %v5018_v30, 9  ;;  %v4220_v27 = vsel %vm4189_vm13, %v4187_v59, %v10489_v32  ;;  %v4569_v3 = vpop.f32.mrf.mxu1 }
 0x50a   : > { %v10492_v24 = vpop.permute.xlu0 %10491  ;;  %6340 = vmatpush.msrb.mxu0 %v6269_v15  ;;  %v9659_v13 = vrot.slane %v5019_v49, 9  ;;  %v4317_v20 = vsel %vm4189_vm13, %v4285_v7, %v10488_v37  ;;  %6381 = vmatpush.msrb.mxu3 %v6285_v16  ;;  %v14334_v50 = vmax.f32 %v4883_v35, 0.0  ;;  %v10499_v43 = vunpack.i.h.bf16 %v10497_v29 }
 0x50b   : > { %v10494_v34 = vunpack.i.h.bf16 %v10492_v24  ;;  %v10493_v5 = vunpack.i.l.bf16 %v10492_v24  ;;  %v4793_v17 = vadd.f32 %v4792_v58, %v4680_v4  ;;  %v10498_v48 = vunpack.i.l.bf16 %v10497_v29 }
 0x50c   : > { %6341 = vmatpush.msrb.mxu0 %v6268_v63  ;;  %6382 = vmatpush.msrb.mxu3 %v6284_v47  ;;  %v9660_v55 = vrot.slane %v5020_v6, 9  ;;  %v5382_v52 = vmax.f32 %v14275_v60, %v9657_v53  ;;  %v5383_v1 = vmax.f32 %v5018_v30, %v9658_v8  ;;  %v5384_v40 = vmax.f32 %v5019_v49, %v9659_v13 }
 0x50d   : > { %v4848_v18 = vmul.f32 %v14186_v44, %v4793_v17  ;;  %v4253_v26 = vsel %vm4222_vm14, %v4220_v27, %v10494_v34  ;;  %v4349_v61 = vsel %vm4222_vm14, %v4317_v20, %v10493_v5  ;;  %v5021_v14 = vrot.slane %v14334_v50, 2  ;;  %v3740_v15 = vpop.permute.xlu2 %3739 }
 0x50e   : > { %6342 = vmatpush.msrb.mxu0 %v6267_v2  ;;  %v4286_v4 = vsel %vm3011_vm11, %v3259_v54, %v10498_v48  ;;  %6383 = vmatpush.msrb.mxu3 %v6283_v39  ;;  %v5022_v49 = vrot.slane %v14334_v50, 4  ;;  %v5023_v34 = vrot.slane %v14334_v50, 6  ;;  %v5385_v16 = vmax.f32 %v5020_v6, %v9660_v55 }
 0x50f   : > { %v14337_v41 = vld [vmem:[#allocation4 + $0x52] sm:$0xff]  ;;  %v4884_v42 = vadd.f32 %v14309_v51, %v4848_v18  ;;  %4589 = vmatmul.f32.gmra.mxu1 %v4253_v26  ;;  %4702 = vmatmul.f32.gmra.mxu2 %v4349_v61  ;;  %v4318_v63 = vsel %vm4189_vm13, %v4286_v4, %v14317_v62  ;;  %v9661_v13 = vrot.slane %v14334_v50, 9  ;;  %v9662_v18 = vrot.slane %v5021_v14, 9 }
 0x510   : > { %v14339_v11 = vld [vmem:[#allocation4 + $0x50] sm:$0xff]  ;;  %v4682_v21 = vpop.f32.mrf.mxu2  ;;  %v10560_v57 = vpack.i.bf16 %v14157_v38, %v14337_v41  ;;  %v9663_v60 = vrot.slane %v5022_v49, 9  ;;  %v9664_v6 = vrot.slane %v5023_v34, 9 }
 0x511   : > { %v14341_v31 = vld [vmem:[#allocation4 + $0x51] sm:$0xff]  ;;  %v10550_v10 = vpack.i.bf16 %v14096_v12, %v14339_v11  ;;  %v4683_v9 = vadd.f32 %v4682_v21, %v4569_v3  ;;  %v4916_v58 = vmax.f32 %v4884_v42, 0.0  ;;  %v3612_v56 = vpop.permute.xlu1 %3611 }
 0x512   : > { %v10555_v22 = vpack.i.bf16 %v14155_v28, %v14341_v31  ;;  %10561 = vrot.lane.b32.xlu0 %v10560_v57, %s11266_s1  ;;  %v3131_v28 = vld [vmem:[#allocation3 + $0x170] sm:$0xff]  ;;  %v4124_v7 = vpop.permute.xlu0 %4123  ;;  %v5389_v54 = vmax.f32 %v5023_v34, %v9664_v6  ;;  %v10688_v6 = vld [vmem:[#allocation4 + $0x11] sm:$0xff] }
 0x513   : > { %v4796_v45 = vadd.f32 %v4795_v25, %v4683_v9  ;;  %10551 = vrot.lane.b32.xlu1 %v10550_v10, %s11268_s5  ;;  %v4188_v23 = vsel %vm3011_vm11, %v3131_v28, %v10499_v43  ;;  %v5024_v30 = vrot.slane %v4916_v58, 2  ;;  %v5025_v24 = vrot.slane %v4916_v58, 4 }
 0x514   : > { %10556 = vrot.lane.b32.xlu2 %v10555_v22, %s11267_s27  ;;  %v5026_v19 = vrot.slane %v4916_v58, 6  ;;  %v9721_v36 = vrot.slane %v4916_v58, 9  ;;  %v4221_v33 = vsel %vm4189_vm13, %v4188_v23, %v3612_v56  ;;  %v4350_v20 = vsel %vm4222_vm14, %v4318_v63, %v4124_v7 }
 0x515   : > { %v4849_v59 = vmul.f32 %v14186_v44, %v4796_v45  ;;  %v9722_v32 = vrot.slane %v5024_v30, 9  ;;  %v9723_v35 = vrot.slane %v5025_v24, 9  ;;  %v4254_v17 = vsel %vm4222_vm14, %v4221_v33, %v3740_v15 }
 0x516   : > { %v9724_v5 = vrot.slane %v5026_v19, 9  ;;  %v5638_v29 = vmax.f32 %v4916_v58, %v9721_v36  ;;  %v5386_v58 = vmax.f32 %v14334_v50, %v9661_v13 }
 0x517   : > { %v4885_v37 = vadd.f32 %v14309_v51, %v4849_v59  ;;  %v5639_v53 = vmax.f32 %v5024_v30, %v9722_v32  ;;  %v5640_v8 = vmax.f32 %v5025_v24, %v9723_v35  ;;  %4592 = vmatmul.f32.gmra.mxu1 %v4254_v17  ;;  %4705 = vmatmul.f32.gmra.mxu2 %v4350_v20  ;;  %v10687_v32 = vld [vmem:[#allocation4 + $0x22] sm:$0xff] }
 0x518   : > { %v5641_v27 = vmax.f32 %v5026_v19, %v9724_v5  ;;  %v5702_v47 = vmax.f32 %v5382_v52, %v5638_v29  ;;  %v14374_v3 = vpop.f32.mrf.mxu2  ;;  %v4572_v52 = vpop.f32.mrf.mxu1 }
 0x519   : > { %v4917_v26 = vmax.f32 %v4885_v37, 0.0  ;;  %v5703_v2 = vmax.f32 %v5383_v1, %v5639_v53  ;;  %v5704_v43 = vmax.f32 %v5384_v40, %v5640_v8  ;;  %v5387_v1 = vmax.f32 %v5021_v14, %v9662_v18  ;;  %v4798_v19 = vpop.f32.mrf.mxu3  ;;  %v10512_v29 = vpop.permute.xlu2 %10511 }
 0x51a   : > { %v5705_v21 = vmax.f32 %v5385_v16, %v5641_v27  ;;  %v5850_v57 = vperm.slane %v5702_v47, 0  ;;  %v5388_v40 = vmax.f32 %v5022_v49, %v9663_v60  ;;  %v10502_v24 = vpop.permute.xlu0 %10501  ;;  %v5954_v16 = vld [vmem:[#allocation4] sm:$0xff]  ;;  %v10514_v47 = vunpack.i.h.bf16 %v10512_v29 }
 0x51b   : > { %v5027_v48 = vrot.slane %v4917_v26, 2  ;;  %v5028_v61 = vrot.slane %v4917_v26, 4  ;;  %v5029_v42 = vrot.slane %v4917_v26, 6  ;;  %v9725_v62 = vrot.slane %v4917_v26, 9 }
 0x51c   : > { %v5851_v10 = vperm.slane %v5703_v2, 0  ;;  %v5852_v22 = vperm.slane %v5704_v43, 0  ;;  %v5853_v36 = vperm.slane %v5705_v21, 0  ;;  %v10504_v5 = vunpack.i.h.bf16 %v10502_v24 }
 0x51d   : > { %v9726_v55 = vrot.slane %v5027_v48, 9  ;;  %v9727_v9 = vrot.slane %v5028_v61, 9  ;;  %v9728_v39 = vrot.slane %v5029_v42, 9  ;;  %v5642_v25 = vmax.f32 %v4917_v26, %v9725_v62 }
 0x51e   : > { %v5916_v28 = vsel %vm5874_vm15, %v5851_v10, %v5850_v57  ;;  %v10503_v37 = vunpack.i.l.bf16 %v10502_v24  ;;  %v6219_v26 = vsel %vm3011_vm11, %v5954_v16, %v10504_v5  ;;  %v10513_v60 = vunpack.i.l.bf16 %v10512_v29 }
 0x51f   : > { %v5643_v45 = vmax.f32 %v5027_v48, %v9726_v55  ;;  %v5644_v56 = vmax.f32 %v5028_v61, %v9727_v9  ;;  %v5645_v23 = vmax.f32 %v5029_v42, %v9728_v39  ;;  %v5917_v4 = vsel %vm5876_vm0, %v5852_v22, %v5916_v28  ;;  %9745 = vmatmul.msk.f32.vlgmr.msrb.gmra.mxu1 %vm3011_vm11, %v10687_v32 }
 0x520   : > { %v5706_v30 = vmax.f32 %v5386_v58, %v5642_v25  ;;  %v5918_v49 = vsel %vm5878_vm1, %v5853_v36, %v5917_v4  ;;  %v4575_v18 = vpop.f32.mrf.mxu1  ;;  %v6243_v2 = vsel %vm3011_vm11, %v10688_v6, %v10503_v37  ;;  %v4686_v25 = vadd.f32 %v14374_v3, %v4572_v52 }
 0x521   : > { %v5707_v59 = vmax.f32 %v5387_v1, %v5643_v45  ;;  %v5708_v33 = vmax.f32 %v5388_v40, %v5644_v56  ;;  %v5709_v15 = vmax.f32 %v5389_v54, %v5645_v23  ;;  %v4688_v53 = vpop.f32.mrf.mxu2  ;;  %v4801_v62 = vpop.f32.mrf.mxu3 }
 0x522   : > { %v5854_v50 = vperm.slane %v5706_v30, 0  ;;  %v10507_v14 = vpop.permute.xlu1 %10506  ;;  %v4799_v28 = vadd.f32 %v4798_v19, %v4686_v25  ;;  %v4689_v45 = vadd.f32 %v4688_v53, %v4575_v18  ;;  %v10517_v56 = vpop.permute.xlu0 %10516 }
 0x523   : > { %v5855_v34 = vperm.slane %v5707_v59, 0  ;;  %v5856_v35 = vperm.slane %v5708_v33, 0  ;;  %v5857_v17 = vperm.slane %v5709_v15, 0  ;;  %v10509_v8 = vunpack.i.h.bf16 %v10507_v14 }
 0x524   : > { %v5919_v7 = vsel %vm5880_vm2, %v5854_v50, %v5918_v49  ;;  %v10508_v20 = vunpack.i.l.bf16 %v10507_v14  ;;  %v4802_v30 = vadd.f32 %v4801_v62, %v4689_v45  ;;  %v10519_v24 = vunpack.i.h.bf16 %v10517_v56  ;;  %v5955_v49 = vld [vmem:[#allocation4 + $0x10] sm:$0xff] }
 0x525   : > { %v5920_v63 = vsel %vm5882_vm3, %v5855_v34, %v5919_v7  ;;  %v6227_v43 = vsel %vm4189_vm13, %v6219_v26, %v10509_v8  ;;  %v10518_v19 = vunpack.i.l.bf16 %v10517_v56  ;;  %v5987_v34 = vld [vmem:[#allocation4 + $0x21] sm:$0xff] }
 0x526   : > { %v5921_v27 = vsel %vm5884_vm4, %v5856_v35, %v5920_v63  ;;  %v6235_v48 = vsel %vm4222_vm14, %v6227_v43, %v10514_v47  ;;  %v6251_v61 = vsel %vm4189_vm13, %v6243_v2, %v10508_v20  ;;  %v4851_v32 = vmul.f32 %v14186_v44, %v4802_v30 }
 0x527   : > { %v5922_v13 = vsel %vm5886_vm5, %v5857_v17, %v5921_v27  ;;  %9746 = vmatmul.msk.f32.gmra.mxu1 %vm3011_vm11, %v14096_v12  ;;  %6343 = vmatmul.f32.vlgmr.msrb.gmra.mxu0 %v6235_v48  ;;  %v6259_v42 = vsel %vm4222_vm14, %v6251_v61, %v10513_v60  ;;  %v6220_v29 = vsel %vm3011_vm11, %v5955_v49, %v10519_v24 }
 0x528   : > { %5951 = vst.msk [vmem:[#allocation4 + $0x61] sm:$0xff] %vm3011_vm11, %v5922_v13  ;;  %6384 = vmatmul.f32.vlgmr.msrb.gmra.mxu3 %v6259_v42  ;;  %v4578_v57 = vpop.f32.mrf.mxu1  ;;  %v6244_v7 = vsel %vm3011_vm11, %v5987_v34, %v10518_v19  ;;  %v4887_v18 = vadd.f32 %v14309_v51, %v4851_v32 }
 0x529   : > { %v4804_v1 = vpop.f32.mrf.mxu3 }
 0x52e   : > { %v4691_v21 = vpop.f32.mrf.mxu2  ;;  %v10527_v36 = vpop.permute.xlu2 %10526 }
 0x52f   : > { %v14394_v10 = vld [vmem:[#allocation4 + $0x62] sm:$0xff]  ;;  %v4692_v9 = vadd.f32 %v4691_v21, %v4578_v57  ;;  %9747 = vmatmul.msk.f32.gmra.mxu1 %vm3011_vm11, %v14153_v46  ;;  %v10529_v35 = vunpack.i.h.bf16 %v10527_v36  ;;  %v10528_v5 = vunpack.i.l.bf16 %v10527_v36  ;;  %v4919_v21 = vmax.f32 %v4887_v18, 0.0 }
 0x530   : > { %v14396_v22 = vld [vmem:[#allocation4 + $0x60] sm:$0xff]  ;;  %v10575_v12 = vpack.i.bf16 %v14341_v31, %v14394_v10 }
 0x531   : > { %v14398_v55 = vld [vmem:[#allocation4 + $0x61] sm:$0xff]  ;;  %v10565_v39 = vpack.i.bf16 %v14153_v46, %v14396_v22  ;;  %v4805_v40 = vadd.f32 %v4804_v1, %v4692_v9  ;;  %v4850_v46 = vmul.f32 %v14186_v44, %v4799_v28  ;;  %v4807_v9 = vpop.f32.mrf.mxu3  ;;  %v5035_v45 = vrot.slane %v4919_v21, 6 }
 0x532   : > { %10576 = vrot.lane.b32.xlu0 %v10575_v12, %s11266_s1  ;;  %v10570_v58 = vpack.i.bf16 %v14339_v11, %v14398_v55  ;;  %v9669_v24 = vrot.slane %v4919_v21, 9 }
 0x533   : > { %10566 = vrot.lane.b32.xlu1 %v10565_v39, %s11268_s5  ;;  %v4852_v54 = vmul.f32 %v14186_v44, %v4805_v40  ;;  %v4886_v52 = vadd.f32 %v14309_v51, %v4850_v46  ;;  %v5033_v46 = vrot.slane %v4919_v21, 2  ;;  %v9672_v32 = vrot.slane %v5035_v45, 9 }
 0x534   : > { %10571 = vrot.lane.b32.xlu2 %v10570_v58, %s11267_s27 }
 0x535   : > { %v4888_v3 = vadd.f32 %v14309_v51, %v4852_v54  ;;  %v4918_v4 = vmax.f32 %v4886_v52, 0.0  ;;  %v5034_v52 = vrot.slane %v4919_v21, 4 }
 0x537   : > { %9748 = vmatmul.msk.f32.gmra.mxu1 %vm3011_vm11, %v14337_v41  ;;  %v4920_v23 = vmax.f32 %v4888_v3, 0.0  ;;  %v5030_v15 = vrot.slane %v4918_v4, 2  ;;  %v5031_v27 = vrot.slane %v4918_v4, 4  ;;  %v9665_v26 = vrot.slane %v4918_v4, 9 }
 0x538   : > { %v5032_v62 = vrot.slane %v4918_v4, 6 }
 0x539   : > { %v5036_v59 = vrot.slane %v4920_v23, 2  ;;  %v5037_v16 = vrot.slane %v4920_v23, 4  ;;  %v9666_v47 = vrot.slane %v5030_v15, 9  ;;  %v9729_v13 = vrot.slane %v4920_v23, 9 }
 0x53a   : > { %v9667_v6 = vrot.slane %v5031_v27, 9  ;;  %v5038_v43 = vrot.slane %v4920_v23, 6  ;;  %v5390_v12 = vmax.f32 %v4918_v4, %v9665_v26  ;;  %v9668_v54 = vrot.slane %v5032_v62, 9 }
 0x53b   : > { %v9730_v37 = vrot.slane %v5036_v59, 9  ;;  %v9731_v20 = vrot.slane %v5037_v16, 9  ;;  %v5391_v2 = vmax.f32 %v5030_v15, %v9666_v47  ;;  %v5646_v48 = vmax.f32 %v4920_v23, %v9729_v13 }
 0x53c   : > { %v5392_v1 = vmax.f32 %v5031_v27, %v9667_v6  ;;  %v9732_v40 = vrot.slane %v5038_v43, 9  ;;  %v5393_v4 = vmax.f32 %v5032_v62, %v9668_v54  ;;  %v9671_v15 = vrot.slane %v5034_v52, 9 }
 0x53d   : > { %v5647_v60 = vmax.f32 %v5036_v59, %v9730_v37  ;;  %v5648_v39 = vmax.f32 %v5037_v16, %v9731_v20  ;;  %v5710_v28 = vmax.f32 %v5390_v12, %v5646_v48  ;;  %v9670_v59 = vrot.slane %v5033_v46, 9 }
 0x53e   : > { %v5649_v19 = vmax.f32 %v5038_v43, %v9732_v40  ;;  %v5397_v27 = vmax.f32 %v5035_v45, %v9672_v32 }
 0x53f   : > { %9749 = vmatmul.msk.f32.gmra.mxu1 %vm3011_vm11, %v14394_v10  ;;  %v5711_v25 = vmax.f32 %v5391_v2, %v5647_v60  ;;  %v5712_v56 = vmax.f32 %v5392_v1, %v5648_v39  ;;  %v5858_v36 = vperm.slane %v5710_v28, 0 }
 0x541   : > { %v5859_v23 = vperm.slane %v5711_v25, 0 }
 0x544   : > { %v10532_v6 = vpop.permute.xlu0 %10531 }
 0x545   : > { %v10522_v33 = vpop.permute.xlu1 %10521  ;;  %v10533_v12 = vunpack.i.l.bf16 %v10532_v6 }
 0x546   : > { %v10524_v50 = vunpack.i.h.bf16 %v10522_v33  ;;  %v10523_v14 = vunpack.i.l.bf16 %v10522_v33 }
 0x548   : > { %v6228_v17 = vsel %vm4189_vm13, %v6220_v29, %v10524_v50  ;;  %v6252_v63 = vsel %vm4189_vm13, %v6244_v7, %v10523_v14  ;;  %v4581_v61 = vpop.f32.mrf.mxu1  ;;  %v5860_v50 = vperm.slane %v5712_v56, 0  ;;  %v5923_v14 = vsel %vm5874_vm15, %v5859_v23, %v5858_v36  ;;  %v5988_v56 = vld [vmem:[#allocation4 + $0x31] sm:$0xff] }
 0x549   : > { %v6236_v53 = vsel %vm4222_vm14, %v6228_v17, %v10529_v35  ;;  %v6260_v8 = vsel %vm4222_vm14, %v6252_v63, %v10528_v5  ;;  %v5394_v29 = vmax.f32 %v4919_v21, %v9669_v24  ;;  %v5713_v7 = vmax.f32 %v5393_v4, %v5649_v19 }
 0x54a   : > { %6346 = vmatmul.f32.gmra.mxu0 %v6236_v53  ;;  %6387 = vmatmul.f32.gmra.mxu3 %v6260_v8  ;;  %v5395_v53 = vmax.f32 %v5033_v46, %v9670_v59  ;;  %v5396_v8 = vmax.f32 %v5034_v52, %v9671_v15  ;;  %v5924_v47 = vsel %vm5876_vm0, %v5860_v50, %v5923_v14  ;;  %v5956_v46 = vld [vmem:[#allocation4 + $0x20] sm:$0xff] }
 0x54b   : > { %v5861_v60 = vperm.slane %v5713_v7, 0  ;;  %v6245_v24 = vsel %vm3011_vm11, %v5988_v56, %v10533_v12 }
 0x54e   : > { %v4694_v42 = vpop.f32.mrf.mxu2  ;;  %v10542_v39 = vpop.permute.xlu2 %10541 }
 0x54f   : > { %v4695_v57 = vadd.f32 %v4694_v42, %v4581_v61  ;;  %v5925_v42 = vsel %vm5878_vm1, %v5861_v60, %v5924_v47  ;;  %v10543_v23 = vunpack.i.l.bf16 %v10542_v39 }
 0x551   : > { %v4808_v58 = vadd.f32 %v4807_v9, %v4695_v57  ;;  %v10534_v9 = vunpack.i.h.bf16 %v10532_v6 }
 0x553   : > { %v4853_v3 = vmul.f32 %v14186_v44, %v4808_v58  ;;  %v6221_v45 = vsel %vm3011_vm11, %v5956_v46, %v10534_v9 }
 0x555   : > { %v4889_v30 = vadd.f32 %v14309_v51, %v4853_v3  ;;  %v10544_v3 = vunpack.i.h.bf16 %v10542_v39 }
 0x557   : > { %v4921_v33 = vmax.f32 %v4889_v30, 0.0 }
 0x559   : > { %v5039_v49 = vrot.slane %v4921_v33, 2  ;;  %v5040_v34 = vrot.slane %v4921_v33, 4  ;;  %v5041_v35 = vrot.slane %v4921_v33, 6  ;;  %v9733_v5 = vrot.slane %v4921_v33, 9 }
 0x55b   : > { %v9734_v16 = vrot.slane %v5039_v49, 9  ;;  %v9735_v37 = vrot.slane %v5040_v34, 9  ;;  %v9736_v17 = vrot.slane %v5041_v35, 9  ;;  %v5650_v63 = vmax.f32 %v4921_v33, %v9733_v5 }
 0x55d   : > { %v5651_v13 = vmax.f32 %v5039_v49, %v9734_v16  ;;  %v5652_v18 = vmax.f32 %v5040_v34, %v9735_v37  ;;  %v5653_v26 = vmax.f32 %v5041_v35, %v9736_v17  ;;  %v5714_v20 = vmax.f32 %v5394_v29, %v5650_v63  ;;  %v4810_v34 = vpop.f32.mrf.mxu3  ;;  %v5957_v63 = vld [vmem:[#allocation4 + $0x30] sm:$0xff] }
 0x55f   : > { %v5715_v2 = vmax.f32 %v5395_v53, %v5651_v13  ;;  %v5716_v43 = vmax.f32 %v5396_v8, %v5652_v18  ;;  %v5717_v48 = vmax.f32 %v5397_v27, %v5653_v26  ;;  %v5862_v61 = vperm.slane %v5714_v20, 0 }
 0x561   : > { %v5863_v62 = vperm.slane %v5715_v2, 0  ;;  %v5864_v21 = vperm.slane %v5716_v43, 0  ;;  %v5926_v57 = vsel %vm5880_vm2, %v5862_v61, %v5925_v42  ;;  %v5865_v25 = vperm.slane %v5717_v48, 0 }
 0x563   : > { %v5927_v58 = vsel %vm5882_vm3, %v5863_v62, %v5926_v57 }
 0x564   : > { %v5928_v1 = vsel %vm5884_vm4, %v5864_v21, %v5927_v58  ;;  %v10547_v49 = vpop.permute.xlu0 %10546 }
 0x565   : > { %v10537_v40 = vpop.permute.xlu1 %10536  ;;  %v5929_v28 = vsel %vm5886_vm5, %v5865_v25, %v5928_v1  ;;  %v10549_v29 = vunpack.i.h.bf16 %v10547_v49  ;;  %v10548_v7 = vunpack.i.l.bf16 %v10547_v49  ;;  %v4813_v43 = vpop.f32.mrf.mxu3 }
 0x566   : > { %v10539_v54 = vunpack.i.h.bf16 %v10537_v40  ;;  %5952 = vst.msk [vmem:[#allocation4 + $0x71] sm:$0xff] %vm3011_vm11, %v5929_v28  ;;  %v10538_v52 = vunpack.i.l.bf16 %v10537_v40 }
 0x567   : > { %v4584_v5 = vpop.f32.mrf.mxu1  ;;  %v6222_v8 = vsel %vm3011_vm11, %v5957_v63, %v10549_v29  ;;  %v6246_v18 = vsel %vm3011_vm11, %v14157_v38, %v10548_v7 }
 0x568   : > { %v6229_v30 = vsel %vm4189_vm13, %v6221_v45, %v10539_v54  ;;  %v6253_v36 = vsel %vm4189_vm13, %v6245_v24, %v10538_v52 }
 0x569   : > { %v6237_v19 = vsel %vm4222_vm14, %v6229_v30, %v10544_v3  ;;  %v6261_v4 = vsel %vm4222_vm14, %v6253_v36, %v10543_v23  ;;  %v10689_v23 = vld [vmem:[#allocation16] ss:$0 sm:$0xff] }
 0x56a   : > { %6349 = vmatmul.f32.gmra.mxu0 %v6237_v19  ;;  %6390 = vmatmul.f32.gmra.mxu3 %v6261_v4 }
 0x56d   : > { %v14444_v59 = vld [vmem:[#allocation4 + $0x72] sm:$0xff]  ;;  %v4697_v35 = vpop.f32.mrf.mxu2 }
 0x56e   : > { %v14446_v33 = vld [vmem:[#allocation4 + $0x70] sm:$0xff]  ;;  %9750 = vmatmul.msk.f32.gmra.mxu1 %vm3011_vm11, %v14444_v59  ;;  %v10590_v32 = vpack.i.bf16 %v14398_v55, %v14444_v59  ;;  %v4698_v16 = vadd.f32 %v4697_v35, %v4584_v5  ;;  %v10557_v37 = vpop.permute.xlu2 %10556  ;;  %v4816_v57 = vpop.f32.mrf.mxu3 }
 0x56f   : > { %v14448_v15 = vld [vmem:[#allocation4 + $0x71] sm:$0xff]  ;;  %v10580_v50 = vpack.i.bf16 %v14337_v41, %v14446_v33  ;;  %v10559_v27 = vunpack.i.h.bf16 %v10557_v37  ;;  %v10558_v47 = vunpack.i.l.bf16 %v10557_v37 }
 0x570   : > { %v10585_v14 = vpack.i.bf16 %v14396_v22, %v14448_v15  ;;  %10591 = vrot.lane.b32.xlu0 %v10590_v32, %s11266_s1  ;;  %v4811_v13 = vadd.f32 %v4810_v34, %v4698_v16  ;;  %v5958_v16 = vld [vmem:[#allocation4 + $0x40] sm:$0xff] }
 0x571   : > { %10581 = vrot.lane.b32.xlu1 %v10580_v50, %s11268_s5 }
 0x572   : > { %10586 = vrot.lane.b32.xlu2 %v10585_v14, %s11267_s27  ;;  %v4854_v48 = vmul.f32 %v14186_v44, %v4811_v13 }
 0x574   : > { %v4890_v62 = vadd.f32 %v14309_v51, %v4854_v48 }
 0x576   : > { %v4922_v9 = vmax.f32 %v4890_v62, 0.0 }
 0x578   : > { %v5042_v1 = vrot.slane %v4922_v9, 2  ;;  %v5043_v40 = vrot.slane %v4922_v9, 4  ;;  %v5044_v28 = vrot.slane %v4922_v9, 6 }
 0x57a   : > { %v9674_v52 = vrot.slane %v5042_v1, 9  ;;  %v9675_v45 = vrot.slane %v5043_v40, 9  ;;  %v9676_v56 = vrot.slane %v5044_v28, 9 }
 0x57c   : > { %v4819_v36 = vpop.f32.mrf.mxu3  ;;  %v5399_v35 = vmax.f32 %v5042_v1, %v9674_v52  ;;  %v5400_v5 = vmax.f32 %v5043_v40, %v9675_v45  ;;  %v14490_v29 = vmax.f32 %v5044_v28, %v9676_v56 }
 0x584   : > { %v4587_v60 = vpop.f32.mrf.mxu1  ;;  %v10562_v54 = vpop.permute.xlu0 %10561 }
 0x585   : > { %v10552_v17 = vpop.permute.xlu1 %10551  ;;  %v10564_v24 = vunpack.i.h.bf16 %v10562_v54  ;;  %v10563_v19 = vunpack.i.l.bf16 %v10562_v54 }
 0x586   : > { %v10554_v41 = vunpack.i.h.bf16 %v10552_v17  ;;  %v10553_v53 = vunpack.i.l.bf16 %v10552_v17 }
 0x587   : > { %v6223_v63 = vsel %vm3011_vm11, %v5958_v16, %v10564_v24 }
 0x588   : > { %v6230_v26 = vsel %vm4189_vm13, %v6222_v8, %v10554_v41  ;;  %v6254_v20 = vsel %vm4189_vm13, %v6246_v18, %v10553_v53  ;;  %v6247_v41 = vsel %vm3011_vm11, %v14341_v31, %v10563_v19 }
 0x589   : > { %v6238_v6 = vsel %vm4222_vm14, %v6230_v26, %v10559_v27  ;;  %v6262_v2 = vsel %vm4222_vm14, %v6254_v20, %v10558_v47 }
 0x58a   : > { %6352 = vmatmul.f32.gmra.mxu0 %v6238_v6  ;;  %6393 = vmatmul.f32.gmra.mxu3 %v6262_v2  ;;  %v4700_v61 = vpop.f32.mrf.mxu2 }
 0x58b   : > { %v4701_v42 = vadd.f32 %v4700_v61, %v4587_v60 }
 0x58c   : > { %v4590_v12 = vpop.f32.mrf.mxu1 }
 0x58d   : > { %v4814_v21 = vadd.f32 %v4813_v43, %v4701_v42 }
 0x58e   : > { %v10572_v53 = vpop.permute.xlu2 %10571 }
 0x58f   : > { %v4855_v38 = vmul.f32 %v14186_v44, %v4814_v21  ;;  %v9673_v44 = vrot.slane %v4922_v9, 9  ;;  %v10574_v61 = vunpack.i.h.bf16 %v10572_v53  ;;  %v10573_v42 = vunpack.i.l.bf16 %v10572_v53 }
 0x591   : > { %v4891_v25 = vadd.f32 %v14309_v51, %v4855_v38  ;;  %v5398_v14 = vmax.f32 %v4922_v9, %v9673_v44 }
 0x592   : > { %v4703_v39 = vpop.f32.mrf.mxu2 }
 0x593   : > { %v4704_v58 = vadd.f32 %v4703_v39, %v4590_v12  ;;  %v14476_v3 = vmax.f32 %v4891_v25, 0.0 }
 0x594   : > { %v4593_v4 = vpop.f32.mrf.mxu1 }
 0x595   : > { %v4817_v46 = vadd.f32 %v4816_v57, %v4704_v58  ;;  %v5045_v49 = vrot.slane %v14476_v3, 2  ;;  %v5046_v37 = vrot.slane %v14476_v3, 4  ;;  %v5047_v18 = vrot.slane %v14476_v3, 6 }
 0x596   : > { %v9677_v26 = vrot.slane %v14476_v3, 9 }
 0x597   : > { %v4856_v30 = vmul.f32 %v10689_v23, %v4817_v46  ;;  %v9678_v20 = vrot.slane %v5045_v49, 9  ;;  %v9679_v48 = vrot.slane %v5046_v37, 9  ;;  %v9680_v39 = vrot.slane %v5047_v18, 9 }
 0x598   : > { %v5402_v25 = vmax.f32 %v14476_v3, %v9677_v26  ;;  %v14513_v26 = vld [vmem:[#allocation19] ss:$0 sm:$0xff] }
 0x599   : > { %v4892_v32 = vadd.f32 %v14309_v51, %v4856_v30  ;;  %v5403_v58 = vmax.f32 %v5045_v49, %v9678_v20  ;;  %v5404_v3 = vmax.f32 %v5046_v37, %v9679_v48  ;;  %v14517_v48 = vld [vmem:[#allocation20] ss:$0 sm:$0xff] }
 0x59a   : > { %v4706_v50 = vpop.f32.mrf.mxu2 }
 0x59b   : > { %v4707_v34 = vadd.f32 %v4706_v50, %v4593_v4  ;;  %v4924_v7 = vmax.f32 %v4892_v32, 0.0 }
 0x59d   : > { %v4820_v17 = vadd.f32 %v4819_v36, %v4707_v34  ;;  %v5048_v8 = vrot.slane %v4924_v7, 2  ;;  %v5049_v27 = vrot.slane %v4924_v7, 4  ;;  %v5050_v47 = vrot.slane %v4924_v7, 6 }
 0x59e   : > { %v9737_v13 = vrot.slane %v4924_v7, 9  ;;  %v5405_v34 = vmax.f32 %v5047_v18, %v9680_v39 }
 0x59f   : > { %v4857_v60 = vmul.f32 %v10689_v23, %v4820_v17  ;;  %v9738_v6 = vrot.slane %v5048_v8, 9  ;;  %v9739_v2 = vrot.slane %v5049_v27, 9  ;;  %v9740_v31 = vrot.slane %v5050_v47, 9 }
 0x5a0   : > { %v5654_v43 = vmax.f32 %v4924_v7, %v9737_v13 }
 0x5a1   : > { %v4893_v62 = vadd.f32 %v14309_v51, %v4857_v60  ;;  %v5655_v21 = vmax.f32 %v5048_v8, %v9738_v6  ;;  %v5656_v38 = vmax.f32 %v5049_v27, %v9739_v2  ;;  %v5657_v57 = vmax.f32 %v5050_v47, %v9740_v31  ;;  %v6426_v2 = vpop.f32.mrf.mxu1 }
 0x5a2   : > { %v5718_v9 = vmax.f32 %v5398_v14, %v5654_v43 }
 0x5a3   : > { %v4925_v1 = vmax.f32 %v4893_v62, 0.0  ;;  %v5719_v40 = vmax.f32 %v5399_v35, %v5655_v21  ;;  %v5720_v28 = vmax.f32 %v5400_v5, %v5656_v38  ;;  %v5721_v54 = vmax.f32 %v14490_v29, %v5657_v57 }
 0x5a4   : > { %v5866_v51 = vperm.slane %v5718_v9, 0  ;;  %v6344_v13 = vpop.f32.mrf.mxu0 }
 0x5a5   : > { %v10567_v12 = vpop.permute.xlu1 %10566  ;;  %v5051_v44 = vrot.slane %v4925_v1, 2  ;;  %v5052_v52 = vrot.slane %v4925_v1, 4  ;;  %v5053_v45 = vrot.slane %v4925_v1, 6  ;;  %v9741_v56 = vrot.slane %v4925_v1, 9 }
 0x5a6   : > { %v10569_v46 = vunpack.i.h.bf16 %v10567_v12  ;;  %v5867_v23 = vperm.slane %v5719_v40, 0  ;;  %v5868_v30 = vperm.slane %v5720_v28, 0  ;;  %v10568_v24 = vunpack.i.l.bf16 %v10567_v12  ;;  %v6010_v28 = vld [vmem:[#allocation4 + $0x90] sm:$0xff] }
 0x5a7   : > { %v9742_v19 = vrot.slane %v5051_v44, 9  ;;  %v9743_v36 = vrot.slane %v5052_v52, 9  ;;  %v9744_v4 = vrot.slane %v5053_v45, 9  ;;  %v5658_v32 = vmax.f32 %v4925_v1, %v9741_v56 }
 0x5a8   : > { %v5930_v50 = vsel %vm5874_vm15, %v5867_v23, %v5866_v51  ;;  %v6231_v14 = vsel %vm4189_vm13, %v6223_v63, %v10569_v46  ;;  %v6255_v49 = vsel %vm4189_vm13, %v6247_v41, %v10568_v24  ;;  %v5869_v8 = vperm.slane %v5721_v54, 0  ;;  %v6018_v54 = vld [vmem:[#allocation4 + $0x91] sm:$0xff]  ;;  %v6520_v46 = vld [vmem:[#allocation5 + $0x1] sm:$0xff]  ;;  %v10577_v24 = vpop.permute.xlu0 %10576 }
 0x5a9   : > { %v5659_v35 = vmax.f32 %v5051_v44, %v9742_v19  ;;  %v5660_v5 = vmax.f32 %v5052_v52, %v9743_v36  ;;  %v5661_v29 = vmax.f32 %v5053_v45, %v9744_v4  ;;  %v5931_v7 = vsel %vm5876_vm0, %v5868_v30, %v5930_v50  ;;  %v6429_v45 = vpop.f32.mrf.mxu1 }
 0x5aa   : > { %v5722_v16 = vmax.f32 %v5402_v25, %v5658_v32  ;;  %v6239_v17 = vsel %vm4222_vm14, %v6231_v14, %v10574_v61  ;;  %v6263_v53 = vsel %vm4222_vm14, %v6255_v49, %v10573_v42  ;;  %v5932_v20 = vsel %vm5878_vm1, %v5869_v8, %v5931_v7 }
 0x5ab   : > { %v5723_v27 = vmax.f32 %v5403_v58, %v5659_v35  ;;  %v5724_v37 = vmax.f32 %v5404_v3, %v5660_v5  ;;  %v5725_v47 = vmax.f32 %v5405_v34, %v5661_v29  ;;  %6355 = vmatmul.f32.gmra.mxu0 %v6239_v17  ;;  %6396 = vmatmul.f32.gmra.mxu3 %v6263_v53  ;;  %v6385_v63 = vpop.f32.mrf.mxu3  ;;  %v10579_v36 = vunpack.i.h.bf16 %v10577_v24 }
 0x5ac   : > { %v5870_v41 = vperm.slane %v5722_v16, 0  ;;  %v6386_v18 = vadd.f32 %v6385_v63, %v6344_v13  ;;  %v10578_v4 = vunpack.i.l.bf16 %v10577_v24  ;;  %v6760_v63 = vld [vmem:[#allocation22 + $0x78] sm:$0xff] }
 0x5ad   : > { %v5871_v60 = vperm.slane %v5723_v27, 0  ;;  %v5872_v6 = vperm.slane %v5724_v37, 0  ;;  %v5873_v61 = vperm.slane %v5725_v47, 0  ;;  %v6224_v35 = vsel %vm3011_vm11, %v14339_v11, %v10579_v36  ;;  %6841 = vmatpush.msrb.mxu2 %v6760_v63 }
 0x5ae   : > { %v5933_v31 = vsel %vm5880_vm2, %v5870_v41, %v5932_v20  ;;  %v6427_v43 = vadd.f32 %v6426_v2, %v6386_v18  ;;  %v6248_v5 = vsel %vm3011_vm11, %v14398_v55, %v10578_v4  ;;  %v6759_v41 = vld [vmem:[#allocation22 + $0x70] sm:$0xff]  ;;  %v6758_v18 = vld [vmem:[#allocation22 + $0x68] sm:$0xff]  ;;  %v6757_v20 = vld [vmem:[#allocation22 + $0x60] sm:$0xff] }
 0x5af   : > { %v5934_v42 = vsel %vm5882_vm3, %v5871_v60, %v5933_v31  ;;  %6842 = vmatpush.msrb.mxu2 %v6759_v41  ;;  %v6755_v2 = vld [vmem:[#allocation22 + $0x50] sm:$0xff]  ;;  %v6754_v31 = vld [vmem:[#allocation22 + $0x48] sm:$0xff] }
 0x5b0   : > { %v5935_v62 = vsel %vm5884_vm4, %v5872_v6, %v5934_v42  ;;  %v6454_v21 = vmul.f32 %v14513_v26, %v6427_v43  ;;  %v6756_v6 = vld [vmem:[#allocation22 + $0x58] sm:$0xff]  ;;  %v6753_v43 = vld [vmem:[#allocation22 + $0x40] sm:$0xff] }
 0x5b1   : > { %v5936_v38 = vsel %vm5886_vm5, %v5873_v61, %v5935_v62  ;;  %v6432_v37 = vpop.f32.mrf.mxu1  ;;  %6843 = vmatpush.msrb.mxu2 %v6758_v18  ;;  %v6752_v61 = vld [vmem:[#allocation22 + $0x38] sm:$0xff] }
 0x5b2   : > { %5953 = vst.msk [vmem:[#allocation4 + $0x81] sm:$0xff] %vm3011_vm11, %v5936_v38  ;;  %v6466_v57 = vadd.f32 %v14517_v48, %v6454_v21  ;;  %v6751_v21 = vld [vmem:[#allocation22 + $0x30] sm:$0xff] }
 0x5b3   : > { %6844 = vmatpush.msrb.mxu2 %v6757_v20 }
 0x5b4   : > { %v6474_v9 = vmax.f32 %v6466_v57, 0.0 }
 0x5b5   : > { %6845 = vmatpush.msrb.mxu2 %v6756_v6 }
 0x5b6   : > { %6504 = vst.msk [vmem:[#allocation5 + $0x11] sm:$0xff] %vm4189_vm13, %v6474_v9 }
 0x5b7   : > { %6846 = vmatpush.msrb.mxu2 %v6755_v2 }
 0x5b9   : > { %v6025_v12 = vld [vmem:[#allocation4 + $0x82] sm:$0xff]  ;;  %6847 = vmatpush.msrb.mxu2 %v6754_v31  ;;  %v6435_v57 = vpop.f32.mrf.mxu1 }
 0x5ba   : > { %v14526_v39 = vld [vmem:[#allocation4 + $0x81] sm:$0xff]  ;;  %9751 = vmatmul.msk.f32.gmra.mxu1 %vm3011_vm11, %v6025_v12  ;;  %v10605_v40 = vpack.i.bf16 %v14448_v15, %v6025_v12 }
 0x5bb   : > { %v6009_v25 = vld [vmem:[#allocation4 + $0x80] sm:$0xff]  ;;  %v10600_v58 = vpack.i.bf16 %v14446_v33, %v14526_v39  ;;  %6848 = vmatpush.msrb.mxu2 %v6753_v43 }
 0x5bc   : > { %v10595_v1 = vpack.i.bf16 %v14394_v10, %v6009_v25  ;;  %10606 = vrot.lane.b32.xlu0 %v10605_v40, %s11266_s1  ;;  %v6749_v40 = vld [vmem:[#allocation22 + $0x20] sm:$0xff]  ;;  %s9304_s1 = scalar_lea.sflag [#allocation10], %s987_s26 }
 0x5bd   : > { %10601 = vrot.lane.b32.xlu2 %v10600_v58, %s11267_s27  ;;  %v14541_v56 = vld [vmem:[#allocation5 + $0x11] sm:$0xff]  ;;  %6849 = vmatpush.msrb.mxu2 %v6752_v61  ;;  %v6750_v58 = vld [vmem:[#allocation22 + $0x28] sm:$0xff] }
 0x5be   : > { %10596 = vrot.lane.b32.xlu1 %v10595_v1, %s11268_s5 }
 0x5bf   : > { %6850 = vmatpush.msrb.mxu2 %v6751_v21 }
 0x5c1   : > { %6851 = vmatpush.msrb.mxu2 %v6750_v58 }
 0x5c3   : > { %6852 = vmatpush.msrb.mxu2 %v6749_v40 }
 0x5c4   : > { %6081 = vrot.lane.b32.xlu0 %v14444_v59, %s11268_s5 }
 0x5c5   : > { %6209 = vrot.lane.b32.xlu2 %v6018_v54, %s11267_s27 }
 0x5c6   : > { %6177 = vrot.lane.b32.xlu1 %v6010_v28, %s11268_s5  ;;  %v6748_v28 = vld [vmem:[#allocation22 + $0x18] sm:$0xff] }
 0x5c7   : > { %v6347_v44 = vpop.f32.mrf.mxu0  ;;  %6853 = vmatpush.msrb.mxu2 %v6748_v28 }
 0x5cc   : > { %6595 = vrot.lane.b32.xlu0 %v14541_v56, %s11268_s5  ;;  %v10587_v32 = vpop.permute.xlu2 %10586 }
 0x5cd   : > { %v6388_v10 = vpop.f32.mrf.mxu3  ;;  %6593 = vrot.lane.b32.xlu2 %v6520_v46, %s11268_s5  ;;  %v10589_v49 = vunpack.i.h.bf16 %v10587_v32  ;;  %v10588_v34 = vunpack.i.l.bf16 %v10587_v32  ;;  %v6747_v46 = vld [vmem:[#allocation22 + $0x10] sm:$0xff] }
 0x5ce   : > { %v6389_v52 = vadd.f32 %v6388_v10, %v6347_v44  ;;  %6113 = vrot.lane.b32.xlu1 %v6009_v25, %s11267_s27  ;;  %6854 = vmatpush.msrb.mxu2 %v6747_v46  ;;  %v6746_v44 = vld [vmem:[#allocation22 + $0x8] sm:$0xff]  ;;  %v6745_v10 = vld [vmem:[#allocation22] sm:$0xff]  ;;  %s11154_s27 = sshra.s32 %s9317_s11, 4  ;;  %s11155_s27 = int_to_ptr.hbm [resolvable:$true] %s11154_s27 }
 0x5cf   : > { %s11156_s7 = scalar_lea.hbm %s11155_s27, 1  ;;  %p11161_p3 = scmp.lt.s32.totalorder %s11155_s27, %s15141_s0 }
 0x5d0   : > { %v6430_v51 = vadd.f32 %v6429_v45, %v6389_v52  ;;  %6855 = vmatpush.msrb.mxu2 %v6746_v44  ;;  %p11157_p0 = scmp.ne.s32.totalorder %s11155_s27, %s11156_s7 }
 0x5d2   : > { %v6455_v23 = vmul.f32 %v14513_v26, %v6430_v51  ;;  %6856 = vmatpush.msrb.mxu2 %v6745_v10  ;;  %v6026_v51 = vld [vmem:[#allocation4 + $0x92] sm:$0xff]  ;;  %p11158_p1 = pnand %p11157_p0, %p11437_p5 }
 0x5d3   : > { %9752 = vmatmul.msk.f32.gmra.mxu1 %vm3011_vm11, %v6026_v51  ;;  %v14619_v51 = vld [vmem:[#allocation5 + $0x12] sm:$0xff] }
 0x5d4   : > { %v6467_v30 = vadd.f32 %v14517_v48, %v6455_v23  ;;  %v6512_v23 = vld [vmem:[#allocation5] sm:$0xff]  ;;  %p11159_p2 = pneg %p11158_p1 }
 0x5d6   : > { %v6475_v59 = vmax.f32 %v6467_v30, 0.0 }
 0x5d8   : > { %6505 = vst.msk [vmem:[#allocation5 + $0x21] sm:$0xff] %vm4189_vm13, %v6475_v59 }
 0x5df   : > { %v14549_v19 = vld [vmem:[#allocation5 + $0x21] sm:$0xff] }
 0x5e0   : > { %6597 = vrot.lane.b32.xlu1 %v14549_v19, %s11268_s5 }
 0x5e2   : > { %v10592_v59 = vpop.permute.xlu0 %10591 }
 0x5e3   : > { %v10582_v3 = vpop.permute.xlu1 %10581  ;;  %v10594_v36 = vunpack.i.h.bf16 %v10592_v59  ;;  %v10593_v4 = vunpack.i.l.bf16 %v10592_v59 }
 0x5e4   : > { %v10584_v50 = vunpack.i.h.bf16 %v10582_v3  ;;  %v10583_v14 = vunpack.i.l.bf16 %v10582_v3 }
 0x5e6   : > { %v6232_v29 = vsel %vm4189_vm13, %v6224_v35, %v10584_v50  ;;  %v6256_v7 = vsel %vm4189_vm13, %v6248_v5, %v10583_v14  ;;  %v6438_v5 = vpop.f32.mrf.mxu1 }
 0x5e7   : > { %v6240_v16 = vsel %vm4222_vm14, %v6232_v29, %v10589_v49  ;;  %v6264_v17 = vsel %vm4222_vm14, %v6256_v7, %v10588_v34  ;;  %v6350_v53 = vpop.f32.mrf.mxu0 }
 0x5e8   : > { %6358 = vmatmul.f32.gmra.mxu0 %v6240_v16  ;;  %6399 = vmatmul.f32.gmra.mxu3 %v6264_v17  ;;  %v6225_v16 = vsel %vm3011_vm11, %v14396_v22, %v10594_v36  ;;  %v6249_v17 = vsel %vm3011_vm11, %v14448_v15, %v10593_v4 }
 0x5ed   : > { %v6391_v8 = vpop.f32.mrf.mxu3 }
 0x5ee   : > { %v6392_v27 = vadd.f32 %v6391_v8, %v6350_v53  ;;  %v6441_v28 = vpop.f32.mrf.mxu1 }
 0x5f0   : > { %v6433_v47 = vadd.f32 %v6432_v37, %v6392_v27 }
 0x5f2   : > { %v6456_v11 = vmul.f32 %v14513_v26, %v6433_v47 }
 0x5f4   : > { %v6468_v13 = vadd.f32 %v14517_v48, %v6456_v11 }
 0x5f6   : > { %v6476_v55 = vmax.f32 %v6468_v13, 0.0 }
 0x5f8   : > { %6506 = vst.msk [vmem:[#allocation5 + $0x31] sm:$0xff] %vm4189_vm13, %v6476_v55 }
 0x5ff   : > { %v14564_v60 = vld [vmem:[#allocation5 + $0x31] sm:$0xff] }
 0x600   : > { %6599 = vrot.lane.b32.xlu2 %v14564_v60, %s11268_s5  ;;  %v14623_v59 = vld [vmem:[#allocation5 + $0x32] sm:$0xff] }
 0x607   : > { %v6353_v42 = vpop.f32.mrf.mxu0 }
 0x60d   : > { %v6394_v62 = vpop.f32.mrf.mxu3 }
 0x60e   : > { %v6395_v38 = vadd.f32 %v6394_v62, %v6353_v42 }
 0x610   : > { %v6436_v9 = vadd.f32 %v6435_v57, %v6395_v38 }
 0x612   : > { %v6457_v12 = vmul.f32 %v14513_v26, %v6436_v9 }
 0x614   : > { %v6469_v25 = vadd.f32 %v14517_v48, %v6457_v12  ;;  %v14608_v12 = vld [vmem:[#allocation5 + $0x30] sm:$0xff] }
 0x616   : > { %v6477_v1 = vmax.f32 %v6469_v25, 0.0 }
 0x617   : > { %v10602_v54 = vpop.permute.xlu2 %10601 }
 0x618   : > { %6507 = vst.msk [vmem:[#allocation5 + $0x41] sm:$0xff] %vm4189_vm13, %v6477_v1  ;;  %v10604_v29 = vunpack.i.h.bf16 %v10602_v54  ;;  %v10603_v7 = vunpack.i.l.bf16 %v10602_v54 }
 0x61f   : > { %v14571_v52 = vld [vmem:[#allocation5 + $0x41] sm:$0xff]  ;;  %v6210_v45 = vpop.permute.xlu2 %6209 }
 0x620   : > { %6601 = vrot.lane.b32.xlu0 %v14571_v52, %s11268_s5 }
 0x627   : > { %v6594_v30 = vpop.permute.xlu2 %6593 }
 0x628   : > { %v6713_v24 = vsel %vm4189_vm13, %v6512_v23, %v6594_v30  ;;  %v6356_v32 = vpop.f32.mrf.mxu0  ;;  %v6576_v23 = vld [vmem:[#allocation5 + $0x91] sm:$0xff] }
 0x629   : > { %6857 = vmatmul.f32.vlgmr.msrb.gmra.mxu2 %v6713_v24  ;;  %v10610_v30 = vpack.i.bf16 %v14619_v51, %v6576_v23  ;;  %v10625_v24 = vpack.i.bf16 %v14564_v60, %v14623_v59 }
 0x62e   : > { %v6397_v3 = vpop.f32.mrf.mxu3  ;;  %v10607_v35 = vpop.permute.xlu0 %10606 }
 0x62f   : > { %v6398_v14 = vadd.f32 %v6397_v3, %v6356_v32  ;;  %v10608_v37 = vunpack.i.l.bf16 %v10607_v35  ;;  %v10609_v20 = vunpack.i.h.bf16 %v10607_v35  ;;  %v14630_v32 = vld [vmem:[#allocation5 + $0x40] sm:$0xff] }
 0x630   : > { %v10597_v50 = vpop.permute.xlu1 %10596  ;;  %v6790_v35 = vld [vmem:[#allocation22 + $0x168] sm:$0xff] }
 0x631   : > { %v10599_v49 = vunpack.i.h.bf16 %v10597_v50  ;;  %v10598_v34 = vunpack.i.l.bf16 %v10597_v50  ;;  %v6439_v53 = vadd.f32 %v6438_v5, %v6398_v14  ;;  %v6250_v15 = vsel %vm3011_vm11, %v14526_v39, %v10608_v37  ;;  %v14596_v39 = vld [vmem:[#allocation5 + $0x10] sm:$0xff]  ;;  %v6789_v5 = vld [vmem:[#allocation22 + $0x160] sm:$0xff] }
 0x632   : > { %v6226_v2 = vsel %vm3011_vm11, %v14446_v33, %v10609_v20  ;;  %v14604_v33 = vld [vmem:[#allocation5 + $0x20] sm:$0xff] }
 0x633   : > { %v6233_v8 = vsel %vm4189_vm13, %v6225_v16, %v10599_v49  ;;  %v6257_v27 = vsel %vm4189_vm13, %v6249_v17, %v10598_v34  ;;  %v6458_v13 = vmul.f32 %v14513_v26, %v6439_v53  ;;  %v6792_v49 = vld [vmem:[#allocation22 + $0x178] sm:$0xff]  ;;  %v6791_v34 = vld [vmem:[#allocation22 + $0x170] sm:$0xff]  ;;  %v6786_v53 = vld [vmem:[#allocation22 + $0x148] sm:$0xff]  ;;  %v10620_v23 = vpack.i.bf16 %v14604_v33, %v14549_v19 }
 0x634   : > { %v6241_v47 = vsel %vm4222_vm14, %v6233_v8, %v10604_v29  ;;  %v6265_v11 = vsel %vm4222_vm14, %v6257_v27, %v10603_v7  ;;  %6923 = vmatpush.msra.mxu3 %v6792_v49  ;;  %v6788_v29 = vld [vmem:[#allocation22 + $0x158] sm:$0xff]  ;;  %v6787_v7 = vld [vmem:[#allocation22 + $0x150] sm:$0xff]  ;;  %v6785_v37 = vld [vmem:[#allocation22 + $0x140] sm:$0xff] }
 0x635   : > { %6361 = vmatmul.f32.gmra.mxu0 %v6241_v47  ;;  %6402 = vmatmul.f32.gmra.mxu3 %v6265_v11  ;;  %v6470_v55 = vadd.f32 %v14517_v48, %v6458_v13 }
 0x636   : > { %v6082_v18 = vpop.permute.xlu0 %6081  ;;  %6924 = vmatpush.msra.mxu3 %v6791_v34 }
 0x637   : > { %v6478_v63 = vmax.f32 %v6470_v55, 0.0  ;;  %v6234_v31 = vsel %vm4189_vm13, %v6226_v2, %v6082_v18  ;;  %v6444_v47 = vpop.f32.mrf.mxu1  ;;  %v6784_v55 = vld [vmem:[#allocation22 + $0x138] sm:$0xff] }
 0x638   : > { %v6178_v22 = vpop.permute.xlu1 %6177  ;;  %6925 = vmatpush.msra.mxu3 %v6790_v35 }
 0x639   : > { %v6258_v41 = vsel %vm4189_vm13, %v6250_v15, %v6178_v22  ;;  %6508 = vst.msk [vmem:[#allocation5 + $0x51] sm:$0xff] %vm4189_vm13, %v6478_v63  ;;  %v6783_v15 = vld [vmem:[#allocation22 + $0x130] sm:$0xff] }
 0x63a   : > { %v6266_v6 = vsel %vm4222_vm14, %v6258_v41, %v6210_v45  ;;  %6926 = vmatpush.msra.mxu3 %v6789_v5  ;;  %v6782_v41 = vld [vmem:[#allocation22 + $0x128] sm:$0xff]  ;;  %v6807_v5 = vld [vmem:[#allocation22 + $0x1f0] sm:$0xff] }
 0x63c   : > { %6927 = vmatpush.msra.mxu3 %v6788_v29 }
 0x63d   : > { %6405 = vmatmul.f32.gmra.mxu3 %v6266_v6  ;;  %v6781_v6 = vld [vmem:[#allocation22 + $0x120] sm:$0xff] }
 0x63e   : > { %v6596_v61 = vpop.permute.xlu0 %6595  ;;  %6928 = vmatpush.msra.mxu3 %v6787_v7  ;;  %v6806_v7 = vld [vmem:[#allocation22 + $0x1e8] sm:$0xff] }
 0x63f   : > { %v6714_v21 = vsel %vm4189_vm13, %v14596_v39, %v6596_v61 }
 0x640   : > { %v6114_v43 = vpop.permute.xlu1 %6113  ;;  %v14598_v62 = vld [vmem:[#allocation5 + $0x51] sm:$0xff]  ;;  %6860 = vmatmul.f32.gmra.mxu2 %v6714_v21  ;;  %6929 = vmatpush.msra.mxu3 %v6786_v53  ;;  %v6805_v53 = vld [vmem:[#allocation22 + $0x1e0] sm:$0xff] }
 0x641   : > { %v6242_v42 = vsel %vm4222_vm14, %v6234_v31, %v6114_v43  ;;  %6603 = vrot.lane.b32.xlu1 %v14598_v62, %s11268_s5  ;;  %v14628_v36 = vld [vmem:[#allocation5 + $0x52] sm:$0xff] }
 0x642   : > { %6364 = vmatmul.f32.gmra.mxu0 %v6242_v42  ;;  %v10640_v50 = vpack.i.bf16 %v14598_v62, %v14628_v36  ;;  %v14641_v17 = vld [vmem:[#allocation5 + $0x50] sm:$0xff]  ;;  %6930 = vmatpush.msra.mxu3 %v6785_v37 }
 0x643   : > { %v6780_v42 = vld [vmem:[#allocation22 + $0x118] sm:$0xff] }
 0x644   : > { %6931 = vmatpush.msra.mxu3 %v6784_v55  ;;  %v6804_v37 = vld [vmem:[#allocation22 + $0x1d8] sm:$0xff]  ;;  %v6802_v55 = vld [vmem:[#allocation22 + $0x1c8] sm:$0xff] }
 0x646   : > { %6932 = vmatpush.msra.mxu3 %v6783_v15  ;;  %v6801_v15 = vld [vmem:[#allocation22 + $0x1c0] sm:$0xff] }
 0x648   : > { %6933 = vmatpush.msra.mxu3 %v6782_v41  ;;  %v6769_v41 = vld [vmem:[#allocation22 + $0xc0] sm:$0xff] }
 0x64a   : > { %6934 = vmatpush.msra.mxu3 %v6781_v6  ;;  %v6799_v6 = vld [vmem:[#allocation22 + $0x1b0] sm:$0xff] }
 0x64c   : > { %6935 = vmatpush.msra.mxu3 %v6780_v42  ;;  %v6765_v42 = vld [vmem:[#allocation22 + $0xa0] sm:$0xff] }
 0x650   : > { %v6447_v31 = vpop.f32.mrf.mxu1 }
 0x652   : > { %v6598_v38 = vpop.permute.xlu1 %6597 }
 0x653   : > { %v6715_v57 = vsel %vm4189_vm13, %v14604_v33, %v6598_v38  ;;  %v6779_v38 = vld [vmem:[#allocation22 + $0x110] sm:$0xff] }
 0x654   : > { %6863 = vmatmul.f32.gmra.mxu2 %v6715_v57  ;;  %6936 = vmatpush.msra.mxu3 %v6779_v38  ;;  %v6764_v38 = vld [vmem:[#allocation22 + $0x98] sm:$0xff] }
 0x65a   : > { %v6600_v9 = vpop.permute.xlu2 %6599 }
 0x65b   : > { %v6716_v25 = vsel %vm4189_vm13, %v14608_v12, %v6600_v9  ;;  %v6778_v9 = vld [vmem:[#allocation22 + $0x108] sm:$0xff] }
 0x65c   : > { %6866 = vmatmul.f32.gmra.mxu2 %v6716_v25  ;;  %6937 = vmatpush.msra.mxu3 %v6778_v9  ;;  %v6763_v9 = vld [vmem:[#allocation22 + $0x90] sm:$0xff] }
 0x665   : > { %v6359_v58 = vpop.f32.mrf.mxu0 }
 0x66b   : > { %v6400_v1 = vpop.f32.mrf.mxu3 }
 0x66c   : > { %v6401_v40 = vadd.f32 %v6400_v1, %v6359_v58  ;;  %v6777_v58 = vld [vmem:[#allocation22 + $0x100] sm:$0xff] }
 0x66d   : > { %6938 = vmatpush.msra.mxu3 %v6777_v58  ;;  %v6762_v58 = vld [vmem:[#allocation22 + $0x88] sm:$0xff] }
 0x66e   : > { %v6442_v54 = vadd.f32 %v6441_v28, %v6401_v40 }
 0x670   : > { %v6459_v46 = vmul.f32 %v14513_v26, %v6442_v54 }
 0x672   : > { %v6471_v44 = vadd.f32 %v14517_v48, %v6459_v46  ;;  %v14668_v46 = vld [vmem:[#allocation5 + $0x42] sm:$0xff] }
 0x674   : > { %v6479_v10 = vmax.f32 %v6471_v44, 0.0 }
 0x676   : > { %6509 = vst.msk [vmem:[#allocation5 + $0x61] sm:$0xff] %vm4189_vm13, %v6479_v10 }
 0x67d   : > { %v14615_v45 = vld [vmem:[#allocation5 + $0x61] sm:$0xff] }
 0x67e   : > { %6605 = vrot.lane.b32.xlu2 %v14615_v45, %s11268_s5  ;;  %v14637_v14 = vld [vmem:[#allocation5 + $0x60] sm:$0xff] }
 0x686   : > { %10611 = vrot.lane.b32.xlu2 %v10610_v30, %s11268_s5  ;;  %v14678_v30 = vld [vmem:[#allocation5 + $0x62] sm:$0xff] }
 0x68e   : > { %10626 = vrot.lane.b32.xlu2 %v10625_v24, %s11268_s5 }
 0x692   : > { %v6602_v4 = vpop.permute.xlu0 %6601 }
 0x693   : > { %v6717_v3 = vsel %vm4189_vm13, %v14630_v32, %v6602_v4 }
 0x694   : > { %6869 = vmatmul.f32.gmra.mxu2 %v6717_v3  ;;  %v10635_v3 = vpack.i.bf16 %v14630_v32, %v14571_v52 }
 0x696   : > { %10641 = vrot.lane.b32.xlu2 %v10640_v50, %s11268_s5  ;;  %v10645_v50 = vpack.i.bf16 %v14678_v30, %v14641_v17 }
 0x69e   : > { %6635 = vrot.lane.b32.xlu2 %v14637_v14, %s11268_s5 }
 0x6b2   : > { %v6362_v27 = vpop.f32.mrf.mxu0 }
 0x6b3   : > { %v6604_v16 = vpop.permute.xlu1 %6603 }
 0x6b4   : > { %v6718_v8 = vsel %vm4189_vm13, %v14641_v17, %v6604_v16  ;;  %v6776_v16 = vld [vmem:[#allocation22 + $0xf8] sm:$0xff] }
 0x6b5   : > { %6872 = vmatmul.f32.gmra.mxu2 %v6718_v8  ;;  %6882 = vmatpush.msra.mxu0 %v6776_v16  ;;  %v6775_v8 = vld [vmem:[#allocation22 + $0xf0] sm:$0xff] }
 0x6b7   : > { %6883 = vmatpush.msra.mxu0 %v6775_v8 }
 0x6b8   : > { %v6403_v11 = vpop.f32.mrf.mxu3 }
 0x6b9   : > { %v6404_v13 = vadd.f32 %v6403_v11, %v6362_v27  ;;  %v6774_v27 = vld [vmem:[#allocation22 + $0xe8] sm:$0xff]  ;;  %v6803_v11 = vld [vmem:[#allocation22 + $0x1d0] sm:$0xff] }
 0x6ba   : > { %6884 = vmatpush.msra.mxu0 %v6774_v27 }
 0x6bb   : > { %v6445_v22 = vadd.f32 %v6444_v47, %v6404_v13  ;;  %v6773_v47 = vld [vmem:[#allocation22 + $0xe0] sm:$0xff]  ;;  %v6772_v13 = vld [vmem:[#allocation22 + $0xd8] sm:$0xff] }
 0x6bc   : > { %6885 = vmatpush.msra.mxu0 %v6773_v47 }
 0x6bd   : > { %v6460_v63 = vmul.f32 %v14513_v26, %v6445_v22  ;;  %v6771_v22 = vld [vmem:[#allocation22 + $0xd0] sm:$0xff] }
 0x6be   : > { %6886 = vmatpush.msra.mxu0 %v6772_v13 }
 0x6bf   : > { %v6472_v18 = vadd.f32 %v14517_v48, %v6460_v63  ;;  %v6365_v20 = vpop.f32.mrf.mxu0  ;;  %v6770_v63 = vld [vmem:[#allocation22 + $0xc8] sm:$0xff] }
 0x6c0   : > { %v6406_v2 = vpop.f32.mrf.mxu3  ;;  %6887 = vmatpush.msra.mxu0 %v6771_v22  ;;  %v6568_v22 = vld [vmem:[#allocation5 + $0x90] sm:$0xff] }
 0x6c1   : > { %v6480_v43 = vmax.f32 %v6472_v18, 0.0  ;;  %v6407_v61 = vadd.f32 %v6406_v2, %v6365_v20  ;;  %v6800_v18 = vld [vmem:[#allocation22 + $0x1b8] sm:$0xff]  ;;  %v6767_v2 = vld [vmem:[#allocation22 + $0xb0] sm:$0xff] }
 0x6c2   : > { %6888 = vmatpush.msra.mxu0 %v6770_v63  ;;  %v6768_v20 = vld [vmem:[#allocation22 + $0xb8] sm:$0xff] }
 0x6c3   : > { %6510 = vst.msk [vmem:[#allocation5 + $0x71] sm:$0xff] %vm4189_vm13, %v6480_v43  ;;  %v6448_v21 = vadd.f32 %v6447_v31, %v6407_v61  ;;  %v6798_v31 = vld [vmem:[#allocation22 + $0x1a8] sm:$0xff]  ;;  %v6797_v61 = vld [vmem:[#allocation22 + $0x1a0] sm:$0xff] }
 0x6c4   : > { %6889 = vmatpush.msra.mxu0 %v6769_v41  ;;  %v6766_v43 = vld [vmem:[#allocation22 + $0xa8] sm:$0xff] }
 0x6c5   : > { %v6461_v57 = vmul.f32 %v14513_v26, %v6448_v21  ;;  %v14659_v26 = vld [vmem:[#allocation5 + $0x22] sm:$0xff]  ;;  %v6796_v21 = vld [vmem:[#allocation22 + $0x198] sm:$0xff] }
 0x6c6   : > { %6890 = vmatpush.msra.mxu0 %v6768_v20 }
 0x6c7   : > { %v6473_v25 = vadd.f32 %v14517_v48, %v6461_v57  ;;  %v10615_v48 = vpack.i.bf16 %v14659_v26, %v14596_v39  ;;  %v10630_v39 = vpack.i.bf16 %v14668_v46, %v14608_v12  ;;  %v6795_v57 = vld [vmem:[#allocation22 + $0x190] sm:$0xff] }
 0x6c8   : > { %6891 = vmatpush.msra.mxu0 %v6767_v2 }
 0x6c9   : > { %v6481_v1 = vmax.f32 %v6473_v25, 0.0  ;;  %v6794_v25 = vld [vmem:[#allocation22 + $0x188] sm:$0xff] }
 0x6ca   : > { %v14650_v40 = vld [vmem:[#allocation5 + $0x70] sm:$0xff]  ;;  %6892 = vmatpush.msra.mxu0 %v6766_v43 }
 0x6cb   : > { %v14652_v28 = vld [vmem:[#allocation5 + $0x71] sm:$0xff]  ;;  %6511 = vst.msk [vmem:[#allocation5 + $0x81] sm:$0xff] %vm4189_vm13, %v6481_v1  ;;  %6637 = vrot.lane.b32.xlu2 %v14650_v40, %s11268_s5  ;;  %v6793_v1 = vld [vmem:[#allocation22 + $0x180] sm:$0xff] }
 0x6cc   : > { %6607 = vrot.lane.b32.xlu0 %v14652_v28, %s11268_s5  ;;  %v14695_v34 = vld [vmem:[#allocation5 + $0x72] sm:$0xff]  ;;  %6893 = vmatpush.msra.mxu0 %v6765_v42 }
 0x6ce   : > { %6894 = vmatpush.msra.mxu0 %v6764_v38 }
 0x6d0   : > { %6895 = vmatpush.msra.mxu0 %v6763_v9 }
 0x6d2   : > { %v14663_v54 = vld [vmem:[#allocation5 + $0x81] sm:$0xff]  ;;  %6896 = vmatpush.msra.mxu0 %v6762_v58 }
 0x6d3   : > { %6701 = vrot.lane.b32.xlu1 %v14663_v54, %s11268_s5  ;;  %v14697_v35 = vld [vmem:[#allocation5 + $0x82] sm:$0xff] }
 0x6d4   : > { %10616 = vrot.lane.b32.xlu0 %v10615_v48, %s11268_s5  ;;  %v14703_v29 = vld [vmem:[#allocation5 + $0x80] sm:$0xff]  ;;  %v6816_v48 = vld [vmem:[#allocation22 + $0x238] sm:$0xff] }
 0x6d8   : > { %v6606_v44 = vpop.permute.xlu2 %6605 }
 0x6d9   : > { %v6719_v10 = vsel %vm4189_vm13, %v14637_v14, %v6606_v44  ;;  %v6761_v44 = vld [vmem:[#allocation22 + $0x80] sm:$0xff] }
 0x6da   : > { %6875 = vmatmul.f32.gmra.mxu2 %v6719_v10  ;;  %v6815_v10 = vld [vmem:[#allocation22 + $0x230] sm:$0xff]  ;;  %6897 = vmatpush.msra.mxu0 %v6761_v44 }
 0x6db   : > { %10621 = vrot.lane.b32.xlu1 %v10620_v23, %s11268_s5  ;;  %v6814_v23 = vld [vmem:[#allocation22 + $0x228] sm:$0xff] }
 0x6dc   : > { %10631 = vrot.lane.b32.xlu0 %v10630_v39, %s11268_s5  ;;  %v6813_v39 = vld [vmem:[#allocation22 + $0x220] sm:$0xff] }
 0x6e0   : > { %v14680_v24 = vpop.permute.xlu2 %10611 }
 0x6e1   : > { %v10614_v4 = vunpack.i.h.bf16 %v14680_v24 }
 0x6e3   : > { %v6729_v49 = vsel %vm4189_vm13, %v14541_v56, %v10614_v4  ;;  %10636 = vrot.lane.b32.xlu1 %v10635_v3, %s11268_s5  ;;  %v6808_v56 = vld [vmem:[#allocation22 + $0x1f8] sm:$0xff]  ;;  %v6811_v3 = vld [vmem:[#allocation22 + $0x210] sm:$0xff] }
 0x6e4   : > { %6939 = vmatmul.f32.vlgmr.msra.gmra.mxu3 %v6729_v49  ;;  %10646 = vrot.lane.b32.xlu0 %v10645_v50, %s11268_s5  ;;  %v6812_v4 = vld [vmem:[#allocation22 + $0x218] sm:$0xff]  ;;  %v6810_v50 = vld [vmem:[#allocation22 + $0x208] sm:$0xff]  ;;  %v6809_v49 = vld [vmem:[#allocation22 + $0x200] sm:$0xff] }
 0x6e5   : > { %9806 = vmatpush.msra.mxu2 %v6808_v56  ;;  %6964 = vmatpush.msra.mxu1 %v6808_v56 }
 0x6e7   : > { %9807 = vmatpush.msra.mxu2 %v6807_v5  ;;  %6965 = vmatpush.msra.mxu1 %v6807_v5 }
 0x6e8   : > { %v10627_v13 = vpop.permute.xlu2 %10626 }
 0x6e9   : > { %9808 = vmatpush.msra.mxu2 %v6806_v7  ;;  %6966 = vmatpush.msra.mxu1 %v6806_v7  ;;  %v10629_v43 = vunpack.i.h.bf16 %v10627_v13 }
 0x6eb   : > { %6697 = vrot.lane.b32.xlu1 %v14615_v45, %s11268_s5  ;;  %9809 = vmatpush.msra.mxu2 %v6805_v53 }
 0x6ec   : > { %6699 = vrot.lane.b32.xlu0 %v14652_v28, %s11268_s5  ;;  %6967 = vmatpush.msra.mxu1 %v6805_v53  ;;  %v6528_v53 = vld [vmem:[#allocation5 + $0x2] sm:$0xff] }
 0x6ed   : > { %9810 = vmatpush.msra.mxu2 %v6804_v37 }
 0x6ee   : > { %6968 = vmatpush.msra.mxu1 %v6804_v37 }
 0x6ef   : > { %9811 = vmatpush.msra.mxu2 %v6803_v11 }
 0x6f0   : > { %6969 = vmatpush.msra.mxu1 %v6803_v11 }
 0x6f1   : > { %9812 = vmatpush.msra.mxu2 %v6802_v55 }
 0x6f2   : > { %6970 = vmatpush.msra.mxu1 %v6802_v55  ;;  %v10613_v55 = vunpack.i.l.bf16 %v14680_v24 }
 0x6f3   : > { %6669 = vrot.lane.b32.xlu1 %v14695_v34, %s11268_s5  ;;  %9813 = vmatpush.msra.mxu2 %v6801_v15 }
 0x6f4   : > { %6671 = vrot.lane.b32.xlu0 %v14697_v35, %s11268_s5  ;;  %6971 = vmatpush.msra.mxu1 %v6801_v15  ;;  %v10628_v15 = vunpack.i.l.bf16 %v10627_v13 }
 0x6f5   : > { %9814 = vmatpush.msra.mxu2 %v6800_v18 }
 0x6f6   : > { %6972 = vmatpush.msra.mxu1 %v6800_v18 }
 0x6f7   : > { %9815 = vmatpush.msra.mxu2 %v6799_v6 }
 0x6f8   : > { %6973 = vmatpush.msra.mxu1 %v6799_v6  ;;  %v6731_v6 = vsel %vm4189_vm13, %v14564_v60, %v10628_v15  ;;  %v10642_v60 = vpop.permute.xlu2 %10641 }
 0x6f9   : > { %9816 = vmatpush.msra.mxu2 %v6798_v31 }
 0x6fa   : > { %6974 = vmatpush.msra.mxu1 %v6798_v31 }
 0x6fb   : > { %6639 = vrot.lane.b32.xlu1 %v14703_v29, %s11268_s5  ;;  %9817 = vmatpush.msra.mxu2 %v6797_v61 }
 0x6fc   : > { %6975 = vmatpush.msra.mxu1 %v6797_v61 }
 0x6fd   : > { %9818 = vmatpush.msra.mxu2 %v6796_v21 }
 0x6fe   : > { %6976 = vmatpush.msra.mxu1 %v6796_v21  ;;  %v10643_v21 = vunpack.i.l.bf16 %v10642_v60 }
 0x6ff   : > { %9819 = vmatpush.msra.mxu2 %v6795_v57 }
 0x700   : > { %6977 = vmatpush.msra.mxu1 %v6795_v57 }
 0x701   : > { %9820 = vmatpush.msra.mxu2 %v6794_v25 }
 0x702   : > { %6978 = vmatpush.msra.mxu1 %v6794_v25 }
 0x703   : > { %9821 = vmatpush.msra.mxu2 %v6793_v1 }
 0x704   : > { %6979 = vmatpush.msra.mxu1 %v6793_v1 }
 0x705   : > { %7013 = vmatpush.msrb.mxu2 %v6816_v48  ;;  %v10644_v48 = vunpack.i.h.bf16 %v10642_v60 }
 0x707   : > { %7014 = vmatpush.msrb.mxu2 %v6815_v10  ;;  %v6740_v44 = vsel %vm4189_vm13, %v14641_v17, %v10644_v48  ;;  %v6636_v10 = vpop.permute.xlu2 %6635 }
 0x709   : > { %7015 = vmatpush.msrb.mxu2 %v6814_v23 }
 0x70b   : > { %7016 = vmatpush.msrb.mxu2 %v6813_v39  ;;  %v6726_v39 = vsel %vm4189_vm13, %v14628_v36, %v6636_v10 }
 0x70d   : > { %7017 = vmatpush.msrb.mxu2 %v6812_v4 }
 0x70f   : > { %7018 = vmatpush.msrb.mxu2 %v6811_v3 }
 0x711   : > { %7019 = vmatpush.msrb.mxu2 %v6810_v50 }
 0x713   : > { %7020 = vmatpush.msrb.mxu2 %v6809_v49  ;;  %v6858_v49 = vpop.f32.mrf.mxu2 }
 0x725   : > { %v6638_v17 = vpop.permute.xlu2 %6637 }
 0x726   : > { %v6727_v3 = vsel %vm4189_vm13, %v14678_v30, %v6638_v17 }
 0x73e   : > { %v6608_v56 = vpop.permute.xlu0 %6607 }
 0x73f   : > { %v6720_v5 = vsel %vm4189_vm13, %v14650_v40, %v6608_v56 }
 0x740   : > { %6878 = vmatmul.f32.gmra.mxu2 %v6720_v5 }
 0x745   : > { %v6702_v7 = vpop.permute.xlu1 %6701 }
 0x746   : > { %v10617_v16 = vpop.permute.xlu0 %10616  ;;  %v6743_v8 = vsel %vm4189_vm13, %v14703_v29, %v6702_v7  ;;  %v6744_v29 = vsel %vm4189_vm13, %v6568_v22, %v10613_v55 }
 0x747   : > { %v10619_v27 = vunpack.i.h.bf16 %v10617_v16  ;;  %v10618_v37 = vunpack.i.l.bf16 %v10617_v16 }
 0x748   : > { %6998 = vmatmul.f32.vlgmr.msra.gmra.mxu2 %v6743_v8 }
 0x749   : > { %v6721_v47 = vsel %vm4189_vm13, %v6528_v53, %v10618_v37  ;;  %v6730_v11 = vsel %vm4189_vm13, %v14549_v19, %v10619_v27 }
 0x74a   : > { %6898 = vmatmul.f32.vlgmr.msra.gmra.mxu0 %v6721_v47  ;;  %6942 = vmatmul.f32.gmra.mxu3 %v6730_v11 }
 0x74d   : > { %v10622_v63 = vpop.permute.xlu1 %10621 }
 0x74e   : > { %v10624_v41 = vunpack.i.h.bf16 %v10622_v63  ;;  %v10623_v18 = vunpack.i.l.bf16 %v10622_v63  ;;  %v10632_v2 = vpop.permute.xlu0 %10631 }
 0x74f   : > { %v10634_v24 = vunpack.i.h.bf16 %v10632_v2  ;;  %v10633_v31 = vunpack.i.l.bf16 %v10632_v2 }
 0x750   : > { %7001 = vmatmul.f32.gmra.mxu2 %v6744_v29  ;;  %v6722_v20 = vsel %vm4189_vm13, %v14619_v51, %v10624_v41  ;;  %v6737_v19 = vsel %vm4189_vm13, %v14604_v33, %v10623_v18  ;;  %v6738_v33 = vsel %vm4189_vm13, %v14608_v12, %v10629_v43  ;;  %v14787_v18 = vld [vmem:[#allocation23] ss:$0 sm:$0xff] }
 0x751   : > { %6980 = vmatmul.f32.vlgmr.msra.gmra.mxu1 %v6737_v19  ;;  %v6723_v61 = vsel %vm4189_vm13, %v14659_v26, %v10633_v31  ;;  %v6732_v51 = vsel %vm4189_vm13, %v14571_v52, %v10634_v24  ;;  %v6733_v52 = vsel %vm4189_vm13, %v14598_v62, %v10643_v21  ;;  %v14789_v19 = vld [vmem:[#allocation25] ss:$0 sm:$0xff] }
 0x752   : > { %6901 = vmatmul.f32.gmra.mxu0 %v6722_v20  ;;  %6945 = vmatmul.f32.gmra.mxu3 %v6731_v6  ;;  %v7339_v20 = vld [vmem:[#allocation6] sm:$0xf] }
 0x753   : > { %7380 = vst [vmem:[#allocation1] ss:$2 sm:$0xff] %v7339_v20 }
 0x755   : > { %v10637_v42 = vpop.permute.xlu1 %10636 }
 0x756   : > { %v10639_v38 = vunpack.i.h.bf16 %v10637_v42  ;;  %v10638_v57 = vunpack.i.l.bf16 %v10637_v42  ;;  %v10647_v9 = vpop.permute.xlu0 %10646 }
 0x757   : > { %v10649_v58 = vunpack.i.h.bf16 %v10647_v9  ;;  %v10648_v1 = vunpack.i.l.bf16 %v10647_v9 }
 0x758   : > { %9753 = vmatmul.msk.f32.vlgmr.msrb.gmra.mxu2 %vm4189_vm13, %v14659_v26  ;;  %v6724_v26 = vsel %vm4189_vm13, %v14623_v59, %v10639_v38  ;;  %v6739_v25 = vsel %vm4189_vm13, %v14630_v32, %v10638_v57 }
 0x759   : > { %6983 = vmatmul.f32.gmra.mxu1 %v6738_v33  ;;  %v6734_v62 = vsel %vm4189_vm13, %v14615_v45, %v10649_v58 }
 0x75a   : > { %6904 = vmatmul.f32.gmra.mxu0 %v6723_v61  ;;  %6948 = vmatmul.f32.gmra.mxu3 %v6732_v51 }
 0x75d   : > { %v6698_v12 = vpop.permute.xlu1 %6697 }
 0x75e   : > { %v6700_v32 = vpop.permute.xlu0 %6699  ;;  %v6741_v45 = vsel %vm4189_vm13, %v14637_v14, %v6698_v12 }
 0x760   : > { %9754 = vmatmul.msk.f32.gmra.mxu2 %vm4189_vm13, %v14623_v59  ;;  %v6725_v59 = vsel %vm4189_vm13, %v14668_v46, %v10648_v1 }
 0x761   : > { %6986 = vmatmul.f32.gmra.mxu1 %v6739_v25 }
 0x762   : > { %6907 = vmatmul.f32.gmra.mxu0 %v6724_v26  ;;  %6951 = vmatmul.f32.gmra.mxu3 %v6733_v52 }
 0x765   : > { %v6670_v23 = vpop.permute.xlu1 %6669 }
 0x766   : > { %v6672_v4 = vpop.permute.xlu0 %6671 }
 0x768   : > { %9755 = vmatmul.msk.f32.gmra.mxu2 %vm4189_vm13, %v14668_v46  ;;  %v6735_v46 = vsel %vm4189_vm13, %v14652_v28, %v6670_v23  ;;  %v6742_v28 = vsel %vm4189_vm13, %v14650_v40, %v6700_v32 }
 0x769   : > { %6989 = vmatmul.f32.gmra.mxu1 %v6740_v44 }
 0x76a   : > { %6910 = vmatmul.f32.gmra.mxu0 %v6725_v59  ;;  %6954 = vmatmul.f32.gmra.mxu3 %v6734_v62 }
 0x76d   : > { %v6640_v50 = vpop.permute.xlu1 %6639 }
 0x76e   : > { %v6728_v14 = vsel %vm4189_vm13, %v14695_v34, %v6640_v50 }
 0x770   : > { %9756 = vmatmul.msk.f32.gmra.mxu2 %vm4189_vm13, %v14628_v36  ;;  %v6736_v36 = vsel %vm4189_vm13, %v14663_v54, %v6672_v4  ;;  %v6861_v54 = vpop.f32.mrf.mxu2 }
 0x771   : > { %6992 = vmatmul.f32.gmra.mxu1 %v6741_v45 }
 0x772   : > { %6913 = vmatmul.f32.gmra.mxu0 %v6726_v39  ;;  %6957 = vmatmul.f32.gmra.mxu3 %v6735_v46 }
 0x778   : > { %9757 = vmatmul.msk.f32.gmra.mxu2 %vm4189_vm13, %v14678_v30  ;;  %v6584_v30 = vld [vmem:[#allocation5 + $0x92] sm:$0xff]  ;;  %v6864_v56 = vpop.f32.mrf.mxu2 }
 0x779   : > { %6995 = vmatmul.f32.gmra.mxu1 %v6742_v28 }
 0x77a   : > { %6916 = vmatmul.f32.gmra.mxu0 %v6727_v3  ;;  %6960 = vmatmul.f32.gmra.mxu3 %v6736_v36 }
 0x780   : > { %9758 = vmatmul.msk.f32.gmra.mxu2 %vm4189_vm13, %v14695_v34  ;;  %v6867_v5 = vpop.f32.mrf.mxu2  ;;  %v6940_v34 = vpop.f32.mrf.mxu3 }
 0x782   : > { %6919 = vmatmul.f32.gmra.mxu0 %v6728_v14 }
 0x788   : > { %9759 = vmatmul.msk.f32.gmra.mxu2 %vm4189_vm13, %v14697_v35  ;;  %v14769_v40 = vpop.f32.mrf.mxu2 }
 0x790   : > { %9760 = vmatmul.msk.f32.gmra.mxu2 %vm4189_vm13, %v6584_v30  ;;  %v14771_v7 = vpop.f32.mrf.mxu2 }
 0x798   : > { %v14773_v16 = vpop.f32.mrf.mxu2 }
 0x7c3   : > { %v14775_v53 = vpop.f32.mrf.mxu2 }
 0x7c7   : > { %v6899_v8 = vpop.f32.mrf.mxu0 }
 0x7c8   : > { %v6900_v13 = vadd.f32 %v6899_v8, %v6858_v49 }
 0x7ca   : > { %v6941_v15 = vadd.f32 %v6940_v34, %v6900_v13 }
 0x7cb   : > { %v14777_v27 = vpop.f32.mrf.mxu2 }
 0x7cd   : > { %v6943_v37 = vpop.f32.mrf.mxu3 }
 0x7ce   : > { %v6981_v47 = vpop.f32.mrf.mxu1 }
 0x7cf   : > { %v6902_v35 = vpop.f32.mrf.mxu0  ;;  %v6982_v41 = vadd.f32 %v6981_v47, %v6941_v15 }
 0x7d0   : > { %v6903_v2 = vadd.f32 %v6902_v35, %v6861_v54 }
 0x7d2   : > { %v6944_v51 = vadd.f32 %v6943_v37, %v6903_v2 }
 0x7d3   : > { %v14779_v11 = vpop.f32.mrf.mxu2 }
 0x7d5   : > { %v6946_v55 = vpop.f32.mrf.mxu3 }
 0x7d6   : > { %v6984_v63 = vpop.f32.mrf.mxu1 }
 0x7d7   : > { %v6905_v22 = vpop.f32.mrf.mxu0  ;;  %v6985_v42 = vadd.f32 %v6984_v63, %v6944_v51 }
 0x7d8   : > { %v6906_v33 = vadd.f32 %v6905_v22, %v6864_v56 }
 0x7da   : > { %v6947_v58 = vadd.f32 %v6946_v55, %v6906_v33 }
 0x7db   : > { %v7022_v29 = vpop.f32.mrf.mxu2 }
 0x7dc   : > { %v7023_v6 = vadd.f32 %v7022_v29, %v6982_v41 }
 0x7dd   : > { %v6949_v24 = vpop.f32.mrf.mxu3 }
 0x7de   : > { %v7050_v31 = vmul.f32 %v14787_v18, %v7023_v6  ;;  %v6987_v60 = vpop.f32.mrf.mxu1 }
 0x7df   : > { %v6908_v43 = vpop.f32.mrf.mxu0  ;;  %v6988_v62 = vadd.f32 %v6987_v60, %v6947_v58 }
 0x7e0   : > { %v7062_v61 = vadd.f32 %v14789_v19, %v7050_v31  ;;  %v6909_v59 = vadd.f32 %v6908_v43, %v6867_v5 }
 0x7e2   : > { %v7070_v21 = vmax.f32 %v7062_v61, 0.0  ;;  %v6950_v50 = vadd.f32 %v6949_v24, %v6909_v59 }
 0x7e3   : > { %v7025_v0 = vpop.f32.mrf.mxu2 }
 0x7e4   : > { %v7026_v38 = vadd.f32 %v7025_v0, %v6985_v42  ;;  %v7086_v9 = vrot.slane %v7070_v21, 2  ;;  %v7087_v25 = vrot.slane %v7070_v21, 4  ;;  %v7088_v12 = vrot.slane %v7070_v21, 6 }
 0x7e5   : > { %v6952_v57 = vpop.f32.mrf.mxu3  ;;  %v9761_v48 = vrot.slane %v7070_v21, 9 }
 0x7e6   : > { %v7051_v26 = vmul.f32 %v14787_v18, %v7026_v38  ;;  %v6990_v32 = vpop.f32.mrf.mxu1  ;;  %v9762_v23 = vrot.slane %v7086_v9, 9  ;;  %v9763_v39 = vrot.slane %v7087_v25, 9  ;;  %v9764_v46 = vrot.slane %v7088_v12, 9 }
 0x7e7   : > { %v6911_v52 = vpop.f32.mrf.mxu0  ;;  %v7182_v28 = vmax.f32 %v7070_v21, %v9761_v48  ;;  %v6991_v6 = vadd.f32 %v6990_v32, %v6950_v50 }
 0x7e8   : > { %v7063_v1 = vadd.f32 %v14789_v19, %v7051_v26  ;;  %v7183_v34 = vmax.f32 %v7086_v9, %v9762_v23  ;;  %v7184_v8 = vmax.f32 %v7087_v25, %v9763_v39  ;;  %v7185_v37 = vmax.f32 %v7088_v12, %v9764_v46 }
 0x7e9   : > { %v6912_v63 = vadd.f32 %v6911_v52, %v14769_v40 }
 0x7ea   : > { %v7071_v44 = vmax.f32 %v7063_v1, 0.0 }
 0x7eb   : > { %v7028_v10 = vpop.f32.mrf.mxu2  ;;  %v6953_v33 = vadd.f32 %v6952_v57, %v6912_v63 }
 0x7ec   : > { %v7029_v45 = vadd.f32 %v7028_v10, %v6988_v62  ;;  %v7089_v17 = vrot.slane %v7071_v44, 2  ;;  %v7090_v4 = vrot.slane %v7071_v44, 4  ;;  %v7091_v3 = vrot.slane %v7071_v44, 6 }
 0x7ed   : > { %v9777_v36 = vrot.slane %v7071_v44, 9  ;;  %v6955_v47 = vpop.f32.mrf.mxu3 }
 0x7ee   : > { %v7052_v14 = vmul.f32 %v14787_v18, %v7029_v45  ;;  %v9778_v49 = vrot.slane %v7089_v17, 9  ;;  %v9779_v30 = vrot.slane %v7090_v4, 9  ;;  %v9780_v54 = vrot.slane %v7091_v3, 9  ;;  %v6993_v51 = vpop.f32.mrf.mxu1 }
 0x7ef   : > { %v7246_v56 = vmax.f32 %v7071_v44, %v9777_v36  ;;  %v6914_v5 = vpop.f32.mrf.mxu0  ;;  %v6994_v57 = vadd.f32 %v6993_v51, %v6953_v33 }
 0x7f0   : > { %v7064_v35 = vadd.f32 %v14789_v19, %v7052_v14  ;;  %v7247_v13 = vmax.f32 %v7089_v17, %v9778_v49  ;;  %v7248_v55 = vmax.f32 %v7090_v4, %v9779_v30  ;;  %v7249_v22 = vmax.f32 %v7091_v3, %v9780_v54 }
 0x7f1   : > { %v7262_v15 = vmax.f32 %v7182_v28, %v7246_v56  ;;  %v6915_v48 = vadd.f32 %v6914_v5, %v14771_v7 }
 0x7f2   : > { %v7263_v41 = vmax.f32 %v7183_v34, %v7247_v13  ;;  %v7264_v29 = vmax.f32 %v7184_v8, %v7248_v55  ;;  %v7265_v20 = vmax.f32 %v7185_v37, %v7249_v22  ;;  %v7072_v24 = vmax.f32 %v7064_v35, 0.0 }
 0x7f3   : > { %v7031_v2 = vpop.f32.mrf.mxu2  ;;  %v7301_v31 = vperm.slane %v7262_v15, 0 }
 0x7f4   : > { %v7302_v43 = vperm.slane %v7263_v41, 0  ;;  %v7303_v61 = vperm.slane %v7264_v29, 0  ;;  %v7032_v60 = vadd.f32 %v7031_v2, %v6991_v6  ;;  %v7304_v42 = vperm.slane %v7265_v20, 0 }
 0x7f5   : > { %v7092_v26 = vrot.slane %v7072_v24, 2  ;;  %v7093_v52 = vrot.slane %v7072_v24, 4  ;;  %v7094_v9 = vrot.slane %v7072_v24, 6  ;;  %v9765_v1 = vrot.slane %v7072_v24, 9  ;;  %v6958_v59 = vpop.f32.mrf.mxu3 }
 0x7f6   : > { %v7317_v0 = vsel %vm5874_vm15, %v7302_v43, %v7301_v31  ;;  %v7053_v21 = vmul.f32 %v14787_v18, %v7032_v60  ;;  %v6996_v54 = vpop.f32.mrf.mxu1  ;;  %v7343_v60 = vld [vmem:[#allocation6 + $0x1] sm:$0xf] }
 0x7f7   : > { %v6917_v38 = vpop.f32.mrf.mxu0  ;;  %v7318_v40 = vsel %vm5876_vm0, %v7303_v61, %v7317_v0  ;;  %v9766_v10 = vrot.slane %v7092_v26, 9  ;;  %v9767_v23 = vrot.slane %v7093_v52, 9  ;;  %v9768_v39 = vrot.slane %v7094_v9, 9 }
 0x7f8   : > { %v7319_v25 = vsel %vm5878_vm1, %v7304_v42, %v7318_v40  ;;  %v7065_v12 = vadd.f32 %v14789_v19, %v7053_v21  ;;  %v6918_v58 = vadd.f32 %v6917_v38, %v14773_v16  ;;  %v7186_v36 = vmax.f32 %v7072_v24, %v9765_v1 }
 0x7f9   : > { %7335 = vst.msk [vmem:[#allocation6 + $0x9] sm:$0xf] %vm7334_vm8, %v7319_v25  ;;  %v6956_v16 = vadd.f32 %v6955_v47, %v6915_v48  ;;  %v7187_v56 = vmax.f32 %v7092_v26, %v9766_v10  ;;  %v7188_v5 = vmax.f32 %v7093_v52, %v9767_v23  ;;  %v7189_v34 = vmax.f32 %v7094_v9, %v9768_v39 }
 0x7fa   : > { %v7073_v62 = vmax.f32 %v7065_v12, 0.0  ;;  %v6959_v44 = vadd.f32 %v6958_v59, %v6918_v58 }
 0x7fb   : > { %v7034_v32 = vpop.f32.mrf.mxu2  ;;  %v6997_v47 = vadd.f32 %v6996_v54, %v6956_v16 }
 0x7fc   : > { %v7035_v46 = vadd.f32 %v7034_v32, %v6994_v57  ;;  %v7095_v45 = vrot.slane %v7073_v62, 2  ;;  %v7096_v17 = vrot.slane %v7073_v62, 4  ;;  %v7097_v4 = vrot.slane %v7073_v62, 6 }
 0x7fd   : > { %v9781_v3 = vrot.slane %v7073_v62, 9  ;;  %v7000_v50 = vadd.f32 %v14777_v27, %v6959_v44 }
 0x7fe   : > { %v7054_v28 = vmul.f32 %v14787_v18, %v7035_v46  ;;  %v9782_v7 = vrot.slane %v7095_v45, 9  ;;  %v9783_v14 = vrot.slane %v7096_v17, 9  ;;  %v9784_v49 = vrot.slane %v7097_v4, 9 }
 0x7ff   : > { %v7250_v30 = vmax.f32 %v7073_v62, %v9781_v3  ;;  %v6920_v61 = vpop.f32.mrf.mxu0  ;;  %v6961_v62 = vpop.f32.mrf.mxu3 }
 0x800   : > { %v7066_v8 = vadd.f32 %v14789_v19, %v7054_v28  ;;  %v7340_v37 = vld [vmem:[#allocation6 + $0x8] sm:$0xf]  ;;  %v7251_v35 = vmax.f32 %v7095_v45, %v9782_v7  ;;  %v7252_v13 = vmax.f32 %v7096_v17, %v9783_v14  ;;  %v7253_v55 = vmax.f32 %v7097_v4, %v9784_v49  ;;  %v7347_v14 = vld [vmem:[#allocation6 + $0x2] sm:$0xf] }
 0x801   : > { %v7266_v22 = vmax.f32 %v7186_v36, %v7250_v30  ;;  %7382 = vst [vmem:[#allocation1 + $0x1] ss:$2 sm:$0xff] %v7340_v37  ;;  %v6921_v9 = vadd.f32 %v6920_v61, %v14775_v53  ;;  %v7344_v25 = vld [vmem:[#allocation6 + $0x9] sm:$0xf] }
 0x802   : > { %v7267_v15 = vmax.f32 %v7187_v56, %v7251_v35  ;;  %v7268_v63 = vmax.f32 %v7188_v5, %v7252_v13  ;;  %v7269_v27 = vmax.f32 %v7189_v34, %v7253_v55  ;;  %v7074_v29 = vmax.f32 %v7066_v8, 0.0  ;;  %v7348_v55 = vld [vmem:[#allocation6 + $0xa] sm:$0xf] }
 0x803   : > { %v7037_v41 = vpop.f32.mrf.mxu2  ;;  %v7305_v6 = vperm.slane %v7266_v22, 0  ;;  %v6962_v46 = vadd.f32 %v6961_v62, %v6921_v9 }
 0x804   : > { %v7038_v20 = vadd.f32 %v7037_v41, %v6997_v47  ;;  %v7306_v2 = vperm.slane %v7267_v15, 0  ;;  %v7307_v24 = vperm.slane %v7268_v63, 0  ;;  %v7308_v31 = vperm.slane %v7269_v27, 0 }
 0x805   : > { %v7098_v0 = vrot.slane %v7074_v29, 2  ;;  %v7099_v33 = vrot.slane %v7074_v29, 4  ;;  %v7100_v21 = vrot.slane %v7074_v29, 6  ;;  %v9769_v52 = vrot.slane %v7074_v29, 9 }
 0x806   : > { %v7320_v43 = vsel %vm5874_vm15, %v7306_v2, %v7305_v6  ;;  %v7055_v51 = vmul.f32 %v14787_v18, %v7038_v20  ;;  %v7003_v56 = vadd.f32 %v14779_v11, %v6962_v46 }
 0x807   : > { %v7321_v42 = vsel %vm5876_vm0, %v7307_v24, %v7320_v43  ;;  %v9770_v1 = vrot.slane %v7098_v0, 9  ;;  %v9771_v48 = vrot.slane %v7099_v33, 9  ;;  %v9772_v57 = vrot.slane %v7100_v21, 9 }
 0x808   : > { %v7322_v38 = vsel %vm5878_vm1, %v7308_v31, %v7321_v42  ;;  %v7067_v40 = vadd.f32 %v14789_v19, %v7055_v51  ;;  %v14814_v26 = vld.sshfl [vmem:[#allocation1] sm:$0xff pattern:$0x75316420]  ;;  %v7190_v39 = vmax.f32 %v7074_v29, %v9769_v52  ;;  %v7351_v51 = vld [vmem:[#allocation6 + $0x8] sm:$0xf] }
 0x809   : > { %7336 = vst.msk [vmem:[#allocation6 + $0x11] sm:$0xf] %vm7334_vm8, %v7322_v38  ;;  %v7191_v36 = vmax.f32 %v7098_v0, %v9770_v1  ;;  %v7192_v16 = vmax.f32 %v7099_v33, %v9771_v48  ;;  %v7193_v28 = vmax.f32 %v7100_v21, %v9772_v57 }
 0x80a   : > { %7395 = vst [vmem:[#allocation1] ss:$2 sm:$0xff] %v7343_v60  ;;  %v7075_v12 = vmax.f32 %v7067_v40, 0.0 }
 0x80b   : > { %v7040_v58 = vpop.f32.mrf.mxu2  ;;  %7397 = vst [vmem:[#allocation1 + $0x1] ss:$2 sm:$0xff] %v7344_v25 }
 0x80c   : > { %v7041_v59 = vadd.f32 %v7040_v58, %v7000_v50  ;;  %v7101_v44 = vrot.slane %v7075_v12, 2  ;;  %v7102_v32 = vrot.slane %v7075_v12, 4  ;;  %v7103_v10 = vrot.slane %v7075_v12, 6 }
 0x80d   : > { %v9785_v23 = vrot.slane %v7075_v12, 9 }
 0x80e   : > { %v7056_v45 = vmul.f32 %v14787_v18, %v7041_v59  ;;  %v9786_v17 = vrot.slane %v7101_v44, 9  ;;  %v9787_v53 = vrot.slane %v7102_v32, 9  ;;  %v9788_v4 = vrot.slane %v7103_v10, 9 }
 0x80f   : > { %v7254_v3 = vmax.f32 %v7075_v12, %v9785_v23 }
 0x810   : > { %v7068_v7 = vadd.f32 %v14789_v19, %v7056_v45  ;;  %v7255_v50 = vmax.f32 %v7101_v44, %v9786_v17  ;;  %v7256_v49 = vmax.f32 %v7102_v32, %v9787_v53  ;;  %v7257_v30 = vmax.f32 %v7103_v10, %v9788_v4  ;;  %v7341_v34 = vld [vmem:[#allocation6 + $0x10] sm:$0xf] }
 0x811   : > { %v7270_v54 = vmax.f32 %v7190_v39, %v7254_v3  ;;  %7384 = vst [vmem:[#allocation1 + $0x10] ss:$2 sm:$0xff] %v7341_v34  ;;  %v7352_v52 = vld [vmem:[#allocation6 + $0x10] sm:$0xf]  ;;  %v7355_v3 = vld [vmem:[#allocation6 + $0x9] sm:$0xf] }
 0x812   : > { %v14821_v5 = vld.sshfl [vmem:[#allocation1] sm:$0xff pattern:$0x75316420]  ;;  %v7271_v8 = vmax.f32 %v7191_v36, %v7255_v50  ;;  %v7272_v37 = vmax.f32 %v7192_v16, %v7256_v49  ;;  %v7273_v35 = vmax.f32 %v7193_v28, %v7257_v30  ;;  %v7076_v27 = vmax.f32 %v7068_v7, 0.0  ;;  %v7356_v16 = vld [vmem:[#allocation6 + $0x11] sm:$0xf] }
 0x813   : > { %v7043_v13 = vpop.f32.mrf.mxu2  ;;  %7414 = vst [vmem:[#allocation1] ss:$2 sm:$0xff] %v7347_v14  ;;  %v7309_v47 = vperm.slane %v7270_v54, 0  ;;  %v7345_v30 = vld [vmem:[#allocation6 + $0x11] sm:$0xf] }
 0x814   : > { %v7044_v22 = vadd.f32 %v7043_v13, %v7003_v56  ;;  %7416 = vst [vmem:[#allocation1 + $0x1] ss:$2 sm:$0xff] %v7348_v55  ;;  %v7310_v15 = vperm.slane %v7271_v8, 0  ;;  %v7311_v63 = vperm.slane %v7272_v37, 0  ;;  %v7312_v41 = vperm.slane %v7273_v35, 0 }
 0x815   : > { %v7104_v20 = vrot.slane %v7076_v27, 2  ;;  %v7105_v6 = vrot.slane %v7076_v27, 4  ;;  %v7106_v2 = vrot.slane %v7076_v27, 6  ;;  %v9773_v60 = vrot.slane %v7076_v27, 9  ;;  %v7359_v34 = vld [vmem:[#allocation6 + $0xa] sm:$0xf] }
 0x816   : > { %v7057_v29 = vmul.f32 %v14787_v18, %v7044_v22  ;;  %v7323_v11 = vsel %vm5874_vm15, %v7310_v15, %v7309_v47  ;;  %v7360_v37 = vld [vmem:[#allocation6 + $0x12] sm:$0xf] }
 0x817   : > { %v7324_v24 = vsel %vm5876_vm0, %v7311_v63, %v7323_v11  ;;  %v9774_v42 = vrot.slane %v7104_v20, 9  ;;  %v9775_v0 = vrot.slane %v7105_v6, 9  ;;  %v9776_v33 = vrot.slane %v7106_v2, 9  ;;  %v7364_v55 = vld [vmem:[#allocation6 + $0x10] sm:$0xf] }
 0x818   : > { %v7069_v31 = vadd.f32 %v14789_v19, %v7057_v29  ;;  %v7325_v43 = vsel %vm5878_vm1, %v7312_v41, %v7324_v24  ;;  %v7194_v58 = vmax.f32 %v7076_v27, %v9773_v60  ;;  %v7368_v41 = vld [vmem:[#allocation6 + $0x11] sm:$0xf]  ;;  %v7548_v60 = vld [vmem:[#allocation26 + $0x78] sm:$0xff] }
 0x819   : > { %7337 = vst.msk [vmem:[#allocation6 + $0x19] sm:$0xf] %vm7334_vm8, %v7325_v43  ;;  %v7195_v1 = vmax.f32 %v7104_v20, %v9774_v42  ;;  %v7196_v48 = vmax.f32 %v7105_v6, %v9775_v0  ;;  %v7197_v59 = vmax.f32 %v7106_v2, %v9776_v33  ;;  %v7564_v42 = vld [vmem:[#allocation26 + $0xf8] sm:$0xff]  ;;  %v7547_v0 = vld [vmem:[#allocation26 + $0x70] sm:$0xff]  ;;  %7609 = vmatpush.msrb.mxu0 %v7548_v60  ;;  %v7590_v60 = vld [vmem:[#allocation26 + $0x1c8] sm:$0xff] }
 0x81a   : > { %v7077_v61 = vmax.f32 %v7069_v31, 0.0  ;;  %7632 = vmatpush.msrb.mxu3 %v7564_v42  ;;  %v7563_v33 = vld [vmem:[#allocation26 + $0xf0] sm:$0xff]  ;;  %v7574_v42 = vld [vmem:[#allocation26 + $0x148] sm:$0xff] }
 0x81b   : > { %v14829_v18 = vld.sshfl [vmem:[#allocation1] sm:$0xff pattern:$0x75316420]  ;;  %7610 = vmatpush.msrb.mxu0 %v7547_v0  ;;  %v7589_v0 = vld [vmem:[#allocation26 + $0x1c0] sm:$0xff] }
 0x81c   : > { %v7107_v21 = vrot.slane %v7077_v61, 2  ;;  %v7108_v38 = vrot.slane %v7077_v61, 4  ;;  %v7109_v40 = vrot.slane %v7077_v61, 6  ;;  %7429 = vst [vmem:[#allocation1] ss:$2 sm:$0xff] %v7351_v51  ;;  %v9789_v9 = vrot.slane %v7077_v61, 9  ;;  %7633 = vmatpush.msrb.mxu3 %v7563_v33 }
 0x81d   : > { %7431 = vst [vmem:[#allocation1 + $0x1] ss:$2 sm:$0xff] %v7352_v52  ;;  %v7573_v33 = vld [vmem:[#allocation26 + $0x140] sm:$0xff] }
 0x81e   : > { %v9790_v19 = vrot.slane %v7107_v21, 9  ;;  %v9791_v25 = vrot.slane %v7108_v38, 9  ;;  %v9792_v12 = vrot.slane %v7109_v40, 9  ;;  %v7258_v57 = vmax.f32 %v7077_v61, %v9789_v9  ;;  %v7372_v61 = vld [vmem:[#allocation6 + $0x12] sm:$0xf] }
 0x820   : > { %v7259_v62 = vmax.f32 %v7107_v21, %v9790_v19  ;;  %v7260_v44 = vmax.f32 %v7108_v38, %v9791_v25  ;;  %v7261_v32 = vmax.f32 %v7109_v40, %v9792_v12  ;;  %v7342_v10 = vld [vmem:[#allocation6 + $0x18] sm:$0xf]  ;;  %v7274_v23 = vmax.f32 %v7194_v58, %v7258_v57  ;;  %v7546_v21 = vld [vmem:[#allocation26 + $0x68] sm:$0xff]  ;;  %v7545_v19 = vld [vmem:[#allocation26 + $0x60] sm:$0xff] }
 0x821   : > { %7386 = vst [vmem:[#allocation1 + $0x11] ss:$2 sm:$0xff] %v7342_v10  ;;  %v7346_v56 = vld [vmem:[#allocation6 + $0x19] sm:$0xf]  ;;  %v7562_v38 = vld [vmem:[#allocation26 + $0xe8] sm:$0xff]  ;;  %v7561_v25 = vld [vmem:[#allocation26 + $0xe0] sm:$0xff]  ;;  %7611 = vmatpush.msrb.mxu0 %v7546_v21 }
 0x822   : > { %v7275_v39 = vmax.f32 %v7195_v1, %v7259_v62  ;;  %v7276_v46 = vmax.f32 %v7196_v48, %v7260_v44  ;;  %v7277_v45 = vmax.f32 %v7197_v59, %v7261_v32  ;;  %v7313_v17 = vperm.slane %v7274_v23, 0  ;;  %v7350_v13 = vld [vmem:[#allocation6 + $0x1a] sm:$0xf]  ;;  %7634 = vmatpush.msrb.mxu3 %v7562_v38  ;;  %v7543_v1 = vld [vmem:[#allocation26 + $0x50] sm:$0xff]  ;;  %v7542_v57 = vld [vmem:[#allocation26 + $0x48] sm:$0xff] }
 0x823   : > { %v7365_v47 = vld [vmem:[#allocation6 + $0x18] sm:$0xf]  ;;  %7612 = vmatpush.msrb.mxu0 %v7545_v19  ;;  %v7559_v48 = vld [vmem:[#allocation26 + $0xd0] sm:$0xff]  ;;  %v7367_v59 = vld [vmem:[#allocation6 + $0x28] sm:$0xf] }
 0x824   : > { %v7314_v53 = vperm.slane %v7275_v39, 0  ;;  %v7315_v4 = vperm.slane %v7276_v46, 0  ;;  %v7436_v36 = vld.sshfl [vmem:[#allocation1] sm:$0xff pattern:$0x75316420]  ;;  %v7316_v28 = vperm.slane %v7277_v45, 0  ;;  %7635 = vmatpush.msrb.mxu3 %v7561_v25 }
 0x825   : > { %7448 = vst [vmem:[#allocation1] ss:$2 sm:$0xff] %v7355_v3  ;;  %v10650_v14 = vpack.i.bf16 %v7436_v36, %v14821_v5  ;;  %v7349_v5 = vld [vmem:[#allocation6 + $0x12] sm:$0xf]  ;;  %v7353_v15 = vld [vmem:[#allocation6 + $0x18] sm:$0xf] }
 0x826   : > { %v7326_v7 = vsel %vm5874_vm15, %v7314_v53, %v7313_v17  ;;  %7450 = vst [vmem:[#allocation1 + $0x1] ss:$2 sm:$0xff] %v7356_v16  ;;  %v7369_v11 = vld [vmem:[#allocation6 + $0x19] sm:$0xf]  ;;  %v7558_v62 = vld [vmem:[#allocation26 + $0xc8] sm:$0xff]  ;;  %v7541_v10 = vld [vmem:[#allocation26 + $0x40] sm:$0xff] }
 0x827   : > { %v7327_v50 = vsel %vm5876_vm0, %v7315_v4, %v7326_v7  ;;  %10651 = vrot.lane.b32.xlu2 %v10650_v14, %s11268_s5  ;;  %v7357_v20 = vld [vmem:[#allocation6 + $0x19] sm:$0xf]  ;;  %v7557_v23 = vld [vmem:[#allocation26 + $0xc0] sm:$0xff]  ;;  %v7539_v45 = vld [vmem:[#allocation26 + $0x30] sm:$0xff] }
 0x828   : > { %v7328_v49 = vsel %vm5878_vm1, %v7316_v28, %v7327_v50  ;;  %v14837_v54 = vld.sshfl [vmem:[#allocation1 + $0x10] sm:$0xff pattern:$0x75316420]  ;;  %v7373_v31 = vld [vmem:[#allocation6 + $0x1a] sm:$0xf]  ;;  %v7555_v17 = vld [vmem:[#allocation26 + $0xb0] sm:$0xff] }
 0x829   : > { %7338 = vst.msk [vmem:[#allocation6 + $0x21] sm:$0xf] %vm7334_vm8, %v7328_v49  ;;  %v7361_v40 = vld [vmem:[#allocation6 + $0x1a] sm:$0xf]  ;;  %v7538_v53 = vld [vmem:[#allocation26 + $0x28] sm:$0xff]  ;;  %v7537_v36 = vld [vmem:[#allocation26 + $0x20] sm:$0xff] }
 0x82a   : > { %7399 = vst [vmem:[#allocation1 + $0x10] ss:$2 sm:$0xff] %v7345_v30  ;;  %v7544_v12 = vld [vmem:[#allocation26 + $0x58] sm:$0xff]  ;;  %v7554_v4 = vld [vmem:[#allocation26 + $0xa8] sm:$0xff]  ;;  %v7553_v7 = vld [vmem:[#allocation26 + $0xa0] sm:$0xff] }
 0x82b   : > { %7401 = vst [vmem:[#allocation1 + $0x11] ss:$2 sm:$0xff] %v7346_v56  ;;  %v7560_v58 = vld [vmem:[#allocation26 + $0xd8] sm:$0xff]  ;;  %7613 = vmatpush.msrb.mxu0 %v7544_v12  ;;  %v7371_v3 = vld [vmem:[#allocation6 + $0x29] sm:$0xf]  ;;  %v7535_v49 = vld [vmem:[#allocation26 + $0x10] sm:$0xff] }
 0x82c   : > { %7636 = vmatpush.msrb.mxu3 %v7560_v58  ;;  %v7540_v39 = vld [vmem:[#allocation26 + $0x38] sm:$0xff]  ;;  %v7551_v30 = vld [vmem:[#allocation26 + $0x90] sm:$0xff]  ;;  %v7534_v56 = vld [vmem:[#allocation26 + $0x8] sm:$0xff] }
 0x82d   : > { %v14839_v8 = vld.sshfl [vmem:[#allocation1] sm:$0xff pattern:$0x75316420]  ;;  %7614 = vmatpush.msrb.mxu0 %v7543_v1  ;;  %v7586_v19 = vld [vmem:[#allocation26 + $0x1a8] sm:$0xff]  ;;  %v7585_v12 = vld [vmem:[#allocation26 + $0x1a0] sm:$0xff] }
 0x82e   : > { %7463 = vst [vmem:[#allocation1] ss:$2 sm:$0xff] %v7359_v34  ;;  %7637 = vmatpush.msrb.mxu3 %v7559_v48  ;;  %v7556_v46 = vld [vmem:[#allocation26 + $0xb8] sm:$0xff]  ;;  %v7570_v25 = vld [vmem:[#allocation26 + $0x128] sm:$0xff]  ;;  %v7569_v58 = vld [vmem:[#allocation26 + $0x120] sm:$0xff] }
 0x82f   : > { %7465 = vst [vmem:[#allocation1 + $0x1] ss:$2 sm:$0xff] %v7360_v37  ;;  %7615 = vmatpush.msrb.mxu0 %v7542_v57  ;;  %v7536_v14 = vld [vmem:[#allocation26 + $0x18] sm:$0xff]  ;;  %v7595_v37 = vld [vmem:[#allocation26 + $0x1f0] sm:$0xff] }
 0x830   : > { %v7354_v27 = vld [vmem:[#allocation6 + $0x20] sm:$0xf]  ;;  %7638 = vmatpush.msrb.mxu3 %v7558_v62  ;;  %v7552_v50 = vld [vmem:[#allocation26 + $0x98] sm:$0xff]  ;;  %v7583_v57 = vld [vmem:[#allocation26 + $0x190] sm:$0xff] }
 0x831   : > { %v7358_v2 = vld [vmem:[#allocation6 + $0x21] sm:$0xf]  ;;  %7616 = vmatpush.msrb.mxu0 %v7541_v10  ;;  %v7596_v34 = vld [vmem:[#allocation26 + $0x1f8] sm:$0xff] }
 0x832   : > { %v7403_v35 = vld.sshfl [vmem:[#allocation1 + $0x10] sm:$0xff pattern:$0x75316420]  ;;  %v7362_v9 = vld [vmem:[#allocation6 + $0x22] sm:$0xf]  ;;  %7639 = vmatpush.msrb.mxu3 %v7557_v23  ;;  %7678 = vmatpush.msra.mxu2 %v7596_v34  ;;  %v7588_v21 = vld [vmem:[#allocation26 + $0x1b8] sm:$0xff] }
 0x833   : > { %7418 = vst [vmem:[#allocation1 + $0x10] ss:$2 sm:$0xff] %v7349_v5  ;;  %v7366_v44 = vld [vmem:[#allocation6 + $0x20] sm:$0xf]  ;;  %7617 = vmatpush.msrb.mxu0 %v7540_v39  ;;  %v7550_v5 = vld [vmem:[#allocation26 + $0x88] sm:$0xff]  ;;  %v7572_v38 = vld [vmem:[#allocation26 + $0x138] sm:$0xff] }
 0x834   : > { %7420 = vst [vmem:[#allocation1 + $0x11] ss:$2 sm:$0xff] %v7350_v13  ;;  %7640 = vmatpush.msrb.mxu3 %v7556_v46  ;;  %v7370_v16 = vld [vmem:[#allocation6 + $0x21] sm:$0xf]  ;;  %v7579_v13 = vld [vmem:[#allocation26 + $0x170] sm:$0xff]  ;;  %7679 = vmatpush.msra.mxu2 %v7595_v37  ;;  %v7584_v1 = vld [vmem:[#allocation26 + $0x198] sm:$0xff] }
 0x835   : > { %7618 = vmatpush.msrb.mxu0 %v7539_v45  ;;  %v7568_v48 = vld [vmem:[#allocation26 + $0x118] sm:$0xff]  ;;  %v7566_v39 = vld [vmem:[#allocation26 + $0x108] sm:$0xff] }
 0x836   : > { %v7470_v22 = vld.sshfl [vmem:[#allocation1] sm:$0xff pattern:$0x75316420]  ;;  %7641 = vmatpush.msrb.mxu3 %v7555_v17  ;;  %v7582_v46 = vld [vmem:[#allocation26 + $0x188] sm:$0xff]  ;;  %v7565_v17 = vld [vmem:[#allocation26 + $0x100] sm:$0xff] }
 0x837   : > { %7482 = vst [vmem:[#allocation1] ss:$2 sm:$0xff] %v7364_v55  ;;  %7619 = vmatpush.msrb.mxu0 %v7538_v53  ;;  %v7533_v55 = vld [vmem:[#allocation26] sm:$0xff]  ;;  %v7602_v45 = vld [vmem:[#allocation26 + $0x228] sm:$0xff] }
 0x838   : > { %7484 = vst [vmem:[#allocation1 + $0x1] ss:$2 sm:$0xff] %v7365_v47  ;;  %7642 = vmatpush.msrb.mxu3 %v7554_v4  ;;  %v7549_v47 = vld [vmem:[#allocation26 + $0x80] sm:$0xff] }
 0x839   : > { %7620 = vmatpush.msrb.mxu0 %v7537_v36  ;;  %v7581_v53 = vld [vmem:[#allocation26 + $0x180] sm:$0xff]  ;;  %v7598_v36 = vld [vmem:[#allocation26 + $0x208] sm:$0xff] }
 0x83a   : > { %7643 = vmatpush.msrb.mxu3 %v7553_v7  ;;  %v7601_v4 = vld [vmem:[#allocation26 + $0x220] sm:$0xff] }
 0x83b   : > { %v14841_v63 = vld.sshfl [vmem:[#allocation1 + $0x10] sm:$0xff pattern:$0x75316420]  ;;  %7621 = vmatpush.msrb.mxu0 %v7536_v14 }
 0x83c   : > { %7433 = vst [vmem:[#allocation1 + $0x10] ss:$2 sm:$0xff] %v7353_v15  ;;  %7644 = vmatpush.msrb.mxu3 %v7552_v50  ;;  %v7594_v15 = vld [vmem:[#allocation26 + $0x1e8] sm:$0xff] }
 0x83d   : > { %7435 = vst [vmem:[#allocation1 + $0x11] ss:$2 sm:$0xff] %v7354_v27  ;;  %7622 = vmatpush.msrb.mxu0 %v7535_v49  ;;  %v7374_v27 = vld [vmem:[#allocation6 + $0x22] sm:$0xf]  ;;  %7680 = vmatpush.msra.mxu2 %v7594_v15 }
 0x83e   : > { %7645 = vmatpush.msrb.mxu3 %v7551_v30  ;;  %v7939_v15 = vld [vmem:[#allocation28 + $0x60] sm:$0xff] }
 0x83f   : > { %v14843_v29 = vld.sshfl [vmem:[#allocation1] sm:$0xff pattern:$0x75316420]  ;;  %7623 = vmatpush.msrb.mxu0 %v7534_v56 }
 0x840   : > { %7497 = vst [vmem:[#allocation1] ss:$2 sm:$0xff] %v7368_v41  ;;  %7646 = vmatpush.msrb.mxu3 %v7550_v5 }
 0x841   : > { %7499 = vst [vmem:[#allocation1 + $0x1] ss:$2 sm:$0xff] %v7369_v11  ;;  %v7578_v11 = vld [vmem:[#allocation26 + $0x168] sm:$0xff]  ;;  %7624 = vmatpush.msrb.mxu0 %v7533_v55 }
 0x842   : > { %7647 = vmatpush.msrb.mxu3 %v7549_v47  ;;  %v7940_v47 = vld [vmem:[#allocation28 + $0x68] sm:$0xff] }
 0x844   : > { %v7437_v6 = vld.sshfl [vmem:[#allocation1 + $0x10] sm:$0xff pattern:$0x75316420] }
 0x845   : > { %7452 = vst [vmem:[#allocation1 + $0x10] ss:$2 sm:$0xff] %v7357_v20  ;;  %v10660_v24 = vpack.i.bf16 %v7470_v22, %v7437_v6  ;;  %v7375_v22 = vld [vmem:[#allocation6 + $0x2a] sm:$0xf]  ;;  %v7593_v20 = vld [vmem:[#allocation26 + $0x1e0] sm:$0xff] }
 0x846   : > { %7454 = vst [vmem:[#allocation1 + $0x11] ss:$2 sm:$0xff] %v7358_v2  ;;  %v7577_v6 = vld [vmem:[#allocation26 + $0x160] sm:$0xff]  ;;  %v7592_v2 = vld [vmem:[#allocation26 + $0x1d8] sm:$0xff]  ;;  %7681 = vmatpush.msra.mxu2 %v7593_v20  ;;  %v7956_v20 = vld [vmem:[#allocation28 + $0xe8] sm:$0xff] }
 0x847   : > { %10661 = vrot.lane.b32.xlu1 %v10660_v24, %s11268_s5  ;;  %v7576_v24 = vld [vmem:[#allocation26 + $0x158] sm:$0xff] }
 0x848   : > { %v7504_v43 = vld.sshfl [vmem:[#allocation1] sm:$0xff pattern:$0x75316420]  ;;  %7682 = vmatpush.msra.mxu2 %v7592_v2  ;;  %v7935_v2 = vld [vmem:[#allocation28 + $0x40] sm:$0xff] }
 0x849   : > { %7518 = vst [vmem:[#allocation1 + $0x1] ss:$2 sm:$0xff] %v7373_v31  ;;  %v10655_v51 = vpack.i.bf16 %v7504_v43, %v7403_v35  ;;  %v7580_v35 = vld [vmem:[#allocation26 + $0x178] sm:$0xff]  ;;  %v7591_v31 = vld [vmem:[#allocation26 + $0x1d0] sm:$0xff] }
 0x84a   : > { %7516 = vst [vmem:[#allocation1] ss:$2 sm:$0xff] %v7372_v61  ;;  %7655 = vmatpush.msrb.mxu1 %v7580_v35  ;;  %v7604_v43 = vld [vmem:[#allocation26 + $0x238] sm:$0xff]  ;;  %v7575_v61 = vld [vmem:[#allocation26 + $0x150] sm:$0xff]  ;;  %7683 = vmatpush.msra.mxu2 %v7591_v31 }
 0x84b   : > { %10656 = vrot.lane.b32.xlu0 %v10655_v51, %s11268_s5  ;;  %7709 = vmatpush.msra.mxu0 %v7604_v43  ;;  %v7603_v51 = vld [vmem:[#allocation26 + $0x230] sm:$0xff]  ;;  %v7934_v31 = vld [vmem:[#allocation28 + $0x38] sm:$0xff] }
 0x84c   : > { %7656 = vmatpush.msrb.mxu1 %v7579_v13  ;;  %7684 = vmatpush.msra.mxu2 %v7590_v60  ;;  %v7954_v43 = vld [vmem:[#allocation28 + $0xd8] sm:$0xff]  ;;  %v7953_v60 = vld [vmem:[#allocation28 + $0xd0] sm:$0xff] }
 0x84d   : > { %v14847_v52 = vld.sshfl [vmem:[#allocation1 + $0x10] sm:$0xff pattern:$0x75316420]  ;;  %7710 = vmatpush.msra.mxu0 %v7603_v51  ;;  %v7933_v51 = vld [vmem:[#allocation28 + $0x30] sm:$0xff] }
 0x84e   : > { %7467 = vst [vmem:[#allocation1 + $0x10] ss:$2 sm:$0xff] %v7361_v40  ;;  %7657 = vmatpush.msrb.mxu1 %v7578_v11  ;;  %7685 = vmatpush.msra.mxu2 %v7589_v0  ;;  %v7587_v40 = vld [vmem:[#allocation26 + $0x1b0] sm:$0xff] }
 0x84f   : > { %7469 = vst [vmem:[#allocation1 + $0x11] ss:$2 sm:$0xff] %v7362_v9  ;;  %v7571_v9 = vld [vmem:[#allocation26 + $0x130] sm:$0xff]  ;;  %7711 = vmatpush.msra.mxu0 %v7602_v45 }
 0x850   : > { %7658 = vmatpush.msrb.mxu1 %v7577_v6  ;;  %7686 = vmatpush.msra.mxu2 %v7588_v21  ;;  %v7957_v11 = vld [vmem:[#allocation28 + $0xf0] sm:$0xff]  ;;  %v7952_v21 = vld [vmem:[#allocation28 + $0xc8] sm:$0xff] }
 0x851   : > { %7712 = vmatpush.msra.mxu0 %v7601_v4  ;;  %v7989_v45 = vld [vmem:[#allocation28 + $0x1f0] sm:$0xff]  ;;  %v7928_v4 = vld [vmem:[#allocation28 + $0x8] sm:$0xff] }
 0x852   : > { %7659 = vmatpush.msrb.mxu1 %v7576_v24  ;;  %7687 = vmatpush.msra.mxu2 %v7587_v40  ;;  %v7955_v24 = vld [vmem:[#allocation28 + $0xe0] sm:$0xff] }
 0x854   : > { %7660 = vmatpush.msrb.mxu1 %v7575_v61  ;;  %7688 = vmatpush.msra.mxu2 %v7586_v19  ;;  %v7974_v61 = vld [vmem:[#allocation28 + $0x178] sm:$0xff]  ;;  %v7951_v19 = vld [vmem:[#allocation28 + $0xc0] sm:$0xff] }
 0x856   : > { %v7471_v32 = vld.sshfl [vmem:[#allocation1 + $0x10] sm:$0xff pattern:$0x75316420]  ;;  %7661 = vmatpush.msrb.mxu1 %v7574_v42  ;;  %7689 = vmatpush.msra.mxu2 %v7585_v12  ;;  %v7973_v42 = vld [vmem:[#allocation28 + $0x170] sm:$0xff] }
 0x857   : > { %7486 = vst [vmem:[#allocation1 + $0x10] ss:$2 sm:$0xff] %v7366_v44  ;;  %7474 = vrot.lane.b32.xlu0 %v7471_v32, %s11268_s5 }
 0x858   : > { %7488 = vst [vmem:[#allocation1 + $0x11] ss:$2 sm:$0xff] %v7367_v59  ;;  %7662 = vmatpush.msrb.mxu1 %v7573_v33  ;;  %7690 = vmatpush.msra.mxu2 %v7584_v1  ;;  %v7567_v59 = vld [vmem:[#allocation26 + $0x110] sm:$0xff]  ;;  %v7932_v33 = vld [vmem:[#allocation28 + $0x28] sm:$0xff] }
 0x85a   : > { %7663 = vmatpush.msrb.mxu1 %v7572_v38  ;;  %7691 = vmatpush.msra.mxu2 %v7583_v57  ;;  %v7972_v38 = vld [vmem:[#allocation28 + $0x168] sm:$0xff]  ;;  %v7950_v57 = vld [vmem:[#allocation28 + $0xb8] sm:$0xff] }
 0x85c   : > { %7664 = vmatpush.msrb.mxu1 %v7571_v9  ;;  %7692 = vmatpush.msra.mxu2 %v7582_v46  ;;  %v7931_v9 = vld [vmem:[#allocation28 + $0x20] sm:$0xff]  ;;  %v14874_v46 = vld [vmem:[%s15074_s14] ss:$0 sm:$0xff] }
 0x85e   : > { %7665 = vmatpush.msrb.mxu1 %v7570_v25  ;;  %7693 = vmatpush.msra.mxu2 %v7581_v53  ;;  %v7971_v25 = vld [vmem:[#allocation28 + $0x160] sm:$0xff] }
 0x85f   : > { %v14850_v28 = vld.sshfl [vmem:[#allocation1 + $0x10] sm:$0xff pattern:$0x75316420] }
 0x860   : > { %7501 = vst [vmem:[#allocation1 + $0x10] ss:$2 sm:$0xff] %v7370_v16  ;;  %7666 = vmatpush.msrb.mxu1 %v7569_v58  ;;  %v7755_v58 = vld [vmem:[#allocation7] sm:$0xf] }
 0x861   : > { %7503 = vst [vmem:[#allocation1 + $0x11] ss:$2 sm:$0xff] %v7371_v3  ;;  %v7600_v3 = vld [vmem:[#allocation26 + $0x218] sm:$0xff] }
 0x862   : > { %7667 = vmatpush.msrb.mxu1 %v7568_v48  ;;  %7713 = vmatpush.msra.mxu0 %v7600_v3  ;;  %v7930_v48 = vld [vmem:[#allocation28 + $0x18] sm:$0xff]  ;;  %v7948_v3 = vld [vmem:[#allocation28 + $0xa8] sm:$0xff] }
 0x864   : > { %7668 = vmatpush.msrb.mxu1 %v7567_v59  ;;  %v7970_v59 = vld [vmem:[#allocation28 + $0x158] sm:$0xff] }
 0x866   : > { %7669 = vmatpush.msrb.mxu1 %v7566_v39 }
 0x868   : > { %v7505_v41 = vld.sshfl [vmem:[#allocation1 + $0x10] sm:$0xff pattern:$0x75316420]  ;;  %7670 = vmatpush.msrb.mxu1 %v7565_v17 }
 0x869   : > { %7520 = vst [vmem:[#allocation1 + $0x10] ss:$2 sm:$0xff] %v7374_v27  ;;  %7508 = vrot.lane.b32.xlu2 %v7505_v41, %s11268_s5  ;;  %v7958_v27 = vld [vmem:[#allocation28 + $0xf8] sm:$0xff]  ;;  %v7937_v41 = vld [vmem:[#allocation28 + $0x50] sm:$0xff] }
 0x86a   : > { %7522 = vst [vmem:[#allocation1 + $0x11] ss:$2 sm:$0xff] %v7375_v22  ;;  %8117 = vmatpush.msra.mxu1 %v7974_v61 }
 0x86c   : > { %8118 = vmatpush.msra.mxu1 %v7973_v42 }
 0x86e   : > { %8119 = vmatpush.msra.mxu1 %v7972_v38  ;;  %v8022_v38 = vld [vmem:[#allocation28 + $0x2f8] sm:$0xff] }
 0x870   : > { %8120 = vmatpush.msra.mxu1 %v7971_v25  ;;  %v8021_v25 = vld [vmem:[#allocation28 + $0x2f0] sm:$0xff] }
 0x871   : > { %v7524_v22 = vld.sshfl [vmem:[#allocation1 + $0x10] sm:$0xff pattern:$0x75316420] }
 0x872   : > { %8121 = vmatpush.msra.mxu1 %v7970_v59  ;;  %v7980_v59 = vld [vmem:[#allocation28 + $0x1a8] sm:$0xff] }
 0x881   : > { %v10652_v62 = vpop.permute.xlu2 %10651 }
 0x882   : > { %v10654_v44 = vunpack.i.h.bf16 %v10652_v62  ;;  %v10653_v32 = vunpack.i.l.bf16 %v10652_v62  ;;  %v7990_v62 = vld [vmem:[#allocation28 + $0x1f8] sm:$0xff] }
 0x883   : > { %8140 = vmatpush.msrb.mxu2 %v7990_v62  ;;  %v8000_v62 = vld [vmem:[#allocation28 + $0x248] sm:$0xff] }
 0x884   : > { %v7525_v10 = vsel %vm4189_vm13, %v14814_v26, %v10653_v32  ;;  %v7527_v23 = vsel %vm4189_vm13, %v14829_v18, %v10654_v44  ;;  %v7599_v26 = vld [vmem:[#allocation26 + $0x210] sm:$0xff]  ;;  %v7597_v18 = vld [vmem:[#allocation26 + $0x200] sm:$0xff] }
 0x885   : > { %7625 = vmatmul.f32.vlgmr.msrb.gmra.mxu0 %v7525_v10  ;;  %7648 = vmatmul.f32.vlgmr.msrb.gmra.mxu3 %v7527_v23  ;;  %v7929_v32 = vld [vmem:[#allocation28 + $0x10] sm:$0xff] }
 0x886   : > { %7714 = vmatpush.msra.mxu0 %v7599_v26  ;;  %v7949_v10 = vld [vmem:[#allocation28 + $0xb0] sm:$0xff]  ;;  %8141 = vmatpush.msrb.mxu2 %v7989_v45  ;;  %v7968_v26 = vld [vmem:[#allocation28 + $0x148] sm:$0xff]  ;;  %v7998_v45 = vld [vmem:[#allocation28 + $0x238] sm:$0xff] }
 0x887   : > { %v7969_v23 = vld [vmem:[#allocation28 + $0x150] sm:$0xff] }
 0x888   : > { %7715 = vmatpush.msra.mxu0 %v7598_v36  ;;  %8122 = vmatpush.msra.mxu1 %v7969_v23  ;;  %v7999_v23 = vld [vmem:[#allocation28 + $0x240] sm:$0xff] }
 0x88a   : > { %7716 = vmatpush.msra.mxu0 %v7597_v18  ;;  %v10674_v18 = vld [vmem:[%s15075_s15] ss:$0 sm:$0xff]  ;;  %8123 = vmatpush.msra.mxu1 %v7968_v26  ;;  %v8037_v26 = vld [vmem:[#allocation28 + $0x370] sm:$0xff] }
 0x88c   : > { %8094 = vmatpush.msrb.mxu0 %v7958_v27  ;;  %v7964_v27 = vld [vmem:[#allocation28 + $0x128] sm:$0xff] }
 0x88e   : > { %8095 = vmatpush.msrb.mxu0 %v7957_v11 }
 0x890   : > { %8096 = vmatpush.msrb.mxu0 %v7956_v20  ;;  %v8004_v20 = vld [vmem:[#allocation28 + $0x268] sm:$0xff] }
 0x892   : > { %8097 = vmatpush.msrb.mxu0 %v7955_v24  ;;  %v7963_v24 = vld [vmem:[#allocation28 + $0x120] sm:$0xff] }
 0x894   : > { %8098 = vmatpush.msrb.mxu0 %v7954_v43 }
 0x896   : > { %8099 = vmatpush.msrb.mxu0 %v7953_v60 }
 0x898   : > { %8100 = vmatpush.msrb.mxu0 %v7952_v21  ;;  %v8002_v21 = vld [vmem:[#allocation28 + $0x258] sm:$0xff] }
 0x89a   : > { %8101 = vmatpush.msrb.mxu0 %v7951_v19  ;;  %v8001_v19 = vld [vmem:[#allocation28 + $0x250] sm:$0xff] }
 0x89c   : > { %8102 = vmatpush.msrb.mxu0 %v7950_v57 }
 0x89e   : > { %8103 = vmatpush.msrb.mxu0 %v7949_v10  ;;  %v7979_v10 = vld [vmem:[#allocation28 + $0x1a0] sm:$0xff] }
 0x8a0   : > { %8104 = vmatpush.msrb.mxu0 %v7948_v3  ;;  %v7997_v3 = vld [vmem:[#allocation28 + $0x230] sm:$0xff] }
 0x8b9   : > { %v10662_v16 = vpop.permute.xlu1 %10661 }
 0x8ba   : > { %v10664_v7 = vunpack.i.h.bf16 %v10662_v16  ;;  %v10663_v14 = vunpack.i.l.bf16 %v10662_v16  ;;  %v7988_v16 = vld [vmem:[#allocation28 + $0x1e8] sm:$0xff] }
 0x8bb   : > { %8142 = vmatpush.msrb.mxu2 %v7988_v16  ;;  %v7976_v16 = vld [vmem:[#allocation28 + $0x188] sm:$0xff] }
 0x8bc   : > { %v7529_v49 = vsel %vm4189_vm13, %v14839_v8, %v10664_v7  ;;  %v7528_v30 = vsel %vm4189_vm13, %v14841_v63, %v10663_v14  ;;  %v7523_v8 = vld.sshfl [vmem:[#allocation1] sm:$0xff pattern:$0x75316420]  ;;  %v7927_v14 = vld [vmem:[#allocation28] sm:$0xff] }
 0x8bd   : > { %v10657_v50 = vpop.permute.xlu0 %10656  ;;  %7651 = vmatmul.f32.gmra.mxu3 %v7528_v30  ;;  %7671 = vmatmul.f32.vlgmr.msrb.gmra.mxu1 %v7529_v49  ;;  %7796 = vst [vmem:[#allocation1] ss:$2 sm:$0xff] %v7755_v58  ;;  %v7967_v49 = vld [vmem:[#allocation28 + $0x140] sm:$0xff] }
 0x8be   : > { %v10659_v56 = vunpack.i.h.bf16 %v10657_v50  ;;  %v10658_v34 = vunpack.i.l.bf16 %v10657_v50  ;;  %v7947_v50 = vld [vmem:[#allocation28 + $0xa0] sm:$0xff]  ;;  %8124 = vmatpush.msra.mxu1 %v7967_v49  ;;  %v8036_v49 = vld [vmem:[#allocation28 + $0x368] sm:$0xff] }
 0x8bf   : > { %8105 = vmatpush.msrb.mxu0 %v7947_v50  ;;  %v8016_v50 = vld [vmem:[#allocation28 + $0x2c8] sm:$0xff] }
 0x8c0   : > { %v7526_v37 = vsel %vm4189_vm13, %v14837_v54, %v10658_v34  ;;  %v7531_v5 = vsel %vm4189_vm13, %v14843_v29, %v10659_v56  ;;  %v7942_v54 = vld [vmem:[#allocation28 + $0x78] sm:$0xff]  ;;  %v7941_v29 = vld [vmem:[#allocation28 + $0x70] sm:$0xff]  ;;  %v7987_v56 = vld [vmem:[#allocation28 + $0x1e0] sm:$0xff] }
 0x8c1   : > { %7628 = vmatmul.f32.gmra.mxu0 %v7526_v37  ;;  %7694 = vmatmul.f32.vlgmr.msra.gmra.mxu2 %v7531_v5  ;;  %v7946_v5 = vld [vmem:[#allocation28 + $0x98] sm:$0xff] }
 0x8c2   : > { %8071 = vmatpush.msra.mxu3 %v7942_v54  ;;  %8143 = vmatpush.msrb.mxu2 %v7987_v56  ;;  %v7995_v56 = vld [vmem:[#allocation28 + $0x220] sm:$0xff] }
 0x8c3   : > { %v7509_v35 = vpop.permute.xlu2 %7508  ;;  %8106 = vmatpush.msrb.mxu0 %v7946_v5 }
 0x8c4   : > { %v7532_v13 = vsel %vm4189_vm13, %v14850_v28, %v7509_v35  ;;  %8072 = vmatpush.msra.mxu3 %v7941_v29  ;;  %v7938_v28 = vld [vmem:[#allocation28 + $0x58] sm:$0xff]  ;;  %v7985_v29 = vld [vmem:[#allocation28 + $0x1d0] sm:$0xff] }
 0x8c5   : > { %v7966_v35 = vld [vmem:[#allocation28 + $0x138] sm:$0xff] }
 0x8c6   : > { %8073 = vmatpush.msra.mxu3 %v7940_v47  ;;  %8125 = vmatpush.msra.mxu1 %v7966_v35  ;;  %v8005_v47 = vld [vmem:[#allocation28 + $0x270] sm:$0xff] }
 0x8c7   : > { %v7759_v35 = vld [vmem:[#allocation7 + $0x1] sm:$0xf] }
 0x8c8   : > { %8074 = vmatpush.msra.mxu3 %v7939_v15  ;;  %v7944_v15 = vld [vmem:[#allocation28 + $0x88] sm:$0xff] }
 0x8c9   : > { %7697 = vmatmul.f32.gmra.mxu2 %v7532_v13  ;;  %9793 = vmatmul.msk.f32.vlgmr.msra.gmra.mxu0 %vm4189_vm13, %v7523_v8  ;;  %v7475_v63 = vpop.permute.xlu0 %7474  ;;  %v7986_v13 = vld [vmem:[#allocation28 + $0x1d8] sm:$0xff] }
 0x8ca   : > { %v7530_v55 = vsel %vm4189_vm13, %v14847_v52, %v7475_v63  ;;  %8075 = vmatpush.msra.mxu3 %v7938_v28  ;;  %v7936_v52 = vld [vmem:[#allocation28 + $0x48] sm:$0xff]  ;;  %v8006_v63 = vld [vmem:[#allocation28 + $0x278] sm:$0xff]  ;;  %8144 = vmatpush.msrb.mxu2 %v7986_v13 }
 0x8cb   : > { %7674 = vmatmul.f32.gmra.mxu1 %v7530_v55  ;;  %v7945_v55 = vld [vmem:[#allocation28 + $0x90] sm:$0xff]  ;;  %v7994_v13 = vld [vmem:[#allocation28 + $0x218] sm:$0xff] }
 0x8cc   : > { %8076 = vmatpush.msra.mxu3 %v7937_v41  ;;  %8107 = vmatpush.msrb.mxu0 %v7945_v55  ;;  %v7984_v41 = vld [vmem:[#allocation28 + $0x1c8] sm:$0xff]  ;;  %v8054_v55 = vld [vmem:[#allocation28 + $0x3f8] sm:$0xff] }
 0x8cd   : > { %8145 = vmatpush.msrb.mxu2 %v7985_v29  ;;  %v8033_v29 = vld [vmem:[#allocation28 + $0x350] sm:$0xff] }
 0x8ce   : > { %8077 = vmatpush.msra.mxu3 %v7936_v52  ;;  %8108 = vmatpush.msrb.mxu0 %v7944_v15  ;;  %v7992_v15 = vld [vmem:[#allocation28 + $0x208] sm:$0xff] }
 0x8cf   : > { %8146 = vmatpush.msrb.mxu2 %v7984_v41  ;;  %v8052_v41 = vld [vmem:[#allocation28 + $0x3e8] sm:$0xff] }
 0x8d0   : > { %8078 = vmatpush.msra.mxu3 %v7935_v2 }
 0x8d1   : > { %9794 = vmatmul.msk.f32.gmra.mxu0 %vm4189_vm13, %v7524_v22  ;;  %v7965_v22 = vld [vmem:[#allocation28 + $0x130] sm:$0xff] }
 0x8d2   : > { %8079 = vmatpush.msra.mxu3 %v7934_v31  ;;  %8126 = vmatpush.msra.mxu1 %v7965_v22  ;;  %v7983_v31 = vld [vmem:[#allocation28 + $0x1c0] sm:$0xff]  ;;  %v7993_v22 = vld [vmem:[#allocation28 + $0x210] sm:$0xff] }
 0x8d3   : > { %8147 = vmatpush.msrb.mxu2 %v7983_v31  ;;  %v8051_v31 = vld [vmem:[#allocation28 + $0x3e0] sm:$0xff] }
 0x8d4   : > { %8080 = vmatpush.msra.mxu3 %v7933_v51  ;;  %8127 = vmatpush.msra.mxu1 %v7964_v27  ;;  %v8003_v51 = vld [vmem:[#allocation28 + $0x260] sm:$0xff]  ;;  %v8032_v27 = vld [vmem:[#allocation28 + $0x348] sm:$0xff] }
 0x8d6   : > { %8081 = vmatpush.msra.mxu3 %v7932_v33  ;;  %8128 = vmatpush.msra.mxu1 %v7963_v24  ;;  %v7982_v33 = vld [vmem:[#allocation28 + $0x1b8] sm:$0xff]  ;;  %v7763_v24 = vld [vmem:[#allocation7 + $0x2] sm:$0xf] }
 0x8d7   : > { %8148 = vmatpush.msrb.mxu2 %v7982_v33 }
 0x8d8   : > { %8082 = vmatpush.msra.mxu3 %v7931_v9  ;;  %v7981_v9 = vld [vmem:[#allocation28 + $0x1b0] sm:$0xff] }
 0x8d9   : > { %8149 = vmatpush.msrb.mxu2 %v7981_v9  ;;  %v8069_v9 = vld [vmem:[#allocation28 + $0x470] sm:$0xff] }
 0x8da   : > { %8083 = vmatpush.msra.mxu3 %v7930_v48 }
 0x8db   : > { %8150 = vmatpush.msrb.mxu2 %v7980_v59  ;;  %v8067_v59 = vld [vmem:[#allocation28 + $0x460] sm:$0xff] }
 0x8dc   : > { %8084 = vmatpush.msra.mxu3 %v7929_v32  ;;  %v7959_v32 = vld [vmem:[#allocation28 + $0x100] sm:$0xff] }
 0x8dd   : > { %8151 = vmatpush.msrb.mxu2 %v7979_v10 }
 0x8de   : > { %8085 = vmatpush.msra.mxu3 %v7928_v4  ;;  %v7977_v4 = vld [vmem:[#allocation28 + $0x190] sm:$0xff] }
 0x8e0   : > { %8086 = vmatpush.msra.mxu3 %v7927_v14 }
 0x8e2   : > { %8163 = vmatpush.msrb.mxu3 %v8006_v63  ;;  %v8034_v63 = vld [vmem:[#allocation28 + $0x358] sm:$0xff] }
 0x8e4   : > { %8164 = vmatpush.msrb.mxu3 %v8005_v47  ;;  %v8053_v47 = vld [vmem:[#allocation28 + $0x3f0] sm:$0xff] }
 0x8e6   : > { %8165 = vmatpush.msrb.mxu3 %v8004_v20 }
 0x8e8   : > { %8166 = vmatpush.msrb.mxu3 %v8003_v51  ;;  %v8030_v51 = vld [vmem:[#allocation28 + $0x338] sm:$0xff] }
 0x8ea   : > { %8167 = vmatpush.msrb.mxu3 %v8002_v21  ;;  %v8009_v21 = vld [vmem:[#allocation28 + $0x290] sm:$0xff] }
 0x8ec   : > { %8168 = vmatpush.msrb.mxu3 %v8001_v19  ;;  %v8008_v19 = vld [vmem:[#allocation28 + $0x288] sm:$0xff] }
 0x8ee   : > { %8169 = vmatpush.msrb.mxu3 %v8000_v62  ;;  %v8026_v62 = vld [vmem:[#allocation28 + $0x318] sm:$0xff] }
 0x8f0   : > { %8170 = vmatpush.msrb.mxu3 %v7999_v23  ;;  %v8046_v23 = vld [vmem:[#allocation28 + $0x3b8] sm:$0xff] }
 0x8f2   : > { %8171 = vmatpush.msrb.mxu3 %v7998_v45  ;;  %v8025_v45 = vld [vmem:[#allocation28 + $0x310] sm:$0xff] }
 0x8f4   : > { %8172 = vmatpush.msrb.mxu3 %v7997_v3  ;;  %v8065_v3 = vld [vmem:[#allocation28 + $0x450] sm:$0xff] }
 0x902   : > { %v7626_v6 = vpop.f32.mrf.mxu0 }
 0x908   : > { %v7649_v0 = vpop.f32.mrf.mxu3 }
 0x909   : > { %v7650_v1 = vadd.f32 %v7649_v0, %v7626_v6  ;;  %v7943_v6 = vld [vmem:[#allocation28 + $0x80] sm:$0xff]  ;;  %v7962_v0 = vld [vmem:[#allocation28 + $0x118] sm:$0xff] }
 0x90a   : > { %8109 = vmatpush.msrb.mxu0 %v7943_v6  ;;  %8129 = vmatpush.msra.mxu1 %v7962_v0  ;;  %v8031_v6 = vld [vmem:[#allocation28 + $0x340] sm:$0xff]  ;;  %v8070_v0 = vld [vmem:[#allocation28 + $0x478] sm:$0xff] }
 0x90c   : > { %8186 = vmatpush.msra.mxu0 %v8022_v38  ;;  %v8029_v38 = vld [vmem:[#allocation28 + $0x330] sm:$0xff] }
 0x90e   : > { %8187 = vmatpush.msra.mxu0 %v8021_v25  ;;  %v8028_v25 = vld [vmem:[#allocation28 + $0x328] sm:$0xff] }
 0x93a   : > { %v7672_v12 = vpop.f32.mrf.mxu1 }
 0x93b   : > { %v7673_v44 = vadd.f32 %v7672_v12, %v7650_v1  ;;  %v7960_v12 = vld [vmem:[#allocation28 + $0x108] sm:$0xff] }
 0x93e   : > { %v7629_v40 = vpop.f32.mrf.mxu0 }
 0x940   : > { %v7652_v17 = vpop.f32.mrf.mxu3 }
 0x941   : > { %v7653_v30 = vadd.f32 %v7652_v17, %v7629_v40  ;;  %v7961_v40 = vld [vmem:[#allocation28 + $0x110] sm:$0xff]  ;;  %v8018_v17 = vld [vmem:[#allocation28 + $0x2d8] sm:$0xff] }
 0x942   : > { %8130 = vmatpush.msra.mxu1 %v7961_v40  ;;  %v8049_v40 = vld [vmem:[#allocation28 + $0x3d0] sm:$0xff] }
 0x944   : > { %v7695_v39 = vpop.f32.mrf.mxu2  ;;  %8131 = vmatpush.msra.mxu1 %v7960_v12  ;;  %v8048_v12 = vld [vmem:[#allocation28 + $0x3c8] sm:$0xff] }
 0x945   : > { %v7696_v53 = vadd.f32 %v7695_v39, %v7673_v44  ;;  %v8020_v44 = vld [vmem:[#allocation28 + $0x2e8] sm:$0xff]  ;;  %v8019_v39 = vld [vmem:[#allocation28 + $0x2e0] sm:$0xff] }
 0x946   : > { %v7718_v36 = vpop.f32.mrf.mxu0  ;;  %8188 = vmatpush.msra.mxu0 %v8020_v44  ;;  %8132 = vmatpush.msra.mxu1 %v7959_v32 }
 0x947   : > { %v7719_v7 = vadd.f32 %v7718_v36, %v7696_v53  ;;  %v8038_v53 = vld [vmem:[#allocation28 + $0x378] sm:$0xff]  ;;  %v8017_v36 = vld [vmem:[#allocation28 + $0x2d0] sm:$0xff] }
 0x948   : > { %v7675_v37 = vpop.f32.mrf.mxu1  ;;  %8189 = vmatpush.msra.mxu0 %v8019_v39  ;;  %8209 = vmatpush.msrb.mxu1 %v8038_v53  ;;  %v8045_v53 = vld [vmem:[#allocation28 + $0x3b0] sm:$0xff] }
 0x949   : > { %v7728_v34 = vmul.f32 %v14874_v46, %v7719_v7  ;;  %v7676_v8 = vadd.f32 %v7675_v37, %v7653_v30  ;;  %v7996_v7 = vld [vmem:[#allocation28 + $0x228] sm:$0xff]  ;;  %v7975_v30 = vld [vmem:[#allocation28 + $0x180] sm:$0xff] }
 0x94a   : > { %8190 = vmatpush.msra.mxu0 %v8018_v17  ;;  %8210 = vmatpush.msrb.mxu1 %v8037_v26  ;;  %v8035_v37 = vld [vmem:[#allocation28 + $0x360] sm:$0xff]  ;;  %v8024_v26 = vld [vmem:[#allocation28 + $0x308] sm:$0xff] }
 0x94b   : > { %v7734_v54 = vadd.f32 %v10674_v18, %v7728_v34  ;;  %8173 = vmatpush.msrb.mxu3 %v7996_v7  ;;  %v8015_v34 = vld [vmem:[#allocation28 + $0x2c0] sm:$0xff] }
 0x94c   : > { %v7698_v28 = vpop.f32.mrf.mxu2  ;;  %8191 = vmatpush.msra.mxu0 %v8017_v36  ;;  %8211 = vmatpush.msrb.mxu1 %v8036_v49  ;;  %v8044_v36 = vld [vmem:[#allocation28 + $0x3a8] sm:$0xff]  ;;  %v8043_v7 = vld [vmem:[#allocation28 + $0x3a0] sm:$0xff] }
 0x94d   : > { %v7736_v11 = vmax.f32 %v7734_v54, 0.0  ;;  %v7699_v52 = vadd.f32 %v7698_v28, %v7676_v8  ;;  %8174 = vmatpush.msrb.mxu3 %v7995_v56  ;;  %v8014_v8 = vld [vmem:[#allocation28 + $0x2b8] sm:$0xff]  ;;  %v8013_v54 = vld [vmem:[#allocation28 + $0x2b0] sm:$0xff]  ;;  %v8012_v28 = vld [vmem:[#allocation28 + $0x2a8] sm:$0xff] }
 0x94e   : > { %v7721_v2 = vpop.f32.mrf.mxu0  ;;  %8192 = vmatpush.msra.mxu0 %v8016_v50  ;;  %8212 = vmatpush.msrb.mxu1 %v8035_v37  ;;  %v8042_v50 = vld [vmem:[#allocation28 + $0x398] sm:$0xff] }
 0x94f   : > { %v7746_v43 = vrot.slane %v7736_v11, 4  ;;  %7751 = vst [vmem:[#allocation7 + $0x9] sm:$0xf] %v7736_v11  ;;  %v7722_v61 = vadd.f32 %v7721_v2, %v7699_v52  ;;  %8175 = vmatpush.msrb.mxu3 %v7994_v13  ;;  %v7991_v11 = vld [vmem:[#allocation28 + $0x200] sm:$0xff]  ;;  %v8061_v13 = vld [vmem:[#allocation28 + $0x430] sm:$0xff] }
 0x950   : > { %8193 = vmatpush.msra.mxu0 %v8015_v34  ;;  %8213 = vmatpush.msrb.mxu1 %v8034_v63  ;;  %v8011_v52 = vld [vmem:[#allocation28 + $0x2a0] sm:$0xff]  ;;  %v8062_v34 = vld [vmem:[#allocation28 + $0x438] sm:$0xff]  ;;  %v8040_v63 = vld [vmem:[#allocation28 + $0x388] sm:$0xff] }
 0x951   : > { %7752 = vst [vmem:[#allocation7 + $0x11] sm:$0xf] %v7746_v43  ;;  %v7729_v60 = vmul.f32 %v14874_v46, %v7722_v61  ;;  %v7978_v46 = vld [vmem:[#allocation28 + $0x198] sm:$0xff]  ;;  %8176 = vmatpush.msrb.mxu3 %v7993_v22  ;;  %v8039_v22 = vld [vmem:[#allocation28 + $0x380] sm:$0xff] }
 0x952   : > { %8152 = vmatpush.msrb.mxu2 %v7978_v46  ;;  %8194 = vmatpush.msra.mxu0 %v8014_v8  ;;  %v8010_v43 = vld [vmem:[#allocation28 + $0x298] sm:$0xff] }
 0x953   : > { %v7735_v42 = vadd.f32 %v10674_v18, %v7729_v60  ;;  %8214 = vmatpush.msrb.mxu1 %v8033_v29  ;;  %8177 = vmatpush.msrb.mxu3 %v7992_v15  ;;  %v8050_v60 = vld [vmem:[#allocation28 + $0x3d8] sm:$0xff] }
 0x954   : > { %8153 = vmatpush.msrb.mxu2 %v7977_v4  ;;  %8195 = vmatpush.msra.mxu0 %v8013_v54  ;;  %v8066_v46 = vld [vmem:[#allocation28 + $0x458] sm:$0xff]  ;;  %v8059_v54 = vld [vmem:[#allocation28 + $0x420] sm:$0xff] }
 0x955   : > { %v7737_v58 = vmax.f32 %v7735_v42, 0.0  ;;  %8215 = vmatpush.msrb.mxu1 %v8032_v27  ;;  %8178 = vmatpush.msrb.mxu3 %v7991_v11  ;;  %v8058_v29 = vld [vmem:[#allocation28 + $0x418] sm:$0xff] }
 0x956   : > { %v7756_v1 = vld [vmem:[#allocation7 + $0x8] sm:$0xf]  ;;  %8154 = vmatpush.msrb.mxu2 %v7976_v16  ;;  %8196 = vmatpush.msra.mxu0 %v8012_v28  ;;  %v8023_v16 = vld [vmem:[#allocation28 + $0x300] sm:$0xff] }
 0x957   : > { %7798 = vst [vmem:[#allocation1 + $0x1] ss:$2 sm:$0xff] %v7756_v1  ;;  %v7747_v57 = vrot.slane %v7737_v58, 4  ;;  %v7760_v18 = vld [vmem:[#allocation7 + $0x9] sm:$0xf]  ;;  %8216 = vmatpush.msrb.mxu1 %v8031_v6  ;;  %v8007_v1 = vld [vmem:[#allocation28 + $0x280] sm:$0xff] }
 0x958   : > { %v7757_v48 = vld [vmem:[#allocation7 + $0x10] sm:$0xf]  ;;  %7753 = vst [vmem:[#allocation7 + $0x19] sm:$0xf] %v7737_v58  ;;  %8155 = vmatpush.msrb.mxu2 %v7975_v30  ;;  %8197 = vmatpush.msra.mxu0 %v8011_v52  ;;  %v7764_v33 = vld [vmem:[#allocation7 + $0xa] sm:$0xf] }
 0x959   : > { %7800 = vst [vmem:[#allocation1 + $0x10] ss:$2 sm:$0xff] %v7757_v48  ;;  %v7761_v20 = vld [vmem:[#allocation7 + $0x11] sm:$0xf]  ;;  %8217 = vmatpush.msrb.mxu1 %v8030_v51  ;;  %v8068_v58 = vld [vmem:[#allocation28 + $0x468] sm:$0xff] }
 0x95a   : > { %7754 = vst [vmem:[#allocation7 + $0x21] sm:$0xf] %v7747_v57  ;;  %8232 = vmatpush.msra.mxu2 %v8054_v55  ;;  %8198 = vmatpush.msra.mxu0 %v8010_v43  ;;  %v8027_v48 = vld [vmem:[#allocation28 + $0x320] sm:$0xff]  ;;  %v7767_v32 = vld [vmem:[#allocation7 + $0x8] sm:$0xf]  ;;  %v8060_v55 = vld [vmem:[#allocation28 + $0x428] sm:$0xff] }
 0x95b   : > { %8218 = vmatpush.msrb.mxu1 %v8029_v38  ;;  %v8047_v57 = vld [vmem:[#allocation28 + $0x3c0] sm:$0xff]  ;;  %v7771_v49 = vld [vmem:[#allocation7 + $0x9] sm:$0xf] }
 0x95c   : > { %8233 = vmatpush.msra.mxu2 %v8053_v47  ;;  %8199 = vmatpush.msra.mxu0 %v8009_v21  ;;  %v7765_v44 = vld [vmem:[#allocation7 + $0x12] sm:$0xf]  ;;  %v7775_v47 = vld [vmem:[#allocation7 + $0xa] sm:$0xf] }
 0x95d   : > { %8219 = vmatpush.msrb.mxu1 %v8028_v25  ;;  %v7768_v4 = vld [vmem:[#allocation7 + $0x10] sm:$0xf] }
 0x95e   : > { %v7803_v14 = vld.sshfl [vmem:[#allocation1] sm:$0xff pattern:$0x75316420]  ;;  %8234 = vmatpush.msra.mxu2 %v8052_v41  ;;  %8200 = vmatpush.msra.mxu0 %v8008_v19  ;;  %v7772_v8 = vld [vmem:[#allocation7 + $0x11] sm:$0xf]  ;;  %v8057_v41 = vld [vmem:[#allocation28 + $0x410] sm:$0xff] }
 0x95f   : > { %8087 = vmatmul.f32.vlgmr.msra.gmra.mxu3 %v7803_v14  ;;  %7813 = vst [vmem:[#allocation1 + $0x1] ss:$2 sm:$0xff] %v7760_v18  ;;  %v7758_v5 = vld [vmem:[#allocation7 + $0x18] sm:$0xf]  ;;  %8220 = vmatpush.msrb.mxu1 %v8027_v48  ;;  %v8063_v14 = vld [vmem:[#allocation28 + $0x440] sm:$0xff] }
 0x960   : > { %7802 = vst [vmem:[#allocation1 + $0x11] ss:$2 sm:$0xff] %v7758_v5  ;;  %v7762_v2 = vld [vmem:[#allocation7 + $0x19] sm:$0xf]  ;;  %8235 = vmatpush.msra.mxu2 %v8051_v31  ;;  %8255 = vmatpush.msra.mxu3 %v8070_v0  ;;  %v8041_v5 = vld [vmem:[#allocation28 + $0x390] sm:$0xff]  ;;  %v8055_v6 = vld [vmem:[#allocation28 + $0x400] sm:$0xff] }
 0x961   : > { %7811 = vst [vmem:[#allocation1] ss:$2 sm:$0xff] %v7759_v35  ;;  %8201 = vmatpush.msra.mxu0 %v8007_v1  ;;  %v7766_v39 = vld [vmem:[#allocation7 + $0x1a] sm:$0xf]  ;;  %8221 = vmatpush.msrb.mxu1 %v8026_v62  ;;  %v7770_v37 = vld [vmem:[#allocation7 + $0x20] sm:$0xf] }
 0x962   : > { %8236 = vmatpush.msra.mxu2 %v8050_v60  ;;  %8256 = vmatpush.msra.mxu3 %v8069_v9  ;;  %v8064_v18 = vld [vmem:[#allocation28 + $0x448] sm:$0xff]  ;;  %v7774_v27 = vld [vmem:[#allocation7 + $0x21] sm:$0xf]  ;;  %v7776_v52 = vld [vmem:[#allocation7 + $0x12] sm:$0xf] }
 0x963   : > { %8222 = vmatpush.msrb.mxu1 %v8025_v45  ;;  %v7769_v30 = vld [vmem:[#allocation7 + $0x18] sm:$0xf]  ;;  %v7780_v31 = vld [vmem:[#allocation7 + $0x10] sm:$0xf]  ;;  %v7778_v43 = vld [vmem:[#allocation7 + $0x22] sm:$0xf] }
 0x964   : > { %8237 = vmatpush.msra.mxu2 %v8049_v40  ;;  %8257 = vmatpush.msra.mxu3 %v8068_v58  ;;  %v7773_v15 = vld [vmem:[#allocation7 + $0x19] sm:$0xf]  ;;  %v7783_v60 = vld [vmem:[#allocation7 + $0x28] sm:$0xf]  ;;  %v7786_v9 = vld [vmem:[#allocation7 + $0x21] sm:$0xf] }
 0x965   : > { %8223 = vmatpush.msrb.mxu1 %v8024_v26  ;;  %v7781_v51 = vld [vmem:[#allocation7 + $0x18] sm:$0xf]  ;;  %v7787_v40 = vld [vmem:[#allocation7 + $0x29] sm:$0xf]  ;;  %v7788_v25 = vld [vmem:[#allocation7 + $0x12] sm:$0xf] }
 0x966   : > { %8238 = vmatpush.msra.mxu2 %v8048_v12  ;;  %8258 = vmatpush.msra.mxu3 %v8067_v59  ;;  %v7785_v38 = vld [vmem:[#allocation7 + $0x19] sm:$0xf]  ;;  %v7791_v1 = vld [vmem:[#allocation7 + $0x2a] sm:$0xf]  ;;  %v7790_v48 = vld [vmem:[#allocation7 + $0x22] sm:$0xf] }
 0x967   : > { %v7804_v61 = vld.sshfl [vmem:[#allocation1 + $0x10] sm:$0xff pattern:$0x75316420]  ;;  %8224 = vmatpush.msrb.mxu1 %v8023_v16  ;;  %v8390_v45 = vld [vmem:[#allocation29 + $0x180] sm:$0xff] }
 0x968   : > { %8090 = vmatmul.f32.gmra.mxu3 %v7804_v61  ;;  %7815 = vst [vmem:[#allocation1 + $0x10] ss:$2 sm:$0xff] %v7761_v20  ;;  %v7818_v42 = vld.sshfl [vmem:[#allocation1] sm:$0xff pattern:$0x75316420]  ;;  %8239 = vmatpush.msra.mxu2 %v8047_v57  ;;  %v8056_v20 = vld [vmem:[#allocation28 + $0x408] sm:$0xff] }
 0x969   : > { %7817 = vst [vmem:[#allocation1 + $0x11] ss:$2 sm:$0xff] %v7762_v2  ;;  %8110 = vmatmul.f32.vlgmr.msrb.gmra.mxu0 %v7818_v42  ;;  %8259 = vmatpush.msra.mxu3 %v8066_v46  ;;  %v7777_v2 = vld [vmem:[#allocation7 + $0x1a] sm:$0xf]  ;;  %v7782_v42 = vld [vmem:[#allocation7 + $0x20] sm:$0xf] }
 0x96a   : > { %7828 = vst [vmem:[#allocation1 + $0x1] ss:$2 sm:$0xff] %v7764_v33  ;;  %8240 = vmatpush.msra.mxu2 %v8046_v23  ;;  %v7784_v33 = vld [vmem:[#allocation7 + $0x11] sm:$0xf]  ;;  %v7789_v58 = vld [vmem:[#allocation7 + $0x1a] sm:$0xf] }
 0x96b   : > { %7826 = vst [vmem:[#allocation1] ss:$2 sm:$0xff] %v7763_v24  ;;  %8260 = vmatpush.msra.mxu3 %v8065_v3  ;;  %v8462_v23 = vld [vmem:[#allocation29 + $0x3c0] sm:$0xff] }
 0x96c   : > { %8241 = vmatpush.msra.mxu2 %v8045_v53  ;;  %v8458_v46 = vld [vmem:[#allocation29 + $0x3a0] sm:$0xff] }
 0x96d   : > { %8261 = vmatpush.msra.mxu3 %v8064_v18  ;;  %v8386_v53 = vld [vmem:[#allocation29 + $0x160] sm:$0xff] }
 0x96e   : > { %8242 = vmatpush.msra.mxu2 %v8044_v36  ;;  %v8530_v3 = vld [vmem:[#allocation29 + $0x5e0] sm:$0xff] }
 0x96f   : > { %8262 = vmatpush.msra.mxu3 %v8063_v14  ;;  %v8594_v26 = vld [vmem:[#allocation29 + $0x7e0] sm:$0xff] }
 0x970   : > { %v7819_v10 = vld.sshfl [vmem:[#allocation1 + $0x10] sm:$0xff pattern:$0x75316420]  ;;  %8243 = vmatpush.msra.mxu2 %v8043_v7  ;;  %v8382_v36 = vld [vmem:[#allocation29 + $0x140] sm:$0xff] }
 0x971   : > { %8113 = vmatmul.f32.gmra.mxu0 %v7819_v10  ;;  %7830 = vst [vmem:[#allocation1 + $0x10] ss:$2 sm:$0xff] %v7765_v44  ;;  %8263 = vmatpush.msra.mxu3 %v8062_v34  ;;  %v8402_v44 = vld [vmem:[#allocation29 + $0x1e0] sm:$0xff] }
 0x972   : > { %7832 = vst [vmem:[#allocation1 + $0x11] ss:$2 sm:$0xff] %v7766_v39  ;;  %v7833_v17 = vld.sshfl [vmem:[#allocation1] sm:$0xff pattern:$0x75316420]  ;;  %8244 = vmatpush.msra.mxu2 %v8042_v50  ;;  %v8398_v10 = vld [vmem:[#allocation29 + $0x1c0] sm:$0xff]  ;;  %8608 = vmatpush.msrb.mxu0 %v8402_v44 }
 0x973   : > { %8133 = vmatmul.f32.vlgmr.msra.gmra.mxu1 %v7833_v17  ;;  %7841 = vst [vmem:[#allocation1] ss:$2 sm:$0xff] %v7767_v32  ;;  %8264 = vmatpush.msra.mxu3 %v8061_v13  ;;  %v8466_v32 = vld [vmem:[#allocation29 + $0x3e0] sm:$0xff]  ;;  %v8395_v44 = vld [vmem:[#allocation29 + $0x1a8] sm:$0xff] }
 0x974   : > { %7843 = vst [vmem:[#allocation1 + $0x1] ss:$2 sm:$0xff] %v7768_v4  ;;  %8245 = vmatpush.msra.mxu2 %v8041_v5  ;;  %8628 = vmatpush.msra.mxu1 %v8466_v32  ;;  %v8394_v39 = vld [vmem:[#allocation29 + $0x1a0] sm:$0xff]  ;;  %v8459_v32 = vld [vmem:[#allocation29 + $0x3a8] sm:$0xff] }
 0x975   : > { %8265 = vmatpush.msra.mxu3 %v8060_v55  ;;  %8609 = vmatpush.msrb.mxu0 %v8398_v10  ;;  %v8454_v17 = vld [vmem:[#allocation29 + $0x380] sm:$0xff] }
 0x976   : > { %8246 = vmatpush.msra.mxu2 %v8040_v63  ;;  %8629 = vmatpush.msra.mxu1 %v8462_v23  ;;  %v8450_v4 = vld [vmem:[#allocation29 + $0x360] sm:$0xff] }
 0x977   : > { %8266 = vmatpush.msra.mxu3 %v8059_v54  ;;  %8610 = vmatpush.msrb.mxu0 %v8394_v39  ;;  %v8446_v18 = vld [vmem:[#allocation29 + $0x340] sm:$0xff]  ;;  %v8391_v39 = vld [vmem:[#allocation29 + $0x188] sm:$0xff] }
 0x978   : > { %8247 = vmatpush.msra.mxu2 %v8039_v22  ;;  %8630 = vmatpush.msra.mxu1 %v8458_v46  ;;  %v8526_v16 = vld [vmem:[#allocation29 + $0x5c0] sm:$0xff]  ;;  %v8455_v46 = vld [vmem:[#allocation29 + $0x388] sm:$0xff] }
 0x979   : > { %v7834_v56 = vld.sshfl [vmem:[#allocation1 + $0x10] sm:$0xff pattern:$0x75316420]  ;;  %8267 = vmatpush.msra.mxu3 %v8058_v29  ;;  %8611 = vmatpush.msrb.mxu0 %v8390_v45  ;;  %v8590_v7 = vld [vmem:[#allocation29 + $0x7c0] sm:$0xff] }
 0x97a   : > { %7845 = vst [vmem:[#allocation1 + $0x10] ss:$2 sm:$0xff] %v7769_v30  ;;  %8631 = vmatpush.msra.mxu1 %v8454_v17  ;;  %v8378_v14 = vld [vmem:[#allocation29 + $0x120] sm:$0xff] }
 0x97b   : > { %8136 = vmatmul.f32.gmra.mxu1 %v7834_v56  ;;  %7847 = vst [vmem:[#allocation1 + $0x11] ss:$2 sm:$0xff] %v7770_v37  ;;  %v7848_v35 = vld.sshfl [vmem:[#allocation1] sm:$0xff pattern:$0x75316420]  ;;  %8268 = vmatpush.msra.mxu3 %v8057_v41  ;;  %v8442_v50 = vld [vmem:[#allocation29 + $0x320] sm:$0xff] }
 0x97c   : > { %8156 = vmatmul.f32.vlgmr.msrb.gmra.mxu2 %v7848_v35  ;;  %7856 = vst [vmem:[#allocation1] ss:$2 sm:$0xff] %v7771_v49  ;;  %8612 = vmatpush.msrb.mxu0 %v8386_v53  ;;  %v8522_v49 = vld [vmem:[#allocation29 + $0x5a0] sm:$0xff]  ;;  %v8387_v53 = vld [vmem:[#allocation29 + $0x168] sm:$0xff] }
 0x97d   : > { %7858 = vst [vmem:[#allocation1 + $0x1] ss:$2 sm:$0xff] %v7772_v8  ;;  %8269 = vmatpush.msra.mxu3 %v8056_v20  ;;  %8648 = vmatpush.msrb.mxu2 %v8530_v3  ;;  %v8586_v30 = vld [vmem:[#allocation29 + $0x7a0] sm:$0xff]  ;;  %v8531_v3 = vld [vmem:[#allocation29 + $0x5e8] sm:$0xff] }
 0x97e   : > { %8632 = vmatpush.msra.mxu1 %v8450_v4  ;;  %8613 = vmatpush.msrb.mxu0 %v8382_v36  ;;  %v8374_v56 = vld [vmem:[#allocation29 + $0x100] sm:$0xff]  ;;  %v8451_v4 = vld [vmem:[#allocation29 + $0x368] sm:$0xff] }
 0x97f   : > { %8270 = vmatpush.msra.mxu3 %v8055_v6  ;;  %8649 = vmatpush.msrb.mxu2 %v8526_v16  ;;  %v8438_v34 = vld [vmem:[#allocation29 + $0x300] sm:$0xff]  ;;  %v8383_v36 = vld [vmem:[#allocation29 + $0x148] sm:$0xff] }
 0x980   : > { %8633 = vmatpush.msra.mxu1 %v8446_v18  ;;  %8614 = vmatpush.msrb.mxu0 %v8378_v14  ;;  %v8518_v37 = vld [vmem:[#allocation29 + $0x580] sm:$0xff]  ;;  %v8447_v18 = vld [vmem:[#allocation29 + $0x348] sm:$0xff] }
 0x981   : > { %8650 = vmatpush.msrb.mxu2 %v8522_v49  ;;  %v8582_v5 = vld [vmem:[#allocation29 + $0x780] sm:$0xff]  ;;  %v8527_v16 = vld [vmem:[#allocation29 + $0x5c8] sm:$0xff] }
 0x982   : > { %v7849_v28 = vld.sshfl [vmem:[#allocation1 + $0x10] sm:$0xff pattern:$0x75316420]  ;;  %8634 = vmatpush.msra.mxu1 %v8442_v50  ;;  %8615 = vmatpush.msrb.mxu0 %v8374_v56  ;;  %v8370_v35 = vld [vmem:[#allocation29 + $0xe0] sm:$0xff] }
 0x983   : > { %7860 = vst [vmem:[#allocation1 + $0x10] ss:$2 sm:$0xff] %v7773_v15  ;;  %8651 = vmatpush.msrb.mxu2 %v8518_v37  ;;  %v8434_v13 = vld [vmem:[#allocation29 + $0x2e0] sm:$0xff]  ;;  %v8379_v14 = vld [vmem:[#allocation29 + $0x128] sm:$0xff] }
 0x984   : > { %8159 = vmatmul.f32.gmra.mxu2 %v7849_v28  ;;  %7862 = vst [vmem:[#allocation1 + $0x11] ss:$2 sm:$0xff] %v7774_v27  ;;  %v7863_v11 = vld.sshfl [vmem:[#allocation1] sm:$0xff pattern:$0x75316420]  ;;  %8635 = vmatpush.msra.mxu1 %v8438_v34  ;;  %v8514_v8 = vld [vmem:[#allocation29 + $0x560] sm:$0xff] }
 0x985   : > { %8179 = vmatmul.f32.vlgmr.msrb.gmra.mxu3 %v7863_v11  ;;  %7871 = vst [vmem:[#allocation1] ss:$2 sm:$0xff] %v7775_v47  ;;  %8616 = vmatpush.msrb.mxu0 %v8370_v35  ;;  %v8578_v63 = vld [vmem:[#allocation29 + $0x760] sm:$0xff]  ;;  %v8443_v50 = vld [vmem:[#allocation29 + $0x328] sm:$0xff] }
 0x986   : > { %7873 = vst [vmem:[#allocation1 + $0x1] ss:$2 sm:$0xff] %v7776_v52  ;;  %8668 = vmatpush.msrb.mxu3 %v8594_v26  ;;  %8636 = vmatpush.msra.mxu1 %v8434_v13  ;;  %v8366_v55 = vld [vmem:[#allocation29 + $0xc0] sm:$0xff]  ;;  %v8595_v26 = vld [vmem:[#allocation29 + $0x7e8] sm:$0xff] }
 0x987   : > { %v8430_v22 = vld [vmem:[#allocation29 + $0x2c0] sm:$0xff]  ;;  %8652 = vmatpush.msrb.mxu2 %v8514_v8  ;;  %8617 = vmatpush.msrb.mxu0 %v8366_v55  ;;  %v8587_v56 = vld [vmem:[#allocation29 + $0x7a8] sm:$0xff] }
 0x988   : > { %8669 = vmatpush.msrb.mxu3 %v8590_v7  ;;  %v8510_v54 = vld [vmem:[#allocation29 + $0x540] sm:$0xff]  ;;  %8637 = vmatpush.msra.mxu1 %v8430_v22  ;;  %v8591_v7 = vld [vmem:[#allocation29 + $0x7c8] sm:$0xff] }
 0x989   : > { %v8574_v29 = vld [vmem:[#allocation29 + $0x740] sm:$0xff]  ;;  %8653 = vmatpush.msrb.mxu2 %v8510_v54  ;;  %v8375_v34 = vld [vmem:[#allocation29 + $0x108] sm:$0xff] }
 0x98a   : > { %8670 = vmatpush.msrb.mxu3 %v8586_v30  ;;  %v8362_v47 = vld [vmem:[#allocation29 + $0xa0] sm:$0xff]  ;;  %v8523_v30 = vld [vmem:[#allocation29 + $0x5a8] sm:$0xff] }
 0x98b   : > { %v7864_v24 = vld.sshfl [vmem:[#allocation1 + $0x10] sm:$0xff pattern:$0x75316420]  ;;  %v8426_v15 = vld [vmem:[#allocation29 + $0x2a0] sm:$0xff]  ;;  %8618 = vmatpush.msrb.mxu0 %v8362_v47 }
 0x98c   : > { %7875 = vst [vmem:[#allocation1 + $0x10] ss:$2 sm:$0xff] %v7777_v2  ;;  %8671 = vmatpush.msrb.mxu3 %v8582_v5  ;;  %v8506_v28 = vld [vmem:[#allocation29 + $0x520] sm:$0xff]  ;;  %8638 = vmatpush.msra.mxu1 %v8426_v15  ;;  %v8439_v37 = vld [vmem:[#allocation29 + $0x308] sm:$0xff] }
 0x98d   : > { %8182 = vmatmul.f32.gmra.mxu3 %v7864_v24  ;;  %7877 = vst [vmem:[#allocation1 + $0x11] ss:$2 sm:$0xff] %v7778_v43  ;;  %v7878_v61 = vld.sshfl [vmem:[#allocation1] sm:$0xff pattern:$0x75316420]  ;;  %v8570_v27 = vld [vmem:[#allocation29 + $0x720] sm:$0xff]  ;;  %8654 = vmatpush.msrb.mxu2 %v8506_v28 }
 0x98e   : > { %8202 = vmatmul.f32.vlgmr.msra.gmra.mxu0 %v7878_v61  ;;  %7886 = vst [vmem:[#allocation1] ss:$2 sm:$0xff] %v7780_v31  ;;  %8672 = vmatpush.msrb.mxu3 %v8578_v63  ;;  %v8358_v41 = vld [vmem:[#allocation29 + $0x80] sm:$0xff]  ;;  %v8519_v5 = vld [vmem:[#allocation29 + $0x588] sm:$0xff] }
 0x98f   : > { %7888 = vst [vmem:[#allocation1 + $0x1] ss:$2 sm:$0xff] %v7781_v51  ;;  %v8422_v11 = vld [vmem:[#allocation29 + $0x280] sm:$0xff]  ;;  %8619 = vmatpush.msrb.mxu0 %v8358_v41  ;;  %v8583_v35 = vld [vmem:[#allocation29 + $0x788] sm:$0xff] }
 0x990   : > { %8673 = vmatpush.msrb.mxu3 %v8574_v29  ;;  %v8502_v52 = vld [vmem:[#allocation29 + $0x500] sm:$0xff]  ;;  %8639 = vmatpush.msra.mxu1 %v8422_v11  ;;  %v8371_v13 = vld [vmem:[#allocation29 + $0xe8] sm:$0xff] }
 0x991   : > { %v8566_v20 = vld [vmem:[#allocation29 + $0x700] sm:$0xff]  ;;  %8655 = vmatpush.msrb.mxu2 %v8502_v52  ;;  %v8435_v8 = vld [vmem:[#allocation29 + $0x2e8] sm:$0xff] }
 0x992   : > { %8674 = vmatpush.msrb.mxu3 %v8570_v27  ;;  %v8354_v6 = vld [vmem:[#allocation29 + $0x60] sm:$0xff]  ;;  %v8515_v63 = vld [vmem:[#allocation29 + $0x568] sm:$0xff] }
 0x993   : > { %v8418_v2 = vld [vmem:[#allocation29 + $0x260] sm:$0xff]  ;;  %8620 = vmatpush.msrb.mxu0 %v8354_v6  ;;  %v8579_v55 = vld [vmem:[#allocation29 + $0x768] sm:$0xff] }
 0x994   : > { %v7879_v0 = vld.sshfl [vmem:[#allocation1 + $0x10] sm:$0xff pattern:$0x75316420]  ;;  %8675 = vmatpush.msrb.mxu3 %v8566_v20  ;;  %v8498_v24 = vld [vmem:[#allocation29 + $0x4e0] sm:$0xff]  ;;  %8640 = vmatpush.msra.mxu1 %v8418_v2 }
 0x995   : > { %7890 = vst [vmem:[#allocation1 + $0x10] ss:$2 sm:$0xff] %v7782_v42  ;;  %v8562_v31 = vld [vmem:[#allocation29 + $0x6e0] sm:$0xff]  ;;  %8656 = vmatpush.msrb.mxu2 %v8498_v24  ;;  %v8367_v22 = vld [vmem:[#allocation29 + $0xc8] sm:$0xff] }
 0x996   : > { %8205 = vmatmul.f32.gmra.mxu0 %v7879_v0  ;;  %v7893_v21 = vld.sshfl [vmem:[#allocation1] sm:$0xff pattern:$0x75316420]  ;;  %7892 = vst [vmem:[#allocation1 + $0x11] ss:$2 sm:$0xff] %v7783_v60  ;;  %v8350_v43 = vld [vmem:[#allocation29 + $0x40] sm:$0xff]  ;;  %8676 = vmatpush.msrb.mxu3 %v8562_v31 }
 0x997   : > { %8225 = vmatmul.f32.vlgmr.msrb.gmra.mxu1 %v7893_v21  ;;  %7901 = vst [vmem:[#allocation1] ss:$2 sm:$0xff] %v7784_v33  ;;  %v8414_v61 = vld [vmem:[#allocation29 + $0x240] sm:$0xff]  ;;  %8621 = vmatpush.msrb.mxu0 %v8350_v43  ;;  %v8431_v54 = vld [vmem:[#allocation29 + $0x2c8] sm:$0xff] }
 0x998   : > { %7903 = vst [vmem:[#allocation1 + $0x1] ss:$2 sm:$0xff] %v7785_v38  ;;  %v8494_v51 = vld [vmem:[#allocation29 + $0x4c0] sm:$0xff]  ;;  %8641 = vmatpush.msra.mxu1 %v8414_v61  ;;  %v8511_v47 = vld [vmem:[#allocation29 + $0x548] sm:$0xff] }
 0x999   : > { %v8558_v60 = vld [vmem:[#allocation29 + $0x6c0] sm:$0xff]  ;;  %8657 = vmatpush.msrb.mxu2 %v8494_v51  ;;  %v8575_v15 = vld [vmem:[#allocation29 + $0x748] sm:$0xff] }
 0x99a   : > { %v8346_v42 = vld [vmem:[#allocation29 + $0x20] sm:$0xff]  ;;  %8677 = vmatpush.msrb.mxu3 %v8558_v60  ;;  %v8363_v28 = vld [vmem:[#allocation29 + $0xa8] sm:$0xff] }
 0x99b   : > { %v8410_v0 = vld [vmem:[#allocation29 + $0x220] sm:$0xff]  ;;  %8622 = vmatpush.msrb.mxu0 %v8346_v42  ;;  %v8427_v27 = vld [vmem:[#allocation29 + $0x2a8] sm:$0xff] }
 0x99c   : > { %v8490_v33 = vld [vmem:[#allocation29 + $0x4a0] sm:$0xff]  ;;  %8642 = vmatpush.msra.mxu1 %v8410_v0  ;;  %v8507_v41 = vld [vmem:[#allocation29 + $0x528] sm:$0xff] }
 0x99d   : > { %v7894_v19 = vld.sshfl [vmem:[#allocation1 + $0x10] sm:$0xff pattern:$0x75316420]  ;;  %v8554_v21 = vld [vmem:[#allocation29 + $0x6a0] sm:$0xff]  ;;  %8658 = vmatpush.msrb.mxu2 %v8490_v33 }
 0x99e   : > { %7905 = vst [vmem:[#allocation1 + $0x10] ss:$2 sm:$0xff] %v7786_v9  ;;  %v8342_v38 = vld [vmem:[#allocation29] sm:$0xff]  ;;  %8678 = vmatpush.msrb.mxu3 %v8554_v21  ;;  %v8571_v20 = vld [vmem:[#allocation29 + $0x728] sm:$0xff] }
 0x99f   : > { %8228 = vmatmul.f32.gmra.mxu1 %v7894_v19  ;;  %v7908_v12 = vld.sshfl [vmem:[#allocation1] sm:$0xff pattern:$0x75316420]  ;;  %7907 = vst [vmem:[#allocation1 + $0x11] ss:$2 sm:$0xff] %v7787_v40  ;;  %v8406_v40 = vld [vmem:[#allocation29 + $0x200] sm:$0xff]  ;;  %8623 = vmatpush.msrb.mxu0 %v8342_v38 }
 0x9a0   : > { %8248 = vmatmul.f32.vlgmr.msra.gmra.mxu2 %v7908_v12  ;;  %7916 = vst [vmem:[#allocation1] ss:$2 sm:$0xff] %v7788_v25  ;;  %v8486_v9 = vld [vmem:[#allocation29 + $0x480] sm:$0xff]  ;;  %8643 = vmatpush.msra.mxu1 %v8406_v40  ;;  %v8403_v25 = vld [vmem:[#allocation29 + $0x1e8] sm:$0xff] }
 0x9a1   : > { %7918 = vst [vmem:[#allocation1 + $0x1] ss:$2 sm:$0xff] %v7789_v58  ;;  %v8550_v19 = vld [vmem:[#allocation29 + $0x680] sm:$0xff]  ;;  %8659 = vmatpush.msrb.mxu2 %v8486_v9  ;;  %v8467_v12 = vld [vmem:[#allocation29 + $0x3e8] sm:$0xff]  ;;  %8688 = vmatpush.msra.mxu0 %v8403_v25 }
 0x9a2   : > { %8679 = vmatpush.msrb.mxu3 %v8550_v19  ;;  %v8482_v58 = vld [vmem:[#allocation29 + $0x460] sm:$0xff]  ;;  %8708 = vmatpush.msrb.mxu1 %v8467_v12  ;;  %v8359_v6 = vld [vmem:[#allocation29 + $0x88] sm:$0xff] }
 0x9a3   : > { %8660 = vmatpush.msrb.mxu2 %v8482_v58  ;;  %v8474_v10 = vld [vmem:[#allocation29 + $0x420] sm:$0xff]  ;;  %v8423_v2 = vld [vmem:[#allocation29 + $0x288] sm:$0xff] }
 0x9a4   : > { %v8538_v23 = vld [vmem:[#allocation29 + $0x620] sm:$0xff]  ;;  %v8503_v24 = vld [vmem:[#allocation29 + $0x508] sm:$0xff] }
 0x9a5   : > { %v8470_v45 = vld [vmem:[#allocation29 + $0x400] sm:$0xff]  ;;  %v8567_v43 = vld [vmem:[#allocation29 + $0x708] sm:$0xff] }
 0x9a6   : > { %v7909_v57 = vld.sshfl [vmem:[#allocation1 + $0x10] sm:$0xff pattern:$0x75316420]  ;;  %v8534_v17 = vld [vmem:[#allocation29 + $0x600] sm:$0xff] }
 0x9a7   : > { %7920 = vst [vmem:[#allocation1 + $0x10] ss:$2 sm:$0xff] %v7790_v48  ;;  %v8399_v48 = vld [vmem:[#allocation29 + $0x1c8] sm:$0xff] }
 0x9a8   : > { %8251 = vmatmul.f32.gmra.mxu2 %v7909_v57  ;;  %v7923_v59 = vld.sshfl [vmem:[#allocation1] sm:$0xff pattern:$0x75316420]  ;;  %7922 = vst [vmem:[#allocation1 + $0x11] ss:$2 sm:$0xff] %v7791_v1  ;;  %v8546_v1 = vld [vmem:[#allocation29 + $0x660] sm:$0xff]  ;;  %8689 = vmatpush.msra.mxu0 %v8399_v48 }
 0x9a9   : > { %8271 = vmatmul.f32.vlgmr.msra.gmra.mxu3 %v7923_v59  ;;  %v8463_v57 = vld [vmem:[#allocation29 + $0x3c8] sm:$0xff]  ;;  %v8478_v59 = vld [vmem:[#allocation29 + $0x440] sm:$0xff] }
 0x9aa   : > { %8680 = vmatpush.msrb.mxu3 %v8546_v1  ;;  %8709 = vmatpush.msrb.mxu1 %v8463_v57  ;;  %v8355_v61 = vld [vmem:[#allocation29 + $0x68] sm:$0xff] }
 0x9ab   : > { %8661 = vmatpush.msrb.mxu2 %v8478_v59  ;;  %8690 = vmatpush.msra.mxu0 %v8395_v44  ;;  %v8419_v51 = vld [vmem:[#allocation29 + $0x268] sm:$0xff] }
 0x9ac   : > { %8710 = vmatpush.msrb.mxu1 %v8459_v32  ;;  %v8499_v60 = vld [vmem:[#allocation29 + $0x4e8] sm:$0xff] }
 0x9ad   : > { %8662 = vmatpush.msrb.mxu2 %v8474_v10  ;;  %8691 = vmatpush.msra.mxu0 %v8391_v39  ;;  %v8563_v42 = vld [vmem:[#allocation29 + $0x6e8] sm:$0xff] }
 0x9ae   : > { %8711 = vmatpush.msrb.mxu1 %v8455_v46  ;;  %v8351_v0 = vld [vmem:[#allocation29 + $0x48] sm:$0xff] }
 0x9af   : > { %v7924_v62 = vld.sshfl [vmem:[#allocation1 + $0x10] sm:$0xff pattern:$0x75316420]  ;;  %8663 = vmatpush.msrb.mxu2 %v8470_v45  ;;  %8692 = vmatpush.msra.mxu0 %v8387_v53 }
 0x9b0   : > { %8712 = vmatpush.msrb.mxu1 %v8451_v4  ;;  %v8415_v33 = vld [vmem:[#allocation29 + $0x248] sm:$0xff] }
 0x9b1   : > { %8274 = vmatmul.f32.gmra.mxu3 %v7924_v62  ;;  %v8542_v62 = vld [vmem:[#allocation29 + $0x640] sm:$0xff]  ;;  %8728 = vmatpush.msra.mxu2 %v8531_v3  ;;  %v8495_v21 = vld [vmem:[#allocation29 + $0x4c8] sm:$0xff] }
 0x9b2   : > { %8681 = vmatpush.msrb.mxu3 %v8542_v62  ;;  %8693 = vmatpush.msra.mxu0 %v8383_v36  ;;  %v8559_v38 = vld [vmem:[#allocation29 + $0x6c8] sm:$0xff] }
 0x9b3   : > { %8713 = vmatpush.msrb.mxu1 %v8447_v18  ;;  %8729 = vmatpush.msra.mxu2 %v8527_v16  ;;  %v8347_v40 = vld [vmem:[#allocation29 + $0x28] sm:$0xff] }
 0x9b4   : > { %8682 = vmatpush.msrb.mxu3 %v8538_v23  ;;  %8694 = vmatpush.msra.mxu0 %v8379_v14  ;;  %v8411_v9 = vld [vmem:[#allocation29 + $0x228] sm:$0xff] }
 0x9b5   : > { %8714 = vmatpush.msrb.mxu1 %v8443_v50  ;;  %8730 = vmatpush.msra.mxu2 %v8523_v30  ;;  %v8491_v19 = vld [vmem:[#allocation29 + $0x4a8] sm:$0xff] }
 0x9b6   : > { %8683 = vmatpush.msrb.mxu3 %v8534_v17  ;;  %8695 = vmatpush.msra.mxu0 %v8375_v34  ;;  %v8555_v58 = vld [vmem:[#allocation29 + $0x6a8] sm:$0xff] }
 0x9b7   : > { %8715 = vmatpush.msrb.mxu1 %v8439_v37  ;;  %8731 = vmatpush.msra.mxu2 %v8519_v5  ;;  %v8343_v1 = vld [vmem:[#allocation29 + $0x8] sm:$0xff] }
 0x9b8   : > { %8748 = vmatpush.msra.mxu3 %v8595_v26  ;;  %8696 = vmatpush.msra.mxu0 %v8371_v13  ;;  %v8407_v48 = vld [vmem:[#allocation29 + $0x208] sm:$0xff] }
 0x9b9   : > { %8716 = vmatpush.msrb.mxu1 %v8435_v8  ;;  %8732 = vmatpush.msra.mxu2 %v8515_v63  ;;  %v8487_v57 = vld [vmem:[#allocation29 + $0x488] sm:$0xff] }
 0x9ba   : > { %8749 = vmatpush.msra.mxu3 %v8591_v7  ;;  %8697 = vmatpush.msra.mxu0 %v8367_v22  ;;  %v8551_v62 = vld [vmem:[#allocation29 + $0x688] sm:$0xff] }
 0x9bb   : > { %8717 = vmatpush.msrb.mxu1 %v8431_v54  ;;  %8733 = vmatpush.msra.mxu2 %v8511_v47  ;;  %v8483_v23 = vld [vmem:[#allocation29 + $0x468] sm:$0xff] }
 0x9bc   : > { %8750 = vmatpush.msra.mxu3 %v8587_v56  ;;  %8698 = vmatpush.msra.mxu0 %v8363_v28  ;;  %v8547_v39 = vld [vmem:[#allocation29 + $0x668] sm:$0xff] }
 0x9bd   : > { %8718 = vmatpush.msrb.mxu1 %v8427_v27  ;;  %8734 = vmatpush.msra.mxu2 %v8507_v41  ;;  %v8479_v45 = vld [vmem:[#allocation29 + $0x448] sm:$0xff] }
 0x9be   : > { %8751 = vmatpush.msra.mxu3 %v8583_v35  ;;  %8699 = vmatpush.msra.mxu0 %v8359_v6  ;;  %v8543_v17 = vld [vmem:[#allocation29 + $0x648] sm:$0xff]  ;;  %v10675_v35 = vld [vmem:[%s15077_s17] ss:$0 sm:$0xff] }
 0x9bf   : > { %8719 = vmatpush.msrb.mxu1 %v8423_v2  ;;  %8735 = vmatpush.msra.mxu2 %v8503_v24  ;;  %v8475_v3 = vld [vmem:[#allocation29 + $0x428] sm:$0xff] }
 0x9c0   : > { %8752 = vmatpush.msra.mxu3 %v8579_v55  ;;  %8700 = vmatpush.msra.mxu0 %v8355_v61  ;;  %v8539_v26 = vld [vmem:[#allocation29 + $0x628] sm:$0xff]  ;;  %v10676_v55 = vld [vmem:[%s15078_s18] ss:$0 sm:$0xff] }
 0x9c1   : > { %8720 = vmatpush.msrb.mxu1 %v8419_v51  ;;  %8736 = vmatpush.msra.mxu2 %v8499_v60  ;;  %v8471_v7 = vld [vmem:[#allocation29 + $0x408] sm:$0xff] }
 0x9c2   : > { %8753 = vmatpush.msra.mxu3 %v8575_v15  ;;  %8701 = vmatpush.msra.mxu0 %v8351_v0  ;;  %v8535_v14 = vld [vmem:[#allocation29 + $0x608] sm:$0xff] }
 0x9c3   : > { %8721 = vmatpush.msrb.mxu1 %v8415_v33  ;;  %8737 = vmatpush.msra.mxu2 %v8495_v21 }
 0x9c4   : > { %8754 = vmatpush.msra.mxu3 %v8571_v20  ;;  %8702 = vmatpush.msra.mxu0 %v8347_v40 }
 0x9c5   : > { %8722 = vmatpush.msrb.mxu1 %v8411_v9  ;;  %8738 = vmatpush.msra.mxu2 %v8491_v19  ;;  %v8404_v9 = vld [vmem:[#allocation29 + $0x1f0] sm:$0xff] }
 0x9c6   : > { %8755 = vmatpush.msra.mxu3 %v8567_v43  ;;  %8703 = vmatpush.msra.mxu0 %v8343_v1 }
 0x9c7   : > { %8723 = vmatpush.msrb.mxu1 %v8407_v48  ;;  %8739 = vmatpush.msra.mxu2 %v8487_v57 }
 0x9c8   : > { %8756 = vmatpush.msra.mxu3 %v8563_v42 }
 0x9c9   : > { %8740 = vmatpush.msra.mxu2 %v8483_v23  ;;  %v8460_v23 = vld [vmem:[#allocation29 + $0x3b0] sm:$0xff] }
 0x9ca   : > { %8757 = vmatpush.msra.mxu3 %v8559_v38 }
 0x9cb   : > { %8741 = vmatpush.msra.mxu2 %v8479_v45 }
 0x9cc   : > { %8758 = vmatpush.msra.mxu3 %v8555_v58 }
 0x9cd   : > { %8742 = vmatpush.msra.mxu2 %v8475_v3 }
 0x9ce   : > { %8759 = vmatpush.msra.mxu3 %v8551_v62  ;;  %v8396_v62 = vld [vmem:[#allocation29 + $0x1b0] sm:$0xff] }
 0x9cf   : > { %8743 = vmatpush.msra.mxu2 %v8471_v7  ;;  %v8596_v7 = vld [vmem:[#allocation29 + $0x7f0] sm:$0xff] }
 0x9d0   : > { %8760 = vmatpush.msra.mxu3 %v8547_v39  ;;  %v8392_v39 = vld [vmem:[#allocation29 + $0x190] sm:$0xff] }
 0x9d2   : > { %8761 = vmatpush.msra.mxu3 %v8543_v17 }
 0x9d4   : > { %8762 = vmatpush.msra.mxu3 %v8539_v26 }
 0x9d6   : > { %8763 = vmatpush.msra.mxu3 %v8535_v14  ;;  %v8384_v14 = vld [vmem:[#allocation29 + $0x150] sm:$0xff] }
 0x9e2   : > { %v14881_v49 = vpop.f32.mrf.mxu3 }
 0x9e6   : > { %v8111_v29 = vpop.f32.mrf.mxu0 }
 0x9e7   : > { %v8112_v44 = vadd.f32 %v8111_v29, %v14881_v49 }
 0x9eb   : > { %v14883_v11 = vpop.f32.mrf.mxu3 }
 0x9ee   : > { %v8114_v25 = vpop.f32.mrf.mxu0 }
 0x9ef   : > { %v8115_v16 = vadd.f32 %v8114_v25, %v14883_v11  ;;  %v8468_v25 = vld [vmem:[#allocation29 + $0x3f0] sm:$0xff] }
 0x9f0   : > { %v8134_v52 = vpop.f32.mrf.mxu1 }
 0x9f1   : > { %v8135_v10 = vadd.f32 %v8134_v52, %v8112_v44 }
 0x9f8   : > { %v8137_v59 = vpop.f32.mrf.mxu1 }
 0x9f9   : > { %v8138_v49 = vadd.f32 %v8137_v59, %v8115_v16  ;;  %v8464_v59 = vld [vmem:[#allocation29 + $0x3d0] sm:$0xff] }
 0x9fa   : > { %v8532_v16 = vld [vmem:[#allocation29 + $0x5f0] sm:$0xff] }
 0x9ff   : > { %v8157_v31 = vpop.f32.mrf.mxu2 }
 0xa00   : > { %v8158_v46 = vadd.f32 %v8157_v31, %v8135_v10 }
 0xa07   : > { %v8160_v32 = vpop.f32.mrf.mxu2 }
 0xa08   : > { %v8180_v12 = vpop.f32.mrf.mxu3  ;;  %v8161_v56 = vadd.f32 %v8160_v32, %v8138_v49  ;;  %v8528_v49 = vld [vmem:[#allocation29 + $0x5d0] sm:$0xff] }
 0xa09   : > { %v8181_v4 = vadd.f32 %v8180_v12, %v8158_v46  ;;  %v8400_v12 = vld [vmem:[#allocation29 + $0x1d0] sm:$0xff] }
 0xa0b   : > { %v8203_v53 = vpop.f32.mrf.mxu0 }
 0xa0c   : > { %v8204_v30 = vadd.f32 %v8203_v53, %v8181_v4  ;;  %v8456_v4 = vld [vmem:[#allocation29 + $0x390] sm:$0xff] }
 0xa10   : > { %v8183_v36 = vpop.f32.mrf.mxu3 }
 0xa11   : > { %v8184_v37 = vadd.f32 %v8183_v36, %v8161_v56  ;;  %v8388_v36 = vld [vmem:[#allocation29 + $0x170] sm:$0xff] }
 0xa12   : > { %v8380_v56 = vld [vmem:[#allocation29 + $0x130] sm:$0xff] }
 0xa13   : > { %v8206_v13 = vpop.f32.mrf.mxu0 }
 0xa14   : > { %v8226_v18 = vpop.f32.mrf.mxu1  ;;  %v8207_v54 = vadd.f32 %v8206_v13, %v8184_v37  ;;  %v8524_v37 = vld [vmem:[#allocation29 + $0x5b0] sm:$0xff] }
 0xa15   : > { %v8227_v34 = vadd.f32 %v8226_v18, %v8204_v30  ;;  %v8452_v18 = vld [vmem:[#allocation29 + $0x370] sm:$0xff] }
 0xa16   : > { %v8592_v30 = vld [vmem:[#allocation29 + $0x7d0] sm:$0xff] }
 0xa17   : > { %v8440_v13 = vld [vmem:[#allocation29 + $0x310] sm:$0xff] }
 0xa1c   : > { %v8229_v22 = vpop.f32.mrf.mxu1 }
 0xa1d   : > { %v8230_v15 = vadd.f32 %v8229_v22, %v8207_v54  ;;  %v8436_v22 = vld [vmem:[#allocation29 + $0x2f0] sm:$0xff] }
 0xa1e   : > { %v8516_v54 = vld [vmem:[#allocation29 + $0x570] sm:$0xff] }
 0xa23   : > { %v8249_v50 = vpop.f32.mrf.mxu2 }
 0xa24   : > { %v8250_v5 = vadd.f32 %v8249_v50, %v8227_v34  ;;  %v8448_v50 = vld [vmem:[#allocation29 + $0x350] sm:$0xff] }
 0xa25   : > { %v8444_v34 = vld [vmem:[#allocation29 + $0x330] sm:$0xff] }
 0xa2b   : > { %v8252_v47 = vpop.f32.mrf.mxu2 }
 0xa2c   : > { %v8272_v8 = vpop.f32.mrf.mxu3  ;;  %v8253_v27 = vadd.f32 %v8252_v47, %v8230_v15  ;;  %v8368_v47 = vld [vmem:[#allocation29 + $0xd0] sm:$0xff] }
 0xa2d   : > { %v8273_v63 = vadd.f32 %v8272_v8, %v8250_v5  ;;  %v8588_v5 = vld [vmem:[#allocation29 + $0x7b0] sm:$0xff] }
 0xa2e   : > { %v8520_v8 = vld [vmem:[#allocation29 + $0x590] sm:$0xff] }
 0xa2f   : > { %v8282_v29 = vmul.f32 %v10675_v35, %v8273_v63  ;;  %v8584_v63 = vld [vmem:[#allocation29 + $0x790] sm:$0xff] }
 0xa30   : > { %v8432_v15 = vld [vmem:[#allocation29 + $0x2d0] sm:$0xff] }
 0xa31   : > { %v8288_v28 = vadd.f32 %v10676_v55, %v8282_v29  ;;  %v8580_v29 = vld [vmem:[#allocation29 + $0x770] sm:$0xff] }
 0xa33   : > { %v8290_v41 = vmax.f32 %v8288_v28, 0.0  ;;  %v8512_v28 = vld [vmem:[#allocation29 + $0x550] sm:$0xff] }
 0xa34   : > { %v8275_v11 = vpop.f32.mrf.mxu3 }
 0xa35   : > { %v8276_v52 = vadd.f32 %v8275_v11, %v8253_v27  ;;  %v8295_v20 = vrot.slane %v8290_v41, 4  ;;  %v9795_v6 = vrot.slane %v8290_v41, 9  ;;  %v8294_v2 = vrot.slane %v8290_v41, 2  ;;  %v8576_v27 = vld [vmem:[#allocation29 + $0x750] sm:$0xff] }
 0xa36   : > { %v8296_v24 = vrot.slane %v8290_v41, 6  ;;  %v8428_v11 = vld [vmem:[#allocation29 + $0x2b0] sm:$0xff] }
 0xa37   : > { %v8283_v31 = vmul.f32 %v10675_v35, %v8276_v52  ;;  %v9799_v43 = vrot.slane %v8295_v20, 9  ;;  %v9796_v61 = vrot.slane %v8294_v2, 9  ;;  %v8318_v42 = vmax.f32 %v8290_v41, %v9795_v6  ;;  %v8376_v35 = vld [vmem:[#allocation29 + $0x110] sm:$0xff] }
 0xa38   : > { %v9800_v51 = vrot.slane %v8296_v24, 9  ;;  %v8364_v41 = vld [vmem:[#allocation29 + $0xb0] sm:$0xff] }
 0xa39   : > { %v8289_v60 = vadd.f32 %v10676_v55, %v8283_v31  ;;  %v8334_v0 = vmax.f32 %v8295_v20, %v9799_v43  ;;  %v8319_v33 = vmax.f32 %v8294_v2, %v9796_v61  ;;  %v8372_v55 = vld [vmem:[#allocation29 + $0xf0] sm:$0xff] }
 0xa3a   : > { %v8335_v21 = vmax.f32 %v8296_v24, %v9800_v51  ;;  %v8508_v52 = vld [vmem:[#allocation29 + $0x530] sm:$0xff] }
 0xa3b   : > { %v8291_v38 = vmax.f32 %v8289_v60, 0.0  ;;  %v14893_v40 = vmax.f32 %v8318_v42, %v8334_v0  ;;  %v8572_v20 = vld [vmem:[#allocation29 + $0x730] sm:$0xff] }
 0xa3c   : > { %v14895_v19 = vmax.f32 %v8319_v33, %v8335_v21  ;;  %v8360_v6 = vld [vmem:[#allocation29 + $0x90] sm:$0xff] }
 0xa3d   : > { %8624 = vmatmul.f32.vlgmr.msrb.gmra.mxu0 %v14893_v40  ;;  %v8298_v58 = vrot.slane %v8291_v38, 4  ;;  %v9797_v1 = vrot.slane %v8291_v38, 9  ;;  %v8297_v48 = vrot.slane %v8291_v38, 2  ;;  %v8299_v57 = vrot.slane %v8291_v38, 6  ;;  %v8424_v2 = vld [vmem:[#allocation29 + $0x290] sm:$0xff] }
 0xa3e   : > { %8644 = vmatmul.f32.vlgmr.msra.gmra.mxu1 %v14895_v19  ;;  %8768 = vmatpush.msrb.mxu0 %v8404_v9  ;;  %v8504_v24 = vld [vmem:[#allocation29 + $0x510] sm:$0xff] }
 0xa3f   : > { %8788 = vmatpush.msra.mxu1 %v8468_v25  ;;  %v9801_v44 = vrot.slane %v8298_v58, 9  ;;  %v9798_v32 = vrot.slane %v8297_v48, 9  ;;  %v9802_v10 = vrot.slane %v8299_v57, 9  ;;  %v8320_v46 = vmax.f32 %v8291_v38, %v9797_v1  ;;  %v8568_v31 = vld [vmem:[#allocation29 + $0x710] sm:$0xff] }
 0xa40   : > { %8769 = vmatpush.msrb.mxu0 %v8400_v12  ;;  %v8356_v43 = vld [vmem:[#allocation29 + $0x70] sm:$0xff] }
 0xa41   : > { %8789 = vmatpush.msra.mxu1 %v8464_v59  ;;  %v8336_v45 = vmax.f32 %v8298_v58, %v9801_v44  ;;  %v8321_v17 = vmax.f32 %v8297_v48, %v9798_v32  ;;  %v8337_v53 = vmax.f32 %v8299_v57, %v9802_v10  ;;  %v8420_v61 = vld [vmem:[#allocation29 + $0x270] sm:$0xff]  ;;  %v8405_v59 = vld [vmem:[#allocation29 + $0x1f8] sm:$0xff] }
 0xa42   : > { %8770 = vmatpush.msrb.mxu0 %v8396_v62  ;;  %v8500_v51 = vld [vmem:[#allocation29 + $0x4f0] sm:$0xff]  ;;  %v8469_v62 = vld [vmem:[#allocation29 + $0x3f8] sm:$0xff] }
 0xa43   : > { %8790 = vmatpush.msra.mxu1 %v8460_v23  ;;  %v14899_v3 = vmax.f32 %v8320_v46, %v8336_v45  ;;  %v14901_v26 = vmax.f32 %v8321_v17, %v8337_v53  ;;  %v8564_v60 = vld [vmem:[#allocation29 + $0x6f0] sm:$0xff]  ;;  %v8401_v10 = vld [vmem:[#allocation29 + $0x1d8] sm:$0xff] }
 0xa44   : > { %8771 = vmatpush.msrb.mxu0 %v8392_v39  ;;  %v8352_v42 = vld [vmem:[#allocation29 + $0x50] sm:$0xff]  ;;  %v8465_v23 = vld [vmem:[#allocation29 + $0x3d8] sm:$0xff] }
 0xa45   : > { %8791 = vmatpush.msra.mxu1 %v8456_v4  ;;  %8664 = vmatmul.f32.vlgmr.msrb.gmra.mxu2 %v14899_v3  ;;  %v8416_v0 = vld [vmem:[#allocation29 + $0x250] sm:$0xff]  ;;  %v8397_v45 = vld [vmem:[#allocation29 + $0x1b8] sm:$0xff] }
 0xa46   : > { %8684 = vmatmul.f32.vlgmr.msrb.gmra.mxu3 %v14901_v26  ;;  %8704 = vmatmul.f32.vlgmr.msra.gmra.mxu0 %v14893_v40  ;;  %v8496_v33 = vld [vmem:[#allocation29 + $0x4d0] sm:$0xff]  ;;  %v8461_v17 = vld [vmem:[#allocation29 + $0x3b8] sm:$0xff] }
 0xa47   : > { %8724 = vmatmul.f32.vlgmr.msrb.gmra.mxu1 %v14895_v19  ;;  %8772 = vmatpush.msrb.mxu0 %v8388_v36  ;;  %v8560_v21 = vld [vmem:[#allocation29 + $0x6d0] sm:$0xff]  ;;  %v8393_v36 = vld [vmem:[#allocation29 + $0x198] sm:$0xff] }
 0xa48   : > { %8792 = vmatpush.msra.mxu1 %v8452_v18  ;;  %8808 = vmatpush.msrb.mxu2 %v8532_v16  ;;  %v8348_v38 = vld [vmem:[#allocation29 + $0x30] sm:$0xff]  ;;  %v8457_v18 = vld [vmem:[#allocation29 + $0x398] sm:$0xff] }
 0xa49   : > { %8828 = vmatpush.msrb.mxu3 %v8596_v7  ;;  %8773 = vmatpush.msrb.mxu0 %v8384_v14  ;;  %v8412_v9 = vld [vmem:[#allocation29 + $0x230] sm:$0xff]  ;;  %v8389_v14 = vld [vmem:[#allocation29 + $0x178] sm:$0xff] }
 0xa4a   : > { %8793 = vmatpush.msra.mxu1 %v8448_v50  ;;  %8809 = vmatpush.msrb.mxu2 %v8528_v49  ;;  %v8492_v25 = vld [vmem:[#allocation29 + $0x4b0] sm:$0xff]  ;;  %v8453_v50 = vld [vmem:[#allocation29 + $0x378] sm:$0xff] }
 0xa4b   : > { %8829 = vmatpush.msrb.mxu3 %v8592_v30  ;;  %8774 = vmatpush.msrb.mxu0 %v8380_v56  ;;  %v8556_v12 = vld [vmem:[#allocation29 + $0x6b0] sm:$0xff]  ;;  %v8533_v49 = vld [vmem:[#allocation29 + $0x5f8] sm:$0xff] }
 0xa4c   : > { %8794 = vmatpush.msra.mxu1 %v8444_v34  ;;  %8810 = vmatpush.msrb.mxu2 %v8524_v37  ;;  %v8344_v58 = vld [vmem:[#allocation29 + $0x10] sm:$0xff]  ;;  %v8597_v30 = vld [vmem:[#allocation29 + $0x7f8] sm:$0xff] }
 0xa4d   : > { %8830 = vmatpush.msrb.mxu3 %v8588_v5  ;;  %8775 = vmatpush.msrb.mxu0 %v8376_v35  ;;  %v8408_v1 = vld [vmem:[#allocation29 + $0x210] sm:$0xff]  ;;  %v8385_v56 = vld [vmem:[#allocation29 + $0x158] sm:$0xff] }
 0xa4e   : > { %8795 = vmatpush.msra.mxu1 %v8440_v13  ;;  %8811 = vmatpush.msrb.mxu2 %v8520_v8  ;;  %v8488_v48 = vld [vmem:[#allocation29 + $0x490] sm:$0xff]  ;;  %v8449_v34 = vld [vmem:[#allocation29 + $0x358] sm:$0xff] }
 0xa4f   : > { %8831 = vmatpush.msrb.mxu3 %v8584_v63  ;;  %8744 = vmatmul.f32.vlgmr.msra.gmra.mxu2 %v14899_v3  ;;  %v8552_v57 = vld [vmem:[#allocation29 + $0x690] sm:$0xff]  ;;  %v8529_v37 = vld [vmem:[#allocation29 + $0x5d8] sm:$0xff] }
 0xa50   : > { %8764 = vmatmul.f32.vlgmr.msra.gmra.mxu3 %v14901_v26  ;;  %8776 = vmatpush.msrb.mxu0 %v8372_v55  ;;  %v8484_v44 = vld [vmem:[#allocation29 + $0x470] sm:$0xff]  ;;  %v8593_v5 = vld [vmem:[#allocation29 + $0x7d8] sm:$0xff] }
 0xa51   : > { %8796 = vmatpush.msra.mxu1 %v8436_v22  ;;  %8812 = vmatpush.msrb.mxu2 %v8516_v54  ;;  %v8548_v32 = vld [vmem:[#allocation29 + $0x670] sm:$0xff]  ;;  %v8381_v35 = vld [vmem:[#allocation29 + $0x138] sm:$0xff] }
 0xa52   : > { %8832 = vmatpush.msrb.mxu3 %v8580_v29  ;;  %8777 = vmatpush.msrb.mxu0 %v8368_v47  ;;  %v8480_v39 = vld [vmem:[#allocation29 + $0x450] sm:$0xff]  ;;  %v8445_v13 = vld [vmem:[#allocation29 + $0x338] sm:$0xff] }
 0xa53   : > { %8797 = vmatpush.msra.mxu1 %v8432_v15  ;;  %8813 = vmatpush.msrb.mxu2 %v8512_v28  ;;  %v8544_v46 = vld [vmem:[#allocation29 + $0x650] sm:$0xff]  ;;  %v8525_v8 = vld [vmem:[#allocation29 + $0x5b8] sm:$0xff] }
 0xa54   : > { %8833 = vmatpush.msrb.mxu3 %v8576_v27  ;;  %8778 = vmatpush.msrb.mxu0 %v8364_v41  ;;  %v8476_v53 = vld [vmem:[#allocation29 + $0x430] sm:$0xff]  ;;  %v8589_v63 = vld [vmem:[#allocation29 + $0x7b8] sm:$0xff] }
 0xa55   : > { %8798 = vmatpush.msra.mxu1 %v8428_v11  ;;  %8814 = vmatpush.msrb.mxu2 %v8508_v52  ;;  %v8540_v4 = vld [vmem:[#allocation29 + $0x630] sm:$0xff]  ;;  %v8377_v55 = vld [vmem:[#allocation29 + $0x118] sm:$0xff] }
 0xa56   : > { %8834 = vmatpush.msrb.mxu3 %v8572_v20  ;;  %8779 = vmatpush.msrb.mxu0 %v8360_v6  ;;  %v8472_v16 = vld [vmem:[#allocation29 + $0x410] sm:$0xff]  ;;  %v8441_v22 = vld [vmem:[#allocation29 + $0x318] sm:$0xff] }
 0xa57   : > { %8799 = vmatpush.msra.mxu1 %v8424_v2  ;;  %8815 = vmatpush.msrb.mxu2 %v8504_v24  ;;  %v8536_v7 = vld [vmem:[#allocation29 + $0x610] sm:$0xff]  ;;  %v8521_v54 = vld [vmem:[#allocation29 + $0x598] sm:$0xff] }
 0xa58   : > { %8835 = vmatpush.msrb.mxu3 %v8568_v31  ;;  %8780 = vmatpush.msrb.mxu0 %v8356_v43  ;;  %v8585_v29 = vld [vmem:[#allocation29 + $0x798] sm:$0xff] }
 0xa59   : > { %8800 = vmatpush.msra.mxu1 %v8420_v61  ;;  %8816 = vmatpush.msrb.mxu2 %v8500_v51  ;;  %v8373_v47 = vld [vmem:[#allocation29 + $0xf8] sm:$0xff] }
 0xa5a   : > { %8836 = vmatpush.msrb.mxu3 %v8564_v60  ;;  %8781 = vmatpush.msrb.mxu0 %v8352_v42  ;;  %v8437_v15 = vld [vmem:[#allocation29 + $0x2f8] sm:$0xff] }
 0xa5b   : > { %8801 = vmatpush.msra.mxu1 %v8416_v0  ;;  %8817 = vmatpush.msrb.mxu2 %v8496_v33  ;;  %v8517_v28 = vld [vmem:[#allocation29 + $0x578] sm:$0xff] }
 0xa5c   : > { %8837 = vmatpush.msrb.mxu3 %v8560_v21  ;;  %8782 = vmatpush.msrb.mxu0 %v8348_v38  ;;  %v8581_v27 = vld [vmem:[#allocation29 + $0x778] sm:$0xff] }
 0xa5d   : > { %8802 = vmatpush.msra.mxu1 %v8412_v9  ;;  %8818 = vmatpush.msrb.mxu2 %v8492_v25  ;;  %v8369_v41 = vld [vmem:[#allocation29 + $0xd8] sm:$0xff] }
 0xa5e   : > { %8838 = vmatpush.msrb.mxu3 %v8556_v12  ;;  %8783 = vmatpush.msrb.mxu0 %v8344_v58  ;;  %v8433_v11 = vld [vmem:[#allocation29 + $0x2d8] sm:$0xff] }
 0xa5f   : > { %8803 = vmatpush.msra.mxu1 %v8408_v1  ;;  %8819 = vmatpush.msrb.mxu2 %v8488_v48  ;;  %v8513_v52 = vld [vmem:[#allocation29 + $0x558] sm:$0xff] }
 0xa60   : > { %8839 = vmatpush.msrb.mxu3 %v8552_v57  ;;  %8784 = vmatmul.f32.vlgmr.msrb.gmra.mxu0 %v14893_v40  ;;  %v8577_v20 = vld [vmem:[#allocation29 + $0x758] sm:$0xff] }
 0xa61   : > { %8804 = vmatmul.f32.vlgmr.msra.gmra.mxu1 %v14895_v19  ;;  %8848 = vmatpush.msra.mxu0 %v8405_v59  ;;  %v8365_v6 = vld [vmem:[#allocation29 + $0xb8] sm:$0xff] }
 0xa62   : > { %8868 = vmatpush.msrb.mxu1 %v8469_v62  ;;  %8820 = vmatpush.msrb.mxu2 %v8484_v44  ;;  %v8429_v2 = vld [vmem:[#allocation29 + $0x2b8] sm:$0xff] }
 0xa63   : > { %8840 = vmatpush.msrb.mxu3 %v8548_v32  ;;  %8849 = vmatpush.msra.mxu0 %v8401_v10  ;;  %v8509_v24 = vld [vmem:[#allocation29 + $0x538] sm:$0xff] }
 0xa64   : > { %8869 = vmatpush.msrb.mxu1 %v8465_v23  ;;  %8821 = vmatpush.msrb.mxu2 %v8480_v39  ;;  %v8573_v31 = vld [vmem:[#allocation29 + $0x738] sm:$0xff]  ;;  %v8962_v39 = vld [vmem:[#allocation31 + $0xf0] sm:$0xff] }
 0xa65   : > { %8841 = vmatpush.msrb.mxu3 %v8544_v46  ;;  %8850 = vmatpush.msra.mxu0 %v8397_v45  ;;  %v8361_v43 = vld [vmem:[#allocation29 + $0x98] sm:$0xff]  ;;  %v8994_v45 = vld [vmem:[#allocation31 + $0x1f0] sm:$0xff] }
 0xa66   : > { %8870 = vmatpush.msrb.mxu1 %v8461_v17  ;;  %8822 = vmatpush.msrb.mxu2 %v8476_v53  ;;  %v8425_v61 = vld [vmem:[#allocation29 + $0x298] sm:$0xff]  ;;  %v8960_v53 = vld [vmem:[#allocation31 + $0xe0] sm:$0xff] }
 0xa67   : > { %8842 = vmatpush.msrb.mxu3 %v8540_v4  ;;  %8851 = vmatpush.msra.mxu0 %v8393_v36  ;;  %v8505_v51 = vld [vmem:[#allocation29 + $0x518] sm:$0xff]  ;;  %v8992_v36 = vld [vmem:[#allocation31 + $0x1e0] sm:$0xff] }
 0xa68   : > { %8871 = vmatpush.msrb.mxu1 %v8457_v18  ;;  %8823 = vmatpush.msrb.mxu2 %v8472_v16  ;;  %v8569_v60 = vld [vmem:[#allocation29 + $0x718] sm:$0xff]  ;;  %v8958_v16 = vld [vmem:[#allocation31 + $0xd0] sm:$0xff] }
 0xa69   : > { %8843 = vmatpush.msrb.mxu3 %v8536_v7  ;;  %8824 = vmatmul.f32.vlgmr.msrb.gmra.mxu2 %v14899_v3  ;;  %v8357_v42 = vld [vmem:[#allocation29 + $0x78] sm:$0xff] }
 0xa6a   : > { %8844 = vmatmul.f32.vlgmr.msrb.gmra.mxu3 %v14901_v26  ;;  %8852 = vmatpush.msra.mxu0 %v8389_v14  ;;  %v8421_v0 = vld [vmem:[#allocation29 + $0x278] sm:$0xff]  ;;  %v8990_v14 = vld [vmem:[#allocation31 + $0x1d0] sm:$0xff] }
 0xa6b   : > { %8872 = vmatpush.msrb.mxu1 %v8453_v50  ;;  %8888 = vmatpush.msra.mxu2 %v8533_v49  ;;  %v8501_v33 = vld [vmem:[#allocation29 + $0x4f8] sm:$0xff]  ;;  %v8988_v50 = vld [vmem:[#allocation31 + $0x1c0] sm:$0xff]  ;;  %v9026_v49 = vld [vmem:[#allocation31 + $0x2f0] sm:$0xff] }
 0xa6c   : > { %8908 = vmatpush.msra.mxu3 %v8597_v30  ;;  %8853 = vmatpush.msra.mxu0 %v8385_v56  ;;  %v8565_v21 = vld [vmem:[#allocation29 + $0x6f8] sm:$0xff]  ;;  %v8954_v30 = vld [vmem:[#allocation31 + $0xb0] sm:$0xff] }
 0xa6d   : > { %8873 = vmatpush.msrb.mxu1 %v8449_v34  ;;  %8889 = vmatpush.msra.mxu2 %v8529_v37  ;;  %v8353_v38 = vld [vmem:[#allocation29 + $0x58] sm:$0xff]  ;;  %v8986_v56 = vld [vmem:[#allocation31 + $0x1b0] sm:$0xff]  ;;  %v8952_v34 = vld [vmem:[#allocation31 + $0xa0] sm:$0xff] }
 0xa6e   : > { %8909 = vmatpush.msra.mxu3 %v8593_v5  ;;  %8854 = vmatpush.msra.mxu0 %v8381_v35  ;;  %v8417_v9 = vld [vmem:[#allocation29 + $0x258] sm:$0xff]  ;;  %v8984_v37 = vld [vmem:[#allocation31 + $0x1a0] sm:$0xff]  ;;  %v8950_v5 = vld [vmem:[#allocation31 + $0x90] sm:$0xff] }
 0xa6f   : > { %8874 = vmatpush.msrb.mxu1 %v8445_v13  ;;  %8890 = vmatpush.msra.mxu2 %v8525_v8  ;;  %v8497_v25 = vld [vmem:[#allocation29 + $0x4d8] sm:$0xff]  ;;  %v8982_v35 = vld [vmem:[#allocation31 + $0x190] sm:$0xff]  ;;  %v8948_v13 = vld [vmem:[#allocation31 + $0x80] sm:$0xff] }
 0xa70   : > { %8910 = vmatpush.msra.mxu3 %v8589_v63  ;;  %8855 = vmatpush.msra.mxu0 %v8377_v55  ;;  %v8561_v12 = vld [vmem:[#allocation29 + $0x6d8] sm:$0xff]  ;;  %v8980_v8 = vld [vmem:[#allocation31 + $0x180] sm:$0xff]  ;;  %v8946_v63 = vld [vmem:[#allocation31 + $0x70] sm:$0xff] }
 0xa71   : > { %8875 = vmatpush.msrb.mxu1 %v8441_v22  ;;  %8891 = vmatpush.msra.mxu2 %v8521_v54  ;;  %v8349_v58 = vld [vmem:[#allocation29 + $0x38] sm:$0xff]  ;;  %v8976_v55 = vld [vmem:[#allocation31 + $0x160] sm:$0xff]  ;;  %v8942_v22 = vld [vmem:[#allocation31 + $0x50] sm:$0xff] }
 0xa72   : > { %8911 = vmatpush.msra.mxu3 %v8585_v29  ;;  %8856 = vmatpush.msra.mxu0 %v8373_v47  ;;  %v8413_v1 = vld [vmem:[#allocation29 + $0x238] sm:$0xff]  ;;  %v8974_v54 = vld [vmem:[#allocation31 + $0x150] sm:$0xff]  ;;  %v8940_v29 = vld [vmem:[#allocation31 + $0x40] sm:$0xff] }
 0xa73   : > { %8876 = vmatpush.msrb.mxu1 %v8437_v15  ;;  %8892 = vmatpush.msra.mxu2 %v8517_v28  ;;  %v8493_v48 = vld [vmem:[#allocation29 + $0x4b8] sm:$0xff]  ;;  %v8972_v47 = vld [vmem:[#allocation31 + $0x140] sm:$0xff]  ;;  %v8938_v15 = vld [vmem:[#allocation31 + $0x30] sm:$0xff] }
 0xa74   : > { %8912 = vmatpush.msra.mxu3 %v8581_v27  ;;  %8857 = vmatpush.msra.mxu0 %v8369_v41  ;;  %v8557_v57 = vld [vmem:[#allocation29 + $0x6b8] sm:$0xff]  ;;  %v8970_v28 = vld [vmem:[#allocation31 + $0x130] sm:$0xff]  ;;  %v8936_v27 = vld [vmem:[#allocation31 + $0x20] sm:$0xff] }
 0xa75   : > { %8877 = vmatpush.msrb.mxu1 %v8433_v11  ;;  %8893 = vmatpush.msra.mxu2 %v8513_v52  ;;  %v8345_v59 = vld [vmem:[#allocation29 + $0x18] sm:$0xff]  ;;  %v9024_v41 = vld [vmem:[#allocation31 + $0x2e0] sm:$0xff]  ;;  %v8934_v52 = vld [vmem:[#allocation31 + $0x10] sm:$0xff] }
 0xa76   : > { %8913 = vmatpush.msra.mxu3 %v8577_v20  ;;  %8858 = vmatpush.msra.mxu0 %v8365_v6  ;;  %v8409_v62 = vld [vmem:[#allocation29 + $0x218] sm:$0xff]  ;;  %v8968_v11 = vld [vmem:[#allocation31 + $0x120] sm:$0xff]  ;;  %v9022_v20 = vld [vmem:[#allocation31 + $0x2d0] sm:$0xff] }
 0xa77   : > { %8878 = vmatpush.msrb.mxu1 %v8429_v2  ;;  %8894 = vmatpush.msra.mxu2 %v8509_v24  ;;  %v8489_v44 = vld [vmem:[#allocation29 + $0x498] sm:$0xff]  ;;  %v8966_v6 = vld [vmem:[#allocation31 + $0x110] sm:$0xff]  ;;  %v9020_v2 = vld [vmem:[#allocation31 + $0x2c0] sm:$0xff] }
 0xa78   : > { %8914 = vmatpush.msra.mxu3 %v8573_v31  ;;  %8859 = vmatpush.msra.mxu0 %v8361_v43  ;;  %v8553_v32 = vld [vmem:[#allocation29 + $0x698] sm:$0xff]  ;;  %v8932_v24 = vld [vmem:[#allocation31] sm:$0xff] }
 0xa79   : > { %8879 = vmatpush.msrb.mxu1 %v8425_v61  ;;  %8895 = vmatpush.msra.mxu2 %v8505_v51  ;;  %v8485_v10 = vld [vmem:[#allocation29 + $0x478] sm:$0xff]  ;;  %v8964_v43 = vld [vmem:[#allocation31 + $0x100] sm:$0xff]  ;;  %v9018_v61 = vld [vmem:[#allocation31 + $0x2b0] sm:$0xff] }
 0xa7a   : > { %8915 = vmatpush.msra.mxu3 %v8569_v60  ;;  %8860 = vmatpush.msra.mxu0 %v8357_v42  ;;  %v8549_v23 = vld [vmem:[#allocation29 + $0x678] sm:$0xff]  ;;  %v8961_v60 = vld [vmem:[#allocation31 + $0xe8] sm:$0xff] }
 0xa7b   : > { %8880 = vmatpush.msrb.mxu1 %v8421_v0  ;;  %8896 = vmatpush.msra.mxu2 %v8501_v33  ;;  %v8481_v46 = vld [vmem:[#allocation29 + $0x458] sm:$0xff]  ;;  %v9016_v0 = vld [vmem:[#allocation31 + $0x2a0] sm:$0xff]  ;;  %v8993_v33 = vld [vmem:[#allocation31 + $0x1e8] sm:$0xff] }
 0xa7c   : > { %8916 = vmatpush.msra.mxu3 %v8565_v21  ;;  %8861 = vmatpush.msra.mxu0 %v8353_v38  ;;  %v8545_v17 = vld [vmem:[#allocation29 + $0x658] sm:$0xff]  ;;  %v8957_v21 = vld [vmem:[#allocation31 + $0xc8] sm:$0xff]  ;;  %v9014_v38 = vld [vmem:[#allocation31 + $0x290] sm:$0xff] }
 0xa7d   : > { %8881 = vmatpush.msrb.mxu1 %v8417_v9  ;;  %8897 = vmatpush.msra.mxu2 %v8497_v25  ;;  %v8477_v4 = vld [vmem:[#allocation29 + $0x438] sm:$0xff]  ;;  %v9012_v25 = vld [vmem:[#allocation31 + $0x280] sm:$0xff] }
 0xa7e   : > { %8917 = vmatpush.msra.mxu3 %v8561_v12  ;;  %8862 = vmatpush.msra.mxu0 %v8349_v58  ;;  %v8541_v18 = vld [vmem:[#allocation29 + $0x638] sm:$0xff]  ;;  %v8989_v12 = vld [vmem:[#allocation31 + $0x1c8] sm:$0xff] }
 0xa7f   : > { %8882 = vmatpush.msrb.mxu1 %v8413_v1  ;;  %8898 = vmatpush.msra.mxu2 %v8493_v48  ;;  %v8473_v7 = vld [vmem:[#allocation29 + $0x418] sm:$0xff]  ;;  %v8953_v1 = vld [vmem:[#allocation31 + $0xa8] sm:$0xff] }
 0xa80   : > { %8918 = vmatpush.msra.mxu3 %v8557_v57  ;;  %8863 = vmatpush.msra.mxu0 %v8345_v59  ;;  %v8963_v31 = vld [vmem:[#allocation31 + $0xf8] sm:$0xff]  ;;  %v9010_v57 = vld [vmem:[#allocation31 + $0x270] sm:$0xff] }
 0xa81   : > { %8883 = vmatpush.msrb.mxu1 %v8409_v62  ;;  %8899 = vmatpush.msra.mxu2 %v8489_v44  ;;  %v8995_v51 = vld [vmem:[#allocation31 + $0x1f8] sm:$0xff]  ;;  %v9008_v62 = vld [vmem:[#allocation31 + $0x260] sm:$0xff]  ;;  %v8985_v44 = vld [vmem:[#allocation31 + $0x1a8] sm:$0xff] }
 0xa82   : > { %8919 = vmatpush.msra.mxu3 %v8553_v32  ;;  %8864 = vmatmul.f32.vlgmr.msra.gmra.mxu0 %v14893_v40  ;;  %v8537_v40 = vld [vmem:[#allocation29 + $0x618] sm:$0xff]  ;;  %v8949_v32 = vld [vmem:[#allocation31 + $0x88] sm:$0xff] }
 0xa83   : > { %8884 = vmatmul.f32.vlgmr.msrb.gmra.mxu1 %v14895_v19  ;;  %8900 = vmatpush.msra.mxu2 %v8485_v10  ;;  %v8956_v19 = vld [vmem:[#allocation31 + $0xc0] sm:$0xff]  ;;  %v8959_v42 = vld [vmem:[#allocation31 + $0xd8] sm:$0xff]  ;;  %v9006_v10 = vld [vmem:[#allocation31 + $0x250] sm:$0xff] }
 0xa84   : > { %8920 = vmatpush.msra.mxu3 %v8549_v23  ;;  %9066 = vmatpush.msrb.mxu0 %v8962_v39  ;;  %v8991_v9 = vld [vmem:[#allocation31 + $0x1d8] sm:$0xff] }
 0xa85   : > { %8901 = vmatpush.msra.mxu2 %v8481_v46  ;;  %9086 = vmatpush.msra.mxu1 %v8994_v45  ;;  %v8955_v58 = vld [vmem:[#allocation31 + $0xb8] sm:$0xff]  ;;  %v9004_v46 = vld [vmem:[#allocation31 + $0x240] sm:$0xff]  ;;  %v8981_v45 = vld [vmem:[#allocation31 + $0x188] sm:$0xff] }
 0xa86   : > { %8921 = vmatpush.msra.mxu3 %v8545_v17  ;;  %9067 = vmatpush.msrb.mxu0 %v8960_v53  ;;  %v8951_v48 = vld [vmem:[#allocation31 + $0x98] sm:$0xff]  ;;  %v8945_v17 = vld [vmem:[#allocation31 + $0x68] sm:$0xff] }
 0xa87   : > { %8902 = vmatpush.msra.mxu2 %v8477_v4  ;;  %9087 = vmatpush.msra.mxu1 %v8992_v36  ;;  %v8987_v59 = vld [vmem:[#allocation31 + $0x1b8] sm:$0xff]  ;;  %v8941_v4 = vld [vmem:[#allocation31 + $0x48] sm:$0xff]  ;;  %v9002_v36 = vld [vmem:[#allocation31 + $0x230] sm:$0xff] }
 0xa88   : > { %8922 = vmatpush.msra.mxu3 %v8541_v18  ;;  %9068 = vmatpush.msrb.mxu0 %v8958_v16  ;;  %v8983_v23 = vld [vmem:[#allocation31 + $0x198] sm:$0xff]  ;;  %v9000_v16 = vld [vmem:[#allocation31 + $0x220] sm:$0xff] }
 0xa89   : > { %8903 = vmatpush.msra.mxu2 %v8473_v7  ;;  %9088 = vmatpush.msra.mxu1 %v8990_v14  ;;  %v8947_v39 = vld [vmem:[#allocation31 + $0x78] sm:$0xff]  ;;  %v8977_v7 = vld [vmem:[#allocation31 + $0x168] sm:$0xff] }
 0xa8a   : > { %8923 = vmatpush.msra.mxu3 %v8537_v40  ;;  %8904 = vmatmul.f32.vlgmr.msra.gmra.mxu2 %v14899_v3  ;;  %v8978_v3 = vld [vmem:[#allocation31 + $0x170] sm:$0xff]  ;;  %v8943_v53 = vld [vmem:[#allocation31 + $0x58] sm:$0xff] }
 0xa8b   : > { %8924 = vmatmul.f32.vlgmr.msra.gmra.mxu3 %v14901_v26  ;;  %9069 = vmatpush.msrb.mxu0 %v8956_v19  ;;  %v8944_v26 = vld [vmem:[#allocation31 + $0x60] sm:$0xff]  ;;  %v8979_v18 = vld [vmem:[#allocation31 + $0x178] sm:$0xff]  ;;  %v8998_v40 = vld [vmem:[#allocation31 + $0x210] sm:$0xff] }
 0xa8c   : > { %9089 = vmatpush.msra.mxu1 %v8988_v50  ;;  %9106 = vmatpush.msrb.mxu2 %v9026_v49  ;;  %v8939_v14 = vld [vmem:[#allocation31 + $0x38] sm:$0xff]  ;;  %v8937_v50 = vld [vmem:[#allocation31 + $0x28] sm:$0xff]  ;;  %v8996_v49 = vld [vmem:[#allocation31 + $0x200] sm:$0xff] }
 0xa8d   : > { %9070 = vmatpush.msrb.mxu0 %v8954_v30  ;;  %v8975_v19 = vld [vmem:[#allocation31 + $0x158] sm:$0xff]  ;;  %v9058_v30 = vld [vmem:[#allocation31 + $0x3f0] sm:$0xff] }
 0xa8e   : > { %9090 = vmatpush.msra.mxu1 %v8986_v56  ;;  %9107 = vmatpush.msrb.mxu2 %v9024_v41  ;;  %v14920_v56 = vld [vmem:[%s15080_s20] sm:$0xf]  ;;  %v9050_v41 = vld [vmem:[#allocation31 + $0x3b0] sm:$0xff] }
 0xa8f   : > { %9071 = vmatpush.msrb.mxu0 %v8952_v34  ;;  %v8973_v34 = vld [vmem:[#allocation31 + $0x148] sm:$0xff]  ;;  %9126 = vmatpush.msrb.mxu3 %v9058_v30  ;;  %v8602_v30 = vperm.slane %v14920_v56, 2 }
 0xa90   : > { %9091 = vmatpush.msra.mxu1 %v8984_v37  ;;  %9108 = vmatpush.msrb.mxu2 %v9022_v20  ;;  %v9027_v37 = vld [vmem:[#allocation31 + $0x2f8] sm:$0xff]  ;;  %v9048_v20 = vld [vmem:[#allocation31 + $0x3a0] sm:$0xff] }
 0xa91   : > { %9072 = vmatpush.msrb.mxu0 %v8950_v5  ;;  %v8935_v5 = vld [vmem:[#allocation31 + $0x18] sm:$0xff] }
 0xa92   : > { %9092 = vmatpush.msra.mxu1 %v8982_v35  ;;  %9109 = vmatpush.msrb.mxu2 %v9020_v2  ;;  %v8971_v35 = vld [vmem:[#allocation31 + $0x138] sm:$0xff]  ;;  %v9017_v2 = vld [vmem:[#allocation31 + $0x2a8] sm:$0xff] }
 0xa93   : > { %9073 = vmatpush.msrb.mxu0 %v8948_v13  ;;  %v8600_v13 = vperm.slane %v14920_v56, 0 }
 0xa94   : > { %9093 = vmatpush.msra.mxu1 %v8980_v8  ;;  %9110 = vmatpush.msrb.mxu2 %v9018_v61  ;;  %v8933_v8 = vld [vmem:[#allocation31 + $0x8] sm:$0xff] }
 0xa95   : > { %9074 = vmatpush.msrb.mxu0 %v8946_v63 }
 0xa96   : > { %9094 = vmatpush.msra.mxu1 %v8978_v3  ;;  %9111 = vmatpush.msrb.mxu2 %v9016_v0  ;;  %v9056_v3 = vld [vmem:[#allocation31 + $0x3e0] sm:$0xff] }
 0xa97   : > { %9075 = vmatpush.msrb.mxu0 %v8944_v26  ;;  %v9025_v26 = vld [vmem:[#allocation31 + $0x2e8] sm:$0xff]  ;;  %9127 = vmatpush.msrb.mxu3 %v9056_v3  ;;  %v9044_v0 = vld [vmem:[#allocation31 + $0x380] sm:$0xff] }
 0xa98   : > { %9095 = vmatpush.msra.mxu1 %v8976_v55  ;;  %9112 = vmatpush.msrb.mxu2 %v9014_v38  ;;  %v8969_v55 = vld [vmem:[#allocation31 + $0x128] sm:$0xff] }
 0xa99   : > { %9076 = vmatpush.msrb.mxu0 %v8942_v22  ;;  %v9054_v22 = vld [vmem:[#allocation31 + $0x3d0] sm:$0xff] }
 0xa9a   : > { %9096 = vmatpush.msra.mxu1 %v8974_v54  ;;  %9113 = vmatpush.msrb.mxu2 %v9012_v25  ;;  %v9023_v54 = vld [vmem:[#allocation31 + $0x2d8] sm:$0xff]  ;;  %v9042_v25 = vld [vmem:[#allocation31 + $0x370] sm:$0xff] }
 0xa9b   : > { %9077 = vmatpush.msrb.mxu0 %v8940_v29  ;;  %v8967_v29 = vld [vmem:[#allocation31 + $0x118] sm:$0xff]  ;;  %9128 = vmatpush.msrb.mxu3 %v9054_v22 }
 0xa9c   : > { %9097 = vmatpush.msra.mxu1 %v8972_v47  ;;  %9114 = vmatpush.msrb.mxu2 %v9010_v57  ;;  %v9052_v47 = vld [vmem:[#allocation31 + $0x3c0] sm:$0xff]  ;;  %v9043_v22 = vld [vmem:[#allocation31 + $0x378] sm:$0xff] }
 0xa9d   : > { %9078 = vmatpush.msrb.mxu0 %v8938_v15  ;;  %9129 = vmatpush.msrb.mxu3 %v9052_v47  ;;  %v9041_v47 = vld [vmem:[#allocation31 + $0x368] sm:$0xff] }
 0xa9e   : > { %9098 = vmatpush.msra.mxu1 %v8970_v28  ;;  %9115 = vmatpush.msrb.mxu2 %v9008_v62  ;;  %v9021_v28 = vld [vmem:[#allocation31 + $0x2c8] sm:$0xff]  ;;  %v9007_v62 = vld [vmem:[#allocation31 + $0x258] sm:$0xff] }
 0xa9f   : > { %9079 = vmatpush.msrb.mxu0 %v8936_v27  ;;  %v8965_v27 = vld [vmem:[#allocation31 + $0x108] sm:$0xff]  ;;  %9130 = vmatpush.msrb.mxu3 %v9050_v41  ;;  %v9035_v41 = vld [vmem:[#allocation31 + $0x338] sm:$0xff] }
 0xaa0   : > { %9099 = vmatpush.msra.mxu1 %v8968_v11  ;;  %9116 = vmatpush.msrb.mxu2 %v9006_v10  ;;  %v9019_v11 = vld [vmem:[#allocation31 + $0x2b8] sm:$0xff] }
 0xaa1   : > { %9080 = vmatpush.msrb.mxu0 %v8934_v52  ;;  %9131 = vmatpush.msrb.mxu3 %v9048_v20  ;;  %v9029_v20 = vld [vmem:[#allocation31 + $0x308] sm:$0xff] }
 0xaa2   : > { %9100 = vmatpush.msra.mxu1 %v8966_v6  ;;  %9117 = vmatpush.msrb.mxu2 %v9004_v46  ;;  %v9034_v46 = vld [vmem:[#allocation31 + $0x330] sm:$0xff] }
 0xaa3   : > { %9081 = vmatpush.msrb.mxu0 %v8932_v24 }
 0xaa4   : > { %9101 = vmatpush.msra.mxu1 %v8964_v43  ;;  %9118 = vmatpush.msrb.mxu2 %v9002_v36  ;;  %v8601_v43 = vperm.slane %v14920_v56, 1  ;;  %v9001_v36 = vld [vmem:[#allocation31 + $0x228] sm:$0xff] }
 0xaa5   : > { %9146 = vmatpush.msra.mxu0 %v8963_v31  ;;  %v9046_v31 = vld [vmem:[#allocation31 + $0x390] sm:$0xff] }
 0xaa6   : > { %9166 = vmatpush.msrb.mxu1 %v8995_v51  ;;  %9119 = vmatpush.msrb.mxu2 %v9000_v16  ;;  %v9015_v51 = vld [vmem:[#allocation31 + $0x298] sm:$0xff] }
 0xaa7   : > { %9147 = vmatpush.msra.mxu0 %v8961_v60  ;;  %9132 = vmatpush.msrb.mxu3 %v9046_v31  ;;  %v8999_v16 = vld [vmem:[#allocation31 + $0x218] sm:$0xff] }
 0xaa8   : > { %9167 = vmatpush.msrb.mxu1 %v8993_v33  ;;  %9120 = vmatpush.msrb.mxu2 %v8998_v40  ;;  %v9059_v40 = vld [vmem:[#allocation31 + $0x3f8] sm:$0xff] }
 0xaa9   : > { %9148 = vmatpush.msra.mxu0 %v8959_v42  ;;  %9133 = vmatpush.msrb.mxu3 %v9044_v0 }
 0xaaa   : > { %9168 = vmatpush.msrb.mxu1 %v8991_v9  ;;  %9121 = vmatpush.msrb.mxu2 %v8996_v49  ;;  %v9053_v49 = vld [vmem:[#allocation31 + $0x3c8] sm:$0xff] }
 0xaab   : > { %9149 = vmatpush.msra.mxu0 %v8957_v21  ;;  %v9013_v21 = vld [vmem:[#allocation31 + $0x288] sm:$0xff]  ;;  %9134 = vmatpush.msrb.mxu3 %v9042_v25 }
 0xaac   : > { %9169 = vmatpush.msrb.mxu1 %v8989_v12  ;;  %9186 = vmatpush.msra.mxu2 %v9027_v37  ;;  %v9011_v12 = vld [vmem:[#allocation31 + $0x278] sm:$0xff]  ;;  %v9258_v25 = vld [vmem:[%s15138_s8 + $0xf0] sm:$0xff] }
 0xaad   : > { %9150 = vmatpush.msra.mxu0 %v8955_v58 }
 0xaae   : > { %9170 = vmatpush.msrb.mxu1 %v8987_v59  ;;  %9187 = vmatpush.msra.mxu2 %v9025_v26  ;;  %v9038_v59 = vld [vmem:[#allocation31 + $0x350] sm:$0xff] }
 0xaaf   : > { %9151 = vmatpush.msra.mxu0 %v8953_v1  ;;  %v9040_v1 = vld [vmem:[#allocation31 + $0x360] sm:$0xff] }
 0xab0   : > { %9171 = vmatpush.msrb.mxu1 %v8985_v44  ;;  %9188 = vmatpush.msra.mxu2 %v9023_v54 }
 0xab1   : > { %9152 = vmatpush.msra.mxu0 %v8951_v48  ;;  %v9009_v48 = vld [vmem:[#allocation31 + $0x268] sm:$0xff]  ;;  %9135 = vmatpush.msrb.mxu3 %v9040_v1 }
 0xab2   : > { %9172 = vmatpush.msrb.mxu1 %v8983_v23  ;;  %9189 = vmatpush.msra.mxu2 %v9021_v28  ;;  %v9005_v23 = vld [vmem:[#allocation31 + $0x248] sm:$0xff]  ;;  %v9039_v28 = vld [vmem:[#allocation31 + $0x358] sm:$0xff] }
 0xab3   : > { %9153 = vmatpush.msra.mxu0 %v8949_v32  ;;  %v9036_v32 = vld [vmem:[#allocation31 + $0x340] sm:$0xff]  ;;  %9136 = vmatpush.msrb.mxu3 %v9038_v59  ;;  %v9238_v1 = vld [vmem:[%s15138_s8 + $0x50] sm:$0xff]  ;;  %v9255_v59 = vld [vmem:[%s15138_s8 + $0xd8] sm:$0xff] }
 0xab4   : > { %9173 = vmatpush.msrb.mxu1 %v8981_v45  ;;  %9190 = vmatpush.msra.mxu2 %v9019_v11  ;;  %v9033_v11 = vld [vmem:[#allocation31 + $0x328] sm:$0xff] }
 0xab5   : > { %9154 = vmatpush.msra.mxu0 %v8947_v39  ;;  %9137 = vmatpush.msrb.mxu3 %v9036_v32  ;;  %v9235_v32 = vld [vmem:[%s15138_s8 + $0x38] sm:$0xff] }
 0xab6   : > { %9174 = vmatpush.msrb.mxu1 %v8979_v18  ;;  %9191 = vmatpush.msra.mxu2 %v9017_v2  ;;  %v9030_v18 = vld [vmem:[#allocation31 + $0x310] sm:$0xff] }
 0xab7   : > { %9155 = vmatpush.msra.mxu0 %v8945_v17  ;;  %v9003_v17 = vld [vmem:[#allocation31 + $0x238] sm:$0xff]  ;;  %9138 = vmatpush.msrb.mxu3 %v9034_v46  ;;  %v9233_v46 = vld [vmem:[%s15138_s8 + $0x28] sm:$0xff] }
 0xab8   : > { %9175 = vmatpush.msrb.mxu1 %v8977_v7  ;;  %9192 = vmatpush.msra.mxu2 %v9015_v51  ;;  %v9028_v7 = vld [vmem:[#allocation31 + $0x300] sm:$0xff] }
 0xab9   : > { %9156 = vmatpush.msra.mxu0 %v8943_v53  ;;  %v9032_v53 = vld [vmem:[#allocation31 + $0x320] sm:$0xff] }
 0xaba   : > { %9176 = vmatpush.msrb.mxu1 %v8975_v19  ;;  %v8625_v63 = vpop.f32.mrf.mxu0  ;;  %9193 = vmatpush.msra.mxu2 %v9013_v21  ;;  %v9057_v19 = vld [vmem:[#allocation31 + $0x3e8] sm:$0xff] }
 0xabb   : > { %9157 = vmatpush.msra.mxu0 %v8941_v4  ;;  %v8626_v15 = vadd.f32 %v8625_v63, %v8600_v13  ;;  %v8645_v52 = vpop.f32.mrf.mxu1  ;;  %9139 = vmatpush.msrb.mxu3 %v9032_v53  ;;  %v9047_v13 = vld [vmem:[#allocation31 + $0x398] sm:$0xff]  ;;  %v9242_v21 = vld [vmem:[%s15138_s8 + $0x70] sm:$0xff]  ;;  %v9231_v53 = vld [vmem:[%s15138_s8 + $0x18] sm:$0xff] }
 0xabc   : > { %9177 = vmatpush.msrb.mxu1 %v8973_v34  ;;  %9194 = vmatpush.msra.mxu2 %v9011_v12  ;;  %v9051_v34 = vld [vmem:[#allocation31 + $0x3b8] sm:$0xff]  ;;  %v9239_v12 = vld [vmem:[%s15138_s8 + $0x58] sm:$0xff] }
 0xabd   : > { %9158 = vmatpush.msra.mxu0 %v8939_v14  ;;  %v8646_v6 = vadd.f32 %v8645_v52, %v8626_v15  ;;  %9140 = vmatpush.msrb.mxu3 %v9030_v18  ;;  %v8997_v14 = vld [vmem:[#allocation31 + $0x208] sm:$0xff]  ;;  %v9031_v52 = vld [vmem:[#allocation31 + $0x318] sm:$0xff]  ;;  %v9229_v18 = vld [vmem:[%s15138_s8 + $0x8] sm:$0xff] }
 0xabe   : > { %9178 = vmatpush.msrb.mxu1 %v8971_v35  ;;  %9195 = vmatpush.msra.mxu2 %v9009_v48  ;;  %v9256_v48 = vld [vmem:[%s15138_s8 + $0xe0] sm:$0xff] }
 0xabf   : > { %9159 = vmatpush.msra.mxu0 %v8937_v50  ;;  %9141 = vmatpush.msrb.mxu3 %v9028_v7  ;;  %v9055_v50 = vld [vmem:[#allocation31 + $0x3d8] sm:$0xff] }
 0xac0   : > { %9179 = vmatpush.msrb.mxu1 %v8969_v55  ;;  %9196 = vmatpush.msra.mxu2 %v9007_v62  ;;  %v9236_v62 = vld [vmem:[%s15138_s8 + $0x40] sm:$0xff] }
 0xac1   : > { %9160 = vmatpush.msra.mxu0 %v8935_v5  ;;  %9206 = vmatpush.msra.mxu3 %v9059_v40  ;;  %v9049_v5 = vld [vmem:[#allocation31 + $0x3a8] sm:$0xff]  ;;  %v9228_v7 = vld [vmem:[%s15138_s8] sm:$0xff]  ;;  %v9247_v40 = vld [vmem:[%s15138_s8 + $0x98] sm:$0xff] }
 0xac2   : > { %9180 = vmatpush.msrb.mxu1 %v8967_v29  ;;  %9197 = vmatpush.msra.mxu2 %v9005_v23  ;;  %v9234_v23 = vld [vmem:[%s15138_s8 + $0x30] sm:$0xff] }
 0xac3   : > { %9161 = vmatpush.msra.mxu0 %v8933_v8  ;;  %v8705_v60 = vpop.f32.mrf.mxu0  ;;  %9207 = vmatpush.msra.mxu3 %v9057_v19  ;;  %v9045_v8 = vld [vmem:[#allocation31 + $0x388] sm:$0xff] }
 0xac4   : > { %9181 = vmatpush.msrb.mxu1 %v8965_v27  ;;  %v8706_v38 = vadd.f32 %v8705_v60, %v8601_v43  ;;  %v8725_v58 = vpop.f32.mrf.mxu1  ;;  %9198 = vmatpush.msra.mxu2 %v9003_v17  ;;  %v9037_v27 = vld [vmem:[#allocation31 + $0x348] sm:$0xff]  ;;  %v9232_v17 = vld [vmem:[%s15138_s8 + $0x20] sm:$0xff] }
 0xac5   : > { %9208 = vmatpush.msra.mxu3 %v9055_v50  ;;  %v9246_v19 = vld [vmem:[%s15138_s8 + $0x90] sm:$0xff]  ;;  %v9245_v50 = vld [vmem:[%s15138_s8 + $0x88] sm:$0xff] }
 0xac6   : > { %v8726_v57 = vadd.f32 %v8725_v58, %v8706_v38  ;;  %9199 = vmatpush.msra.mxu2 %v9001_v36  ;;  %v9240_v38 = vld [vmem:[%s15138_s8 + $0x60] sm:$0xff]  ;;  %v9257_v58 = vld [vmem:[%s15138_s8 + $0xe8] sm:$0xff]  ;;  %v9250_v36 = vld [vmem:[%s15138_s8 + $0xb0] sm:$0xff] }
 0xac7   : > { %9209 = vmatpush.msra.mxu3 %v9053_v49  ;;  %v9244_v49 = vld [vmem:[%s15138_s8 + $0x80] sm:$0xff] }
 0xac8   : > { %v8665_v24 = vpop.f32.mrf.mxu2  ;;  %9200 = vmatpush.msra.mxu2 %v8999_v16  ;;  %v9249_v16 = vld [vmem:[%s15138_s8 + $0xa8] sm:$0xff] }
 0xac9   : > { %v8666_v61 = vadd.f32 %v8665_v24, %v8646_v6  ;;  %v8685_v42 = vpop.f32.mrf.mxu3  ;;  %9210 = vmatpush.msra.mxu3 %v9051_v34  ;;  %v8603_v6 = vperm.slane %v14920_v56, 3  ;;  %v9241_v56 = vld [vmem:[%s15138_s8 + $0x68] sm:$0xff] }
 0xaca   : > { %9201 = vmatpush.msra.mxu2 %v8997_v14  ;;  %v9248_v14 = vld [vmem:[%s15138_s8 + $0xa0] sm:$0xff] }
 0xacb   : > { %v8686_v33 = vadd.f32 %v8685_v42, %v8666_v61  ;;  %9211 = vmatpush.msra.mxu3 %v9049_v5 }
 0xacd   : > { %v8928_v9 = vmax.f32 %v8686_v33, 0.0  ;;  %9212 = vmatpush.msra.mxu3 %v9047_v13  ;;  %v9243_v33 = vld [vmem:[%s15138_s8 + $0x78] sm:$0xff] }
 0xacf   : > { %9082 = vmatmul.f32.vlgmr.msrb.gmra.mxu0 %v8928_v9  ;;  %9213 = vmatpush.msra.mxu3 %v9045_v8 }
 0xad0   : > { %9261 = vmatpush.msrb.mxu0 %v9243_v33 }
 0xad1   : > { %9214 = vmatpush.msra.mxu3 %v9043_v22 }
 0xad2   : > { %v8745_v44 = vpop.f32.mrf.mxu2  ;;  %9262 = vmatpush.msrb.mxu0 %v9242_v21 }
 0xad3   : > { %v8746_v10 = vadd.f32 %v8745_v44, %v8726_v57  ;;  %v8765_v39 = vpop.f32.mrf.mxu3  ;;  %9215 = vmatpush.msra.mxu3 %v9041_v47  ;;  %v9237_v57 = vld [vmem:[%s15138_s8 + $0x48] sm:$0xff]  ;;  %v9254_v44 = vld [vmem:[%s15138_s8 + $0xd0] sm:$0xff] }
 0xad4   : > { %9263 = vmatpush.msrb.mxu0 %v9241_v56 }
 0xad5   : > { %v8766_v45 = vadd.f32 %v8765_v39, %v8746_v10  ;;  %9216 = vmatpush.msra.mxu3 %v9039_v28  ;;  %v9253_v10 = vld [vmem:[%s15138_s8 + $0xc8] sm:$0xff]  ;;  %v9252_v39 = vld [vmem:[%s15138_s8 + $0xc0] sm:$0xff] }
 0xad6   : > { %9264 = vmatpush.msrb.mxu0 %v9240_v38 }
 0xad7   : > { %v8929_v4 = vmax.f32 %v8766_v45, 0.0  ;;  %9162 = vmatmul.f32.vlgmr.msra.gmra.mxu0 %v8928_v9  ;;  %9217 = vmatpush.msra.mxu3 %v9037_v27  ;;  %v9259_v9 = vld [vmem:[%s15138_s8 + $0xf8] sm:$0xff] }
 0xad8   : > { %9265 = vmatpush.msrb.mxu0 %v9239_v12  ;;  %v9251_v45 = vld [vmem:[%s15138_s8 + $0xb8] sm:$0xff] }
 0xad9   : > { %9102 = vmatmul.f32.vlgmr.msra.gmra.mxu1 %v8929_v4  ;;  %9218 = vmatpush.msra.mxu3 %v9035_v41 }
 0xada   : > { %9281 = vmatpush.msra.mxu1 %v9259_v9  ;;  %9266 = vmatpush.msrb.mxu0 %v9238_v1 }
 0xadb   : > { %9219 = vmatpush.msra.mxu3 %v9033_v11 }
 0xadc   : > { %9282 = vmatpush.msra.mxu1 %v9258_v25  ;;  %9267 = vmatpush.msrb.mxu0 %v9237_v57 }
 0xadd   : > { %v8785_v37 = vpop.f32.mrf.mxu0  ;;  %9220 = vmatpush.msra.mxu3 %v9031_v52 }
 0xade   : > { %v8786_v35 = vadd.f32 %v8785_v37, %v8602_v30  ;;  %v8805_v63 = vpop.f32.mrf.mxu1  ;;  %9283 = vmatpush.msra.mxu1 %v9257_v58  ;;  %9268 = vmatpush.msrb.mxu0 %v9236_v62  ;;  %v9060_v30 = vld [vmem:[%s15139_s13] sm:$0x3]  ;;  %s11160_s13 = scalar_lea.hbm %s15141_s0, 2 }
 0xadf   : > { %9221 = vmatpush.msra.mxu3 %v9029_v20  ;;  %v9062_v37 = vperm.slane %v9060_v30, 0  ;;  %v9260_v20 = vld [vmem:[%s15142_s2] sm:$0x1]  ;;  %p11162_p4 = scmp.lt.s32.totalorder %s11160_s13, %s11156_s7 }
 0xae0   : > { %v8806_v3 = vadd.f32 %v8805_v63, %v8786_v35  ;;  %9284 = vmatpush.msra.mxu1 %v9256_v48  ;;  %9269 = vmatpush.msrb.mxu0 %v9235_v32  ;;  %v9063_v63 = vperm.slane %v9060_v30, 1 }
 0xae1   : > { %9182 = vmatmul.f32.vlgmr.msrb.gmra.mxu1 %v8929_v4  ;;  %v9230_v4 = vld [vmem:[%s15138_s8 + $0x10] sm:$0xff]  ;;  %p11163_p7 = por %p11162_p4, %p11161_p3 }
 0xae2   : > { %9285 = vmatpush.msra.mxu1 %v9255_v59  ;;  %9270 = vmatpush.msrb.mxu0 %v9234_v23 }
 0xae3   : > { %p11164_p8 = pnand %p11163_p7, %p11159_p2 }
 0xae4   : > { %9286 = vmatpush.msra.mxu1 %v9254_v44  ;;  %9271 = vmatpush.msrb.mxu0 %v9233_v46 }
 0xae6   : > { %9287 = vmatpush.msra.mxu1 %v9253_v10  ;;  %9272 = vmatpush.msrb.mxu0 %v9232_v17 }
 0xae8   : > { %9288 = vmatpush.msra.mxu1 %v9252_v39  ;;  %9273 = vmatpush.msrb.mxu0 %v9231_v53 }
 0xaea   : > { %9289 = vmatpush.msra.mxu1 %v9251_v45  ;;  %9274 = vmatpush.msrb.mxu0 %v9230_v4 }
 0xaec   : > { %v8825_v26 = vpop.f32.mrf.mxu2  ;;  %9290 = vmatpush.msra.mxu1 %v9250_v36  ;;  %9275 = vmatpush.msrb.mxu0 %v9229_v18 }
 0xaed   : > { %v8826_v55 = vadd.f32 %v8825_v26, %v8806_v3  ;;  %v8845_v54 = vpop.f32.mrf.mxu3 }
 0xaee   : > { %9291 = vmatpush.msra.mxu1 %v9249_v16  ;;  %9276 = vmatpush.msrb.mxu0 %v9228_v7 }
 0xaef   : > { %v8846_v29 = vadd.f32 %v8845_v54, %v8826_v55 }
 0xaf0   : > { %9292 = vmatpush.msra.mxu1 %v9248_v14 }
 0xaf1   : > { %v8930_v15 = vmax.f32 %v8846_v29, 0.0 }
 0xaf2   : > { %9293 = vmatpush.msra.mxu1 %v9247_v40 }
 0xaf3   : > { %9122 = vmatmul.f32.vlgmr.msrb.gmra.mxu2 %v8930_v15 }
 0xaf4   : > { %9294 = vmatpush.msra.mxu1 %v9246_v19 }
 0xaf6   : > { %9295 = vmatpush.msra.mxu1 %v9245_v50 }
 0xaf8   : > { %9296 = vmatpush.msra.mxu1 %v9244_v49 }
 0xafb   : > { %9202 = vmatmul.f32.vlgmr.msra.gmra.mxu2 %v8930_v15 }
 0xaff   : > { %v8865_v2 = vpop.f32.mrf.mxu0 }
 0xb00   : > { %v8866_v24 = vadd.f32 %v8865_v2, %v8603_v6  ;;  %v8885_v31 = vpop.f32.mrf.mxu1 }
 0xb02   : > { %v8886_v43 = vadd.f32 %v8885_v31, %v8866_v24 }
 0xb0d   : > { %v8905_v61 = vpop.f32.mrf.mxu2 }
 0xb0e   : > { %v8906_v51 = vadd.f32 %v8905_v61, %v8886_v43  ;;  %v8925_v60 = vpop.f32.mrf.mxu3 }
 0xb10   : > { %v8926_v42 = vadd.f32 %v8925_v60, %v8906_v51 }
 0xb12   : > { %v8931_v0 = vmax.f32 %v8926_v42, 0.0 }
 0xb14   : > { %9142 = vmatmul.f32.vlgmr.msrb.gmra.mxu3 %v8931_v0 }
 0xb1c   : > { %9222 = vmatmul.f32.vlgmr.msra.gmra.mxu3 %v8931_v0 }
 0xb4c   : > { %v9083_v34 = vpop.f32.mrf.mxu0 }
 0xb4d   : > { %v9084_v13 = vadd.f32 %v9083_v34, %v9062_v37 }
 0xb54   : > { %v9163_v26 = vpop.f32.mrf.mxu0 }
 0xb55   : > { %v9164_v29 = vadd.f32 %v9163_v26, %v9063_v63 }
 0xb56   : > { %v9103_v5 = vpop.f32.mrf.mxu1 }
 0xb57   : > { %v9104_v8 = vadd.f32 %v9103_v5, %v9084_v13 }
 0xb5e   : > { %v9183_v54 = vpop.f32.mrf.mxu1 }
 0xb5f   : > { %v9184_v28 = vadd.f32 %v9183_v54, %v9164_v29 }
 0xb76   : > { %v9123_v35 = vpop.f32.mrf.mxu2 }
 0xb77   : > { %v9124_v3 = vadd.f32 %v9123_v35, %v9104_v8 }
 0xb7e   : > { %v9203_v15 = vpop.f32.mrf.mxu2 }
 0xb7f   : > { %v9204_v27 = vadd.f32 %v9203_v15, %v9184_v28 }
 0xb97   : > { %v9143_v55 = vpop.f32.mrf.mxu3 }
 0xb98   : > { %v9144_v22 = vadd.f32 %v9143_v55, %v9124_v3 }
 0xb9a   : > { %v9226_v47 = vmax.f32 %v9144_v22, 0.0 }
 0xb9c   : > { %9277 = vmatmul.f32.vlgmr.msrb.gmra.mxu0 %v9226_v47 }
 0xb9f   : > { %v9223_v41 = vpop.f32.mrf.mxu3 }
 0xba0   : > { %v9224_v11 = vadd.f32 %v9223_v41, %v9204_v27 }
 0xba2   : > { %v9227_v52 = vmax.f32 %v9224_v11, 0.0 }
 0xba4   : > { %9297 = vmatmul.f32.vlgmr.msra.gmra.mxu1 %v9227_v52 }
 0xc19   : > { %v9278_v6 = vpop.f32.mrf.mxu0 }
 0xc1a   : > { %v9279_v2 = vadd.f32 %v9278_v6, %v9260_v20 }
 0xc21   : > { %v9298_v24 = vpop.f32.mrf.mxu1 }
 0xc22   : > { %v9299_v31 = vadd.f32 %v9298_v24, %v9279_v2 }
 0xc24   : > { %9302 = vst.msk [vmem:[%s988_s9] sm:$0x1] %vm9301_vm9, %v9299_v31 }
 0xc25   : > { %11167 = shalt.err (!%p11164_p8)
}
 0xc26   : > { %9882 = dma.vmem_to_hbm [thread:$0]  (%p11437_p5), %s9315_s3, 16, %s9317_s11, %s9304_s1  }
 0xc27 PF: > { %s15144_s26 = sld [smem:[#allocation45_spill]] }
 0xc28   : > { %s15145_s24 = sld [smem:[#allocation42_spill]] }
 0xc2d   : > { %p9964_p9 = scmp.ge.s32.totalorder %s15144_s26, 2 }
 0xc2e   : > { %s9328_s29 = sand.u32 1, %s15145_s24  }
 0xc2f   : > { %p9931_p10 = pnand %p9964_p9, %p11441_p6  ;;  %s9329_s25 = scalar_lea.sflag [#allocation10], %s9328_s29 }
 0xc31   : > { %p9932_p11 = pneg %p9931_p10 }
 0xc33   : > { %11217 = dma.done.wait (%p9932_p11), %s9329_s25, 16  }
 0xc34   : > { %11219 = vsyncadd (%p9932_p11), %s9329_s25, 4294967280  ;;  %s15147_s30 = sld [smem:[#allocation46_spill]] }
 0xc35   : > { %s15148_s29 = sld [smem:[#allocation43_spill]] }
 0xc36   : > { %s15149_s2 = sld [smem:[#allocation44_spill]] }
 0xc37   : > { %s15150_s6 = sld [smem:[#allocation47_spill]] }
 0xc3a   : > { %p43_p12 = scmp.ge.s32.totalorder %s15147_s30, 4  }
 0xc3c   :  { %45 = sbr.rel (!%p43_p12) target bundleno = 28 (0x1c), region = 282 }
 0xc41   :  { %9334 = vsyncpa [#allocation9], 1 }
 0xc42   :  { %9336 = vsyncpa [#allocation9 + $0x1], 1 }
 0xc43   :  { %9337 = vsyncpa [#allocation12], 1 }
 0xc44   :  { %9338 = vsyncpa [#allocation15], 1 }
 0xc45   :  { %9339 = vsyncpa [#allocation18], 1 }
 0xc46   :  { %9340 = vsyncpa [#allocation21], 1 }
 0xc47   :  { %9341 = vsyncpa [#allocation24], 1 }
 0xc48   :  { %9342 = vsyncpa [#allocation27], 1 }
 0xc49   :  { %9343 = vsyncpa [#allocation30], 1 }
 0xc4a   :  { %9344 = vsyncpa [#allocation10], 1 }
 0xc4b   :  { %9346 = vsyncpa [#allocation10 + $0x1], 1 }

</bundles_post_ra>
